<compile_context>
chip_gen: v5e
topology: v5e:2x2
jax: 0.10.0
libtpu: 0.0.40
codegen_flags: <defaults>
</compile_context>

<pallas_src>
import jax
import jax.numpy as jnp
from jax.experimental import pallas as pl
from jax.experimental.pallas import tpu as pltpu

# ---------------- configuration (consistent with the module) ----------------
M = 500        # batch (rows of x) -- MC-PILCO uses many particles
D = 4          # flow dimension (x.shape[1])
K = 2          # coupling split (must equal D - K for alternating flips)
OBS_DIM = 6    # conditioning observation dimension
HIDDEN = 32    # hidden width of sig_net / mu_net
N_FLOWS = 4    # number of stacked conditional flows
TILE_M = 256   # batch rows per grid step


# ---------------- Pallas kernel ---------------------------------------------
def _make_kernel(n_flows: int, d: int, k: int, hidden: int):
    dk = d - k

    def kernel(x_ref, obs_ref,
               w1x_ref, w1o_ref, b1_ref, w2_ref, b2_ref,   # fused sig/mu params
               z_ref, stats_ref):
        x = x_ref[...].astype(jnp.float32)
        obs = obs_ref[...].astype(jnp.float32)
        tm = x.shape[0]

        # carry the two coupling halves separately (no per-flow concats)
        xa = x[:, :k]
        xb = x[:, k:]
        ld = jnp.zeros((tm, 1), jnp.float32)

        def leaky(v):  # nn.LeakyReLU(negative_slope=0.01)
            return jnp.where(v > 0, v, 0.01 * v)

        for f in range(n_flows):                 # static unroll over flows
            flip = (f % 2 == 1)                  # alternate transformed half
            x1 = xb if flip else xa              # conditioning half
            x2 = xa if flip else xb              # transformed half

            # fused first layer: replaces concat([x1, obs]) @ W1 with
            # x1 @ W1x + obs @ W1o  (columns = [sig hidden | mu hidden])
            hid = leaky(
                jnp.dot(x1, w1x_ref[f], preferred_element_type=jnp.float32)
                + jnp.dot(obs, w1o_ref[f], preferred_element_type=jnp.float32)
                + b1_ref[f])

            # fused block-diagonal second layer: columns = [sig | mu]
            out = (jnp.dot(hid, w2_ref[f], preferred_element_type=jnp.float32)
                   + b2_ref[f])
            sig = out[:, :dk]
            mu = out[:, dk:]

            x2t = x2 * jnp.exp(sig) + mu
            if flip:
                xa = x2t                         # transformed half is the front half
            else:
                xb = x2t                         # transformed half is the back half
            ld = ld + jnp.sum(sig, axis=1, keepdims=True)   # per-flow log|det J|

        z = jnp.concatenate([xa, xb], axis=1)
        z_ref[...] = z.astype(z_ref.dtype)

        # standard multivariate normal prior log-prob on final z
        plp = (-0.5 * d * jnp.log(2.0 * jnp.pi)
               - 0.5 * jnp.sum(z * z, axis=1, keepdims=True))
        stats_ref[...] = jnp.concatenate([plp, ld], axis=1).astype(stats_ref.dtype)

    return kernel


# ---------------- parameter packing (fuses sig_net and mu_net) --------------
def pack_params(params):
    """(w1s,b1s,w2s,b2s,w1m,b1m,w2m,b2m) -> (w1x, w1o, b1, w2, b2) fused."""
    w1s, b1s, w2s, b2s, w1m, b1m, w2m, b2m = params
    # first layer: concat output columns -> (F, K+OBS, 2H); split x / obs rows
    w1 = jnp.concatenate([w1s, w1m], axis=-1)
    w1x = w1[:, :K, :]                                   # (F, K, 2H)
    w1o = w1[:, K:, :]                                   # (F, OBS_DIM, 2H)
    b1 = jnp.concatenate([b1s, b1m], axis=-1)            # (F, 1, 2H)
    # second layer: block-diagonal -> (F, 2H, 2*(D-K)); cols = [sig | mu]
    top = jnp.concatenate([w2s, jnp.zeros_like(w2s)], axis=-1)
    bot = jnp.concatenate([jnp.zeros_like(w2m), w2m], axis=-1)
    w2 = jnp.concatenate([top, bot], axis=1)             # (F, 2H, 2dk)
    b2 = jnp.concatenate([b2s, b2m], axis=-1)            # (F, 1, 2dk)
    return w1x, w1o, b1, w2, b2


# ---------------- wrapper ----------------------------------------------------
def normalizing_flow_forward(x, obser, params, *, tile_m=TILE_M):
    m, d = x.shape
    obs_dim = obser.shape[1]
    packed = pack_params(params)

    g = pl.cdiv(m, tile_m)
    m_pad = g * tile_m
    if m_pad != m:                                   # pad batch to tile multiple
        x = jnp.pad(x, ((0, m_pad - m), (0, 0)))
        obser = jnp.pad(obser, ((0, m_pad - m), (0, 0)))

    kernel = _make_kernel(N_FLOWS, d, K, HIDDEN)

    def const_spec(a):                               # weights stay VMEM-resident
        nd = a.ndim
        return pl.BlockSpec(a.shape, lambda i, nd=nd: (0,) * nd)

    grid_spec = pltpu.PrefetchScalarGridSpec(
        num_scalar_prefetch=0,
        grid=(g,),
        in_specs=[pl.BlockSpec((tile_m, d), lambda i: (i, 0)),
                  pl.BlockSpec((tile_m, obs_dim), lambda i: (i, 0))]
                 + [const_spec(p) for p in packed],
        out_specs=(pl.BlockSpec((tile_m, d), lambda i: (i, 0)),
                   pl.BlockSpec((tile_m, 2), lambda i: (i, 0))),
    )

    z, stats = pl.pallas_call(
        kernel,
        out_shape=(jax.ShapeDtypeStruct((m_pad, d), jnp.float32),   # z
                   jax.ShapeDtypeStruct((m_pad, 2), jnp.float32)),  # [plp, ld]
        grid_spec=grid_spec,
        compiler_params=pltpu.CompilerParams(
            dimension_semantics=("parallel",)),
    )(x, obser, *packed)

    # match PyTorch return shapes: (m, d), (m,), (m,)
    return z[:m], stats[:m, 0], stats[:m, 1]


# ---------------- deterministic parameter init (per-net, PyTorch-style) -----
def init_params(key):
    dk = D - K
    in_dim = K + OBS_DIM
    ks = jax.random.split(key, 8)
    s = 0.1
    w1s = jax.random.normal(ks[0], (N_FLOWS, in_dim, HIDDEN), jnp.float32) * s
    b1s = jax.random.normal(ks[1], (N_FLOWS, 1, HIDDEN), jnp.float32) * s
    w2s = jax.random.normal(ks[2], (N_FLOWS, HIDDEN, dk), jnp.float32) * s
    b2s = jax.random.normal(ks[3], (N_FLOWS, 1, dk), jnp.float32) * s
    w1m = jax.random.normal(ks[4], (N_FLOWS, in_dim, HIDDEN), jnp.float32) * s
    b1m = jax.random.normal(ks[5], (N_FLOWS, 1, HIDDEN), jnp.float32) * s
    w2m = jax.random.normal(ks[6], (N_FLOWS, HIDDEN, dk), jnp.float32) * s
    b2m = jax.random.normal(ks[7], (N_FLOWS, 1, dk), jnp.float32) * s
    return (w1s, b1s, w2s, b2s, w1m, b1m, w2m, b2m)


# ---------------- pure-JAX reference (unfused, for a sanity check) ----------
def reference_forward(x, obser, params):
    w1s, b1s, w2s, b2s, w1m, b1m, w2m, b2m = params
    ld = jnp.zeros((x.shape[0],), jnp.float32)

    def leaky(v):
        return jnp.where(v > 0, v, 0.01 * v)

    for f in range(N_FLOWS):
        flip = (f % 2 == 1)
        x1, x2 = x[:, :K], x[:, K:]
        if flip:
            x1, x2 = x2, x1
        h = jnp.concatenate([x1, obser], axis=1)
        sig = leaky(h @ w1s[f] + b1s[f]) @ w2s[f] + b2s[f]
        mu = leaky(h @ w1m[f] + b1m[f]) @ w2m[f] + b2m[f]
        z1, z2 = x1, x2 * jnp.exp(sig) + mu
        if flip:
            z1, z2 = z2, z1
        x = jnp.concatenate([z1, z2], axis=1)
        ld = ld + jnp.sum(sig, axis=1)
    plp = -0.5 * D * jnp.log(2.0 * jnp.pi) - 0.5 * jnp.sum(x * x, axis=1)
    return x, plp, ld


# TODO(synk): the PyTorch container accepts arbitrary `prior` / `flows`
# objects; this kernel specializes to stacked R_NVP_cond couplings with
# alternating flips and a standard-normal prior (the MC-PILCO configuration).

if __name__ == "__main__":
    key = jax.random.PRNGKey(0)
    kx, ko, kp = jax.random.split(key, 3)
    x = jax.random.normal(kx, (M, D), jnp.float32)
    obser = jax.random.normal(ko, (M, OBS_DIM), jnp.float32)
    params = init_params(kp)

    z, prior_logprob, log_det = normalizing_flow_forward(x, obser, params)
    jax.block_until_ready((z, prior_logprob, log_det))

    z_ref, plp_ref, ld_ref = reference_forward(x, obser, params)
    assert jnp.allclose(z, z_ref, rtol=1e-3, atol=1e-3)
    assert jnp.allclose(prior_logprob, plp_ref, rtol=1e-3, atol=1e-3)
    assert jnp.allclose(log_det, ld_ref, rtol=1e-3, atol=1e-3)

    print("KERNEL_OK")
</pallas_src>

<mosaic_0001>
module attributes {stable_mosaic.version = 11 : i64} {
  func.func @kernel(%arg0: i32, %arg1: memref<256x4xf32, #tpu.memory_space<vmem>>, %arg2: memref<256x6xf32, #tpu.memory_space<vmem>>, %arg3: memref<4x2x64xf32, #tpu.memory_space<vmem>>, %arg4: memref<4x6x64xf32, #tpu.memory_space<vmem>>, %arg5: memref<4x1x64xf32, #tpu.memory_space<vmem>>, %arg6: memref<4x64x4xf32, #tpu.memory_space<vmem>>, %arg7: memref<4x1x4xf32, #tpu.memory_space<vmem>>, %arg8: memref<256x4xf32, #tpu.memory_space<vmem>>, %arg9: memref<256x2xf32, #tpu.memory_space<vmem>>) attributes {dimension_semantics = [#tpu.dimension_semantics<parallel>], iteration_bounds = array<i64: 2>, scalar_prefetch = 0 : i64, scratch_operands = 0 : i64, tpu.core_type = #tpu.core_type<tc>, window_params = [{transform_indices = @transform_0, window_bounds = array<i64: 256, 4>}, {transform_indices = @transform_1, window_bounds = array<i64: 256, 6>}, {pipeline_mode = #tpu.pipeline_mode<synchronous>, transform_indices = @transform_2, window_bounds = array<i64: 4, 2, 64>}, {pipeline_mode = #tpu.pipeline_mode<synchronous>, transform_indices = @transform_3, window_bounds = array<i64: 4, 6, 64>}, {pipeline_mode = #tpu.pipeline_mode<synchronous>, transform_indices = @transform_4, window_bounds = array<i64: 4, 1, 64>}, {pipeline_mode = #tpu.pipeline_mode<synchronous>, transform_indices = @transform_5, window_bounds = array<i64: 4, 64, 4>}, {pipeline_mode = #tpu.pipeline_mode<synchronous>, transform_indices = @transform_6, window_bounds = array<i64: 4, 1, 4>}, {transform_indices = @transform_7, window_bounds = array<i64: 256, 4>}, {transform_indices = @transform_8, window_bounds = array<i64: 256, 2>}]} {
    %c0 = arith.constant 0 : index
    %c0_0 = arith.constant 0 : index
    %0 = vector.load %arg1[%c0, %c0_0] : memref<256x4xf32, #tpu.memory_space<vmem>>, vector<256x4xf32>
    %c0_1 = arith.constant 0 : index
    %c0_2 = arith.constant 0 : index
    %1 = vector.load %arg2[%c0_1, %c0_2] : memref<256x6xf32, #tpu.memory_space<vmem>>, vector<256x6xf32>
    %2 = vector.extract_strided_slice %0 {offsets = [0, 0], sizes = [256, 2], strides = [1, 1]} : vector<256x4xf32> to vector<256x2xf32>
    %3 = vector.extract_strided_slice %0 {offsets = [0, 2], sizes = [256, 2], strides = [1, 1]} : vector<256x4xf32> to vector<256x2xf32>
    %cst = arith.constant 0.000000e+00 : f32
    %4 = vector.broadcast %cst : f32 to vector<256x1xf32>
    %c0_3 = arith.constant 0 : index
    %c0_4 = arith.constant 0 : index
    %c0_5 = arith.constant 0 : index
    %5 = vector.load %arg3[%c0_3, %c0_4, %c0_5] : memref<4x2x64xf32, #tpu.memory_space<vmem>>, vector<1x2x64xf32>
    %6 = vector.shape_cast %5 : vector<1x2x64xf32> to vector<2x64xf32>
    %cst_6 = arith.constant dense<0.000000e+00> : vector<256x64xf32>
    %7 = tpu.matmul %2, %6, %cst_6 {dimension_numbers = #tpu.dot_dimension_numbers<[1], [0], [0], [1], [0, 0, 1, 1], [], []>} : vector<256x2xf32>, vector<2x64xf32>, vector<256x64xf32> -> vector<256x64xf32>
    %c0_7 = arith.constant 0 : index
    %c0_8 = arith.constant 0 : index
    %c0_9 = arith.constant 0 : index
    %8 = vector.load %arg4[%c0_7, %c0_8, %c0_9] : memref<4x6x64xf32, #tpu.memory_space<vmem>>, vector<1x6x64xf32>
    %9 = vector.shape_cast %8 : vector<1x6x64xf32> to vector<6x64xf32>
    %cst_10 = arith.constant dense<0.000000e+00> : vector<256x64xf32>
    %10 = tpu.matmul %1, %9, %cst_10 {dimension_numbers = #tpu.dot_dimension_numbers<[1], [0], [0], [1], [0, 0, 1, 1], [], []>} : vector<256x6xf32>, vector<6x64xf32>, vector<256x64xf32> -> vector<256x64xf32>
    %11 = arith.addf %7, %10 : vector<256x64xf32>
    %c0_11 = arith.constant 0 : index
    %c0_12 = arith.constant 0 : index
    %c0_13 = arith.constant 0 : index
    %12 = vector.load %arg5[%c0_11, %c0_12, %c0_13] : memref<4x1x64xf32, #tpu.memory_space<vmem>>, vector<1x1x64xf32>
    %13 = vector.shape_cast %12 : vector<1x1x64xf32> to vector<1x64xf32>
    %14 = vector.broadcast %13 : vector<1x64xf32> to vector<256x64xf32>
    %15 = arith.addf %11, %14 : vector<256x64xf32>
    %cst_14 = arith.constant 0.000000e+00 : f32
    %16 = vector.broadcast %cst_14 : f32 to vector<256x64xf32>
    %17 = arith.cmpf ogt, %15, %16 : vector<256x64xf32>
    %cst_15 = arith.constant 0.00999999977 : f32
    %18 = vector.broadcast %cst_15 : f32 to vector<256x64xf32>
    %19 = arith.mulf %18, %15 : vector<256x64xf32>
    %20 = arith.select %17, %15, %19 : vector<256x64xi1>, vector<256x64xf32>
    %c0_16 = arith.constant 0 : index
    %c0_17 = arith.constant 0 : index
    %c0_18 = arith.constant 0 : index
    %21 = vector.load %arg6[%c0_16, %c0_17, %c0_18] : memref<4x64x4xf32, #tpu.memory_space<vmem>>, vector<1x64x4xf32>
    %22 = vector.shape_cast %21 : vector<1x64x4xf32> to vector<64x4xf32>
    %cst_19 = arith.constant dense<0.000000e+00> : vector<256x4xf32>
    %23 = tpu.matmul %20, %22, %cst_19 {dimension_numbers = #tpu.dot_dimension_numbers<[1], [0], [0], [1], [0, 0, 1, 1], [], []>} : vector<256x64xf32>, vector<64x4xf32>, vector<256x4xf32> -> vector<256x4xf32>
    %c0_20 = arith.constant 0 : index
    %c0_21 = arith.constant 0 : index
    %c0_22 = arith.constant 0 : index
    %24 = vector.load %arg7[%c0_20, %c0_21, %c0_22] : memref<4x1x4xf32, #tpu.memory_space<vmem>>, vector<1x1x4xf32>
    %25 = vector.shape_cast %24 : vector<1x1x4xf32> to vector<1x4xf32>
    %26 = vector.broadcast %25 : vector<1x4xf32> to vector<256x4xf32>
    %27 = arith.addf %23, %26 : vector<256x4xf32>
    %28 = vector.extract_strided_slice %27 {offsets = [0, 0], sizes = [256, 2], strides = [1, 1]} : vector<256x4xf32> to vector<256x2xf32>
    %29 = vector.extract_strided_slice %27 {offsets = [0, 2], sizes = [256, 2], strides = [1, 1]} : vector<256x4xf32> to vector<256x2xf32>
    %30 = math.exp %28 : vector<256x2xf32>
    %31 = arith.mulf %3, %30 : vector<256x2xf32>
    %32 = arith.addf %31, %29 : vector<256x2xf32>
    %cst_23 = arith.constant dense<0.000000e+00> : vector<256xf32>
    %33 = vector.multi_reduction <add>, %28, %cst_23 [1] : vector<256x2xf32> to vector<256xf32>
    %34 = vector.shape_cast %33 : vector<256xf32> to vector<256x1xf32>
    %35 = arith.addf %4, %34 : vector<256x1xf32>
    %c1 = arith.constant 1 : index
    %c0_24 = arith.constant 0 : index
    %c0_25 = arith.constant 0 : index
    %36 = vector.load %arg3[%c1, %c0_24, %c0_25] : memref<4x2x64xf32, #tpu.memory_space<vmem>>, vector<1x2x64xf32>
    %37 = vector.shape_cast %36 : vector<1x2x64xf32> to vector<2x64xf32>
    %cst_26 = arith.constant dense<0.000000e+00> : vector<256x64xf32>
    %38 = tpu.matmul %32, %37, %cst_26 {dimension_numbers = #tpu.dot_dimension_numbers<[1], [0], [0], [1], [0, 0, 1, 1], [], []>} : vector<256x2xf32>, vector<2x64xf32>, vector<256x64xf32> -> vector<256x64xf32>
    %c1_27 = arith.constant 1 : index
    %c0_28 = arith.constant 0 : index
    %c0_29 = arith.constant 0 : index
    %39 = vector.load %arg4[%c1_27, %c0_28, %c0_29] : memref<4x6x64xf32, #tpu.memory_space<vmem>>, vector<1x6x64xf32>
    %40 = vector.shape_cast %39 : vector<1x6x64xf32> to vector<6x64xf32>
    %cst_30 = arith.constant dense<0.000000e+00> : vector<256x64xf32>
    %41 = tpu.matmul %1, %40, %cst_30 {dimension_numbers = #tpu.dot_dimension_numbers<[1], [0], [0], [1], [0, 0, 1, 1], [], []>} : vector<256x6xf32>, vector<6x64xf32>, vector<256x64xf32> -> vector<256x64xf32>
    %42 = arith.addf %38, %41 : vector<256x64xf32>
    %c1_31 = arith.constant 1 : index
    %c0_32 = arith.constant 0 : index
    %c0_33 = arith.constant 0 : index
    %43 = vector.load %arg5[%c1_31, %c0_32, %c0_33] : memref<4x1x64xf32, #tpu.memory_space<vmem>>, vector<1x1x64xf32>
    %44 = vector.shape_cast %43 : vector<1x1x64xf32> to vector<1x64xf32>
    %45 = vector.broadcast %44 : vector<1x64xf32> to vector<256x64xf32>
    %46 = arith.addf %42, %45 : vector<256x64xf32>
    %cst_34 = arith.constant 0.000000e+00 : f32
    %47 = vector.broadcast %cst_34 : f32 to vector<256x64xf32>
    %48 = arith.cmpf ogt, %46, %47 : vector<256x64xf32>
    %cst_35 = arith.constant 0.00999999977 : f32
    %49 = vector.broadcast %cst_35 : f32 to vector<256x64xf32>
    %50 = arith.mulf %49, %46 : vector<256x64xf32>
    %51 = arith.select %48, %46, %50 : vector<256x64xi1>, vector<256x64xf32>
    %c1_36 = arith.constant 1 : index
    %c0_37 = arith.constant 0 : index
    %c0_38 = arith.constant 0 : index
    %52 = vector.load %arg6[%c1_36, %c0_37, %c0_38] : memref<4x64x4xf32, #tpu.memory_space<vmem>>, vector<1x64x4xf32>
    %53 = vector.shape_cast %52 : vector<1x64x4xf32> to vector<64x4xf32>
    %cst_39 = arith.constant dense<0.000000e+00> : vector<256x4xf32>
    %54 = tpu.matmul %51, %53, %cst_39 {dimension_numbers = #tpu.dot_dimension_numbers<[1], [0], [0], [1], [0, 0, 1, 1], [], []>} : vector<256x64xf32>, vector<64x4xf32>, vector<256x4xf32> -> vector<256x4xf32>
    %c1_40 = arith.constant 1 : index
    %c0_41 = arith.constant 0 : index
    %c0_42 = arith.constant 0 : index
    %55 = vector.load %arg7[%c1_40, %c0_41, %c0_42] : memref<4x1x4xf32, #tpu.memory_space<vmem>>, vector<1x1x4xf32>
    %56 = vector.shape_cast %55 : vector<1x1x4xf32> to vector<1x4xf32>
    %57 = vector.broadcast %56 : vector<1x4xf32> to vector<256x4xf32>
    %58 = arith.addf %54, %57 : vector<256x4xf32>
    %59 = vector.extract_strided_slice %58 {offsets = [0, 0], sizes = [256, 2], strides = [1, 1]} : vector<256x4xf32> to vector<256x2xf32>
    %60 = vector.extract_strided_slice %58 {offsets = [0, 2], sizes = [256, 2], strides = [1, 1]} : vector<256x4xf32> to vector<256x2xf32>
    %61 = math.exp %59 : vector<256x2xf32>
    %62 = arith.mulf %2, %61 : vector<256x2xf32>
    %63 = arith.addf %62, %60 : vector<256x2xf32>
    %cst_43 = arith.constant dense<0.000000e+00> : vector<256xf32>
    %64 = vector.multi_reduction <add>, %59, %cst_43 [1] : vector<256x2xf32> to vector<256xf32>
    %65 = vector.shape_cast %64 : vector<256xf32> to vector<256x1xf32>
    %66 = arith.addf %35, %65 : vector<256x1xf32>
    %c2 = arith.constant 2 : index
    %c0_44 = arith.constant 0 : index
    %c0_45 = arith.constant 0 : index
    %67 = vector.load %arg3[%c2, %c0_44, %c0_45] : memref<4x2x64xf32, #tpu.memory_space<vmem>>, vector<1x2x64xf32>
    %68 = vector.shape_cast %67 : vector<1x2x64xf32> to vector<2x64xf32>
    %cst_46 = arith.constant dense<0.000000e+00> : vector<256x64xf32>
    %69 = tpu.matmul %63, %68, %cst_46 {dimension_numbers = #tpu.dot_dimension_numbers<[1], [0], [0], [1], [0, 0, 1, 1], [], []>} : vector<256x2xf32>, vector<2x64xf32>, vector<256x64xf32> -> vector<256x64xf32>
    %c2_47 = arith.constant 2 : index
    %c0_48 = arith.constant 0 : index
    %c0_49 = arith.constant 0 : index
    %70 = vector.load %arg4[%c2_47, %c0_48, %c0_49] : memref<4x6x64xf32, #tpu.memory_space<vmem>>, vector<1x6x64xf32>
    %71 = vector.shape_cast %70 : vector<1x6x64xf32> to vector<6x64xf32>
    %cst_50 = arith.constant dense<0.000000e+00> : vector<256x64xf32>
    %72 = tpu.matmul %1, %71, %cst_50 {dimension_numbers = #tpu.dot_dimension_numbers<[1], [0], [0], [1], [0, 0, 1, 1], [], []>} : vector<256x6xf32>, vector<6x64xf32>, vector<256x64xf32> -> vector<256x64xf32>
    %73 = arith.addf %69, %72 : vector<256x64xf32>
    %c2_51 = arith.constant 2 : index
    %c0_52 = arith.constant 0 : index
    %c0_53 = arith.constant 0 : index
    %74 = vector.load %arg5[%c2_51, %c0_52, %c0_53] : memref<4x1x64xf32, #tpu.memory_space<vmem>>, vector<1x1x64xf32>
    %75 = vector.shape_cast %74 : vector<1x1x64xf32> to vector<1x64xf32>
    %76 = vector.broadcast %75 : vector<1x64xf32> to vector<256x64xf32>
    %77 = arith.addf %73, %76 : vector<256x64xf32>
    %cst_54 = arith.constant 0.000000e+00 : f32
    %78 = vector.broadcast %cst_54 : f32 to vector<256x64xf32>
    %79 = arith.cmpf ogt, %77, %78 : vector<256x64xf32>
    %cst_55 = arith.constant 0.00999999977 : f32
    %80 = vector.broadcast %cst_55 : f32 to vector<256x64xf32>
    %81 = arith.mulf %80, %77 : vector<256x64xf32>
    %82 = arith.select %79, %77, %81 : vector<256x64xi1>, vector<256x64xf32>
    %c2_56 = arith.constant 2 : index
    %c0_57 = arith.constant 0 : index
    %c0_58 = arith.constant 0 : index
    %83 = vector.load %arg6[%c2_56, %c0_57, %c0_58] : memref<4x64x4xf32, #tpu.memory_space<vmem>>, vector<1x64x4xf32>
    %84 = vector.shape_cast %83 : vector<1x64x4xf32> to vector<64x4xf32>
    %cst_59 = arith.constant dense<0.000000e+00> : vector<256x4xf32>
    %85 = tpu.matmul %82, %84, %cst_59 {dimension_numbers = #tpu.dot_dimension_numbers<[1], [0], [0], [1], [0, 0, 1, 1], [], []>} : vector<256x64xf32>, vector<64x4xf32>, vector<256x4xf32> -> vector<256x4xf32>
    %c2_60 = arith.constant 2 : index
    %c0_61 = arith.constant 0 : index
    %c0_62 = arith.constant 0 : index
    %86 = vector.load %arg7[%c2_60, %c0_61, %c0_62] : memref<4x1x4xf32, #tpu.memory_space<vmem>>, vector<1x1x4xf32>
    %87 = vector.shape_cast %86 : vector<1x1x4xf32> to vector<1x4xf32>
    %88 = vector.broadcast %87 : vector<1x4xf32> to vector<256x4xf32>
    %89 = arith.addf %85, %88 : vector<256x4xf32>
    %90 = vector.extract_strided_slice %89 {offsets = [0, 0], sizes = [256, 2], strides = [1, 1]} : vector<256x4xf32> to vector<256x2xf32>
    %91 = vector.extract_strided_slice %89 {offsets = [0, 2], sizes = [256, 2], strides = [1, 1]} : vector<256x4xf32> to vector<256x2xf32>
    %92 = math.exp %90 : vector<256x2xf32>
    %93 = arith.mulf %32, %92 : vector<256x2xf32>
    %94 = arith.addf %93, %91 : vector<256x2xf32>
    %cst_63 = arith.constant dense<0.000000e+00> : vector<256xf32>
    %95 = vector.multi_reduction <add>, %90, %cst_63 [1] : vector<256x2xf32> to vector<256xf32>
    %96 = vector.shape_cast %95 : vector<256xf32> to vector<256x1xf32>
    %97 = arith.addf %66, %96 : vector<256x1xf32>
    %c3 = arith.constant 3 : index
    %c0_64 = arith.constant 0 : index
    %c0_65 = arith.constant 0 : index
    %98 = vector.load %arg3[%c3, %c0_64, %c0_65] : memref<4x2x64xf32, #tpu.memory_space<vmem>>, vector<1x2x64xf32>
    %99 = vector.shape_cast %98 : vector<1x2x64xf32> to vector<2x64xf32>
    %cst_66 = arith.constant dense<0.000000e+00> : vector<256x64xf32>
    %100 = tpu.matmul %94, %99, %cst_66 {dimension_numbers = #tpu.dot_dimension_numbers<[1], [0], [0], [1], [0, 0, 1, 1], [], []>} : vector<256x2xf32>, vector<2x64xf32>, vector<256x64xf32> -> vector<256x64xf32>
    %c3_67 = arith.constant 3 : index
    %c0_68 = arith.constant 0 : index
    %c0_69 = arith.constant 0 : index
    %101 = vector.load %arg4[%c3_67, %c0_68, %c0_69] : memref<4x6x64xf32, #tpu.memory_space<vmem>>, vector<1x6x64xf32>
    %102 = vector.shape_cast %101 : vector<1x6x64xf32> to vector<6x64xf32>
    %cst_70 = arith.constant dense<0.000000e+00> : vector<256x64xf32>
    %103 = tpu.matmul %1, %102, %cst_70 {dimension_numbers = #tpu.dot_dimension_numbers<[1], [0], [0], [1], [0, 0, 1, 1], [], []>} : vector<256x6xf32>, vector<6x64xf32>, vector<256x64xf32> -> vector<256x64xf32>
    %104 = arith.addf %100, %103 : vector<256x64xf32>
    %c3_71 = arith.constant 3 : index
    %c0_72 = arith.constant 0 : index
    %c0_73 = arith.constant 0 : index
    %105 = vector.load %arg5[%c3_71, %c0_72, %c0_73] : memref<4x1x64xf32, #tpu.memory_space<vmem>>, vector<1x1x64xf32>
    %106 = vector.shape_cast %105 : vector<1x1x64xf32> to vector<1x64xf32>
    %107 = vector.broadcast %106 : vector<1x64xf32> to vector<256x64xf32>
    %108 = arith.addf %104, %107 : vector<256x64xf32>
    %cst_74 = arith.constant 0.000000e+00 : f32
    %109 = vector.broadcast %cst_74 : f32 to vector<256x64xf32>
    %110 = arith.cmpf ogt, %108, %109 : vector<256x64xf32>
    %cst_75 = arith.constant 0.00999999977 : f32
    %111 = vector.broadcast %cst_75 : f32 to vector<256x64xf32>
    %112 = arith.mulf %111, %108 : vector<256x64xf32>
    %113 = arith.select %110, %108, %112 : vector<256x64xi1>, vector<256x64xf32>
    %c3_76 = arith.constant 3 : index
    %c0_77 = arith.constant 0 : index
    %c0_78 = arith.constant 0 : index
    %114 = vector.load %arg6[%c3_76, %c0_77, %c0_78] : memref<4x64x4xf32, #tpu.memory_space<vmem>>, vector<1x64x4xf32>
    %115 = vector.shape_cast %114 : vector<1x64x4xf32> to vector<64x4xf32>
    %cst_79 = arith.constant dense<0.000000e+00> : vector<256x4xf32>
    %116 = tpu.matmul %113, %115, %cst_79 {dimension_numbers = #tpu.dot_dimension_numbers<[1], [0], [0], [1], [0, 0, 1, 1], [], []>} : vector<256x64xf32>, vector<64x4xf32>, vector<256x4xf32> -> vector<256x4xf32>
    %c3_80 = arith.constant 3 : index
    %c0_81 = arith.constant 0 : index
    %c0_82 = arith.constant 0 : index
    %117 = vector.load %arg7[%c3_80, %c0_81, %c0_82] : memref<4x1x4xf32, #tpu.memory_space<vmem>>, vector<1x1x4xf32>
    %118 = vector.shape_cast %117 : vector<1x1x4xf32> to vector<1x4xf32>
    %119 = vector.broadcast %118 : vector<1x4xf32> to vector<256x4xf32>
    %120 = arith.addf %116, %119 : vector<256x4xf32>
    %121 = vector.extract_strided_slice %120 {offsets = [0, 0], sizes = [256, 2], strides = [1, 1]} : vector<256x4xf32> to vector<256x2xf32>
    %122 = vector.extract_strided_slice %120 {offsets = [0, 2], sizes = [256, 2], strides = [1, 1]} : vector<256x4xf32> to vector<256x2xf32>
    %123 = math.exp %121 : vector<256x2xf32>
    %124 = arith.mulf %63, %123 : vector<256x2xf32>
    %125 = arith.addf %124, %122 : vector<256x2xf32>
    %cst_83 = arith.constant dense<0.000000e+00> : vector<256xf32>
    %126 = vector.multi_reduction <add>, %121, %cst_83 [1] : vector<256x2xf32> to vector<256xf32>
    %127 = vector.shape_cast %126 : vector<256xf32> to vector<256x1xf32>
    %128 = arith.addf %97, %127 : vector<256x1xf32>
    %129 = tpu.concatenate %125, %94 in 1 : vector<256x2xf32>, vector<256x2xf32> -> vector<256x4xf32>
    %c0_84 = arith.constant 0 : index
    %c0_85 = arith.constant 0 : index
    %130 = vector.load %arg8[%c0_84, %c0_85] : memref<256x4xf32, #tpu.memory_space<vmem>>, vector<256x4xf32>
    tpu.vector_store %arg8[%c0_84, %c0_85], %129 {strides = array<i32>} : memref<256x4xf32, #tpu.memory_space<vmem>>, vector<256x4xf32>,
    %cst_86 = arith.constant 6.28318548 : f32
    %131 = math.log %cst_86 : f32
    %cst_87 = arith.constant -2.000000e+00 : f32
    %132 = arith.mulf %cst_87, %131 : f32
    %133 = arith.mulf %129, %129 : vector<256x4xf32>
    %cst_88 = arith.constant dense<0.000000e+00> : vector<256xf32>
    %134 = vector.multi_reduction <add>, %133, %cst_88 [1] : vector<256x4xf32> to vector<256xf32>
    %135 = vector.shape_cast %134 : vector<256xf32> to vector<256x1xf32>
    %cst_89 = arith.constant 5.000000e-01 : f32
    %136 = vector.broadcast %cst_89 : f32 to vector<256x1xf32>
    %137 = arith.mulf %136, %135 : vector<256x1xf32>
    %138 = vector.broadcast %132 : f32 to vector<256x1xf32>
    %139 = arith.subf %138, %137 : vector<256x1xf32>
    %140 = tpu.concatenate %139, %128 in 1 : vector<256x1xf32>, vector<256x1xf32> -> vector<256x2xf32>
    %c0_90 = arith.constant 0 : index
    %c0_91 = arith.constant 0 : index
    %141 = vector.load %arg9[%c0_90, %c0_91] : memref<256x2xf32, #tpu.memory_space<vmem>>, vector<256x2xf32>
    tpu.vector_store %arg9[%c0_90, %c0_91], %140 {strides = array<i32>} : memref<256x2xf32, #tpu.memory_space<vmem>>, vector<256x2xf32>,
    return
  }
  func.func @transform_0(%arg0: i32) -> (i32, i32) {
    %c0_i32 = arith.constant 0 : i32
    %c0_i32_0 = arith.constant 0 : i32
    return %arg0, %c0_i32 : i32, i32
  }
  func.func @transform_1(%arg0: i32) -> (i32, i32) {
    %c0_i32 = arith.constant 0 : i32
    %c0_i32_0 = arith.constant 0 : i32
    return %arg0, %c0_i32 : i32, i32
  }
  func.func @transform_2(%arg0: i32) -> (i32, i32, i32) {
    %c0_i32 = arith.constant 0 : i32
    %c0_i32_0 = arith.constant 0 : i32
    %c0_i32_1 = arith.constant 0 : i32
    %c0_i32_2 = arith.constant 0 : i32
    return %c0_i32, %c0_i32_0, %c0_i32_1 : i32, i32, i32
  }
  func.func @transform_3(%arg0: i32) -> (i32, i32, i32) {
    %c0_i32 = arith.constant 0 : i32
    %c0_i32_0 = arith.constant 0 : i32
    %c0_i32_1 = arith.constant 0 : i32
    %c0_i32_2 = arith.constant 0 : i32
    return %c0_i32, %c0_i32_0, %c0_i32_1 : i32, i32, i32
  }
  func.func @transform_4(%arg0: i32) -> (i32, i32, i32) {
    %c0_i32 = arith.constant 0 : i32
    %c0_i32_0 = arith.constant 0 : i32
    %c0_i32_1 = arith.constant 0 : i32
    %c0_i32_2 = arith.constant 0 : i32
    return %c0_i32, %c0_i32_0, %c0_i32_1 : i32, i32, i32
  }
  func.func @transform_5(%arg0: i32) -> (i32, i32, i32) {
    %c0_i32 = arith.constant 0 : i32
    %c0_i32_0 = arith.constant 0 : i32
    %c0_i32_1 = arith.constant 0 : i32
    %c0_i32_2 = arith.constant 0 : i32
    return %c0_i32, %c0_i32_0, %c0_i32_1 : i32, i32, i32
  }
  func.func @transform_6(%arg0: i32) -> (i32, i32, i32) {
    %c0_i32 = arith.constant 0 : i32
    %c0_i32_0 = arith.constant 0 : i32
    %c0_i32_1 = arith.constant 0 : i32
    %c0_i32_2 = arith.constant 0 : i32
    return %c0_i32, %c0_i32_0, %c0_i32_1 : i32, i32, i32
  }
  func.func @transform_7(%arg0: i32) -> (i32, i32) {
    %c0_i32 = arith.constant 0 : i32
    %c0_i32_0 = arith.constant 0 : i32
    return %arg0, %c0_i32 : i32, i32
  }
  func.func @transform_8(%arg0: i32) -> (i32, i32) {
    %c0_i32 = arith.constant 0 : i32
    %c0_i32_0 = arith.constant 0 : i32
    return %arg0, %c0_i32 : i32, i32
  }
}

</mosaic_0001>

<bundles_post_ra>
// kernel: tpu_custom_call.1
= control target key start
LH: loop header
LB: loop body
LE: loop exit
PB: predicated region body
PF: predicated region fallthrough
CT: control target
= control target key end

     0   :  { %s6257_s27 = smov 0   ;;  %s9691_s0 = inlined_call_operand.vmem [shape: f32[512,4], index: 0, kind: input, shape index: {}]   ;;  %s9692_s1 = inlined_call_operand.vmem [shape: f32[512,6], index: 1, kind: input, shape index: {}]   ;;  %s9693_s2 = inlined_call_operand.vmem [shape: f32[4,2,64], index: 2, kind: input, shape index: {}]   ;;  %s9694_s3 = inlined_call_operand.vmem [shape: f32[4,6,64], index: 3, kind: input, shape index: {}]   ;;  %s9695_s4 = inlined_call_operand.vmem [shape: f32[4,1,64], index: 4, kind: input, shape index: {}]   ;;  %s9696_s5 = inlined_call_operand.vmem [shape: f32[4,64,4], index: 5, kind: input, shape index: {}]   ;;  %s9697_s6 = inlined_call_operand.vmem [shape: f32[4,1,4], index: 6, kind: input, shape index: {}]   ;;  %s9698_s7 = inlined_call_operand.vmem [shape: f32[512,4], index: 7, kind: output, shape index: {0}]   ;;  %s9699_s8 = inlined_call_operand.vmem [shape: f32[512,2], index: 8, kind: output, shape index: {1}]  }
   0x1 LB: > { %s5345_s28 = sadd.s32 4294967295, %s6208_s27   ;;  %p5349_p0 = scmp.ge.s32.totalorder %s6208_s27, 1  ;;  %s6208_s27 = sphi %s6257_s27, %s19_s27  }
   0x2   : > { %p277_p1 = scmp.lt.s32.totalorder %s6208_s27, 3 }
   0x4   : > { %p278_p2 = pnand %p5349_p0, %p277_p1 }
   0x6   : > { %281 = sbr.rel (%p278_p2) target bundleno = 3506 (0xdb2), region = 48 }
   0xb   : > { %v410_v0 = vld [vmem:[%s9694_s3] sm:$0x3f]  ;;  %vm508_vm0 = vcmask 1045504   ;;  %vm722_vm1 = vcmask 1041408   ;;  %s5350_s11 = sshll.u32 %s5345_s28, 5  ;;  %vm411_vm2 = vcmask 48128  }
   0xc   : > { %v409_v1 = vld [vmem:[%s9693_s2] sm:$0x3]  ;;  %5358 = vmatpush.msk.msra.mxu0 %vm508_vm0, %v410_v0  ;;  %p322_p3 = scmp.lt.s32.totalorder %s5350_s11, 63  ;;  %vm625_vm3 = vcmask 15360   ;;  %v978_v18 = vld [vmem:[%s9696_s5 + $0x38] sm:$0xff]  ;;  %v977_v28 = vld [vmem:[%s9696_s5 + $0x30] sm:$0xff] }
   0xd   : > { %5391 = vmatpush.msk.msra.mxu1 %vm722_vm1, %v409_v1  ;;  %5788 = vmatpush.msra.mxu2 %v978_v18  ;;  %v976_v29 = vld [vmem:[%s9696_s5 + $0x28] sm:$0xff]  ;;  %v975_v30 = vld [vmem:[%s9696_s5 + $0x20] sm:$0xff]  ;;  %v974_v33 = vld [vmem:[%s9696_s5 + $0x18] sm:$0xff]  ;;  %vm983_vm5 = vcmask 523264   ;;  %s6210_s21 = smov 2   ;;  %s6211_s22 = smov 126  }
   0xe   : > { %s10049_s11 = smov (!%p322_p3, %s5350_s11), 63  ;;  %1088 = vmatpush.msrb.mxu0 %v978_v18  ;;  %v973_v34 = vld [vmem:[%s9696_s5 + $0x10] sm:$0xff]  ;;  %v972_v35 = vld [vmem:[%s9696_s5 + $0x8] sm:$0xff]  ;;  %v971_v36 = vld [vmem:[%s9696_s5] sm:$0xff] }
   0xf   : > { %s6273_s12 = sshll.u32 %s10049_s11, 3  ;;  %5789 = vmatpush.msra.mxu2 %v977_v28  ;;  %v6381_v46 = vld [vmem:[%s9695_s4] ss:$0 sm:$0xff] }
  0x10   : > { %s6279_s15 = scalar_lea.vmem %s9692_s1, %s6273_s12  ;;  %s6285_s18 = scalar_lea.vmem %s9691_s0, %s6273_s12  ;;  %1089 = vmatpush.msrb.mxu0 %v977_v28 }
  0x11   : > { %v377_v2 = vld [vmem:[%s6279_s15] sm:$0xff]  ;;  %v378_v4 = vld [vmem:[%s6279_s15 + $0x8] sm:$0xff]  ;;  %v379_v6 = vld [vmem:[%s6279_s15 + $0x10] sm:$0xff]  ;;  %5790 = vmatpush.msra.mxu2 %v976_v29  ;;  %s8748_s19 = scalar_lea.vmem %s9698_s7, %s6273_s12  ;;  %s9206_s29 = scalar_lea.vmem %s9699_s8, %s6273_s12 }
  0x12   : > { %v345_v3 = vld [vmem:[%s6285_s18] sm:$0xff]  ;;  %5359 = vmatmul.msk.f32.vlgmr.msra.gmra.mxu0 %vm411_vm2, %v377_v2  ;;  %v346_v5 = vld [vmem:[%s6285_s18 + $0x8] sm:$0xff]  ;;  %v347_v7 = vld [vmem:[%s6285_s18 + $0x10] sm:$0xff] }
  0x13   : > { %5392 = vmatmul.msk.f32.vlgmr.msra.gmra.mxu1 %vm625_vm3, %v345_v3  ;;  %v380_v8 = vld [vmem:[%s6279_s15 + $0x18] sm:$0xff]  ;;  %v381_v10 = vld [vmem:[%s6279_s15 + $0x20] sm:$0xff]  ;;  %v382_v12 = vld [vmem:[%s6279_s15 + $0x28] sm:$0xff]  ;;  %1090 = vmatpush.msrb.mxu0 %v976_v29 }
  0x14   : > { %v348_v9 = vld [vmem:[%s6285_s18 + $0x18] sm:$0xff]  ;;  %v349_v11 = vld [vmem:[%s6285_s18 + $0x20] sm:$0xff]  ;;  %v350_v13 = vld [vmem:[%s6285_s18 + $0x28] sm:$0xff]  ;;  %5791 = vmatpush.msra.mxu2 %v975_v30 }
  0x15   : > { %v383_v14 = vld [vmem:[%s6279_s15 + $0x30] sm:$0xff]  ;;  %v384_v16 = vld [vmem:[%s6279_s15 + $0x38] sm:$0xff]  ;;  %v385_v19 = vld [vmem:[%s6279_s15 + $0x40] sm:$0xff]  ;;  %1091 = vmatpush.msrb.mxu0 %v975_v30 }
  0x16   : > { %v351_v15 = vld [vmem:[%s6285_s18 + $0x30] sm:$0xff]  ;;  %v352_v17 = vld [vmem:[%s6285_s18 + $0x38] sm:$0xff]  ;;  %v353_v20 = vld [vmem:[%s6285_s18 + $0x40] sm:$0xff]  ;;  %5792 = vmatpush.msra.mxu2 %v974_v33 }
  0x17   : > { %v386_v21 = vld [vmem:[%s6279_s15 + $0x48] sm:$0xff]  ;;  %v387_v23 = vld [vmem:[%s6279_s15 + $0x50] sm:$0xff]  ;;  %v388_v25 = vld [vmem:[%s6279_s15 + $0x58] sm:$0xff]  ;;  %1092 = vmatpush.msrb.mxu0 %v974_v33 }
  0x18   : > { %v354_v22 = vld [vmem:[%s6285_s18 + $0x48] sm:$0xff]  ;;  %v355_v24 = vld [vmem:[%s6285_s18 + $0x50] sm:$0xff]  ;;  %v389_v26 = vld [vmem:[%s6279_s15 + $0x60] sm:$0xff]  ;;  %5793 = vmatpush.msra.mxu2 %v973_v34 }
  0x19   : > { %v356_v27 = vld [vmem:[%s6285_s18 + $0x58] sm:$0xff]  ;;  %v390_v31 = vld [vmem:[%s6279_s15 + $0x68] sm:$0xff]  ;;  %v357_v32 = vld [vmem:[%s6285_s18 + $0x60] sm:$0xff]  ;;  %1093 = vmatpush.msrb.mxu0 %v973_v34 }
  0x1a   : > { %5360 = vmatmul.msk.f32.gmra.mxu0 %vm411_vm2, %v378_v4  ;;  %5794 = vmatpush.msra.mxu2 %v972_v35  ;;  %v391_v37 = vld [vmem:[%s6279_s15 + $0x70] sm:$0xff]  ;;  %v358_v38 = vld [vmem:[%s6285_s18 + $0x68] sm:$0xff]  ;;  %v392_v39 = vld [vmem:[%s6279_s15 + $0x78] sm:$0xff] }
  0x1b   : > { %5393 = vmatmul.msk.f32.gmra.mxu1 %vm625_vm3, %v346_v5  ;;  %1094 = vmatpush.msrb.mxu0 %v972_v35  ;;  %v393_v42 = vld [vmem:[%s6279_s15 + $0x80] sm:$0xff]  ;;  %v394_v45 = vld [vmem:[%s6279_s15 + $0x88] sm:$0xff]  ;;  %v395_v53 = vld [vmem:[%s6279_s15 + $0x90] sm:$0xff] }
  0x1c   : > { %5795 = vmatpush.msra.mxu2 %v971_v36  ;;  %v396_v60 = vld [vmem:[%s6279_s15 + $0x98] sm:$0xff]  ;;  %v359_v63 = vld [vmem:[%s6285_s18 + $0x70] sm:$0xff]  ;;  %v397_v3 = vld [vmem:[%s6279_s15 + $0xa0] sm:$0xff] }
  0x1d   : > { %1095 = vmatpush.msrb.mxu0 %v971_v36  ;;  %v399_v18 = vld [vmem:[%s6279_s15 + $0xb0] sm:$0xff]  ;;  %v361_v28 = vld [vmem:[%s6285_s18 + $0x80] sm:$0xff] }
  0x1e   : > { %v401_v33 = vld [vmem:[%s6279_s15 + $0xc0] sm:$0xff] }
  0x22   : > { %5361 = vmatmul.msk.f32.gmra.mxu0 %vm411_vm2, %v379_v6 }
  0x23   : > { %5394 = vmatmul.msk.f32.gmra.mxu1 %vm625_vm3, %v347_v7  ;;  %v360_v7 = vld [vmem:[%s6285_s18 + $0x78] sm:$0xff] }
  0x2a   : > { %5362 = vmatmul.msk.f32.gmra.mxu0 %vm411_vm2, %v380_v8 }
  0x2b   : > { %5395 = vmatmul.msk.f32.gmra.mxu1 %vm625_vm3, %v348_v9 }
  0x32   : > { %5363 = vmatmul.msk.f32.gmra.mxu0 %vm411_vm2, %v381_v10 }
  0x33   : > { %5396 = vmatmul.msk.f32.gmra.mxu1 %vm625_vm3, %v349_v11  ;;  %v398_v11 = vld [vmem:[%s6279_s15 + $0xa8] sm:$0xff] }
  0x3a   : > { %5364 = vmatmul.msk.f32.gmra.mxu0 %vm411_vm2, %v382_v12 }
  0x3b   : > { %5397 = vmatmul.msk.f32.gmra.mxu1 %vm625_vm3, %v350_v13 }
  0x42   : > { %5365 = vmatmul.msk.f32.gmra.mxu0 %vm411_vm2, %v383_v14 }
  0x43   : > { %5398 = vmatmul.msk.f32.gmra.mxu1 %vm625_vm3, %v351_v15 }
  0x4a   : > { %5366 = vmatmul.msk.f32.gmra.mxu0 %vm411_vm2, %v384_v16 }
  0x4b   : > { %5399 = vmatmul.msk.f32.gmra.mxu1 %vm625_vm3, %v352_v17 }
  0x52   : > { %5367 = vmatmul.msk.f32.gmra.mxu0 %vm411_vm2, %v385_v19 }
  0x53   : > { %5400 = vmatmul.msk.f32.gmra.mxu1 %vm625_vm3, %v353_v20 }
  0x5a   : > { %5368 = vmatmul.msk.f32.gmra.mxu0 %vm411_vm2, %v386_v21 }
  0x5b   : > { %5401 = vmatmul.msk.f32.gmra.mxu1 %vm625_vm3, %v354_v22 }
  0x62   : > { %5369 = vmatmul.msk.f32.gmra.mxu0 %vm411_vm2, %v387_v23 }
  0x63   : > { %5402 = vmatmul.msk.f32.gmra.mxu1 %vm625_vm3, %v355_v24 }
  0x6a   : > { %5370 = vmatmul.msk.f32.gmra.mxu0 %vm411_vm2, %v388_v25  ;;  %v400_v25 = vld [vmem:[%s6279_s15 + $0xb8] sm:$0xff] }
  0x6b   : > { %5403 = vmatmul.msk.f32.gmra.mxu1 %vm625_vm3, %v356_v27 }
  0x72   : > { %5371 = vmatmul.msk.f32.gmra.mxu0 %vm411_vm2, %v389_v26 }
  0x73   : > { %5404 = vmatmul.msk.f32.gmra.mxu1 %vm625_vm3, %v357_v32 }
  0x7a   : > { %5372 = vmatmul.msk.f32.gmra.mxu0 %vm411_vm2, %v390_v31 }
  0x7b   : > { %5405 = vmatmul.msk.f32.gmra.mxu1 %vm625_vm3, %v358_v38 }
  0x82   : > { %5373 = vmatmul.msk.f32.gmra.mxu0 %vm411_vm2, %v391_v37  ;;  %v362_v37 = vld [vmem:[%s6285_s18 + $0x88] sm:$0xff] }
  0x83   : > { %5406 = vmatmul.msk.f32.gmra.mxu1 %vm625_vm3, %v359_v63 }
  0x8a   : > { %5374 = vmatmul.msk.f32.gmra.mxu0 %vm411_vm2, %v392_v39 }
  0x8b   : > { %5407 = vmatmul.msk.f32.gmra.mxu1 %vm625_vm3, %v360_v7 }
  0x8f   : > { %v6371_v40 = vpop.f32.mrf.mxu0 }
  0x90   : > { %v6373_v41 = vpop.f32.mrf.mxu1 }
  0x92   : > { %5375 = vmatmul.msk.f32.gmra.mxu0 %vm411_vm2, %v393_v42 }
  0x93   : > { %5408 = vmatmul.msk.f32.gmra.mxu1 %vm625_vm3, %v361_v28  ;;  %v6471_v28 = vld [vmem:[%s9697_s6] ss:$0 sm:$0xff] }
  0x97   : > { %v532_v43 = vpop.f32.mrf.mxu0 }
  0x98   : > { %v746_v44 = vpop.f32.mrf.mxu1 }
  0x99   : > { %v747_v47 = vadd.f32 %v746_v44, %v532_v43  ;;  %v402_v43 = vld [vmem:[%s6279_s15 + $0xc8] sm:$0xff] }
  0x9a   : > { %5376 = vmatmul.msk.f32.gmra.mxu0 %vm411_vm2, %v394_v45 }
  0x9b   : > { %v844_v48 = vadd.f32 %v6381_v46, %v747_v47  ;;  %5409 = vmatmul.msk.f32.gmra.mxu1 %vm625_vm3, %v362_v37 }
  0x9d   : > { %vm876_vm4 = vcmp.gt.f32.partialorder %v844_v48, 0.0  ;;  %v908_v49 = vmul.f32 0.01, %v844_v48 }
  0x9f   : > { %v940_v50 = vsel %vm876_vm4, %v844_v48, %v908_v49  ;;  %v535_v51 = vpop.f32.mrf.mxu0  ;;  %v363_v48 = vld [vmem:[%s6285_s18 + $0x90] sm:$0xff] }
  0xa0   : > { %v749_v52 = vpop.f32.mrf.mxu1  ;;  %5425 = vmatmul.msk.f32.vlgmr.msra.gmra.mxu2 %vm983_vm5, %v940_v50 }
  0xa1   : > { %v750_v54 = vadd.f32 %v749_v52, %v535_v51  ;;  %v403_v52 = vld [vmem:[%s6279_s15 + $0xd0] sm:$0xff] }
  0xa2   : > { %5377 = vmatmul.msk.f32.gmra.mxu0 %vm411_vm2, %v395_v53 }
  0xa3   : > { %v845_v55 = vadd.f32 %v6381_v46, %v750_v54  ;;  %5410 = vmatmul.msk.f32.gmra.mxu1 %vm625_vm3, %v363_v48 }
  0xa5   : > { %vm877_vm6 = vcmp.gt.f32.partialorder %v845_v55, 0.0  ;;  %v909_v56 = vmul.f32 0.01, %v845_v55 }
  0xa7   : > { %v941_v57 = vsel %vm877_vm6, %v845_v55, %v909_v56  ;;  %v538_v58 = vpop.f32.mrf.mxu0  ;;  %v364_v56 = vld [vmem:[%s6285_s18 + $0x98] sm:$0xff] }
  0xa8   : > { %v752_v59 = vpop.f32.mrf.mxu1  ;;  %5426 = vmatmul.msk.f32.gmra.mxu2 %vm983_vm5, %v941_v57 }
  0xa9   : > { %v753_v61 = vadd.f32 %v752_v59, %v538_v58  ;;  %v404_v59 = vld [vmem:[%s6279_s15 + $0xd8] sm:$0xff] }
  0xaa   : > { %5378 = vmatmul.msk.f32.gmra.mxu0 %vm411_vm2, %v396_v60  ;;  %v365_v60 = vld [vmem:[%s6285_s18 + $0xa0] sm:$0xff] }
  0xab   : > { %v846_v62 = vadd.f32 %v6381_v46, %v753_v61  ;;  %5411 = vmatmul.msk.f32.gmra.mxu1 %vm625_vm3, %v364_v56 }
  0xad   : > { %vm878_vm7 = vcmp.gt.f32.partialorder %v846_v62, 0.0  ;;  %v910_v0 = vmul.f32 0.01, %v846_v62 }
  0xaf   : > { %v942_v1 = vsel %vm878_vm7, %v846_v62, %v910_v0  ;;  %v541_v2 = vpop.f32.mrf.mxu0  ;;  %v405_v0 = vld [vmem:[%s6279_s15 + $0xe0] sm:$0xff] }
  0xb0   : > { %5427 = vmatmul.msk.f32.gmra.mxu2 %vm983_vm5, %v942_v1  ;;  %v755_v4 = vpop.f32.mrf.mxu1 }
  0xb1   : > { %v756_v5 = vadd.f32 %v755_v4, %v541_v2  ;;  %v366_v2 = vld [vmem:[%s6285_s18 + $0xa8] sm:$0xff] }
  0xb2   : > { %5379 = vmatmul.msk.f32.gmra.mxu0 %vm411_vm2, %v397_v3 }
  0xb3   : > { %v847_v6 = vadd.f32 %v6381_v46, %v756_v5  ;;  %5412 = vmatmul.msk.f32.gmra.mxu1 %vm625_vm3, %v365_v60  ;;  %v375_v60 = vld [vmem:[%s6285_s18 + $0xf0] sm:$0xff] }
  0xb5   : > { %vm879_vm8 = vcmp.gt.f32.partialorder %v847_v6, 0.0  ;;  %v911_v8 = vmul.f32 0.01, %v847_v6 }
  0xb7   : > { %v943_v9 = vsel %vm879_vm8, %v847_v6, %v911_v8  ;;  %v544_v10 = vpop.f32.mrf.mxu0  ;;  %v406_v8 = vld [vmem:[%s6279_s15 + $0xe8] sm:$0xff] }
  0xb8   : > { %v758_v12 = vpop.f32.mrf.mxu1  ;;  %5428 = vmatmul.msk.f32.gmra.mxu2 %vm983_vm5, %v943_v9 }
  0xb9   : > { %v759_v13 = vadd.f32 %v758_v12, %v544_v10  ;;  %v367_v10 = vld [vmem:[%s6285_s18 + $0xb0] sm:$0xff] }
  0xba   : > { %5380 = vmatmul.msk.f32.gmra.mxu0 %vm411_vm2, %v398_v11 }
  0xbb   : > { %v848_v14 = vadd.f32 %v6381_v46, %v759_v13  ;;  %5413 = vmatmul.msk.f32.gmra.mxu1 %vm625_vm3, %v366_v2  ;;  %v407_v13 = vld [vmem:[%s6279_s15 + $0xf0] sm:$0xff]  ;;  %v6507_v2 = vld [vmem:[%s6285_s18 + $0xf8] sm:$0xff] }
  0xbd   : > { %vm880_vm9 = vcmp.gt.f32.partialorder %v848_v14, 0.0  ;;  %v912_v15 = vmul.f32 0.01, %v848_v14 }
  0xbf   : > { %v944_v16 = vsel %vm880_vm9, %v848_v14, %v912_v15  ;;  %v547_v17 = vpop.f32.mrf.mxu0 }
  0xc0   : > { %v761_v19 = vpop.f32.mrf.mxu1  ;;  %5429 = vmatmul.msk.f32.gmra.mxu2 %vm983_vm5, %v944_v16 }
  0xc1   : > { %v762_v20 = vadd.f32 %v761_v19, %v547_v17  ;;  %v744_v19 = vadd.f32 %v6373_v41, %v6371_v40  ;;  %v370_v41 = vld [vmem:[%s6285_s18 + $0xc8] sm:$0xff] }
  0xc2   : > { %5381 = vmatmul.msk.f32.gmra.mxu0 %vm411_vm2, %v399_v18  ;;  %v368_v18 = vld [vmem:[%s6285_s18 + $0xb8] sm:$0xff] }
  0xc3   : > { %v849_v21 = vadd.f32 %v6381_v46, %v762_v20  ;;  %5414 = vmatmul.msk.f32.gmra.mxu1 %vm625_vm3, %v367_v10 }
  0xc5   : > { %vm881_vm10 = vcmp.gt.f32.partialorder %v849_v21, 0.0  ;;  %v913_v22 = vmul.f32 0.01, %v849_v21 }
  0xc7   : > { %v945_v23 = vsel %vm881_vm10, %v849_v21, %v913_v22  ;;  %v550_v24 = vpop.f32.mrf.mxu0  ;;  %v408_v21 = vld [vmem:[%s6279_s15 + $0xf8] sm:$0xff] }
  0xc8   : > { %v764_v26 = vpop.f32.mrf.mxu1  ;;  %5430 = vmatmul.msk.f32.gmra.mxu2 %vm983_vm5, %v945_v23  ;;  %v843_v23 = vadd.f32 %v6381_v46, %v744_v19 }
  0xc9   : > { %v765_v27 = vadd.f32 %v764_v26, %v550_v24  ;;  %v369_v24 = vld [vmem:[%s6285_s18 + $0xc0] sm:$0xff] }
  0xca   : > { %5382 = vmatmul.msk.f32.gmra.mxu0 %vm411_vm2, %v400_v25  ;;  %v907_v25 = vmul.f32 0.01, %v843_v23  ;;  %vm875_vm7 = vcmp.gt.f32.partialorder %v843_v23, 0.0 }
  0xcb   : > { %v850_v29 = vadd.f32 %v6381_v46, %v765_v27  ;;  %5415 = vmatmul.msk.f32.gmra.mxu1 %vm625_vm3, %v368_v18  ;;  %v371_v27 = vld [vmem:[%s6285_s18 + $0xd0] sm:$0xff] }
  0xcc   : > { %v939_v40 = vsel %vm875_vm7, %v843_v23, %v907_v25 }
  0xcd   : > { %vm882_vm11 = vcmp.gt.f32.partialorder %v850_v29, 0.0  ;;  %v914_v30 = vmul.f32 0.01, %v850_v29 }
  0xcf   : > { %v946_v31 = vsel %vm882_vm11, %v850_v29, %v914_v30  ;;  %v553_v32 = vpop.f32.mrf.mxu0 }
  0xd0   : > { %v767_v34 = vpop.f32.mrf.mxu1  ;;  %5431 = vmatmul.msk.f32.gmra.mxu2 %vm983_vm5, %v946_v31  ;;  %v372_v31 = vld [vmem:[%s6285_s18 + $0xd8] sm:$0xff] }
  0xd1   : > { %v768_v35 = vadd.f32 %v767_v34, %v553_v32 }
  0xd2   : > { %5383 = vmatmul.msk.f32.gmra.mxu0 %vm411_vm2, %v401_v33 }
  0xd3   : > { %v851_v36 = vadd.f32 %v6381_v46, %v768_v35  ;;  %5416 = vmatmul.msk.f32.gmra.mxu1 %vm625_vm3, %v369_v24 }
  0xd5   : > { %vm883_vm12 = vcmp.gt.f32.partialorder %v851_v36, 0.0  ;;  %v915_v38 = vmul.f32 0.01, %v851_v36 }
  0xd7   : > { %v947_v39 = vsel %vm883_vm12, %v851_v36, %v915_v38  ;;  %v556_v42 = vpop.f32.mrf.mxu0  ;;  %v373_v38 = vld [vmem:[%s6285_s18 + $0xe0] sm:$0xff] }
  0xd8   : > { %v770_v44 = vpop.f32.mrf.mxu1  ;;  %5432 = vmatmul.msk.f32.gmra.mxu2 %vm983_vm5, %v947_v39 }
  0xd9   : > { %v771_v45 = vadd.f32 %v770_v44, %v556_v42 }
  0xda   : > { %5384 = vmatmul.msk.f32.gmra.mxu0 %vm411_vm2, %v402_v43 }
  0xdb   : > { %v852_v47 = vadd.f32 %v6381_v46, %v771_v45  ;;  %5417 = vmatmul.msk.f32.gmra.mxu1 %vm625_vm3, %v370_v41 }
  0xdd   : > { %vm884_vm13 = vcmp.gt.f32.partialorder %v852_v47, 0.0  ;;  %v916_v49 = vmul.f32 0.01, %v852_v47 }
  0xdf   : > { %v948_v50 = vsel %vm884_vm13, %v852_v47, %v916_v49  ;;  %v559_v51 = vpop.f32.mrf.mxu0 }
  0xe0   : > { %v773_v53 = vpop.f32.mrf.mxu1  ;;  %5433 = vmatmul.msk.f32.gmra.mxu2 %vm983_vm5, %v948_v50 }
  0xe1   : > { %v774_v54 = vadd.f32 %v773_v53, %v559_v51  ;;  %v374_v51 = vld [vmem:[%s6285_s18 + $0xe8] sm:$0xff] }
  0xe2   : > { %5385 = vmatmul.msk.f32.gmra.mxu0 %vm411_vm2, %v403_v52 }
  0xe3   : > { %v853_v55 = vadd.f32 %v6381_v46, %v774_v54  ;;  %5418 = vmatmul.msk.f32.gmra.mxu1 %vm625_vm3, %v371_v27 }
  0xe5   : > { %vm885_vm14 = vcmp.gt.f32.partialorder %v853_v55, 0.0  ;;  %v917_v57 = vmul.f32 0.01, %v853_v55 }
  0xe7   : > { %v949_v58 = vsel %vm885_vm14, %v853_v55, %v917_v57  ;;  %v562_v61 = vpop.f32.mrf.mxu0 }
  0xe8   : > { %5434 = vmatmul.msk.f32.gmra.mxu2 %vm983_vm5, %v949_v58  ;;  %v776_v62 = vpop.f32.mrf.mxu1 }
  0xe9   : > { %v777_v63 = vadd.f32 %v776_v62, %v562_v61 }
  0xea   : > { %5386 = vmatmul.msk.f32.gmra.mxu0 %vm411_vm2, %v404_v59 }
  0xeb   : > { %v854_v1 = vadd.f32 %v6381_v46, %v777_v63  ;;  %5419 = vmatmul.msk.f32.gmra.mxu1 %vm625_vm3, %v372_v31 }
  0xed   : > { %vm886_vm15 = vcmp.gt.f32.partialorder %v854_v1, 0.0  ;;  %v918_v3 = vmul.f32 0.01, %v854_v1 }
  0xef   : > { %v950_v4 = vsel %vm886_vm15, %v854_v1, %v918_v3  ;;  %v565_v5 = vpop.f32.mrf.mxu0 }
  0xf0   : > { %v779_v6 = vpop.f32.mrf.mxu1  ;;  %5435 = vmatmul.msk.f32.gmra.mxu2 %vm983_vm5, %v950_v4 }
  0xf1   : > { %v780_v7 = vadd.f32 %v779_v6, %v565_v5 }
  0xf2   : > { %5387 = vmatmul.msk.f32.gmra.mxu0 %vm411_vm2, %v405_v0 }
  0xf3   : > { %v855_v9 = vadd.f32 %v6381_v46, %v780_v7  ;;  %5420 = vmatmul.msk.f32.gmra.mxu1 %vm625_vm3, %v373_v38 }
  0xf5   : > { %vm887_vm4 = vcmp.gt.f32.partialorder %v855_v9, 0.0  ;;  %v919_v11 = vmul.f32 0.01, %v855_v9 }
  0xf7   : > { %v951_v12 = vsel %vm887_vm4, %v855_v9, %v919_v11  ;;  %v568_v14 = vpop.f32.mrf.mxu0 }
  0xf8   : > { %5436 = vmatmul.msk.f32.gmra.mxu2 %vm983_vm5, %v951_v12  ;;  %v782_v15 = vpop.f32.mrf.mxu1 }
  0xf9   : > { %v783_v16 = vadd.f32 %v782_v15, %v568_v14 }
  0xfa   : > { %5388 = vmatmul.msk.f32.gmra.mxu0 %vm411_vm2, %v406_v8 }
  0xfb   : > { %v856_v17 = vadd.f32 %v6381_v46, %v783_v16  ;;  %5421 = vmatmul.msk.f32.gmra.mxu1 %vm625_vm3, %v374_v51 }
  0xfd   : > { %v920_v20 = vmul.f32 0.01, %v856_v17  ;;  %vm888_vm6 = vcmp.gt.f32.partialorder %v856_v17, 0.0 }
  0xff   : > { %v952_v22 = vsel %vm888_vm6, %v856_v17, %v920_v20  ;;  %v571_v26 = vpop.f32.mrf.mxu0 }
 0x100   : > { %5437 = vmatmul.msk.f32.gmra.mxu2 %vm983_vm5, %v952_v22  ;;  %v785_v35 = vpop.f32.mrf.mxu1 }
 0x101   : > { %v786_v36 = vadd.f32 %v785_v35, %v571_v26 }
 0x102   : > { %5389 = vmatmul.msk.f32.gmra.mxu0 %vm411_vm2, %v407_v13 }
 0x103   : > { %v857_v39 = vadd.f32 %v6381_v46, %v786_v36  ;;  %5422 = vmatmul.msk.f32.gmra.mxu1 %vm625_vm3, %v375_v60 }
 0x105   : > { %vm889_vm8 = vcmp.gt.f32.partialorder %v857_v39, 0.0  ;;  %v921_v44 = vmul.f32 0.01, %v857_v39 }
 0x107   : > { %v574_v29 = vpop.f32.mrf.mxu0  ;;  %v953_v49 = vsel %vm889_vm8, %v857_v39, %v921_v44 }
 0x108   : > { %v788_v47 = vpop.f32.mrf.mxu1  ;;  %5438 = vmatmul.msk.f32.gmra.mxu2 %vm983_vm5, %v953_v49 }
 0x109   : > { %v789_v48 = vadd.f32 %v788_v47, %v574_v29 }
 0x10a   : > { %5390 = vmatmul.msk.f32.gmra.mxu0 %vm411_vm2, %v408_v21 }
 0x10b   : > { %v858_v54 = vadd.f32 %v6381_v46, %v789_v48  ;;  %5423 = vmatmul.msk.f32.gmra.mxu1 %vm625_vm3, %v6507_v2 }
 0x10d   : > { %vm890_vm9 = vcmp.gt.f32.partialorder %v858_v54, 0.0  ;;  %v922_v57 = vmul.f32 0.01, %v858_v54 }
 0x10f   : > { %v577_v42 = vpop.f32.mrf.mxu0  ;;  %v954_v59 = vsel %vm890_vm9, %v858_v54, %v922_v57 }
 0x110   : > { %5439 = vmatmul.msk.f32.gmra.mxu2 %vm983_vm5, %v954_v59  ;;  %v791_v6 = vpop.f32.mrf.mxu1 }
 0x111   : > { %v792_v7 = vadd.f32 %v791_v6, %v577_v42 }
 0x112   : > { %5424 = vmatmul.msk.f32.vlgmr.msrb.gmra.mxu0 %vm983_vm5, %v939_v40 }
 0x113   : > { %v859_v10 = vadd.f32 %v6381_v46, %v792_v7 }
 0x115   : > { %v923_v12 = vmul.f32 0.01, %v859_v10  ;;  %vm891_vm10 = vcmp.gt.f32.partialorder %v859_v10, 0.0 }
 0x117   : > { %v580_v56 = vpop.f32.mrf.mxu0  ;;  %v955_v14 = vsel %vm891_vm10, %v859_v10, %v923_v12 }
 0x118   : > { %5440 = vmatmul.msk.f32.gmra.mxu2 %vm983_vm5, %v955_v14  ;;  %v794_v15 = vpop.f32.mrf.mxu1 }
 0x119   : > { %v795_v17 = vadd.f32 %v794_v15, %v580_v56 }
 0x11b   : > { %v860_v19 = vadd.f32 %v6381_v46, %v795_v17 }
 0x11d   : > { %vm892_vm11 = vcmp.gt.f32.partialorder %v860_v19, 0.0  ;;  %v924_v22 = vmul.f32 0.01, %v860_v19 }
 0x11f   : > { %v583_v0 = vpop.f32.mrf.mxu0  ;;  %v956_v24 = vsel %vm892_vm11, %v860_v19, %v924_v22 }
 0x120   : > { %v797_v23 = vpop.f32.mrf.mxu1  ;;  %5441 = vmatmul.msk.f32.gmra.mxu2 %vm983_vm5, %v956_v24 }
 0x121   : > { %v798_v40 = vadd.f32 %v797_v23, %v583_v0 }
 0x123   : > { %v1100_v30 = vpop.f32.mrf.mxu2  ;;  %v861_v41 = vadd.f32 %v6381_v46, %v798_v40 }
 0x124   : > { %v6475_v32 = vadd.f32 %v6471_v28, %v1100_v30 }
 0x125   : > { %vm893_vm12 = vcmp.gt.f32.partialorder %v861_v41, 0.0  ;;  %v925_v29 = vmul.f32 0.01, %v861_v41 }
 0x126   : > { %v1195_v33 = vmul.f32 1.442695, %v6475_v32  ;;  %v1452_v34 = vsel %vm625_vm3, %v6475_v32, 0.0 }
 0x127   : > { %1453 = vadd.xlane.f32.xlu1 %v1452_v34  ;;  %v586_v8 = vpop.f32.mrf.mxu0  ;;  %v957_v31 = vsel %vm893_vm12, %v861_v41, %v925_v29 }
 0x128   : > { %5814 = vpow2.f32 %v1195_v33  ;;  %v800_v30 = vpop.f32.mrf.mxu1  ;;  %5442 = vmatmul.msk.f32.gmra.mxu2 %vm983_vm5, %v957_v31 }
 0x129   : > { %v801_v34 = vadd.f32 %v800_v30, %v586_v8 }
 0x12b   : > { %v1103_v37 = vpop.f32.mrf.mxu2  ;;  %v862_v35 = vadd.f32 %v6381_v46, %v801_v34 }
 0x12c   : > { %v6486_v45 = vadd.f32 %v6471_v28, %v1103_v37 }
 0x12d   : > { %vm894_vm13 = vcmp.gt.f32.partialorder %v862_v35, 0.0  ;;  %v926_v37 = vmul.f32 0.01, %v862_v35 }
 0x12e   : > { %v5815_v43 = vpop.eup %5814  ;;  %v1197_v53 = vmul.f32 1.442695, %v6486_v45  ;;  %v1455_v21 = vsel %vm625_vm3, %v6486_v45, 0.0 }
 0x12f   : > { %1291 = vrot.lane.b32.xlu0 %v5815_v43, %s6210_s21  ;;  %v589_v18 = vpop.f32.mrf.mxu0  ;;  %v958_v43 = vsel %vm894_vm13, %v862_v35, %v926_v37 }
 0x130   : > { %5816 = vpow2.f32 %v1197_v53  ;;  %v803_v42 = vpop.f32.mrf.mxu1  ;;  %5443 = vmatmul.msk.f32.gmra.mxu2 %vm983_vm5, %v958_v43 }
 0x131   : > { %v804_v47 = vadd.f32 %v803_v42, %v589_v18 }
 0x133   : > { %v1106_v50 = vpop.f32.mrf.mxu2  ;;  %v863_v48 = vadd.f32 %v6381_v46, %v804_v47 }
 0x134   : > { %v6491_v52 = vadd.f32 %v6471_v28, %v1106_v50 }
 0x135   : > { %v927_v50 = vmul.f32 0.01, %v863_v48  ;;  %vm895_vm14 = vcmp.gt.f32.partialorder %v863_v48, 0.0 }
 0x136   : > { %v1458_v55 = vsel %vm625_vm3, %v6491_v52, 0.0  ;;  %v1199_v61 = vmul.f32 1.442695, %v6491_v52  ;;  %v5817_v62 = vpop.eup %5816 }
 0x137   : > { %1459 = vadd.xlane.f32.xlu2 %v1458_v55  ;;  %v592_v26 = vpop.f32.mrf.mxu0  ;;  %v959_v54 = vsel %vm895_vm14, %v863_v48, %v927_v50 }
 0x138   : > { %5818 = vpow2.f32 %v1199_v61  ;;  %v806_v56 = vpop.f32.mrf.mxu1  ;;  %5444 = vmatmul.msk.f32.gmra.mxu2 %vm983_vm5, %v959_v54 }
 0x13b   : > { %v1109_v58 = vpop.f32.mrf.mxu2 }
 0x13c   : > { %v6503_v63 = vadd.f32 %v6471_v28, %v1109_v58  ;;  %v807_v58 = vadd.f32 %v806_v56, %v592_v26 }
 0x13e   : > { %v1201_v3 = vmul.f32 1.442695, %v6503_v63  ;;  %v5819_v4 = vpop.eup %5818  ;;  %v1461_v51 = vsel %vm625_vm3, %v6503_v63, 0.0  ;;  %v864_v59 = vadd.f32 %v6381_v46, %v807_v58 }
 0x13f   : > { %v595_v38 = vpop.f32.mrf.mxu0 }
 0x140   : > { %1293 = vrot.lane.b32.xlu1 %v5817_v62, %s6210_s21  ;;  %5820 = vpow2.f32 %v1201_v3  ;;  %v928_v60 = vmul.f32 0.01, %v864_v59  ;;  %vm896_vm15 = vcmp.gt.f32.partialorder %v864_v59, 0.0  ;;  %v809_v0 = vpop.f32.mrf.mxu1 }
 0x141   : > { %v810_v3 = vadd.f32 %v809_v0, %v595_v38 }
 0x142   : > { %v960_v61 = vsel %vm896_vm15, %v864_v59, %v928_v60 }
 0x143   : > { %v1112_v1 = vpop.f32.mrf.mxu2  ;;  %5445 = vmatmul.msk.f32.gmra.mxu2 %vm983_vm5, %v960_v61  ;;  %v865_v6 = vadd.f32 %v6381_v46, %v810_v3 }
 0x144   : > { %v6513_v5 = vadd.f32 %v6471_v28, %v1112_v1 }
 0x145   : > { %v929_v10 = vmul.f32 0.01, %v865_v6  ;;  %vm897_vm4 = vcmp.gt.f32.partialorder %v865_v6, 0.0 }
 0x146   : > { %v1203_v11 = vmul.f32 1.442695, %v6513_v5  ;;  %v5821_v13 = vpop.eup %5820  ;;  %v1464_v27 = vsel %vm625_vm3, %v6513_v5, 0.0 }
 0x147   : > { %v598_v55 = vpop.f32.mrf.mxu0 }
 0x148   : > { %1295 = vrot.lane.b32.xlu1 %v5819_v4, %s6210_s21  ;;  %5822 = vpow2.f32 %v1203_v11  ;;  %v812_v11 = vpop.f32.mrf.mxu1 }
 0x149   : > { %v813_v12 = vadd.f32 %v812_v11, %v598_v55 }
 0x14b   : > { %v6516_v9 = vpop.f32.mrf.mxu2 }
 0x14c   : > { %v6553_v62 = vadd.f32 %v6471_v28, %v6516_v9  ;;  %v961_v9 = vsel %vm897_vm4, %v865_v6, %v929_v10 }
 0x14d   : > { %5446 = vmatmul.msk.f32.gmra.mxu2 %vm983_vm5, %v961_v9 }
 0x14e   : > { %v5823_v20 = vpop.eup %5822  ;;  %v1467_v7 = vsel %vm625_vm3, %v6553_v62, 0.0  ;;  %v1205_v8 = vmul.f32 1.442695, %v6553_v62 }
 0x14f   : > { %1297 = vrot.lane.b32.xlu2 %v5821_v13, %s6210_s21  ;;  %v601_v4 = vpop.f32.mrf.mxu0  ;;  %v866_v13 = vadd.f32 %v6381_v46, %v813_v12 }
 0x151   : > { %vm898_vm6 = vcmp.gt.f32.partialorder %v866_v13, 0.0 }
 0x153   : > { %v1118_v16 = vpop.f32.mrf.mxu2 }
 0x154   : > { %v6537_v36 = vadd.f32 %v6471_v28, %v1118_v16  ;;  %v930_v16 = vmul.f32 0.01, %v866_v13 }
 0x156   : > { %v1207_v39 = vmul.f32 1.442695, %v6537_v36  ;;  %v1470_v15 = vsel %vm625_vm3, %v6537_v36, 0.0  ;;  %v962_v18 = vsel %vm898_vm6, %v866_v13, %v930_v16 }
 0x157   : > { %1299 = vrot.lane.b32.xlu2 %v5823_v20, %s6210_s21  ;;  %v604_v14 = vpop.f32.mrf.mxu0  ;;  %v815_v20 = vpop.f32.mrf.mxu1  ;;  %5447 = vmatmul.msk.f32.gmra.mxu2 %vm983_vm5, %v962_v18 }
 0x158   : > { %5824 = vpow2.f32 %v1207_v39 }
 0x159   : > { %1456 = vadd.xlane.f32.xlu0 %v1455_v21  ;;  %v816_v21 = vadd.f32 %v815_v20, %v601_v4 }
 0x15b   : > { %v6526_v25 = vpop.f32.mrf.mxu2  ;;  %v867_v22 = vadd.f32 %v6381_v46, %v816_v21 }
 0x15c   : > { %v6567_v19 = vadd.f32 %v6471_v28, %v6526_v25 }
 0x15d   : > { %v931_v24 = vmul.f32 0.01, %v867_v22  ;;  %vm899_vm7 = vcmp.gt.f32.partialorder %v867_v22, 0.0 }
 0x15e   : > { %v5825_v57 = vpop.eup %5824  ;;  %v1473_v23 = vsel %vm625_vm3, %v6567_v19, 0.0  ;;  %v1209_v38 = vmul.f32 1.442695, %v6567_v19 }
 0x15f   : > { %v607_v40 = vpop.f32.mrf.mxu0  ;;  %v963_v41 = vsel %vm899_vm7, %v867_v22, %v931_v24  ;;  %v818_v26 = vpop.f32.mrf.mxu1 }
 0x160   : > { %5448 = vmatmul.msk.f32.gmra.mxu2 %vm983_vm5, %v963_v41  ;;  %v819_v25 = vadd.f32 %v818_v26, %v604_v14 }
 0x161   : > { %1465 = vadd.xlane.f32.xlu0 %v1464_v27 }
 0x162   : > { %v868_v29 = vadd.f32 %v6381_v46, %v819_v25 }
 0x163   : > { %v6532_v33 = vpop.f32.mrf.mxu2 }
 0x164   : > { %v932_v30 = vmul.f32 0.01, %v868_v29  ;;  %vm900_vm8 = vcmp.gt.f32.partialorder %v868_v29, 0.0  ;;  %v6596_v3 = vadd.f32 %v6471_v28, %v6532_v33 }
 0x166   : > { %v964_v31 = vsel %vm900_vm8, %v868_v29, %v932_v30  ;;  %v1476_v10 = vsel %vm625_vm3, %v6596_v3, 0.0  ;;  %v1211_v21 = vmul.f32 1.442695, %v6596_v3 }
 0x167   : > { %v610_v34 = vpop.f32.mrf.mxu0  ;;  %v821_v35 = vpop.f32.mrf.mxu1 }
 0x168   : > { %5449 = vmatmul.msk.f32.gmra.mxu2 %vm983_vm5, %v964_v31  ;;  %v822_v37 = vadd.f32 %v821_v35, %v607_v40 }
 0x16a   : > { %v869_v39 = vadd.f32 %v6381_v46, %v822_v37 }
 0x16b   : > { %v1127_v44 = vpop.f32.mrf.mxu2 }
 0x16c   : > { %v6543_v49 = vadd.f32 %v6471_v28, %v1127_v44  ;;  %vm901_vm9 = vcmp.gt.f32.partialorder %v869_v39, 0.0  ;;  %v933_v43 = vmul.f32 0.01, %v869_v39 }
 0x16e   : > { %v1213_v53 = vmul.f32 1.442695, %v6543_v49  ;;  %v965_v47 = vsel %vm901_vm9, %v869_v39, %v933_v43  ;;  %v1479_v29 = vsel %vm625_vm3, %v6543_v49, 0.0 }
 0x16f   : > { %v824_v48 = vpop.f32.mrf.mxu1 }
 0x170   : > { %5826 = vpow2.f32 %v1213_v53  ;;  %5450 = vmatmul.msk.f32.gmra.mxu2 %vm983_vm5, %v965_v47  ;;  %v825_v50 = vadd.f32 %v824_v48, %v610_v34 }
 0x171   : > { %5828 = vpow2.f32 %v1205_v8 }
 0x172   : > { %1462 = vadd.xlane.f32.xlu1 %v1461_v51  ;;  %5830 = vpow2.f32 %v1209_v38  ;;  %v613_v51 = vpop.f32.mrf.mxu0  ;;  %v870_v54 = vadd.f32 %v6381_v46, %v825_v50 }
 0x173   : > { %v6575_v27 = vpop.f32.mrf.mxu2 }
 0x174   : > { %vm902_vm10 = vcmp.gt.f32.partialorder %v870_v54, 0.0  ;;  %v934_v56 = vmul.f32 0.01, %v870_v54  ;;  %v6615_v31 = vadd.f32 %v6471_v28, %v6575_v27 }
 0x175   : > { %1303 = vrot.lane.b32.xlu0 %v5825_v57, %s6210_s21 }
 0x176   : > { %v5827_v1 = vpop.eup %5826  ;;  %v966_v58 = vsel %vm902_vm10, %v870_v54, %v934_v56  ;;  %v1482_v50 = vsel %vm625_vm3, %v6615_v31, 0.0 }
 0x177   : > { %v5829_v17 = vpop.eup %5828  ;;  %v827_v59 = vpop.f32.mrf.mxu1 }
 0x178   : > { %v5831_v55 = vpop.eup %5830  ;;  %5451 = vmatmul.msk.f32.gmra.mxu2 %vm983_vm5, %v966_v58  ;;  %v828_v61 = vadd.f32 %v827_v59, %v613_v51 }
 0x17a   : > { %v871_v0 = vadd.f32 %v6381_v46, %v828_v61 }
 0x17b   : > { %v1133_v42 = vpop.f32.mrf.mxu2 }
 0x17c   : > { %v6582_v44 = vadd.f32 %v6471_v28, %v1133_v42  ;;  %v935_v6 = vmul.f32 0.01, %v871_v0  ;;  %vm903_vm11 = vcmp.gt.f32.partialorder %v871_v0, 0.0 }
 0x17d   : > { %1309 = vrot.lane.b32.xlu0 %v5827_v1, %s6210_s21  ;;  %v616_v1 = vpop.f32.mrf.mxu0 }
 0x17e   : > { %v1485_v53 = vsel %vm625_vm3, %v6582_v44, 0.0  ;;  %v1217_v54 = vmul.f32 1.442695, %v6582_v44 }
 0x17f   : > { %v830_v8 = vpop.f32.mrf.mxu1 }
 0x180   : > { %1468 = vadd.xlane.f32.xlu2 %v1467_v7  ;;  %v967_v7 = vsel %vm903_vm11, %v871_v0, %v935_v6  ;;  %v831_v9 = vadd.f32 %v830_v8, %v616_v1 }
 0x181   : > { %5452 = vmatmul.msk.f32.gmra.mxu2 %vm983_vm5, %v967_v7 }
 0x182   : > { %v872_v11 = vadd.f32 %v6381_v46, %v831_v9 }
 0x183   : > { %v1136_v57 = vpop.f32.mrf.mxu2 }
 0x184   : > { %v6591_v60 = vadd.f32 %v6471_v28, %v1136_v57  ;;  %vm904_vm12 = vcmp.gt.f32.partialorder %v872_v11, 0.0  ;;  %v936_v12 = vmul.f32 0.01, %v872_v11 }
 0x185   : > { %v619_v33 = vpop.f32.mrf.mxu0 }
 0x186   : > { %v1219_v4 = vmul.f32 1.442695, %v6591_v60  ;;  %v968_v14 = vsel %vm904_vm12, %v872_v11, %v936_v12  ;;  %v1488_v56 = vsel %vm625_vm3, %v6591_v60, 0.0  ;;  %v6070_v12 = vld [vmem:[%s6285_s18 + $0x18] sm:$0xff] }
 0x188   : > { %1471 = vadd.xlane.f32.xlu2 %v1470_v15  ;;  %5832 = vpow2.f32 %v1219_v4  ;;  %v833_v15 = vpop.f32.mrf.mxu1 }
 0x189   : > { %5453 = vmatmul.msk.f32.gmra.mxu2 %vm983_vm5, %v968_v14  ;;  %v834_v16 = vadd.f32 %v833_v15, %v619_v33  ;;  %5834 = vpow2.f32 %v1211_v21 }
 0x18b   : > { %1301 = vrot.lane.b32.xlu1 %v5829_v17, %s6210_s21  ;;  %v873_v17 = vadd.f32 %v6381_v46, %v834_v16  ;;  %v1139_v30 = vpop.f32.mrf.mxu2 }
 0x18c   : > { %v6643_v59 = vadd.f32 %v6471_v28, %v1139_v30 }
 0x18d   : > { %vm905_vm13 = vcmp.gt.f32.partialorder %v873_v17, 0.0  ;;  %v937_v18 = vmul.f32 0.01, %v873_v17  ;;  %v622_v22 = vpop.f32.mrf.mxu0 }
 0x18e   : > { %v5833_v13 = vpop.eup %5832  ;;  %v1221_v4 = vmul.f32 1.442695, %v6643_v59 }
 0x18f   : > { %v969_v20 = vsel %vm905_vm13, %v873_v17, %v937_v18  ;;  %v5835_v25 = vpop.eup %5834 }
 0x190   : > { %1474 = vadd.xlane.f32.xlu2 %v1473_v23  ;;  %v836_v23 = vpop.f32.mrf.mxu1 }
 0x191   : > { %5454 = vmatmul.msk.f32.gmra.mxu2 %vm983_vm5, %v969_v20  ;;  %v837_v24 = vadd.f32 %v836_v23, %v622_v22 }
 0x193   : > { %v874_v40 = vadd.f32 %v6381_v46, %v837_v24  ;;  %v1142_v34 = vpop.f32.mrf.mxu2  ;;  %v1215_v46 = vmul.f32 1.442695, %v6615_v31  ;;  %v6071_v24 = vld [vmem:[%s6285_s18 + $0x8] sm:$0xff] }
 0x194   : > { %v6619_v35 = vadd.f32 %v6471_v28, %v1142_v34 }
 0x195   : > { %v938_v41 = vmul.f32 0.01, %v874_v40  ;;  %vm906_vm14 = vcmp.gt.f32.partialorder %v874_v40, 0.0  ;;  %5836 = vpow2.f32 %v1215_v46  ;;  %v1097_v38 = vpop.f32.mrf.mxu0 }
 0x196   : > { %v1494_v37 = vsel %vm625_vm3, %v6619_v35, 0.0  ;;  %v6625_v42 = vadd.f32 %v6471_v28, %v1097_v38  ;;  %v1223_v17 = vmul.f32 1.442695, %v6619_v35 }
 0x197   : > { %v970_v26 = vsel %vm906_vm14, %v874_v40, %v938_v41 }
 0x198   : > { %v1193_v27 = vmul.f32 1.442695, %v6625_v42  ;;  %v1449_v58 = vsel %vm625_vm3, %v6625_v42, 0.0 }
 0x199   : > { %5455 = vmatmul.msk.f32.gmra.mxu2 %vm983_vm5, %v970_v26 }
 0x19a   : > { %5838 = vpow2.f32 %v1193_v27  ;;  %v6645_v0 = vpop.xlane.xlu1 %1453 }
 0x19b   : > { %v5837_v39 = vpop.eup %5836  ;;  %v1145_v43 = vpop.f32.mrf.mxu2  ;;  %9754 = vst [vmem:[#allocation2_spill] sm:$0xff] %v6645_v0  ;;  %v7053_v0 = vld [vmem:[%s6279_s15 + $0x38] sm:$0xff] }
 0x19c   : > { %v6629_v47 = vadd.f32 %v6471_v28, %v1145_v43  ;;  %v6072_v43 = vld [vmem:[%s6285_s18 + $0x30] sm:$0xff] }
 0x19e   : > { %v1225_v48 = vmul.f32 1.442695, %v6629_v47  ;;  %v1497_v20 = vsel %vm625_vm3, %v6629_v47, 0.0 }
 0x1a0   : > { %v5839_v51 = vpop.eup %5838  ;;  %5840 = vpow2.f32 %v1225_v48 }
 0x1a1   : > { %5842 = vpow2.f32 %v1217_v54  ;;  %v1292_v21 = vpop.permute.xlu0 %1291  ;;  %v6073_v54 = vld [vmem:[%s6285_s18 + $0x10] sm:$0xff] }
 0x1a2   : > { %5844 = vpow2.f32 %v1221_v4  ;;  %v1386_v40 = vmul.f32 %v6071_v24, %v1292_v21 }
 0x1a3   : > { %v1148_v57 = vpop.f32.mrf.mxu2 }
 0x1a4   : > { %v6672_v22 = vadd.f32 %v6471_v28, %v1148_v57 }
 0x1a6   : > { %v1227_v41 = vmul.f32 1.442695, %v6672_v22  ;;  %v1500_v38 = vsel %vm625_vm3, %v6672_v22, 0.0 }
 0x1a7   : > { %1486 = vadd.xlane.f32.xlu0 %v1485_v53  ;;  %v5841_v53 = vpop.eup %5840 }
 0x1a8   : > { %1305 = vrot.lane.b32.xlu2 %v5831_v55, %s6210_s21  ;;  %v5843_v55 = vpop.eup %5842 }
 0x1a9   : > { %v5845_v8 = vpop.eup %5844 }
 0x1aa   : > { %v6686_v30 = vpop.xlane.xlu2 %1459 }
 0x1ab   : > { %v1151_v61 = vpop.f32.mrf.mxu2  ;;  %9755 = vst [vmem:[#allocation3_spill] sm:$0xff] %v6686_v30 }
 0x1ac   : > { %v6648_v1 = vadd.f32 %v6471_v28, %v1151_v61  ;;  %v6074_v61 = vld [vmem:[%s6285_s18 + $0x28] sm:$0xff] }
 0x1ae   : > { %v1503_v6 = vsel %vm625_vm3, %v6648_v1, 0.0 }
 0x1b2   : > { %v1294_v7 = vpop.permute.xlu1 %1293 }
 0x1b5   : > { %1477 = vadd.xlane.f32.xlu1 %v1476_v10  ;;  %v1154_v10 = vpop.f32.mrf.mxu2 }
 0x1b6   : > { %v6655_v11 = vadd.f32 %v6471_v28, %v1154_v10 }
 0x1b8   : > { %v1231_v14 = vmul.f32 1.442695, %v6655_v11 }
 0x1ba   : > { %v1296_v9 = vpop.permute.xlu1 %1295  ;;  %5846 = vpow2.f32 %v1231_v14 }
 0x1bb   : > { %1315 = vrot.lane.b32.xlu0 %v5833_v13, %s6210_s21  ;;  %v1388_v33 = vmul.f32 %v6070_v12, %v1296_v9  ;;  %v1491_v13 = vsel %vm625_vm3, %v6643_v59, 0.0  ;;  %5848 = vpow2.f32 %v1223_v17 }
 0x1bc   : > { %5850 = vpow2.f32 %v1227_v41 }
 0x1bd   : > { %v6662_v15 = vadd.f32 %v1388_v33, %v6491_v52  ;;  %v1157_v52 = vpop.f32.mrf.mxu2 }
 0x1be   : > { %v6675_v23 = vadd.f32 %v6471_v28, %v1157_v52 }
 0x1c0   : > { %v5847_v16 = vpop.eup %5846  ;;  %v1509_v26 = vsel %vm625_vm3, %v6675_v23, 0.0  ;;  %v1233_v21 = vmul.f32 1.442695, %v6675_v23 }
 0x1c1   : > { %v5849_v18 = vpop.eup %5848 }
 0x1cc   : > { %v6728_v33 = vpop.xlane.xlu0 %1456 }
 0x1cd   : > { %9760 = vst [vmem:[#allocation8_spill] sm:$0xff] %v6728_v33  ;;  %v7033_v33 = vld [vmem:[%s6279_s15 + $0x30] sm:$0xff] }
 0x1ce   : > { %1307 = vrot.lane.b32.xlu1 %v5835_v25, %s6210_s21  ;;  %v6682_v25 = vadd.f32 %v1386_v40, %v6475_v32 }
 0x1d1   : > { %1480 = vadd.xlane.f32.xlu2 %v1479_v29  ;;  %v1160_v29 = vpop.f32.mrf.mxu2 }
 0x1d2   : > { %v6689_v34 = vadd.f32 %v6471_v28, %v1160_v29 }
 0x1d4   : > { %v1512_v46 = vsel %vm625_vm3, %v6689_v34, 0.0  ;;  %v6746_v40 = vpop.xlane.xlu0 %1465 }
 0x1d5   : > { %9762 = vst [vmem:[#allocation10_spill] sm:$0xff] %v6746_v40 }
 0x1d9   : > { %v1163_v10 = vpop.f32.mrf.mxu2 }
 0x1e5   : > { %1495 = vadd.xlane.f32.xlu0 %v1494_v37  ;;  %v5851_v37 = vpop.eup %5850  ;;  %v6694_v32 = vpop.xlane.xlu1 %1462 }
 0x1e6   : > { %9756 = vst [vmem:[#allocation4_spill] sm:$0xff] %v6694_v32  ;;  %v6995_v32 = vld [vmem:[%s6279_s15 + $0x18] sm:$0xff] }
 0x1e9   : > { %1311 = vrot.lane.b32.xlu2 %v5837_v39, %s6210_s21  ;;  %v1298_v39 = vpop.permute.xlu2 %1297 }
 0x1f8   : > { %1483 = vadd.xlane.f32.xlu1 %v1482_v50  ;;  %v1300_v50 = vpop.permute.xlu2 %1299 }
 0x1f9   : > { %1289 = vrot.lane.b32.xlu0 %v5839_v51, %s6210_s21  ;;  %v1390_v4 = vmul.f32 %v6074_v61, %v1300_v50  ;;  %v6078_v50 = vld [vmem:[%s6285_s18 + $0x48] sm:$0xff] }
 0x1fd   : > { %v1302_v27 = vpop.permute.xlu1 %1301 }
 0x1fe   : > { %v1391_v48 = vmul.f32 %v6072_v43, %v1302_v27 }
 0x200   : > { %v6700_v51 = vadd.f32 %v1391_v48, %v6553_v62 }
 0x201   : > { %1321 = vrot.lane.b32.xlu0 %v5841_v53, %s6210_s21  ;;  %v6704_v53 = vpop.xlane.xlu2 %1468 }
 0x202   : > { %9757 = vst [vmem:[#allocation5_spill] sm:$0xff] %v6704_v53 }
 0x211   : > { %1313 = vrot.lane.b32.xlu1 %v5843_v55, %s6210_s21  ;;  %v1387_v55 = vmul.f32 %v6073_v54, %v1294_v7 }
 0x212   : > { %1489 = vadd.xlane.f32.xlu2 %v1488_v56  ;;  %v1229_v56 = vmul.f32 1.442695, %v6648_v1 }
 0x213   : > { %v6709_v57 = vadd.f32 %v1387_v55, %v6486_v45  ;;  %v1235_v45 = vmul.f32 1.442695, %v6689_v34 }
 0x214   : > { %5852 = vpow2.f32 %v1229_v56 }
 0x215   : > { %5854 = vpow2.f32 %v1235_v45 }
 0x216   : > { %5856 = vpow2.f32 %v1233_v21 }
 0x21a   : > { %1450 = vadd.xlane.f32.xlu2 %v1449_v58  ;;  %v6713_v58 = vpop.xlane.xlu2 %1471  ;;  %v5853_v62 = vpop.eup %5852 }
 0x21b   : > { %9758 = vst [vmem:[#allocation6_spill] sm:$0xff] %v6713_v58  ;;  %v5855_v9 = vpop.eup %5854  ;;  %v6092_v58 = vld [vmem:[%s6285_s18 + $0x70] sm:$0xff] }
 0x21c   : > { %v5857_v29 = vpop.eup %5856 }
 0x222   : > { %v6719_v7 = vpop.xlane.xlu2 %1474 }
 0x223   : > { %9759 = vst [vmem:[#allocation7_spill] sm:$0xff] %v6719_v7 }
 0x22a   : > { %v1306_v12 = vpop.permute.xlu2 %1305 }
 0x22b   : > { %1504 = vadd.xlane.f32.xlu0 %v1503_v6  ;;  %v1506_v6 = vsel %vm625_vm3, %v6655_v11, 0.0 }
 0x232   : > { %1317 = vrot.lane.b32.xlu2 %v5845_v8, %s6210_s21  ;;  %v6723_v8 = vadd.f32 %v1390_v4, %v6513_v5  ;;  %v1166_v5 = vpop.f32.mrf.mxu2 }
 0x23b   : > { %1492 = vadd.xlane.f32.xlu1 %v1491_v13  ;;  %v6075_v13 = vld [vmem:[%s6285_s18 + $0x40] sm:$0xff] }
 0x23c   : > { %v1393_v14 = vmul.f32 %v6075_v13, %v1306_v12 }
 0x23e   : > { %v6735_v17 = vadd.f32 %v1393_v14, %v6567_v19  ;;  %v1169_v19 = vpop.f32.mrf.mxu2 }
 0x23f   : > { %1735 = vrot.lane.b32.xlu0 %v6662_v15, %s6211_s22 }
 0x240   : > { %9761 = vst [vmem:[#allocation9_spill] sm:$0xff] %v6735_v17 }
 0x247   : > { %1327 = vrot.lane.b32.xlu0 %v5847_v16, %s6210_s21  ;;  %v6732_v16 = vadd.f32 %v6471_v28, %v1163_v10 }
 0x249   : > { %v1515_v52 = vsel %vm625_vm3, %v6732_v16, 0.0  ;;  %v1237_v41 = vmul.f32 1.442695, %v6732_v16 }
 0x24b   : > { %5858 = vpow2.f32 %v1237_v41 }
 0x254   : > { %1319 = vrot.lane.b32.xlu1 %v5849_v18, %s6210_s21  ;;  %v6076_v18 = vld [vmem:[%s6285_s18 + $0x20] sm:$0xff] }
 0x25b   : > { %1498 = vadd.xlane.f32.xlu2 %v1497_v20  ;;  %v1389_v20 = vmul.f32 %v6076_v18, %v1298_v39  ;;  %v5859_v39 = vpop.eup %5858  ;;  %v6079_v18 = vld [vmem:[%s6285_s18 + $0x58] sm:$0xff] }
 0x25d   : > { %v6744_v24 = vadd.f32 %v1389_v20, %v6503_v63 }
 0x271   : > { %1510 = vadd.xlane.f32.xlu0 %v1509_v26  ;;  %v6751_v26 = vpop.xlane.xlu1 %1477 }
 0x272   : > { %9763 = vst [vmem:[#allocation11_spill] sm:$0xff] %v6751_v26 }
 0x273   : > { %1731 = vrot.lane.b32.xlu2 %v6682_v25, %s6211_s22 }
 0x279   : > { %1513 = vadd.xlane.f32.xlu0 %v1512_v46  ;;  %v1304_v46 = vpop.permute.xlu0 %1303  ;;  %v1308_v43 = vpop.permute.xlu1 %1307 }
 0x27a   : > { %v1394_v54 = vmul.f32 %v6078_v50, %v1308_v43 }
 0x27b   : > { %1323 = vrot.lane.b32.xlu2 %v5851_v37, %s6210_s21  ;;  %v6077_v37 = vld [vmem:[%s6285_s18 + $0x38] sm:$0xff] }
 0x27c   : > { %v1392_v63 = vmul.f32 %v6077_v37, %v1304_v46  ;;  %v6767_v56 = vadd.f32 %v1394_v54, %v6596_v3  ;;  %v6781_v3 = vadd.f32 %v6471_v28, %v1166_v5  ;;  %v5532_v5 = vld [vmem:[%s9696_s5 + $0x78] sm:$0xff] }
 0x27d   : > { %2224 = vmatpush.msrb.mxu1 %v5532_v5  ;;  %v6837_v5 = vld [vmem:[%s6285_s18] sm:$0xff] }
 0x27e   : > { %1501 = vadd.xlane.f32.xlu1 %v1500_v38  ;;  %v1172_v38 = vpop.f32.mrf.mxu2  ;;  %v6756_v27 = vadd.f32 %v1392_v63, %v6537_v36  ;;  %9765 = vst [vmem:[#allocation13_spill] sm:$0xff] %v6767_v56  ;;  %v1518_v45 = vsel %vm625_vm3, %v6781_v3, 0.0 }
 0x27f   : > { %v6760_v48 = vadd.f32 %v6471_v28, %v1172_v38 }
 0x280   : > { %9764 = vst [vmem:[#allocation12_spill] sm:$0xff] %v6756_v27 }
 0x281   : > { %v1243_v55 = vmul.f32 1.442695, %v6760_v48  ;;  %v6785_v12 = vpop.permute.xlu0 %1309  ;;  %v6787_v14 = vpop.xlane.xlu1 %1483 }
 0x282   : > { %9767 = vst [vmem:[#allocation15_spill] sm:$0xff] %v6787_v14 }
 0x283   : > { %5860 = vpow2.f32 %v1243_v55 }
 0x286   : > { %v1175_v10 = vpop.f32.mrf.mxu2 }
 0x287   : > { %v6795_v21 = vadd.f32 %v6471_v28, %v1175_v10 }
 0x289   : > { %v5861_v36 = vpop.eup %5860  ;;  %v6800_v41 = vpop.xlane.xlu0 %1486  ;;  %v1527_v37 = vsel %vm625_vm3, %v6795_v21, 0.0 }
 0x28a   : > { %9769 = vst [vmem:[#allocation17_spill] sm:$0xff] %v6800_v41  ;;  %v1314_v46 = vpop.permute.xlu1 %1313 }
 0x28d   : > { %1741 = vrot.lane.b32.xlu0 %v6700_v51, %s6211_s22 }
 0x291   : > { %v6807_v63 = vpop.permute.xlu0 %1315 }
 0x297   : > { %1733 = vrot.lane.b32.xlu1 %v6709_v57, %s6211_s22 }
 0x299   : > { %v6812_v43 = vpop.xlane.xlu0 %1495 }
 0x29a   : > { %9771 = vst [vmem:[#allocation19_spill] sm:$0xff] %v6812_v43 }
 0x29f   : > { %1325 = vrot.lane.b32.xlu1 %v5853_v62, %s6210_s21  ;;  %v6773_v62 = vadd.f32 %v6471_v28, %v1169_v19 }
 0x2a1   : > { %v1521_v61 = vsel %vm625_vm3, %v6773_v62, 0.0  ;;  %v1241_v4 = vmul.f32 1.442695, %v6773_v62  ;;  %v1290_v10 = vpop.permute.xlu0 %1289 }
 0x2a3   : > { %5862 = vpow2.f32 %v1241_v4 }
 0x2a4   : > { %1507 = vadd.xlane.f32.xlu2 %v1506_v6  ;;  %v6778_v6 = vpop.xlane.xlu2 %1480 }
 0x2a5   : > { %9766 = vst [vmem:[#allocation14_spill] sm:$0xff] %v6778_v6 }
 0x2a7   : > { %1739 = vrot.lane.b32.xlu1 %v6723_v8, %s6211_s22 }
 0x2ac   : > { %v1312_v13 = vpop.permute.xlu2 %1311 }
 0x2ad   : > { %v1396_v20 = vmul.f32 %v6079_v18, %v1312_v13 }
 0x2af   : > { %1331 = vrot.lane.b32.xlu1 %v5855_v9, %s6210_s21  ;;  %v5863_v9 = vpop.eup %5862  ;;  %v6798_v19 = vadd.f32 %v1396_v20, %v6615_v31  ;;  %v6809_v31 = vpop.xlane.xlu1 %1492  ;;  %v5531_v20 = vld [vmem:[%s9696_s5 + $0x70] sm:$0xff] }
 0x2b0   : > { %9770 = vst [vmem:[#allocation18_spill] sm:$0xff] %v6809_v31  ;;  %2225 = vmatpush.msrb.mxu1 %v5531_v20 }
 0x2b1   : > { %9768 = vst [vmem:[#allocation16_spill] sm:$0xff] %v6798_v19 }
 0x2b7   : > { %1745 = vrot.lane.b32.xlu1 %v6735_v17, %s6211_s22  ;;  %1516 = vadd.xlane.f32.xlu0 %v1515_v52  ;;  %v1178_v52 = vpop.f32.mrf.mxu2 }
 0x2bc   : > { %1737 = vrot.lane.b32.xlu2 %v6744_v24, %s6211_s22 }
 0x2bf   : > { %v1181_v38 = vpop.f32.mrf.mxu2 }
 0x2c0   : > { %v6815_v50 = vadd.f32 %v6471_v28, %v1181_v38 }
 0x2c2   : > { %v1249_v4 = vmul.f32 1.442695, %v6815_v50 }
 0x2c4   : > { %1329 = vrot.lane.b32.xlu2 %v5857_v29, %s6210_s21  ;;  %v1239_v29 = vmul.f32 1.442695, %v6781_v3 }
 0x2c6   : > { %5864 = vpow2.f32 %v1239_v29  ;;  %v1320_v54 = vpop.permute.xlu1 %1319  ;;  %v1385_v29 = vmul.f32 %v6837_v5, %v1290_v10 }
 0x2c7   : > { %v6817_v55 = vpop.f32.mrf.mxu2  ;;  %5866 = vpow2.f32 %v1249_v4  ;;  %v6082_v4 = vld [vmem:[%s6285_s18 + $0x78] sm:$0xff] }
 0x2c8   : > { %v6846_v38 = vadd.f32 %v1385_v29, %v6625_v42  ;;  %v1400_v10 = vmul.f32 %v6082_v4, %v1320_v54  ;;  %v1524_v54 = vsel %vm625_vm3, %v6760_v48, 0.0 }
 0x2ca   : > { %v6860_v20 = vadd.f32 %v1400_v10, %v6619_v35  ;;  %v6083_v35 = vld [vmem:[%s6285_s18 + $0x90] sm:$0xff] }
 0x2cb   : > { %1333 = vrot.lane.b32.xlu0 %v5859_v39, %s6210_s21 }
 0x2cc   : > { %1743 = vrot.lane.b32.xlu2 %v6756_v27, %s6211_s22  ;;  %v5865_v39 = vpop.eup %5864  ;;  %9775 = vst [vmem:[#allocation23_spill] sm:$0xff] %v6860_v20 }
 0x2cd   : > { %v5867_v18 = vpop.eup %5866 }
 0x2cf   : > { %v6828_v13 = vpop.f32.mrf.mxu2 }
 0x2d3   : > { %1747 = vrot.lane.b32.xlu0 %v6767_v56, %s6211_s22 }
 0x2db   : > { %1339 = vrot.lane.b32.xlu0 %v5861_v36, %s6210_s21  ;;  %v6080_v36 = vld [vmem:[%s6285_s18 + $0x60] sm:$0xff] }
 0x2e1   : > { %1522 = vadd.xlane.f32.xlu1 %v1521_v61  ;;  %v1397_v61 = vmul.f32 %v6080_v36, %v1314_v46  ;;  %v6840_v46 = vpop.permute.xlu0 %1321 }
 0x2f5   : > { %1519 = vadd.xlane.f32.xlu2 %v1518_v45  ;;  %v6822_v45 = vadd.f32 %v1397_v61, %v6582_v44  ;;  %v6853_v61 = vpop.xlane.xlu0 %1504 }
 0x2f6   : > { %9774 = vst [vmem:[#allocation22_spill] sm:$0xff] %v6853_v61 }
 0x2f7   : > { %9772 = vst [vmem:[#allocation20_spill] sm:$0xff] %v6822_v45 }
 0x2fa   : > { %1337 = vrot.lane.b32.xlu1 %v5863_v9, %s6210_s21  ;;  %v6826_v9 = vpop.xlane.xlu1 %1501 }
 0x2fb   : > { %9773 = vst [vmem:[#allocation21_spill] sm:$0xff] %v6826_v9 }
 0x2fd   : > { %v6864_v29 = vpop.permute.xlu0 %1735 }
 0x302   : > { %1751 = vrot.lane.b32.xlu1 %v6798_v19, %s6211_s22 }
 0x305   : > { %1528 = vadd.xlane.f32.xlu0 %v1527_v37  ;;  %v6843_v37 = vadd.f32 %v6471_v28, %v1178_v52  ;;  %v6873_v43 = vpop.permute.xlu0 %1327 }
 0x309   : > { %v6834_v44 = vpop.permute.xlu1 %1733 }
 0x30d   : > { %1335 = vrot.lane.b32.xlu2 %v5865_v39, %s6210_s21  ;;  %v1190_v39 = vpop.f32.mrf.mxu2 }
 0x30e   : > { %v6851_v36 = vadd.f32 %v6471_v28, %v1190_v39 }
 0x310   : > { %v1255_v42 = vmul.f32 1.442695, %v6851_v36 }
 0x311   : > { %v1326_v52 = vpop.permute.xlu1 %1325 }
 0x312   : > { %5868 = vpow2.f32 %v1255_v42  ;;  %v1403_v10 = vmul.f32 %v6083_v35, %v1326_v52  ;;  %v5530_v42 = vld [vmem:[%s9696_s5 + $0x68] sm:$0xff]  ;;  %v6884_v52 = vpop.xlane.xlu0 %1510  ;;  %v6085_v35 = vld [vmem:[%s6285_s18 + $0x50] sm:$0xff] }
 0x313   : > { %2226 = vmatpush.msrb.mxu1 %v5530_v42  ;;  %9777 = vst [vmem:[#allocation25_spill] sm:$0xff] %v6884_v52 }
 0x314   : > { %v6879_v9 = vadd.f32 %v1403_v10, %v6648_v1  ;;  %v1395_v1 = vmul.f32 %v6085_v35, %v6785_v12  ;;  %v1245_v10 = vmul.f32 1.442695, %v6795_v21  ;;  %v6914_v35 = vpop.xlane.xlu2 %1489 }
 0x315   : > { %9781 = vst [vmem:[#allocation29_spill] sm:$0xff] %v6914_v35 }
 0x316   : > { %9776 = vst [vmem:[#allocation24_spill] sm:$0xff] %v6879_v9  ;;  %v6896_v42 = vadd.f32 %v1395_v1, %v6543_v49  ;;  %v5529_v49 = vld [vmem:[%s9696_s5 + $0x60] sm:$0xff] }
 0x317   : > { %2227 = vmatpush.msrb.mxu1 %v5529_v49 }
 0x318   : > { %v5869_v4 = vpop.eup %5868  ;;  %9779 = vst [vmem:[#allocation27_spill] sm:$0xff] %v6896_v42 }
 0x319   : > { %1753 = vrot.lane.b32.xlu0 %v6822_v45, %s6211_s22  ;;  %v6868_v39 = vpop.permute.xlu1 %1739 }
 0x321   : > { %1345 = vrot.lane.b32.xlu0 %v5867_v18, %s6210_s21  ;;  %v1530_v18 = vsel %vm625_vm3, %v6843_v37, 0.0 }
 0x329   : > { %1729 = vrot.lane.b32.xlu0 %v6846_v38, %s6211_s22 }
 0x32c   : > { %1531 = vadd.xlane.f32.xlu1 %v1530_v18  ;;  %v1247_v18 = vmul.f32 1.442695, %v6843_v37 }
 0x32e   : > { %5870 = vpow2.f32 %v1247_v18 }
 0x32f   : > { %5872 = vpow2.f32 %v1245_v10 }
 0x331   : > { %1759 = vrot.lane.b32.xlu0 %v6860_v20, %s6211_s22 }
 0x334   : > { %v5871_v41 = vpop.eup %5870 }
 0x336   : > { %1525 = vadd.xlane.f32.xlu2 %v1524_v54  ;;  %v1332_v54 = vpop.permute.xlu1 %1331 }
 0x339   : > { %1351 = vrot.lane.b32.xlu0 %v5869_v4, %s6210_s21  ;;  %v6084_v4 = vld [vmem:[%s6285_s18 + $0xa8] sm:$0xff] }
 0x33a   : > { %v1406_v31 = vmul.f32 %v6084_v4, %v1332_v54  ;;  %v6900_v54 = vpop.xlane.xlu0 %1513 }
 0x33b   : > { %9780 = vst [vmem:[#allocation28_spill] sm:$0xff] %v6900_v54 }
 0x33c   : > { %v6888_v18 = vadd.f32 %v1406_v31, %v6689_v34  ;;  %v6905_v34 = vadd.f32 %v6471_v28, %v6817_v55  ;;  %v6086_v31 = vld [vmem:[%s6285_s18 + $0x68] sm:$0xff]  ;;  %v6926_v55 = vpop.xlane.xlu2 %1450 }
 0x33d   : > { %v1398_v4 = vmul.f32 %v6086_v31, %v6807_v63  ;;  %9783 = vst [vmem:[#allocation31_spill] sm:$0xff] %v6926_v55 }
 0x33e   : > { %9778 = vst [vmem:[#allocation26_spill] sm:$0xff] %v6888_v18  ;;  %v1251_v1 = vmul.f32 1.442695, %v6905_v34  ;;  %v6920_v28 = vpop.permute.xlu1 %1745 }
 0x33f   : > { %v6918_v10 = vadd.f32 %v1398_v4, %v6591_v60  ;;  %v6087_v4 = vld [vmem:[%s6285_s18 + $0xc0] sm:$0xff] }
 0x340   : > { %5874 = vpow2.f32 %v1251_v1  ;;  %v1533_v1 = vsel %vm625_vm3, %v6815_v50, 0.0 }
 0x341   : > { %1765 = vrot.lane.b32.xlu0 %v6879_v9, %s6211_s22 }
 0x342   : > { %v6907_v12 = vpop.permute.xlu0 %1741 }
 0x344   : > { %v1318_v35 = vpop.permute.xlu2 %1317 }
 0x345   : > { %1343 = vrot.lane.b32.xlu1 %v5871_v41, %s6210_s21  ;;  %v5873_v41 = vpop.eup %5872  ;;  %v1399_v53 = vmul.f32 %v6092_v58, %v1318_v35 }
 0x346   : > { %v5875_v31 = vpop.eup %5874 }
 0x347   : > { %v6990_v40 = vadd.f32 %v1399_v53, %v6643_v59  ;;  %v6094_v59 = vld [vmem:[%s6285_s18 + $0xe0] sm:$0xff] }
 0x349   : > { %1771 = vrot.lane.b32.xlu0 %v6888_v18, %s6211_s22  ;;  %9788 = vst [vmem:[#allocation36_spill] sm:$0xff] %v6990_v40 }
 0x34a   : > { %v6924_v63 = vpop.xlane.xlu0 %1516 }
 0x34b   : > { %9782 = vst [vmem:[#allocation30_spill] sm:$0xff] %v6924_v63 }
 0x34e   : > { %1749 = vrot.lane.b32.xlu2 %v6896_v42, %s6211_s22 }
 0x352   : > { %v6931_v49 = vpop.permute.xlu0 %1333 }
 0x356   : > { %1341 = vrot.lane.b32.xlu2 %v5873_v41, %s6210_s21  ;;  %v6928_v41 = vpop.xlane.xlu1 %1522 }
 0x357   : > { %9784 = vst [vmem:[#allocation32_spill] sm:$0xff] %v6928_v41  ;;  %v6973_v41 = vld [vmem:[%s6279_s15 + $0x10] sm:$0xff] }
 0x35a   : > { %v6939_v6 = vpop.permute.xlu0 %1747 }
 0x35e   : > { %1755 = vrot.lane.b32.xlu2 %v6918_v10, %s6211_s22 }
 0x366   : > { %1347 = vrot.lane.b32.xlu2 %v5875_v31, %s6210_s21  ;;  %v5457_v31 = vld [vmem:[%s9694_s3 + $0x8] sm:$0x3f] }
 0x367   : > { %5458 = vmatpush.msk.msra.mxu3 %vm508_vm0, %v5457_v31  ;;  %v6963_v31 = vld [vmem:[%s6279_s15 + $0x8] sm:$0xff] }
 0x36c   : > { %v1338_v60 = vpop.permute.xlu1 %1337 }
 0x36d   : > { %v1409_v52 = vmul.f32 %v6087_v4, %v1338_v60  ;;  %v6947_v60 = vpop.xlane.xlu2 %1498  ;;  %v1536_v4 = vsel %vm625_vm3, %v6905_v34, 0.0 }
 0x36e   : > { %9786 = vst [vmem:[#allocation34_spill] sm:$0xff] %v6947_v60  ;;  %v5528_v60 = vld [vmem:[%s9696_s5 + $0x58] sm:$0xff] }
 0x36f   : > { %v6937_v14 = vadd.f32 %v1409_v52, %v6773_v62  ;;  %1534 = vadd.xlane.f32.xlu1 %v1533_v1  ;;  %v5456_v62 = vld [vmem:[%s9693_s2 + $0x2] sm:$0x3]  ;;  %v6960_v1 = vpop.permute.xlu0 %1339  ;;  %2228 = vmatpush.msrb.mxu1 %v5528_v60 }
 0x370   : > { %v6955_v52 = vld [vmem:[%s6279_s15] sm:$0xff]  ;;  %5491 = vmatpush.msk.msra.mxu0 %vm722_vm1, %v5456_v62 }
 0x371   : > { %9785 = vst [vmem:[#allocation33_spill] sm:$0xff] %v6937_v14  ;;  %1777 = vrot.lane.b32.xlu0 %v6937_v14, %s6211_s22  ;;  %5459 = vmatmul.msk.f32.vlgmr.msra.gmra.mxu3 %vm411_vm2, %v6955_v52 }
 0x375   : > { %v1732_v26 = vpop.permute.xlu2 %1731 }
 0x377   : > { %1537 = vadd.xlane.f32.xlu1 %v1536_v4  ;;  %v6091_v4 = vld [vmem:[%s9697_s6] ss:$0 sm:$0xff] }
 0x378   : > { %v6970_v7 = vpop.xlane.xlu0 %1528  ;;  %v6981_v62 = vadd.f32 %v6091_v4, %v6828_v13  ;;  %v7008_v4 = vld [vmem:[%s6279_s15 + $0x20] sm:$0xff] }
 0x379   : > { %5460 = vmatmul.msk.f32.gmra.mxu3 %vm411_vm2, %v6963_v31  ;;  %9787 = vst [vmem:[#allocation35_spill] sm:$0xff] %v6970_v7 }
 0x37a   : > { %v1253_v7 = vmul.f32 1.442695, %v6981_v62  ;;  %v1539_v54 = vsel %vm625_vm3, %v6981_v62, 0.0 }
 0x37c   : > { %5876 = vpow2.f32 %v1253_v7 }
 0x37d   : > { %v6984_v63 = vpop.permute.xlu2 %1323 }
 0x381   : > { %5461 = vmatmul.msk.f32.gmra.mxu3 %vm411_vm2, %v6973_v41 }
 0x385   : > { %v7001_v58 = vpop.xlane.xlu2 %1507 }
 0x386   : > { %9789 = vst [vmem:[#allocation37_spill] sm:$0xff] %v7001_v58 }
 0x389   : > { %5462 = vmatmul.msk.f32.gmra.mxu3 %vm411_vm2, %v6995_v32 }
 0x38b   : > { %v6986_v60 = vpop.permute.xlu0 %1753 }
 0x38d   : > { %v1738_v58 = vpop.permute.xlu2 %1737 }
 0x38f   : > { %1540 = vadd.xlane.f32.xlu2 %v1539_v54  ;;  %v5877_v54 = vpop.eup %5876 }
 0x390   : > { %1757 = vrot.lane.b32.xlu1 %v6990_v40, %s6211_s22 }
 0x391   : > { %5463 = vmatmul.msk.f32.gmra.mxu3 %vm411_vm2, %v7008_v4 }
 0x393   : > { %v1346_v13 = vpop.permute.xlu0 %1345 }
 0x394   : > { %v1413_v53 = vmul.f32 %v6094_v59, %v1346_v13  ;;  %v7017_v13 = vld [vmem:[%s6279_s15 + $0x28] sm:$0xff]  ;;  %v6097_v59 = vld [vmem:[%s6285_s18 + $0x80] sm:$0xff] }
 0x395   : > { %v1330_v30 = vpop.permute.xlu2 %1329 }
 0x396   : > { %v7005_v35 = vadd.f32 %v1413_v53, %v6815_v50  ;;  %v5527_v50 = vld [vmem:[%s9696_s5 + $0x50] sm:$0xff]  ;;  %v1401_v53 = vmul.f32 %v6097_v59, %v6840_v46 }
 0x397   : > { %2229 = vmatpush.msrb.mxu1 %v5527_v50  ;;  %v6099_v50 = vld [vmem:[%s6285_s18 + $0x98] sm:$0xff] }
 0x398   : > { %9790 = vst [vmem:[#allocation38_spill] sm:$0xff] %v7005_v35  ;;  %1349 = vrot.lane.b32.xlu1 %v5877_v54, %s6210_s21  ;;  %1785 = vrot.lane.b32.xlu0 %v7005_v35, %s6211_s22  ;;  %v1404_v46 = vmul.f32 %v6099_v50, %v6873_v43  ;;  %v7232_v35 = vld [vmem:[%s6279_s15 + $0xa8] sm:$0xff] }
 0x399   : > { %5464 = vmatmul.msk.f32.gmra.mxu3 %vm411_vm2, %v7017_v13 }
 0x39b   : > { %v1730_v7 = vpop.permute.xlu0 %1729 }
 0x39c   : > { %5492 = vmatmul.msk.f32.vlgmr.msra.gmra.mxu0 %vm625_vm3, %v1730_v7  ;;  %v7030_v7 = vadd.f32 %v1401_v53, %v6629_v47  ;;  %v7045_v47 = vadd.f32 %v1404_v46, %v6655_v11  ;;  %v7047_v53 = vpop.permute.xlu1 %1751  ;;  %v6101_v11 = vld [vmem:[%s6285_s18 + $0xb0] sm:$0xff]  ;;  %v7071_v46 = vld [vmem:[%s6279_s15 + $0x40] sm:$0xff] }
 0x39d   : > { %v1407_v43 = vmul.f32 %v6101_v11, %v6931_v49  ;;  %v6103_v49 = vld [vmem:[%s6285_s18 + $0xc8] sm:$0xff] }
 0x39e   : > { %9791 = vst [vmem:[#allocation39_spill] sm:$0xff] %v7030_v7 }
 0x39f   : > { %9792 = vst [vmem:[#allocation40_spill] sm:$0xff] %v7045_v47 }
 0x3a1   : > { %5465 = vmatmul.msk.f32.gmra.mxu3 %vm411_vm2, %v7033_v33 }
 0x3a3   : > { %v7026_v54 = vpop.permute.xlu0 %1759 }
 0x3a4   : > { %5493 = vmatmul.msk.f32.gmra.mxu0 %vm625_vm3, %v1732_v26  ;;  %v7068_v50 = vpop.xlane.xlu1 %1531 }
 0x3a5   : > { %9795 = vst [vmem:[#allocation43_spill] sm:$0xff] %v7068_v50 }
 0x3a7   : > { %1761 = vrot.lane.b32.xlu2 %v7030_v7, %s6211_s22 }
 0x3a9   : > { %5466 = vmatmul.msk.f32.gmra.mxu3 %vm411_vm2, %v7053_v0 }
 0x3ab   : > { %v1352_v59 = vpop.permute.xlu0 %1351 }
 0x3ac   : > { %v1416_v26 = vmul.f32 %v1352_v59, %v6507_v2  ;;  %5494 = vmatmul.msk.f32.gmra.mxu0 %vm625_vm3, %v6834_v44  ;;  %v1744_v2 = vpop.permute.xlu2 %1743  ;;  %v7066_v44 = vadd.f32 %v1407_v43, %v6732_v16  ;;  %v5526_v16 = vld [vmem:[%s9696_s5 + $0x48] sm:$0xff] }
 0x3ad   : > { %2230 = vmatpush.msrb.mxu1 %v5526_v16  ;;  %v7089_v43 = vld [vmem:[%s6279_s15 + $0x48] sm:$0xff]  ;;  %v7104_v16 = vld [vmem:[%s6279_s15 + $0x50] sm:$0xff] }
 0x3ae   : > { %v7050_v61 = vadd.f32 %v1416_v26, %v6851_v36  ;;  %9794 = vst [vmem:[#allocation42_spill] sm:$0xff] %v7066_v44  ;;  %v1410_v26 = vmul.f32 %v6103_v49, %v6960_v1  ;;  %v6105_v1 = vld [vmem:[%s6285_s18 + $0xd8] sm:$0xff]  ;;  %v1542_v49 = vsel %vm625_vm3, %v6851_v36, 0.0 }
 0x3af   : > { %1767 = vrot.lane.b32.xlu2 %v7045_v47, %s6211_s22  ;;  %v7115_v36 = vld [vmem:[%s6279_s15 + $0x58] sm:$0xff] }
 0x3b0   : > { %9793 = vst [vmem:[#allocation41_spill] sm:$0xff] %v7050_v61  ;;  %1791 = vrot.lane.b32.xlu0 %v7050_v61, %s6211_s22 }
 0x3b1   : > { %5467 = vmatmul.msk.f32.gmra.mxu3 %vm411_vm2, %v7071_v46 }
 0x3b4   : > { %5495 = vmatmul.msk.f32.gmra.mxu0 %vm625_vm3, %v6864_v29  ;;  %v7077_v59 = vpop.xlane.xlu2 %1519  ;;  %v7086_v29 = vadd.f32 %v1410_v26, %v6760_v48 }
 0x3b5   : > { %9796 = vst [vmem:[#allocation44_spill] sm:$0xff] %v7077_v59  ;;  %v7139_v59 = vld [vmem:[%s6279_s15 + $0x68] sm:$0xff] }
 0x3b6   : > { %9797 = vst [vmem:[#allocation45_spill] sm:$0xff] %v7086_v29 }
 0x3b7   : > { %1773 = vrot.lane.b32.xlu2 %v7066_v44, %s6211_s22  ;;  %v1344_v11 = vpop.permute.xlu1 %1343 }
 0x3b9   : > { %5468 = vmatmul.msk.f32.gmra.mxu3 %vm411_vm2, %v7089_v43 }
 0x3bc   : > { %5496 = vmatmul.msk.f32.gmra.mxu0 %vm625_vm3, %v1738_v58  ;;  %v1412_v58 = vmul.f32 %v6105_v1, %v1344_v11  ;;  %v1336_v48 = vpop.permute.xlu2 %1335 }
 0x3be   : > { %v7101_v26 = vadd.f32 %v1412_v58, %v6843_v37  ;;  %v7123_v58 = vld [vmem:[%s6279_s15 + $0x60] sm:$0xff] }
 0x3bf   : > { %1779 = vrot.lane.b32.xlu2 %v7086_v29, %s6211_s22 }
 0x3c0   : > { %9798 = vst [vmem:[#allocation46_spill] sm:$0xff] %v7101_v26 }
 0x3c1   : > { %5469 = vmatmul.msk.f32.gmra.mxu3 %vm411_vm2, %v7104_v16 }
 0x3c2   : > { %1543 = vadd.xlane.f32.xlu1 %v1542_v49 }
 0x3c4   : > { %5497 = vmatmul.msk.f32.gmra.mxu0 %vm625_vm3, %v6868_v39  ;;  %v7110_v11 = vpop.xlane.xlu2 %1525  ;;  %v6108_v39 = vld [vmem:[%s6285_s18 + $0x88] sm:$0xff] }
 0x3c5   : > { %9799 = vst [vmem:[#allocation47_spill] sm:$0xff] %v7110_v11  ;;  %v1402_v1 = vmul.f32 %v6108_v39, %v6984_v63  ;;  %v5525_v63 = vld [vmem:[%s9696_s5 + $0x40] sm:$0xff]  ;;  %v7209_v11 = vld [vmem:[%s6279_s15 + $0x98] sm:$0xff] }
 0x3c6   : > { %2231 = vmatpush.msrb.mxu1 %v5525_v63 }
 0x3c7   : > { %1783 = vrot.lane.b32.xlu2 %v7101_v26, %s6211_s22 }
 0x3c9   : > { %5470 = vmatmul.msk.f32.gmra.mxu3 %vm411_vm2, %v7115_v36 }
 0x3cc   : > { %5498 = vmatmul.msk.f32.gmra.mxu0 %vm625_vm3, %v6907_v12  ;;  %v1750_v37 = vpop.permute.xlu2 %1749  ;;  %v7128_v12 = vadd.f32 %v1402_v1, %v6672_v22  ;;  %v7152_v1 = vld [vmem:[%s6279_s15 + $0x70] sm:$0xff] }
 0x3ce   : > { %9800 = vst [vmem:[#allocation48_spill] sm:$0xff] %v7128_v12 }
 0x3d1   : > { %5471 = vmatmul.msk.f32.gmra.mxu3 %vm411_vm2, %v7123_v58 }
 0x3d4   : > { %5499 = vmatmul.msk.f32.gmra.mxu0 %vm625_vm3, %v1744_v2  ;;  %v6110_v2 = vld [vmem:[%s6285_s18 + $0xa0] sm:$0xff]  ;;  %v1342_v39 = vpop.permute.xlu2 %1341 }
 0x3d5   : > { %v1405_v49 = vmul.f32 %v6110_v2, %v1330_v30 }
 0x3d7   : > { %v7144_v22 = vadd.f32 %v1405_v49, %v6675_v23  ;;  %v6114_v23 = vld [vmem:[%s6285_s18 + $0xd0] sm:$0xff]  ;;  %v7164_v49 = vld [vmem:[%s6279_s15 + $0x78] sm:$0xff] }
 0x3d9   : > { %5472 = vmatmul.msk.f32.gmra.mxu3 %vm411_vm2, %v7139_v59  ;;  %9801 = vst [vmem:[#allocation49_spill] sm:$0xff] %v7144_v22 }
 0x3db   : > { %1763 = vrot.lane.b32.xlu1 %v7128_v12, %s6211_s22 }
 0x3dc   : > { %5500 = vmatmul.msk.f32.gmra.mxu0 %vm625_vm3, %v6920_v28  ;;  %v6112_v28 = vld [vmem:[%s6285_s18 + $0xb8] sm:$0xff]  ;;  %v1756_v63 = vpop.permute.xlu2 %1755 }
 0x3dd   : > { %v1408_v30 = vmul.f32 %v6112_v28, %v1336_v48 }
 0x3df   : > { %v7157_v2 = vadd.f32 %v1408_v30, %v6781_v3  ;;  %v7179_v30 = vld [vmem:[%s6279_s15 + $0x80] sm:$0xff] }
 0x3e1   : > { %5473 = vmatmul.msk.f32.gmra.mxu3 %vm411_vm2, %v7152_v1  ;;  %9802 = vst [vmem:[#allocation50_spill] sm:$0xff] %v7157_v2 }
 0x3e2   : > { %v7168_v48 = vpop.xlane.xlu1 %1534 }
 0x3e3   : > { %1769 = vrot.lane.b32.xlu1 %v7144_v22, %s6211_s22  ;;  %9803 = vst [vmem:[#allocation51_spill] sm:$0xff] %v7168_v48 }
 0x3e4   : > { %5501 = vmatmul.msk.f32.gmra.mxu0 %vm625_vm3, %v6939_v6  ;;  %v1411_v6 = vmul.f32 %v6114_v23, %v1342_v39  ;;  %v1348_v3 = vpop.permute.xlu2 %1347 }
 0x3e6   : > { %v7171_v28 = vadd.f32 %v1411_v6, %v6795_v21 }
 0x3e8   : > { %9804 = vst [vmem:[#allocation52_spill] sm:$0xff] %v7171_v28 }
 0x3e9   : > { %5474 = vmatmul.msk.f32.gmra.mxu3 %vm411_vm2, %v7164_v49 }
 0x3ea   : > { %v7186_v6 = vpop.xlane.xlu1 %1537 }
 0x3eb   : > { %1775 = vrot.lane.b32.xlu1 %v7157_v2, %s6211_s22  ;;  %9806 = vst [vmem:[#allocation54_spill] sm:$0xff] %v7186_v6  ;;  %v6120_v6 = vld [vmem:[%s6285_s18 + $0xf0] sm:$0xff] }
 0x3ec   : > { %5502 = vmatmul.msk.f32.gmra.mxu0 %vm625_vm3, %v1750_v37  ;;  %v6116_v37 = vld [vmem:[%s6285_s18 + $0xe8] sm:$0xff]  ;;  %v7239_v2 = vld [vmem:[%s6279_s15 + $0xb0] sm:$0xff] }
 0x3ed   : > { %v1414_v39 = vmul.f32 %v6116_v37, %v1348_v3 }
 0x3ef   : > { %v7184_v23 = vadd.f32 %v1414_v39, %v6905_v34  ;;  %v7199_v34 = vld [vmem:[%s6279_s15 + $0x90] sm:$0xff] }
 0x3f1   : > { %5475 = vmatmul.msk.f32.gmra.mxu3 %vm411_vm2, %v7179_v30  ;;  %9805 = vst [vmem:[#allocation53_spill] sm:$0xff] %v7184_v23 }
 0x3f3   : > { %1781 = vrot.lane.b32.xlu1 %v7171_v28, %s6211_s22 }
 0x3f4   : > { %5503 = vmatmul.msk.f32.gmra.mxu0 %vm625_vm3, %v7047_v53  ;;  %v1601_v21 = vpop.f32.mrf.mxu3  ;;  %v7193_v53 = vld [vmem:[%s6279_s15 + $0x88] sm:$0xff] }
 0x3f9   : > { %5476 = vmatmul.msk.f32.gmra.mxu3 %vm411_vm2, %v7193_v53 }
 0x3fb   : > { %1787 = vrot.lane.b32.xlu1 %v7184_v23, %s6211_s22 }
 0x3fc   : > { %5504 = vmatmul.msk.f32.gmra.mxu0 %vm625_vm3, %v6986_v60  ;;  %v1604_v3 = vpop.f32.mrf.mxu3 }
 0x401   : > { %5477 = vmatmul.msk.f32.gmra.mxu3 %vm411_vm2, %v7199_v34 }
 0x402   : > { %v1758_v37 = vpop.permute.xlu1 %1757 }
 0x404   : > { %5505 = vmatmul.msk.f32.gmra.mxu0 %vm625_vm3, %v1756_v63  ;;  %v1607_v50 = vpop.f32.mrf.mxu3  ;;  %v7215_v63 = vpop.xlane.xlu2 %1540 }
 0x405   : > { %9808 = vst [vmem:[#allocation56_spill] sm:$0xff] %v7215_v63 }
 0x409   : > { %5478 = vmatmul.msk.f32.gmra.mxu3 %vm411_vm2, %v7209_v11 }
 0x40a   : > { %v1350_v39 = vpop.permute.xlu1 %1349 }
 0x40b   : > { %v1415_v48 = vmul.f32 %v6120_v6, %v1350_v39  ;;  %v7220_v39 = vld [vmem:[%s6279_s15 + $0xa0] sm:$0xff] }
 0x40c   : > { %5506 = vmatmul.msk.f32.gmra.mxu0 %vm625_vm3, %v1758_v37  ;;  %v1610_v6 = vpop.f32.mrf.mxu3  ;;  %v1762_v55 = vpop.permute.xlu2 %1761 }
 0x40d   : > { %v7206_v60 = vadd.f32 %v1415_v48, %v6981_v62  ;;  %v7227_v62 = vld [vmem:[%s9695_s4 + $0x1] ss:$0 sm:$0xff] }
 0x40f   : > { %9807 = vst [vmem:[#allocation55_spill] sm:$0xff] %v7206_v60  ;;  %1789 = vrot.lane.b32.xlu2 %v7206_v60, %s6211_s22 }
 0x411   : > { %5479 = vmatmul.msk.f32.gmra.mxu3 %vm411_vm2, %v7220_v39 }
 0x414   : > { %5507 = vmatmul.msk.f32.gmra.mxu0 %vm625_vm3, %v7026_v54  ;;  %v1613_v28 = vpop.f32.mrf.mxu3 }
 0x419   : > { %v1877_v48 = vpop.f32.mrf.mxu0  ;;  %5480 = vmatmul.msk.f32.gmra.mxu3 %vm411_vm2, %v7232_v35 }
 0x41a   : > { %v1878_v37 = vadd.f32 %v1877_v48, %v1601_v21 }
 0x41c   : > { %v1978_v63 = vadd.f32 %v7227_v62, %v1878_v37  ;;  %5508 = vmatmul.msk.f32.gmra.mxu0 %vm625_vm3, %v1762_v55 }
 0x41e   : > { %v2042_v54 = vmul.f32 0.01, %v1978_v63  ;;  %vm2010_vm15 = vcmp.gt.f32.partialorder %v1978_v63, 0.0 }
 0x420   : > { %v2074_v29 = vsel %vm2010_vm15, %v1978_v63, %v2042_v54  ;;  %v1616_v63 = vpop.f32.mrf.mxu3 }
 0x421   : > { %v1880_v14 = vpop.f32.mrf.mxu0  ;;  %5534 = vmatmul.msk.f32.vlgmr.msrb.gmra.mxu1 %vm983_vm5, %v2074_v29  ;;  %5481 = vmatmul.msk.f32.gmra.mxu3 %vm411_vm2, %v7239_v2  ;;  %v7246_v29 = vld [vmem:[%s6279_s15 + $0xb8] sm:$0xff] }
 0x422   : > { %v1881_v21 = vadd.f32 %v1880_v14, %v1604_v3 }
 0x424   : > { %v1979_v48 = vadd.f32 %v7227_v62, %v1881_v21 }
 0x426   : > { %vm2011_vm4 = vcmp.gt.f32.partialorder %v1979_v48, 0.0  ;;  %v2043_v37 = vmul.f32 0.01, %v1979_v48 }
 0x428   : > { %v2075_v55 = vsel %vm2011_vm4, %v1979_v48, %v2043_v37  ;;  %v1619_v37 = vpop.f32.mrf.mxu3 }
 0x429   : > { %v1883_v44 = vpop.f32.mrf.mxu0  ;;  %5535 = vmatmul.msk.f32.gmra.mxu1 %vm983_vm5, %v2075_v55  ;;  %5482 = vmatmul.msk.f32.gmra.mxu3 %vm411_vm2, %v7246_v29 }
 0x42a   : > { %v1884_v54 = vadd.f32 %v1883_v44, %v1607_v50  ;;  %v7253_v50 = vld [vmem:[%s6279_s15 + $0xc0] sm:$0xff] }
 0x42c   : > { %v1980_v45 = vadd.f32 %v7227_v62, %v1884_v54 }
 0x42e   : > { %vm2012_vm6 = vcmp.gt.f32.partialorder %v1980_v45, 0.0  ;;  %v2044_v14 = vmul.f32 0.01, %v1980_v45 }
 0x430   : > { %v2076_v3 = vsel %vm2012_vm6, %v1980_v45, %v2044_v14 }
 0x431   : > { %v1886_v21 = vpop.f32.mrf.mxu0  ;;  %5536 = vmatmul.msk.f32.gmra.mxu1 %vm983_vm5, %v2076_v3  ;;  %5483 = vmatmul.msk.f32.gmra.mxu3 %vm411_vm2, %v7253_v50  ;;  %v1622_v3 = vpop.f32.mrf.mxu3 }
 0x432   : > { %v1887_v48 = vadd.f32 %v1886_v21, %v1610_v6  ;;  %v7260_v21 = vld [vmem:[%s6279_s15 + $0xc8] sm:$0xff] }
 0x434   : > { %v1981_v55 = vadd.f32 %v7227_v62, %v1887_v48 }
 0x436   : > { %vm2013_vm7 = vcmp.gt.f32.partialorder %v1981_v55, 0.0  ;;  %v2045_v44 = vmul.f32 0.01, %v1981_v55 }
 0x438   : > { %v2077_v54 = vsel %vm2013_vm7, %v1981_v55, %v2045_v44 }
 0x439   : > { %v1889_v19 = vpop.f32.mrf.mxu0  ;;  %5537 = vmatmul.msk.f32.gmra.mxu1 %vm983_vm5, %v2077_v54  ;;  %5484 = vmatmul.msk.f32.gmra.mxu3 %vm411_vm2, %v7260_v21  ;;  %v7266_v54 = vpop.xlane.xlu1 %1543 }
 0x43a   : > { %v1890_v45 = vadd.f32 %v1889_v19, %v1613_v28  ;;  %9809 = vst [vmem:[#allocation57_spill] sm:$0xff] %v7266_v54  ;;  %v7269_v28 = vld [vmem:[%s6279_s15 + $0xd0] sm:$0xff] }
 0x43c   : > { %v1982_v14 = vadd.f32 %v7227_v62, %v1890_v45  ;;  %v1625_v45 = vpop.f32.mrf.mxu3 }
 0x43e   : > { %vm2014_vm8 = vcmp.gt.f32.partialorder %v1982_v14, 0.0  ;;  %v2046_v6 = vmul.f32 0.01, %v1982_v14 }
 0x440   : > { %v2078_v48 = vsel %vm2014_vm8, %v1982_v14, %v2046_v6 }
 0x441   : > { %v1892_v42 = vpop.f32.mrf.mxu0  ;;  %5538 = vmatmul.msk.f32.gmra.mxu1 %vm983_vm5, %v2078_v48  ;;  %5485 = vmatmul.msk.f32.gmra.mxu3 %vm411_vm2, %v7269_v28  ;;  %v7277_v48 = vld [vmem:[%s6279_s15 + $0xd8] sm:$0xff] }
 0x442   : > { %v1893_v55 = vadd.f32 %v1892_v42, %v1616_v63 }
 0x444   : > { %v1983_v44 = vadd.f32 %v7227_v62, %v1893_v55 }
 0x446   : > { %vm2015_vm9 = vcmp.gt.f32.partialorder %v1983_v44, 0.0  ;;  %v2047_v19 = vmul.f32 0.01, %v1983_v44 }
 0x448   : > { %v2079_v61 = vsel %vm2015_vm9, %v1983_v44, %v2047_v19  ;;  %v1628_v44 = vpop.f32.mrf.mxu3 }
 0x449   : > { %v1895_v60 = vpop.f32.mrf.mxu0  ;;  %5539 = vmatmul.msk.f32.gmra.mxu1 %vm983_vm5, %v2079_v61  ;;  %5486 = vmatmul.msk.f32.gmra.mxu3 %vm411_vm2, %v7277_v48 }
 0x44a   : > { %v1896_v14 = vadd.f32 %v1895_v60, %v1619_v37  ;;  %v1766_v37 = vpop.permute.xlu0 %1765 }
 0x44c   : > { %v1984_v42 = vadd.f32 %v7227_v62, %v1896_v14  ;;  %v7285_v14 = vld [vmem:[%s6279_s15 + $0xe0] sm:$0xff] }
 0x44d   : > { %v1764_v63 = vpop.permute.xlu1 %1763 }
 0x44e   : > { %5509 = vmatmul.msk.f32.gmra.mxu0 %vm625_vm3, %v1764_v63  ;;  %vm2016_vm10 = vcmp.gt.f32.partialorder %v1984_v42, 0.0  ;;  %v2048_v6 = vmul.f32 0.01, %v1984_v42 }
 0x450   : > { %v2080_v55 = vsel %vm2016_vm10, %v1984_v42, %v2048_v6 }
 0x451   : > { %v1898_v54 = vpop.f32.mrf.mxu0  ;;  %5540 = vmatmul.msk.f32.gmra.mxu1 %vm983_vm5, %v2080_v55  ;;  %5487 = vmatmul.msk.f32.gmra.mxu3 %vm411_vm2, %v7285_v14  ;;  %v1631_v55 = vpop.f32.mrf.mxu3 }
 0x452   : > { %v1899_v61 = vadd.f32 %v1898_v54, %v1622_v3  ;;  %v1768_v54 = vpop.permute.xlu2 %1767 }
 0x454   : > { %v1985_v60 = vadd.f32 %v7227_v62, %v1899_v61 }
 0x456   : > { %5510 = vmatmul.msk.f32.gmra.mxu0 %vm625_vm3, %v1766_v37  ;;  %vm2017_vm11 = vcmp.gt.f32.partialorder %v1985_v60, 0.0  ;;  %v2049_v19 = vmul.f32 0.01, %v1985_v60  ;;  %v7293_v37 = vld [vmem:[%s6279_s15 + $0xe8] sm:$0xff] }
 0x458   : > { %v2081_v63 = vsel %vm2017_vm11, %v1985_v60, %v2049_v19 }
 0x459   : > { %v1901_v42 = vpop.f32.mrf.mxu0  ;;  %5541 = vmatmul.msk.f32.gmra.mxu1 %vm983_vm5, %v2081_v63  ;;  %5488 = vmatmul.msk.f32.gmra.mxu3 %vm411_vm2, %v7293_v37  ;;  %v1770_v63 = vpop.permute.xlu1 %1769 }
 0x45a   : > { %v1902_v6 = vadd.f32 %v1901_v42, %v1625_v45  ;;  %v1634_v42 = vpop.f32.mrf.mxu3 }
 0x45c   : > { %v1986_v3 = vadd.f32 %v7227_v62, %v1902_v6 }
 0x45e   : > { %5511 = vmatmul.msk.f32.gmra.mxu0 %vm625_vm3, %v1768_v54  ;;  %vm2018_vm12 = vcmp.gt.f32.partialorder %v1986_v3, 0.0  ;;  %v2050_v61 = vmul.f32 0.01, %v1986_v3  ;;  %v7301_v54 = vld [vmem:[%s6279_s15 + $0xf0] sm:$0xff] }
 0x460   : > { %v2082_v23 = vsel %vm2018_vm12, %v1986_v3, %v2050_v61  ;;  %v1772_v61 = vpop.permute.xlu0 %1771 }
 0x461   : > { %v1904_v60 = vpop.f32.mrf.mxu0  ;;  %5542 = vmatmul.msk.f32.gmra.mxu1 %vm983_vm5, %v2082_v23  ;;  %5489 = vmatmul.msk.f32.gmra.mxu3 %vm411_vm2, %v7301_v54 }
 0x462   : > { %v1905_v19 = vadd.f32 %v1904_v60, %v1628_v44 }
 0x464   : > { %v1987_v45 = vadd.f32 %v7227_v62, %v1905_v19  ;;  %v7309_v19 = vld [vmem:[%s6279_s15 + $0xf8] sm:$0xff] }
 0x466   : > { %5512 = vmatmul.msk.f32.gmra.mxu0 %vm625_vm3, %v1770_v63  ;;  %vm2019_vm13 = vcmp.gt.f32.partialorder %v1987_v45, 0.0  ;;  %v2051_v6 = vmul.f32 0.01, %v1987_v45  ;;  %v1637_v63 = vpop.f32.mrf.mxu3 }
 0x468   : > { %v2083_v26 = vsel %vm2019_vm13, %v1987_v45, %v2051_v6 }
 0x469   : > { %v1907_v3 = vpop.f32.mrf.mxu0  ;;  %5543 = vmatmul.msk.f32.gmra.mxu1 %vm983_vm5, %v2083_v26  ;;  %5490 = vmatmul.msk.f32.gmra.mxu3 %vm411_vm2, %v7309_v19 }
 0x46a   : > { %v1908_v23 = vadd.f32 %v1907_v3, %v1631_v55  ;;  %v1774_v55 = vpop.permute.xlu2 %1773 }
 0x46c   : > { %v1988_v44 = vadd.f32 %v7227_v62, %v1908_v23 }
 0x46e   : > { %5513 = vmatmul.msk.f32.gmra.mxu0 %vm625_vm3, %v1772_v61  ;;  %vm2020_vm14 = vcmp.gt.f32.partialorder %v1988_v44, 0.0  ;;  %v2052_v60 = vmul.f32 0.01, %v1988_v44  ;;  %v1640_v61 = vpop.f32.mrf.mxu3 }
 0x470   : > { %v2084_v18 = vsel %vm2020_vm14, %v1988_v44, %v2052_v60  ;;  %v1776_v44 = vpop.permute.xlu1 %1775 }
 0x471   : > { %v1910_v22 = vpop.f32.mrf.mxu0  ;;  %5544 = vmatmul.msk.f32.gmra.mxu1 %vm983_vm5, %v2084_v18 }
 0x472   : > { %v1911_v45 = vadd.f32 %v1910_v22, %v1634_v42 }
 0x474   : > { %v1989_v26 = vadd.f32 %v7227_v62, %v1911_v45 }
 0x476   : > { %5514 = vmatmul.msk.f32.gmra.mxu0 %vm625_vm3, %v1774_v55  ;;  %vm2021_vm15 = vcmp.gt.f32.partialorder %v1989_v26, 0.0  ;;  %v2053_v6 = vmul.f32 0.01, %v1989_v26  ;;  %v1643_v45 = vpop.f32.mrf.mxu3  ;;  %v1778_v55 = vpop.permute.xlu0 %1777 }
 0x478   : > { %v2085_v3 = vsel %vm2021_vm15, %v1989_v26, %v2053_v6 }
 0x479   : > { %v1913_v23 = vpop.f32.mrf.mxu0  ;;  %5545 = vmatmul.msk.f32.gmra.mxu1 %vm983_vm5, %v2085_v3 }
 0x47a   : > { %v1914_v20 = vadd.f32 %v1913_v23, %v1637_v63 }
 0x47c   : > { %v1990_v56 = vadd.f32 %v7227_v62, %v1914_v20 }
 0x47e   : > { %5515 = vmatmul.msk.f32.gmra.mxu0 %vm625_vm3, %v1776_v44  ;;  %vm2022_vm4 = vcmp.gt.f32.partialorder %v1990_v56, 0.0  ;;  %v2054_v18 = vmul.f32 0.01, %v1990_v56  ;;  %v1646_v44 = vpop.f32.mrf.mxu3 }
 0x480   : > { %v2086_v22 = vsel %vm2022_vm4, %v1990_v56, %v2054_v18  ;;  %v1780_v56 = vpop.permute.xlu2 %1779 }
 0x481   : > { %v1916_v42 = vpop.f32.mrf.mxu0  ;;  %5546 = vmatmul.msk.f32.gmra.mxu1 %vm983_vm5, %v2086_v22 }
 0x482   : > { %v1917_v60 = vadd.f32 %v1916_v42, %v1640_v61 }
 0x484   : > { %v1991_v26 = vadd.f32 %v7227_v62, %v1917_v60 }
 0x486   : > { %5516 = vmatmul.msk.f32.gmra.mxu0 %vm625_vm3, %v1778_v55  ;;  %vm2023_vm6 = vcmp.gt.f32.partialorder %v1991_v26, 0.0  ;;  %v2055_v63 = vmul.f32 0.01, %v1991_v26  ;;  %v1649_v55 = vpop.f32.mrf.mxu3 }
 0x488   : > { %v2087_v6 = vsel %vm2023_vm6, %v1991_v26, %v2055_v63  ;;  %v1782_v26 = vpop.permute.xlu1 %1781 }
 0x489   : > { %v1919_v20 = vpop.f32.mrf.mxu0  ;;  %5547 = vmatmul.msk.f32.gmra.mxu1 %vm983_vm5, %v2087_v6 }
 0x48a   : > { %v1920_v3 = vadd.f32 %v1919_v20, %v1643_v45 }
 0x48c   : > { %v1992_v23 = vadd.f32 %v7227_v62, %v1920_v3  ;;  %v7332_v3 = vld [vmem:[%s9697_s6 + $0x1] ss:$0 sm:$0xff] }
 0x48e   : > { %5517 = vmatmul.msk.f32.gmra.mxu0 %vm625_vm3, %v1780_v56  ;;  %vm2024_vm7 = vcmp.gt.f32.partialorder %v1992_v23, 0.0  ;;  %v2056_v61 = vmul.f32 0.01, %v1992_v23  ;;  %v1784_v56 = vpop.permute.xlu2 %1783 }
 0x490   : > { %v2088_v18 = vsel %vm2024_vm7, %v1992_v23, %v2056_v61 }
 0x491   : > { %v1922_v22 = vpop.f32.mrf.mxu0  ;;  %5548 = vmatmul.msk.f32.gmra.mxu1 %vm983_vm5, %v2088_v18 }
 0x492   : > { %v1923_v42 = vadd.f32 %v1922_v22, %v1646_v44 }
 0x494   : > { %v1993_v60 = vadd.f32 %v7227_v62, %v1923_v42 }
 0x496   : > { %5518 = vmatmul.msk.f32.gmra.mxu0 %vm625_vm3, %v1782_v26  ;;  %vm2025_vm8 = vcmp.gt.f32.partialorder %v1993_v60, 0.0  ;;  %v2057_v45 = vmul.f32 0.01, %v1993_v60 }
 0x498   : > { %v2089_v63 = vsel %vm2025_vm8, %v1993_v60, %v2057_v45  ;;  %v1786_v60 = vpop.permute.xlu0 %1785  ;;  %v1788_v45 = vpop.permute.xlu1 %1787 }
 0x499   : > { %v1925_v6 = vpop.f32.mrf.mxu0  ;;  %5549 = vmatmul.msk.f32.gmra.mxu1 %vm983_vm5, %v2089_v63 }
 0x49a   : > { %v1926_v20 = vadd.f32 %v1925_v6, %v1649_v55  ;;  %v1652_v55 = vpop.f32.mrf.mxu3 }
 0x49c   : > { %v1994_v23 = vadd.f32 %v7227_v62, %v1926_v20  ;;  %v1790_v20 = vpop.permute.xlu2 %1789 }
 0x49e   : > { %5519 = vmatmul.msk.f32.gmra.mxu0 %vm625_vm3, %v1784_v56  ;;  %v2233_v44 = vpop.f32.mrf.mxu1  ;;  %vm2026_vm9 = vcmp.gt.f32.partialorder %v1994_v23, 0.0  ;;  %v2058_v61 = vmul.f32 0.01, %v1994_v23 }
 0x49f   : > { %v7337_v18 = vadd.f32 %v7332_v3, %v2233_v44 }
 0x4a0   : > { %v2090_v22 = vsel %vm2026_vm9, %v1994_v23, %v2058_v61  ;;  %v1792_v44 = vpop.permute.xlu0 %1791 }
 0x4a1   : > { %2457 = vrot.lane.b32.xlu1 %v7337_v18, %s6211_s22  ;;  %5550 = vmatmul.msk.f32.gmra.mxu1 %vm983_vm5, %v2090_v22  ;;  %v2585_v42 = vsel %vm625_vm3, %v7337_v18, 0.0 }
 0x4a2   : > { %2586 = vadd.xlane.f32.xlu2 %v2585_v42  ;;  %v1655_v23 = vpop.f32.mrf.mxu3 }
 0x4a6   : > { %5520 = vmatmul.msk.f32.gmra.mxu0 %vm625_vm3, %v1786_v60  ;;  %v2236_v26 = vpop.f32.mrf.mxu1 }
 0x4a7   : > { %v7353_v56 = vadd.f32 %v7332_v3, %v2236_v26 }
 0x4a9   : > { %v2588_v42 = vsel %vm625_vm3, %v7353_v56, 0.0 }
 0x4aa   : > { %v1658_v61 = vpop.f32.mrf.mxu3 }
 0x4ae   : > { %5521 = vmatmul.msk.f32.gmra.mxu0 %vm625_vm3, %v1788_v45  ;;  %v2239_v63 = vpop.f32.mrf.mxu1 }
 0x4af   : > { %v7347_v6 = vadd.f32 %v7332_v3, %v2239_v63 }
 0x4b1   : > { %2461 = vrot.lane.b32.xlu0 %v7347_v6, %s6211_s22 }
 0x4b2   : > { %v1661_v45 = vpop.f32.mrf.mxu3 }
 0x4b6   : > { %5522 = vmatmul.msk.f32.gmra.mxu0 %vm625_vm3, %v1790_v20  ;;  %v2242_v22 = vpop.f32.mrf.mxu1 }
 0x4ba   : > { %2459 = vrot.lane.b32.xlu2 %v7353_v56, %s6211_s22 }
 0x4be   : > { %5523 = vmatmul.msk.f32.gmra.mxu0 %vm625_vm3, %v1792_v44  ;;  %v2245_v17 = vpop.f32.mrf.mxu1  ;;  %v1664_v44 = vpop.f32.mrf.mxu3 }
 0x4bf   : > { %v7363_v12 = vadd.f32 %v7332_v3, %v2245_v17  ;;  %v7371_v17 = vadd.f32 %v7332_v3, %v2242_v22 }
 0x4cb   : > { %2589 = vadd.xlane.f32.xlu1 %v2588_v42  ;;  %v1928_v60 = vpop.f32.mrf.mxu0 }
 0x4cc   : > { %v1929_v63 = vadd.f32 %v1928_v60, %v1652_v55  ;;  %v2597_v55 = vsel %vm625_vm3, %v7363_v12, 0.0 }
 0x4ce   : > { %v1995_v20 = vadd.f32 %v7227_v62, %v1929_v63 }
 0x4d0   : > { %vm2027_vm10 = vcmp.gt.f32.partialorder %v1995_v20, 0.0  ;;  %v2059_v26 = vmul.f32 0.01, %v1995_v20 }
 0x4d2   : > { %v2091_v47 = vsel %vm2027_vm10, %v1995_v20, %v2059_v26 }
 0x4d3   : > { %v1931_v27 = vpop.f32.mrf.mxu0  ;;  %5551 = vmatmul.msk.f32.gmra.mxu1 %vm983_vm5, %v2091_v47 }
 0x4d4   : > { %v1932_v9 = vadd.f32 %v1931_v27, %v1655_v23  ;;  %v1667_v27 = vpop.f32.mrf.mxu3 }
 0x4d6   : > { %v1996_v40 = vadd.f32 %v7227_v62, %v1932_v9  ;;  %v2591_v9 = vsel %vm625_vm3, %v7347_v6, 0.0 }
 0x4d8   : > { %vm2028_vm11 = vcmp.gt.f32.partialorder %v1996_v40, 0.0  ;;  %v2060_v42 = vmul.f32 0.01, %v1996_v40 }
 0x4da   : > { %v2092_v60 = vsel %vm2028_vm11, %v1996_v40, %v2060_v42 }
 0x4db   : > { %2598 = vadd.xlane.f32.xlu0 %v2597_v55  ;;  %v1934_v63 = vpop.f32.mrf.mxu0  ;;  %5552 = vmatmul.msk.f32.gmra.mxu1 %vm983_vm5, %v2092_v60  ;;  %v2248_v60 = vpop.f32.mrf.mxu1 }
 0x4dc   : > { %v1935_v20 = vadd.f32 %v1934_v63, %v1658_v61  ;;  %v1670_v55 = vpop.f32.mrf.mxu3 }
 0x4de   : > { %v1997_v47 = vadd.f32 %v7227_v62, %v1935_v20 }
 0x4e0   : > { %vm2029_vm12 = vcmp.gt.f32.partialorder %v1997_v47, 0.0  ;;  %v2061_v23 = vmul.f32 0.01, %v1997_v47 }
 0x4e2   : > { %v2093_v26 = vsel %vm2029_vm12, %v1997_v47, %v2061_v23  ;;  %v7381_v47 = vadd.f32 %v7332_v3, %v2248_v60 }
 0x4e3   : > { %2592 = vadd.xlane.f32.xlu2 %v2591_v9  ;;  %v1937_v7 = vpop.f32.mrf.mxu0  ;;  %5553 = vmatmul.msk.f32.gmra.mxu1 %vm983_vm5, %v2093_v26 }
 0x4e4   : > { %v1938_v40 = vadd.f32 %v1937_v7, %v1661_v45  ;;  %2463 = vrot.lane.b32.xlu1 %v7371_v17, %s6211_s22  ;;  %v1673_v26 = vpop.f32.mrf.mxu3 }
 0x4e6   : > { %v1998_v61 = vadd.f32 %v7227_v62, %v1938_v40 }
 0x4e8   : > { %vm2030_vm13 = vcmp.gt.f32.partialorder %v1998_v61, 0.0  ;;  %v2062_v42 = vmul.f32 0.01, %v1998_v61 }
 0x4ea   : > { %v2094_v22 = vsel %vm2030_vm13, %v1998_v61, %v2062_v42  ;;  %v5566_v61 = vld [vmem:[%s9693_s2 + $0x4] sm:$0x3] }
 0x4eb   : > { %v1940_v63 = vpop.f32.mrf.mxu0  ;;  %5554 = vmatmul.msk.f32.gmra.mxu1 %vm983_vm5, %v2094_v22  ;;  %5601 = vmatpush.msk.msrb.mxu2 %vm722_vm1, %v5566_v61  ;;  %v7407_v61 = vpop.f32.mrf.mxu1 }
 0x4ec   : > { %v1941_v20 = vadd.f32 %v1940_v63, %v1664_v44  ;;  %v5567_v44 = vld [vmem:[%s9694_s3 + $0x10] sm:$0x3f] }
 0x4ed   : > { %5568 = vmatpush.msk.msrb.mxu3 %vm508_vm0, %v5567_v44 }
 0x4ee   : > { %v1999_v23 = vadd.f32 %v7227_v62, %v1941_v20  ;;  %5569 = vmatmul.msk.f32.vlgmr.msrb.gmra.mxu3 %vm411_vm2, %v6955_v52  ;;  %v1676_v20 = vpop.f32.mrf.mxu3 }
 0x4ef   : > { %2467 = vrot.lane.b32.xlu0 %v7381_v47, %s6211_s22 }
 0x4f0   : > { %vm2031_vm14 = vcmp.gt.f32.partialorder %v1999_v23, 0.0  ;;  %v2063_v7 = vmul.f32 0.01, %v1999_v23 }
 0x4f2   : > { %v2095_v45 = vsel %vm2031_vm14, %v1999_v23, %v2063_v7 }
 0x4f3   : > { %v1943_v9 = vpop.f32.mrf.mxu0  ;;  %5555 = vmatmul.msk.f32.gmra.mxu1 %vm983_vm5, %v2095_v45 }
 0x4f4   : > { %v1944_v40 = vadd.f32 %v1943_v9, %v1667_v27 }
 0x4f6   : > { %v2000_v42 = vadd.f32 %v7227_v62, %v1944_v40  ;;  %5570 = vmatmul.msk.f32.gmra.mxu3 %vm411_vm2, %v6963_v31  ;;  %v2329_v40 = vmul.f32 1.442695, %v7337_v18 }
 0x4f8   : > { %vm2032_vm15 = vcmp.gt.f32.partialorder %v2000_v42, 0.0  ;;  %v2064_v60 = vmul.f32 0.01, %v2000_v42  ;;  %5878 = vpow2.f32 %v2329_v40 }
 0x4fa   : > { %v2096_v27 = vsel %vm2032_vm15, %v2000_v42, %v2064_v60 }
 0x4fb   : > { %2465 = vrot.lane.b32.xlu2 %v7363_v12, %s6211_s22  ;;  %v1946_v22 = vpop.f32.mrf.mxu0  ;;  %5556 = vmatmul.msk.f32.gmra.mxu1 %vm983_vm5, %v2096_v27 }
 0x4fc   : > { %v1947_v63 = vadd.f32 %v1946_v22, %v1670_v55  ;;  %v1679_v55 = vpop.f32.mrf.mxu3 }
 0x4fe   : > { %v2001_v23 = vadd.f32 %v7227_v62, %v1947_v63  ;;  %5571 = vmatmul.msk.f32.gmra.mxu3 %vm411_vm2, %v6973_v41  ;;  %v5879_v22 = vpop.eup %5878  ;;  %v2331_v63 = vmul.f32 1.442695, %v7353_v56 }
 0x500   : > { %vm2033_vm4 = vcmp.gt.f32.partialorder %v2001_v23, 0.0  ;;  %v2065_v7 = vmul.f32 0.01, %v2001_v23  ;;  %5880 = vpow2.f32 %v2331_v63  ;;  %v6134_v63 = vld [vmem:[%s6285_s18 + $0x8] sm:$0xff] }
 0x502   : > { %v2097_v45 = vsel %vm2033_vm4, %v2001_v23, %v2065_v7  ;;  %v2254_v23 = vpop.f32.mrf.mxu1 }
 0x503   : > { %v1949_v52 = vpop.f32.mrf.mxu0  ;;  %5557 = vmatmul.msk.f32.gmra.mxu1 %vm983_vm5, %v2097_v45  ;;  %v2393_v45 = vmul.f32 %v6837_v5, %v5879_v22  ;;  %v7421_v40 = vadd.f32 %v7332_v3, %v2254_v23  ;;  %v2333_v5 = vmul.f32 1.442695, %v7347_v6 }
 0x504   : > { %v1950_v9 = vadd.f32 %v1949_v52, %v1673_v26  ;;  %v2594_v26 = vsel %vm625_vm3, %v7371_v17, 0.0  ;;  %v1682_v7 = vpop.f32.mrf.mxu3 }
 0x505   : > { %5882 = vpow2.f32 %v2333_v5  ;;  %v6135_v5 = vld [vmem:[%s6285_s18 + $0x10] sm:$0xff] }
 0x506   : > { %v2002_v44 = vadd.f32 %v7227_v62, %v1950_v9  ;;  %5572 = vmatmul.msk.f32.gmra.mxu3 %vm411_vm2, %v6995_v32 }
 0x508   : > { %vm2034_vm6 = vcmp.gt.f32.partialorder %v2002_v44, 0.0  ;;  %v2066_v42 = vmul.f32 0.01, %v2002_v44 }
 0x50a   : > { %v2098_v31 = vsel %vm2034_vm6, %v2002_v44, %v2066_v42 }
 0x50b   : > { %v1952_v60 = vpop.f32.mrf.mxu0  ;;  %5558 = vmatmul.msk.f32.gmra.mxu1 %vm983_vm5, %v2098_v31  ;;  %v2606_v31 = vsel %vm625_vm3, %v7421_v40, 0.0 }
 0x50c   : > { %v1953_v27 = vadd.f32 %v1952_v60, %v1676_v20 }
 0x50e   : > { %v2003_v18 = vadd.f32 %v7227_v62, %v1953_v27  ;;  %2595 = vadd.xlane.f32.xlu1 %v2594_v26  ;;  %5573 = vmatmul.msk.f32.gmra.mxu3 %vm411_vm2, %v7008_v4  ;;  %v5881_v27 = vpop.eup %5880 }
 0x50f   : > { %v2394_v6 = vmul.f32 %v6134_v63, %v5881_v27 }
 0x510   : > { %vm2035_vm7 = vcmp.gt.f32.partialorder %v2003_v18, 0.0  ;;  %v2067_v41 = vmul.f32 0.01, %v2003_v18 }
 0x512   : > { %v2099_v52 = vsel %vm2035_vm7, %v2003_v18, %v2067_v41  ;;  %v1685_v18 = vpop.f32.mrf.mxu3 }
 0x513   : > { %v2458_v20 = vpop.permute.xlu1 %2457  ;;  %v1955_v9 = vpop.f32.mrf.mxu0  ;;  %5559 = vmatmul.msk.f32.gmra.mxu1 %vm983_vm5, %v2099_v52 }
 0x514   : > { %v7423_v44 = vadd.f32 %v2458_v20, %v2393_v45  ;;  %v1956_v56 = vadd.f32 %v1955_v9, %v1679_v55  ;;  %v5883_v52 = vpop.eup %5882 }
 0x515   : > { %v7425_v42 = vpop.xlane.xlu2 %2586 }
 0x516   : > { %9810 = vst [vmem:[#allocation58_spill] sm:$0xff] %v7425_v42  ;;  %v2004_v32 = vadd.f32 %v7227_v62, %v1956_v56  ;;  %5602 = vmatmul.msk.f32.vlgmr.msrb.gmra.mxu2 %vm625_vm3, %v7423_v44  ;;  %5574 = vmatmul.msk.f32.gmra.mxu3 %vm411_vm2, %v7017_v13  ;;  %v2600_v56 = vsel %vm625_vm3, %v7381_v47, 0.0  ;;  %v7450_v13 = vadd.f32 %v7332_v3, %v7407_v61 }
 0x518   : > { %vm2036_vm8 = vcmp.gt.f32.partialorder %v2004_v32, 0.0  ;;  %v2068_v60 = vmul.f32 0.01, %v2004_v32 }
 0x519   : > { %2607 = vadd.xlane.f32.xlu0 %v2606_v31  ;;  %v2395_v31 = vmul.f32 %v6135_v5, %v5883_v52 }
 0x51a   : > { %v2100_v55 = vsel %vm2036_vm8, %v2004_v32, %v2068_v60  ;;  %v1688_v60 = vpop.f32.mrf.mxu3 }
 0x51b   : > { %v1958_v26 = vpop.f32.mrf.mxu0  ;;  %5560 = vmatmul.msk.f32.gmra.mxu1 %vm983_vm5, %v2100_v55 }
 0x51c   : > { %v1959_v22 = vadd.f32 %v1958_v26, %v1682_v7  ;;  %v2257_v26 = vpop.f32.mrf.mxu1 }
 0x51d   : > { %v2460_v41 = vpop.permute.xlu2 %2459  ;;  %v7462_v61 = vadd.f32 %v7332_v3, %v2257_v26  ;;  %v2335_v26 = vmul.f32 1.442695, %v7371_v17 }
 0x51e   : > { %v2005_v4 = vadd.f32 %v7227_v62, %v1959_v22  ;;  %v7438_v23 = vadd.f32 %v2460_v41, %v2394_v6  ;;  %5575 = vmatmul.msk.f32.gmra.mxu3 %vm411_vm2, %v7033_v33 }
 0x51f   : > { %5884 = vpow2.f32 %v2335_v26  ;;  %v5640_v26 = vld [vmem:[%s9696_s5 + $0xa8] sm:$0xff] }
 0x520   : > { %5603 = vmatmul.msk.f32.gmra.mxu2 %vm625_vm3, %v7438_v23  ;;  %vm2037_vm9 = vcmp.gt.f32.partialorder %v2005_v4, 0.0  ;;  %v2069_v45 = vmul.f32 0.01, %v2005_v4 }
 0x522   : > { %v2101_v20 = vsel %vm2037_vm9, %v2005_v4, %v2069_v45  ;;  %v1691_v33 = vpop.f32.mrf.mxu3 }
 0x523   : > { %v1961_v9 = vpop.f32.mrf.mxu0  ;;  %5561 = vmatmul.msk.f32.gmra.mxu1 %vm983_vm5, %v2101_v20  ;;  %v2462_v7 = vpop.permute.xlu0 %2461 }
 0x524   : > { %v1962_v32 = vadd.f32 %v1961_v9, %v1685_v18  ;;  %2601 = vadd.xlane.f32.xlu2 %v2600_v56  ;;  %v7453_v55 = vadd.f32 %v2462_v7, %v2395_v31 }
 0x526   : > { %v2006_v27 = vadd.f32 %v7227_v62, %v1962_v32  ;;  %5576 = vmatmul.msk.f32.gmra.mxu3 %vm411_vm2, %v7053_v0 }
 0x527   : > { %2469 = vrot.lane.b32.xlu1 %v7450_v13, %s6211_s22 }
 0x528   : > { %5604 = vmatmul.msk.f32.gmra.mxu2 %vm625_vm3, %v7453_v55  ;;  %vm2038_vm10 = vcmp.gt.f32.partialorder %v2006_v27, 0.0  ;;  %v2070_v18 = vmul.f32 0.01, %v2006_v27 }
 0x52a   : > { %v2102_v22 = vsel %vm2038_vm10, %v2006_v27, %v2070_v18  ;;  %v1694_v56 = vpop.f32.mrf.mxu3  ;;  %v2260_v27 = vpop.f32.mrf.mxu1 }
 0x52b   : > { %v1964_v63 = vpop.f32.mrf.mxu0  ;;  %5562 = vmatmul.msk.f32.gmra.mxu1 %vm983_vm5, %v2102_v22 }
 0x52c   : > { %v1965_v6 = vadd.f32 %v1964_v63, %v1688_v60  ;;  %v5885_v63 = vpop.eup %5884 }
 0x52d   : > { %2473 = vrot.lane.b32.xlu0 %v7462_v61, %s6211_s22 }
 0x52e   : > { %v2007_v41 = vadd.f32 %v7227_v62, %v1965_v6  ;;  %5577 = vmatmul.msk.f32.gmra.mxu3 %vm411_vm2, %v7071_v46 }
 0x530   : > { %vm2039_vm11 = vcmp.gt.f32.partialorder %v2007_v41, 0.0  ;;  %v2071_v4 = vmul.f32 0.01, %v2007_v41 }
 0x532   : > { %v2103_v45 = vsel %vm2039_vm11, %v2007_v41, %v2071_v4  ;;  %v2263_v22 = vpop.f32.mrf.mxu1 }
 0x533   : > { %v1967_v52 = vpop.f32.mrf.mxu0  ;;  %5563 = vmatmul.msk.f32.gmra.mxu1 %vm983_vm5, %v2103_v45  ;;  %v7492_v6 = vadd.f32 %v7332_v3, %v2263_v22  ;;  %v5638_v22 = vld [vmem:[%s9696_s5 + $0x98] sm:$0xff] }
 0x534   : > { %v1968_v20 = vadd.f32 %v1967_v52, %v1691_v33 }
 0x536   : > { %v2008_v9 = vadd.f32 %v7227_v62, %v1968_v20  ;;  %5578 = vmatmul.msk.f32.gmra.mxu3 %vm411_vm2, %v7089_v43  ;;  %v2337_v43 = vmul.f32 1.442695, %v7363_v12  ;;  %v2339_v12 = vmul.f32 1.442695, %v7381_v47  ;;  %v6137_v20 = vld [vmem:[%s6285_s18 + $0x20] sm:$0xff] }
 0x538   : > { %vm2040_vm12 = vcmp.gt.f32.partialorder %v2008_v9, 0.0  ;;  %v2072_v7 = vmul.f32 0.01, %v2008_v9  ;;  %5886 = vpow2.f32 %v2337_v43  ;;  %v5637_v43 = vld [vmem:[%s9696_s5 + $0x90] sm:$0xff] }
 0x539   : > { %5888 = vpow2.f32 %v2339_v12 }
 0x53a   : > { %v2104_v32 = vsel %vm2040_vm12, %v2008_v9, %v2072_v7 }
 0x53b   : > { %v1970_v5 = vpop.f32.mrf.mxu0  ;;  %5564 = vmatmul.msk.f32.gmra.mxu1 %vm983_vm5, %v2104_v32  ;;  %v2609_v32 = vsel %vm625_vm3, %v7462_v61, 0.0 }
 0x53c   : > { %v1971_v0 = vadd.f32 %v1970_v5, %v1694_v56  ;;  %2471 = vrot.lane.b32.xlu2 %v7421_v40, %s6211_s22  ;;  %v6138_v5 = vld [vmem:[%s6285_s18 + $0x28] sm:$0xff] }
 0x53e   : > { %v2009_v31 = vadd.f32 %v7227_v62, %v1971_v0  ;;  %5579 = vmatmul.msk.f32.gmra.mxu3 %vm411_vm2, %v7104_v16  ;;  %v7484_v18 = vpop.xlane.xlu1 %2589  ;;  %v2603_v62 = vsel %vm625_vm3, %v7450_v13, 0.0  ;;  %v6136_v16 = vld [vmem:[%s6285_s18 + $0x18] sm:$0xff]  ;;  %v5887_v45 = vpop.eup %5886 }
 0x53f   : > { %9811 = vst [vmem:[#allocation59_spill] sm:$0xff] %v7484_v18  ;;  %v2396_v17 = vmul.f32 %v6136_v16, %v5885_v63  ;;  %v2397_v9 = vmul.f32 %v6137_v20, %v5887_v45  ;;  %v2341_v16 = vmul.f32 1.442695, %v7450_v13 }
 0x540   : > { %vm2041_vm13 = vcmp.gt.f32.partialorder %v2009_v31, 0.0  ;;  %v2073_v60 = vmul.f32 0.01, %v2009_v31 }
 0x541   : > { %5890 = vpow2.f32 %v2341_v16 }
 0x542   : > { %v2105_v46 = vsel %vm2041_vm13, %v2009_v31, %v2073_v60  ;;  %v2266_v31 = vpop.f32.mrf.mxu1 }
 0x543   : > { %5565 = vmatmul.msk.f32.gmra.mxu1 %vm983_vm5, %v2105_v46  ;;  %v7523_v46 = vadd.f32 %v7332_v3, %v2260_v27  ;;  %v5641_v27 = vld [vmem:[%s9696_s5 + $0xb0] sm:$0xff] }
 0x545   : > { %v2612_v12 = vsel %vm625_vm3, %v7523_v46, 0.0 }
 0x546   : > { %5580 = vmatmul.msk.f32.gmra.mxu3 %vm411_vm2, %v7115_v36  ;;  %v2615_v36 = vsel %vm625_vm3, %v7492_v6, 0.0 }
 0x54a   : > { %v2269_v63 = vpop.f32.mrf.mxu1 }
 0x54e   : > { %5581 = vmatmul.msk.f32.gmra.mxu3 %vm411_vm2, %v7123_v58  ;;  %v7506_v52 = vpop.xlane.xlu0 %2598  ;;  %v5889_v58 = vpop.eup %5888 }
 0x54f   : > { %9813 = vst [vmem:[#allocation61_spill] sm:$0xff] %v7506_v52  ;;  %v2398_v0 = vmul.f32 %v6138_v5, %v5889_v58  ;;  %v5891_v13 = vpop.eup %5890  ;;  %v2345_v5 = vmul.f32 1.442695, %v7462_v61 }
 0x551   : > { %2604 = vadd.xlane.f32.xlu1 %v2603_v62  ;;  %v5635_v62 = vld [vmem:[%s9696_s5 + $0x80] sm:$0xff] }
 0x556   : > { %v2464_v41 = vpop.permute.xlu1 %2463  ;;  %v7495_v33 = vpop.xlane.xlu2 %2592  ;;  %5582 = vmatmul.msk.f32.gmra.mxu3 %vm411_vm2, %v7139_v59  ;;  %v7526_v59 = vadd.f32 %v7332_v3, %v2266_v31 }
 0x557   : > { %9812 = vst [vmem:[#allocation60_spill] sm:$0xff] %v7495_v33  ;;  %v7499_v4 = vadd.f32 %v2464_v41, %v2396_v17  ;;  %2616 = vadd.xlane.f32.xlu0 %v2615_v36  ;;  %v2272_v17 = vpop.f32.mrf.mxu1  ;;  %v2343_v36 = vmul.f32 1.442695, %v7421_v40  ;;  %v7589_v40 = vld [vmem:[%s9695_s4 + $0x2] ss:$0 sm:$0xff] }
 0x558   : > { %v7572_v41 = vadd.f32 %v7332_v3, %v2272_v17 }
 0x559   : > { %5605 = vmatmul.msk.f32.gmra.mxu2 %vm625_vm3, %v7499_v4  ;;  %5892 = vpow2.f32 %v2343_v36  ;;  %v2618_v36 = vsel %vm625_vm3, %v7526_v59, 0.0 }
 0x55a   : > { %5894 = vpow2.f32 %v2345_v5 }
 0x55e   : > { %v2466_v7 = vpop.permute.xlu2 %2465  ;;  %5583 = vmatmul.msk.f32.gmra.mxu3 %vm411_vm2, %v7152_v1  ;;  %v5642_v1 = vld [vmem:[%s9696_s5 + $0xb8] sm:$0xff] }
 0x55f   : > { %v7509_v56 = vadd.f32 %v2466_v7, %v2397_v9  ;;  %3296 = vmatpush.msrb.mxu0 %v5642_v1 }
 0x561   : > { %5606 = vmatmul.msk.f32.gmra.mxu2 %vm625_vm3, %v7509_v56  ;;  %v2468_v47 = vpop.permute.xlu0 %2467  ;;  %3297 = vmatpush.msrb.mxu0 %v5641_v27 }
 0x562   : > { %v7518_v60 = vadd.f32 %v2468_v47, %v2398_v0 }
 0x563   : > { %3298 = vmatpush.msrb.mxu0 %v5640_v26 }
 0x565   : > { %2610 = vadd.xlane.f32.xlu2 %v2609_v32 }
 0x566   : > { %5584 = vmatmul.msk.f32.gmra.mxu3 %vm411_vm2, %v7164_v49  ;;  %v5639_v49 = vld [vmem:[%s9696_s5 + $0xa0] sm:$0xff] }
 0x567   : > { %3299 = vmatpush.msrb.mxu0 %v5639_v49 }
 0x569   : > { %5607 = vmatmul.msk.f32.gmra.mxu2 %vm625_vm3, %v7518_v60  ;;  %3300 = vmatpush.msrb.mxu0 %v5638_v22  ;;  %v6140_v22 = vld [vmem:[%s6285_s18 + $0x38] sm:$0xff] }
 0x56a   : > { %2475 = vrot.lane.b32.xlu1 %v7523_v46, %s6211_s22 }
 0x56b   : > { %2479 = vrot.lane.b32.xlu0 %v7526_v59, %s6211_s22  ;;  %3301 = vmatpush.msrb.mxu0 %v5637_v43 }
 0x56e   : > { %5585 = vmatmul.msk.f32.gmra.mxu3 %vm411_vm2, %v7179_v30  ;;  %v5636_v30 = vld [vmem:[%s9696_s5 + $0x88] sm:$0xff] }
 0x56f   : > { %3302 = vmatpush.msrb.mxu0 %v5636_v30 }
 0x571   : > { %3303 = vmatpush.msrb.mxu0 %v5635_v62  ;;  %v2737_v45 = vpop.f32.mrf.mxu3  ;;  %v2275_v62 = vpop.f32.mrf.mxu1 }
 0x576   : > { %5586 = vmatmul.msk.f32.gmra.mxu3 %vm411_vm2, %v7193_v53 }
 0x579   : > { %v2740_v1 = vpop.f32.mrf.mxu3 }
 0x57d   : > { %2477 = vrot.lane.b32.xlu2 %v7492_v6, %s6211_s22 }
 0x57e   : > { %5587 = vmatmul.msk.f32.gmra.mxu3 %vm411_vm2, %v7199_v34  ;;  %v2624_v34 = vsel %vm625_vm3, %v7572_v41, 0.0 }
 0x581   : > { %v7574_v53 = vpop.xlane.xlu1 %2595 }
 0x582   : > { %9814 = vst [vmem:[#allocation62_spill] sm:$0xff] %v7574_v53 }
 0x586   : > { %5588 = vmatmul.msk.f32.gmra.mxu3 %vm411_vm2, %v7209_v11  ;;  %v6139_v11 = vld [vmem:[%s6285_s18 + $0x30] sm:$0xff] }
 0x587   : > { %v2399_v9 = vmul.f32 %v6139_v11, %v5891_v13  ;;  %v6141_v13 = vld [vmem:[%s6285_s18 + $0x40] sm:$0xff] }
 0x58c   : > { %v7597_v27 = vpop.xlane.xlu0 %2607 }
 0x58d   : > { %9816 = vst [vmem:[#allocation64_spill] sm:$0xff] %v7597_v27 }
 0x58e   : > { %5589 = vmatmul.msk.f32.gmra.mxu3 %vm411_vm2, %v7220_v39  ;;  %v5893_v39 = vpop.eup %5892 }
 0x58f   : > { %v2400_v61 = vmul.f32 %v6140_v22, %v5893_v39  ;;  %v5895_v17 = vpop.eup %5894 }
 0x594   : > { %2613 = vadd.xlane.f32.xlu1 %v2612_v12  ;;  %v7611_v12 = vadd.f32 %v7332_v3, %v2275_v62  ;;  %v6142_v62 = vld [vmem:[%s6285_s18 + $0x48] sm:$0xff] }
 0x595   : > { %2625 = vadd.xlane.f32.xlu0 %v2624_v34 }
 0x596   : > { %5590 = vmatmul.msk.f32.gmra.mxu3 %vm411_vm2, %v7232_v35 }
 0x597   : > { %v7581_v20 = vpop.xlane.xlu2 %2601 }
 0x598   : > { %9815 = vst [vmem:[#allocation63_spill] sm:$0xff] %v7581_v20 }
 0x599   : > { %v2470_v7 = vpop.permute.xlu1 %2469  ;;  %v2949_v58 = vpop.f32.mrf.mxu2 }
 0x59a   : > { %v7591_v47 = vadd.f32 %v2470_v7, %v2399_v9  ;;  %v2950_v32 = vadd.f32 %v2949_v58, %v2737_v45  ;;  %v2401_v45 = vmul.f32 %v6141_v13, %v5895_v17  ;;  %v2743_v9 = vpop.f32.mrf.mxu3  ;;  %v2351_v13 = vmul.f32 1.442695, %v7526_v59  ;;  %v6143_v59 = vld [vmem:[%s6285_s18 + $0x50] sm:$0xff] }
 0x59c   : > { %v3050_v0 = vadd.f32 %v7589_v40, %v2950_v32  ;;  %5608 = vmatmul.msk.f32.gmra.mxu2 %vm625_vm3, %v7591_v47  ;;  %v7621_v32 = vadd.f32 %v7332_v3, %v2269_v63  ;;  %v7638_v63 = vpop.f32.mrf.mxu1 }
 0x59e   : > { %vm3082_vm14 = vcmp.gt.f32.partialorder %v3050_v0, 0.0  ;;  %v3114_v31 = vmul.f32 0.01, %v3050_v0  ;;  %5591 = vmatmul.msk.f32.gmra.mxu3 %vm411_vm2, %v7239_v2 }
 0x59f   : > { %v2472_v26 = vpop.permute.xlu2 %2471  ;;  %v2474_v34 = vpop.permute.xlu0 %2473 }
 0x5a0   : > { %v3146_v49 = vsel %vm3082_vm14, %v3050_v0, %v3114_v31  ;;  %v7603_v43 = vadd.f32 %v2472_v26, %v2400_v61  ;;  %v7618_v7 = vadd.f32 %v2474_v34, %v2401_v45  ;;  %v2347_v26 = vmul.f32 1.442695, %v7523_v46 }
 0x5a1   : > { %5644 = vmatmul.msk.f32.vlgmr.msrb.gmra.mxu0 %vm983_vm5, %v3146_v49  ;;  %v2621_v61 = vsel %vm625_vm3, %v7621_v32, 0.0  ;;  %v2349_v46 = vmul.f32 1.442695, %v7492_v6 }
 0x5a2   : > { %5896 = vpow2.f32 %v2347_v26 }
 0x5a3   : > { %v2952_v30 = vpop.f32.mrf.mxu2  ;;  %5898 = vpow2.f32 %v2349_v46 }
 0x5a4   : > { %v2953_v16 = vadd.f32 %v2952_v30, %v2740_v1  ;;  %5609 = vmatmul.msk.f32.gmra.mxu2 %vm625_vm3, %v7603_v43  ;;  %v2746_v1 = vpop.f32.mrf.mxu3  ;;  %5900 = vpow2.f32 %v2351_v13 }
 0x5a6   : > { %v3051_v35 = vadd.f32 %v7589_v40, %v2953_v16  ;;  %2619 = vadd.xlane.f32.xlu2 %v2618_v36  ;;  %5592 = vmatmul.msk.f32.gmra.mxu3 %vm411_vm2, %v7246_v29  ;;  %v2281_v29 = vpop.f32.mrf.mxu1 }
 0x5a7   : > { %v7644_v49 = vadd.f32 %v7332_v3, %v2281_v29 }
 0x5a8   : > { %vm3083_vm15 = vcmp.gt.f32.partialorder %v3051_v35, 0.0  ;;  %v3115_v11 = vmul.f32 0.01, %v3051_v35  ;;  %v5897_v30 = vpop.eup %5896 }
 0x5a9   : > { %2485 = vrot.lane.b32.xlu0 %v7611_v12, %s6211_s22  ;;  %v2402_v16 = vmul.f32 %v6142_v62, %v5897_v30  ;;  %v6144_v30 = vld [vmem:[%s6285_s18 + $0x58] sm:$0xff] }
 0x5aa   : > { %v3147_v58 = vsel %vm3083_vm15, %v3051_v35, %v3115_v11  ;;  %v5899_v11 = vpop.eup %5898 }
 0x5ab   : > { %v2955_v5 = vpop.f32.mrf.mxu2  ;;  %5645 = vmatmul.msk.f32.gmra.mxu0 %vm983_vm5, %v3147_v58 }
 0x5ac   : > { %v2956_v0 = vadd.f32 %v2955_v5, %v2743_v9  ;;  %5610 = vmatmul.msk.f32.gmra.mxu2 %vm625_vm3, %v7618_v7  ;;  %v2749_v22 = vpop.f32.mrf.mxu3 }
 0x5ad   : > { %2481 = vrot.lane.b32.xlu1 %v7621_v32, %s6211_s22 }
 0x5ae   : > { %v3052_v2 = vadd.f32 %v7589_v40, %v2956_v0  ;;  %5593 = vmatmul.msk.f32.gmra.mxu3 %vm411_vm2, %v7253_v50  ;;  %v2633_v50 = vsel %vm625_vm3, %v7644_v49, 0.0 }
 0x5b0   : > { %vm3084_vm4 = vcmp.gt.f32.partialorder %v3052_v2, 0.0  ;;  %v3116_v39 = vmul.f32 0.01, %v3052_v2 }
 0x5b2   : > { %v3148_v31 = vsel %vm3084_vm4, %v3052_v2, %v3116_v39  ;;  %v2403_v2 = vmul.f32 %v6143_v59, %v5899_v11 }
 0x5b3   : > { %5646 = vmatmul.msk.f32.gmra.mxu0 %vm983_vm5, %v3148_v31 }
 0x5b6   : > { %5594 = vmatmul.msk.f32.gmra.mxu3 %vm411_vm2, %v7260_v21 }
 0x5be   : > { %2483 = vrot.lane.b32.xlu2 %v7572_v41, %s6211_s22  ;;  %5595 = vmatmul.msk.f32.gmra.mxu3 %vm411_vm2, %v7269_v28  ;;  %v2284_v28 = vpop.f32.mrf.mxu1 }
 0x5bf   : > { %v7675_v31 = vadd.f32 %v7332_v3, %v2284_v28 }
 0x5c4   : > { %v7650_v21 = vpop.xlane.xlu1 %2604 }
 0x5c5   : > { %9817 = vst [vmem:[#allocation65_spill] sm:$0xff] %v7650_v21 }
 0x5c6   : > { %5596 = vmatmul.msk.f32.gmra.mxu3 %vm411_vm2, %v7277_v48  ;;  %v7668_v45 = vpop.f32.mrf.mxu1 }
 0x5ca   : > { %v7670_v58 = vpop.xlane.xlu0 %2616 }
 0x5cb   : > { %9819 = vst [vmem:[#allocation67_spill] sm:$0xff] %v7670_v58 }
 0x5ce   : > { %5597 = vmatmul.msk.f32.gmra.mxu3 %vm411_vm2, %v7285_v14  ;;  %v2752_v14 = vpop.f32.mrf.mxu3  ;;  %v2290_v28 = vpop.f32.mrf.mxu1 }
 0x5d3   : > { %2634 = vadd.xlane.f32.xlu0 %v2633_v50  ;;  %v5901_v50 = vpop.eup %5900 }
 0x5d4   : > { %v2404_v62 = vmul.f32 %v6144_v30, %v5901_v50 }
 0x5d6   : > { %5598 = vmatmul.msk.f32.gmra.mxu3 %vm411_vm2, %v7293_v37 }
 0x5d7   : > { %2622 = vadd.xlane.f32.xlu1 %v2621_v61 }
 0x5d8   : > { %v7657_v48 = vpop.xlane.xlu2 %2610 }
 0x5d9   : > { %9818 = vst [vmem:[#allocation66_spill] sm:$0xff] %v7657_v48 }
 0x5dc   : > { %v2476_v17 = vpop.permute.xlu1 %2475  ;;  %v2958_v36 = vpop.f32.mrf.mxu2 }
 0x5dd   : > { %v7660_v35 = vadd.f32 %v2476_v17, %v2402_v16  ;;  %v2959_v34 = vadd.f32 %v2958_v36, %v2746_v1  ;;  %v2627_v1 = vsel %vm625_vm3, %v7611_v12, 0.0  ;;  %v2480_v46 = vpop.permute.xlu0 %2479  ;;  %v7689_v17 = vadd.f32 %v7332_v3, %v2290_v28 }
 0x5de   : > { %v7695_v13 = vadd.f32 %v2480_v46, %v2404_v62 }
 0x5df   : > { %v3053_v6 = vadd.f32 %v7589_v40, %v2959_v34  ;;  %5611 = vmatmul.msk.f32.gmra.mxu2 %vm625_vm3, %v7660_v35  ;;  %v7693_v34 = vadd.f32 %v7332_v3, %v7638_v63  ;;  %v2755_v63 = vpop.f32.mrf.mxu3  ;;  %5599 = vmatmul.msk.f32.gmra.mxu3 %vm411_vm2, %v7301_v54 }
 0x5e0   : > { %v2478_v5 = vpop.permute.xlu2 %2477 }
 0x5e1   : > { %vm3085_vm6 = vcmp.gt.f32.partialorder %v3053_v6, 0.0  ;;  %v3117_v9 = vmul.f32 0.01, %v3053_v6  ;;  %v7677_v29 = vadd.f32 %v2478_v5, %v2403_v2  ;;  %v2353_v5 = vmul.f32 1.442695, %v7621_v32  ;;  %v6145_v32 = vld [vmem:[%s6285_s18 + $0x60] sm:$0xff] }
 0x5e2   : > { %v2642_v2 = vsel %vm625_vm3, %v7689_v17, 0.0  ;;  %v2630_v54 = vsel %vm625_vm3, %v7693_v34, 0.0 }
 0x5e3   : > { %v3149_v0 = vsel %vm3085_vm6, %v3053_v6, %v3117_v9  ;;  %5902 = vpow2.f32 %v2353_v5 }
 0x5e4   : > { %v2961_v39 = vpop.f32.mrf.mxu2  ;;  %5647 = vmatmul.msk.f32.gmra.mxu0 %vm983_vm5, %v3149_v0  ;;  %v2293_v0 = vpop.f32.mrf.mxu1 }
 0x5e5   : > { %v2962_v37 = vadd.f32 %v2961_v39, %v2749_v22  ;;  %v2355_v39 = vmul.f32 1.442695, %v7572_v41  ;;  %v2357_v41 = vmul.f32 1.442695, %v7611_v12  ;;  %v2636_v12 = vsel %vm625_vm3, %v7675_v31, 0.0 }
 0x5e7   : > { %v3054_v26 = vadd.f32 %v7589_v40, %v2962_v37  ;;  %2628 = vadd.xlane.f32.xlu2 %v2627_v1  ;;  %2491 = vrot.lane.b32.xlu0 %v7675_v31, %s6211_s22  ;;  %v2758_v9 = vpop.f32.mrf.mxu3  ;;  %5904 = vpow2.f32 %v2355_v39 }
 0x5e8   : > { %5612 = vmatmul.msk.f32.gmra.mxu2 %vm625_vm3, %v7677_v29  ;;  %5600 = vmatmul.msk.f32.gmra.mxu3 %vm411_vm2, %v7309_v19  ;;  %5906 = vpow2.f32 %v2357_v41 }
 0x5e9   : > { %vm3086_vm7 = vcmp.gt.f32.partialorder %v3054_v26, 0.0  ;;  %v3118_v61 = vmul.f32 0.01, %v3054_v26  ;;  %v5903_v37 = vpop.eup %5902 }
 0x5eb   : > { %v3150_v22 = vsel %vm3086_vm7, %v3054_v26, %v3118_v61  ;;  %v2405_v26 = vmul.f32 %v6145_v32, %v5903_v37  ;;  %v7740_v32 = vadd.f32 %v7332_v3, %v2293_v0 }
 0x5ec   : > { %v2964_v16 = vpop.f32.mrf.mxu2  ;;  %5648 = vmatmul.msk.f32.gmra.mxu0 %vm983_vm5, %v3150_v22  ;;  %v2296_v19 = vpop.f32.mrf.mxu1 }
 0x5ed   : > { %v2965_v36 = vadd.f32 %v2964_v16, %v2752_v14  ;;  %v5905_v30 = vpop.eup %5904  ;;  %v2645_v0 = vsel %vm625_vm3, %v7740_v32, 0.0 }
 0x5ee   : > { %v5907_v37 = vpop.eup %5906 }
 0x5ef   : > { %v3055_v6 = vadd.f32 %v7589_v40, %v2965_v36  ;;  %2495 = vrot.lane.b32.xlu0 %v7689_v17, %s6211_s22 }
 0x5f0   : > { %5613 = vmatmul.msk.f32.gmra.mxu2 %vm625_vm3, %v7695_v13  ;;  %2487 = vrot.lane.b32.xlu1 %v7693_v34, %s6211_s22 }
 0x5f1   : > { %vm3087_vm8 = vcmp.gt.f32.partialorder %v3055_v6, 0.0  ;;  %v3119_v11 = vmul.f32 0.01, %v3055_v6 }
 0x5f3   : > { %v3151_v14 = vsel %vm3087_vm8, %v3055_v6, %v3119_v11  ;;  %v6146_v11 = vld [vmem:[%s6285_s18 + $0x68] sm:$0xff] }
 0x5f4   : > { %5649 = vmatmul.msk.f32.gmra.mxu0 %vm983_vm5, %v3151_v14  ;;  %v2299_v6 = vpop.f32.mrf.mxu1  ;;  %v2406_v14 = vmul.f32 %v6146_v11, %v5905_v30  ;;  %v7755_v11 = vadd.f32 %v7332_v3, %v7668_v45 }
 0x5ff   : > { %2489 = vrot.lane.b32.xlu2 %v7644_v49, %s6211_s22 }
 0x607   : > { %v7712_v59 = vpop.xlane.xlu1 %2613 }
 0x608   : > { %9820 = vst [vmem:[#allocation68_spill] sm:$0xff] %v7712_v59  ;;  %v7728_v16 = vpop.xlane.xlu0 %2625 }
 0x609   : > { %9822 = vst [vmem:[#allocation70_spill] sm:$0xff] %v7728_v16 }
 0x619   : > { %2643 = vadd.xlane.f32.xlu0 %v2642_v2  ;;  %v7719_v1 = vpop.xlane.xlu2 %2619 }
 0x61a   : > { %2631 = vadd.xlane.f32.xlu1 %v2630_v54  ;;  %9821 = vst [vmem:[#allocation69_spill] sm:$0xff] %v7719_v1 }
 0x61f   : > { %v2482_v50 = vpop.permute.xlu1 %2481  ;;  %v2967_v61 = vpop.f32.mrf.mxu2 }
 0x620   : > { %v7722_v28 = vadd.f32 %v2482_v50, %v2405_v26  ;;  %v2968_v46 = vadd.f32 %v2967_v61, %v2755_v63  ;;  %v7743_v26 = vadd.f32 %v7332_v3, %v2296_v19  ;;  %v2486_v61 = vpop.permute.xlu0 %2485 }
 0x621   : > { %v2484_v36 = vpop.permute.xlu2 %2483 }
 0x622   : > { %v3056_v22 = vadd.f32 %v7589_v40, %v2968_v46  ;;  %5614 = vmatmul.msk.f32.gmra.mxu2 %vm625_vm3, %v7722_v28  ;;  %v7734_v63 = vadd.f32 %v2484_v36, %v2406_v14  ;;  %v6147_v46 = vld [vmem:[%s6285_s18 + $0x70] sm:$0xff] }
 0x623   : > { %v2407_v41 = vmul.f32 %v6147_v46, %v5907_v37  ;;  %v2639_v46 = vsel %vm625_vm3, %v7755_v11, 0.0 }
 0x624   : > { %vm3088_vm9 = vcmp.gt.f32.partialorder %v3056_v22, 0.0  ;;  %v3120_v62 = vmul.f32 0.01, %v3056_v22 }
 0x625   : > { %v7751_v36 = vadd.f32 %v2486_v61, %v2407_v41 }
 0x626   : > { %v3152_v5 = vsel %vm3088_vm9, %v3056_v22, %v3120_v62  ;;  %v2302_v62 = vpop.f32.mrf.mxu1 }
 0x627   : > { %v2970_v2 = vpop.f32.mrf.mxu2  ;;  %5650 = vmatmul.msk.f32.gmra.mxu0 %vm983_vm5, %v3152_v5  ;;  %9823 = vst [vmem:[#allocation71_spill] sm:$0xff] %v7751_v36  ;;  %v7761_v5 = vadd.f32 %v7332_v3, %v2299_v6 }
 0x628   : > { %v2971_v39 = vadd.f32 %v2970_v2, %v2758_v9  ;;  %2637 = vadd.xlane.f32.xlu2 %v2636_v12  ;;  %v2761_v9 = vpop.f32.mrf.mxu3  ;;  %v7764_v2 = vadd.f32 %v7332_v3, %v2302_v62 }
 0x629   : > { %v2373_v21 = vmul.f32 1.442695, %v7761_v5 }
 0x62a   : > { %v3057_v54 = vadd.f32 %v7589_v40, %v2971_v39  ;;  %5615 = vmatmul.msk.f32.gmra.mxu2 %vm625_vm3, %v7734_v63  ;;  %v2654_v39 = vsel %vm625_vm3, %v7764_v2, 0.0 }
 0x62c   : > { %vm3089_vm10 = vcmp.gt.f32.partialorder %v3057_v54, 0.0  ;;  %v3121_v50 = vmul.f32 0.01, %v3057_v54 }
 0x62d   : > { %2499 = vrot.lane.b32.xlu0 %v7743_v26, %s6211_s22 }
 0x62e   : > { %v3153_v22 = vsel %vm3089_vm10, %v3057_v54, %v3121_v50  ;;  %v7773_v6 = vpop.f32.mrf.mxu1  ;;  %v2359_v50 = vmul.f32 1.442695, %v7693_v34 }
 0x62f   : > { %v2973_v30 = vpop.f32.mrf.mxu2  ;;  %5651 = vmatmul.msk.f32.gmra.mxu0 %vm983_vm5, %v3153_v22 }
 0x630   : > { %v2974_v19 = vadd.f32 %v2973_v30, %v2761_v9  ;;  %2646 = vadd.xlane.f32.xlu2 %v2645_v0  ;;  %5908 = vpow2.f32 %v2359_v50  ;;  %v2361_v9 = vmul.f32 1.442695, %v7644_v49  ;;  %v2764_v41 = vpop.f32.mrf.mxu3  ;;  %v6148_v0 = vld [vmem:[%s6285_s18 + $0x78] sm:$0xff] }
 0x632   : > { %v3058_v14 = vadd.f32 %v7589_v40, %v2974_v19  ;;  %5616 = vmatmul.msk.f32.gmra.mxu2 %vm625_vm3, %v7751_v36  ;;  %5910 = vpow2.f32 %v2361_v9 }
 0x633   : > { %2493 = vrot.lane.b32.xlu1 %v7755_v11, %s6211_s22 }
 0x634   : > { %vm3090_vm11 = vcmp.gt.f32.partialorder %v3058_v14, 0.0  ;;  %v3122_v12 = vmul.f32 0.01, %v3058_v14 }
 0x635   : > { %2501 = vrot.lane.b32.xlu0 %v7761_v5, %s6211_s22 }
 0x636   : > { %v3154_v45 = vsel %vm3090_vm11, %v3058_v14, %v3122_v12  ;;  %v2308_v54 = vpop.f32.mrf.mxu1  ;;  %v5909_v22 = vpop.eup %5908  ;;  %v2363_v14 = vmul.f32 1.442695, %v7675_v31 }
 0x637   : > { %5652 = vmatmul.msk.f32.gmra.mxu0 %vm983_vm5, %v3154_v45  ;;  %v7776_v37 = vadd.f32 %v7332_v3, %v2308_v54  ;;  %v2651_v3 = vsel %vm625_vm3, %v7761_v5, 0.0  ;;  %v2408_v34 = vmul.f32 %v6148_v0, %v5909_v22  ;;  %v6149_v22 = vld [vmem:[%s6285_s18 + $0x80] sm:$0xff] }
 0x638   : > { %2655 = vadd.xlane.f32.xlu2 %v2654_v39  ;;  %v5911_v45 = vpop.eup %5910  ;;  %v2767_v54 = vpop.f32.mrf.mxu3  ;;  %5912 = vpow2.f32 %v2363_v14 }
 0x646   : > { %v7797_v50 = vpop.xlane.xlu0 %2634 }
 0x647   : > { %9827 = vst [vmem:[#allocation75_spill] sm:$0xff] %v7797_v50  ;;  %v2311_v50 = vpop.f32.mrf.mxu1 }
 0x64a   : > { %v7781_v61 = vpop.xlane.xlu1 %2622 }
 0x64b   : > { %9824 = vst [vmem:[#allocation72_spill] sm:$0xff] %v7781_v61 }
 0x650   : > { %2507 = vrot.lane.b32.xlu2 %v7776_v37, %s6211_s22 }
 0x659   : > { %v2492_v14 = vpop.permute.xlu0 %2491 }
 0x65a   : > { %v7786_v30 = vpop.xlane.xlu2 %2628 }
 0x65b   : > { %9825 = vst [vmem:[#allocation73_spill] sm:$0xff] %v7786_v30  ;;  %v6150_v30 = vld [vmem:[%s6285_s18 + $0x88] sm:$0xff] }
 0x65d   : > { %2640 = vadd.xlane.f32.xlu1 %v2639_v46 }
 0x65f   : > { %2652 = vadd.xlane.f32.xlu0 %v2651_v3  ;;  %v2409_v3 = vmul.f32 %v6149_v22, %v5911_v45  ;;  %v2770_v45 = vpop.f32.mrf.mxu3 }
 0x662   : > { %v2488_v62 = vpop.permute.xlu1 %2487  ;;  %v2976_v49 = vpop.f32.mrf.mxu2 }
 0x663   : > { %v7791_v19 = vadd.f32 %v2488_v62, %v2408_v34  ;;  %v2977_v12 = vadd.f32 %v2976_v49, %v2764_v41  ;;  %v2490_v9 = vpop.permute.xlu2 %2489  ;;  %v5913_v62 = vpop.eup %5912 }
 0x664   : > { %v7800_v34 = vadd.f32 %v2490_v9, %v2409_v3  ;;  %v2410_v16 = vmul.f32 %v6150_v30, %v5913_v62 }
 0x665   : > { %9826 = vst [vmem:[#allocation74_spill] sm:$0xff] %v7791_v19  ;;  %5617 = vmatmul.msk.f32.gmra.mxu2 %vm625_vm3, %v7791_v19  ;;  %v3059_v39 = vadd.f32 %v7589_v40, %v2977_v12  ;;  %v5746_v19 = vld [vmem:[%s9696_s5 + $0xc8] sm:$0xff] }
 0x666   : > { %9828 = vst [vmem:[#allocation76_spill] sm:$0xff] %v7800_v34  ;;  %v7807_v9 = vadd.f32 %v2492_v14, %v2410_v16  ;;  %v2365_v14 = vmul.f32 1.442695, %v7755_v11 }
 0x667   : > { %vm3091_vm12 = vcmp.gt.f32.partialorder %v3059_v39, 0.0  ;;  %v3123_v46 = vmul.f32 0.01, %v3059_v39 }
 0x668   : > { %9829 = vst [vmem:[#allocation77_spill] sm:$0xff] %v7807_v9  ;;  %5914 = vpow2.f32 %v2365_v14 }
 0x669   : > { %v3155_v0 = vsel %vm3091_vm12, %v3059_v39, %v3123_v46 }
 0x66a   : > { %5653 = vmatmul.msk.f32.gmra.mxu0 %vm983_vm5, %v3155_v0 }
 0x66b   : > { %v2979_v31 = vpop.f32.mrf.mxu2 }
 0x66c   : > { %v2980_v41 = vadd.f32 %v2979_v31, %v2767_v54  ;;  %v7815_v54 = vld [vmem:[%s9697_s6 + $0x1] ss:$0 sm:$0xff] }
 0x66d   : > { %5618 = vmatmul.msk.f32.gmra.mxu2 %vm625_vm3, %v7800_v34  ;;  %v7818_v22 = vadd.f32 %v7815_v54, %v2311_v50  ;;  %v7829_v31 = vadd.f32 %v7815_v54, %v7773_v6 }
 0x66e   : > { %v3060_v49 = vadd.f32 %v7589_v40, %v2980_v41  ;;  %v2314_v41 = vpop.f32.mrf.mxu1 }
 0x66f   : > { %v2663_v30 = vsel %vm625_vm3, %v7818_v22, 0.0  ;;  %v7835_v62 = vadd.f32 %v7815_v54, %v2314_v41 }
 0x670   : > { %vm3092_vm13 = vcmp.gt.f32.partialorder %v3060_v49, 0.0  ;;  %v3124_v12 = vmul.f32 0.01, %v3060_v49 }
 0x672   : > { %v3156_v39 = vsel %vm3092_vm13, %v3060_v49, %v3124_v12 }
 0x673   : > { %v2982_v46 = vpop.f32.mrf.mxu2  ;;  %5654 = vmatmul.msk.f32.gmra.mxu0 %vm983_vm5, %v3156_v39  ;;  %2503 = vrot.lane.b32.xlu0 %v7764_v2, %s6211_s22  ;;  %v2648_v39 = vsel %vm625_vm3, %v7743_v26, 0.0 }
 0x674   : > { %v2983_v3 = vadd.f32 %v2982_v46, %v2770_v45  ;;  %v2367_v45 = vmul.f32 1.442695, %v7689_v17  ;;  %v2773_v46 = vpop.f32.mrf.mxu3  ;;  %v2657_v17 = vsel %vm625_vm3, %v7829_v31, 0.0 }
 0x675   : > { %5619 = vmatmul.msk.f32.gmra.mxu2 %vm625_vm3, %v7807_v9 }
 0x676   : > { %v3061_v16 = vadd.f32 %v7589_v40, %v2983_v3  ;;  %2497 = vrot.lane.b32.xlu1 %v7740_v32, %s6211_s22  ;;  %v2317_v49 = vpop.f32.mrf.mxu1  ;;  %v5915_v3 = vpop.eup %5914  ;;  %5916 = vpow2.f32 %v2367_v45 }
 0x677   : > { %v7841_v6 = vadd.f32 %v7815_v54, %v2317_v49 }
 0x678   : > { %vm3093_vm14 = vcmp.gt.f32.partialorder %v3061_v16, 0.0  ;;  %v3125_v0 = vmul.f32 0.01, %v3061_v16 }
 0x679   : > { %2664 = vadd.xlane.f32.xlu2 %v2663_v30  ;;  %v2660_v30 = vsel %vm625_vm3, %v7776_v37, 0.0  ;;  %v2385_v53 = vmul.f32 1.442695, %v7841_v6 }
 0x67a   : > { %v3157_v50 = vsel %vm3093_vm14, %v3061_v16, %v3125_v0  ;;  %v6152_v16 = vld [vmem:[%s6285_s18 + $0x90] sm:$0xff] }
 0x67b   : > { %5655 = vmatmul.msk.f32.gmra.mxu0 %vm983_vm5, %v3157_v50  ;;  %2505 = vrot.lane.b32.xlu0 %v7829_v31, %s6211_s22  ;;  %v2411_v11 = vmul.f32 %v6152_v16, %v5915_v3  ;;  %v2496_v16 = vpop.permute.xlu0 %2495 }
 0x67c   : > { %v5917_v45 = vpop.eup %5916 }
 0x67e   : > { %v2320_v61 = vpop.f32.mrf.mxu1 }
 0x68d   : > { %v7845_v12 = vpop.xlane.xlu1 %2631 }
 0x68e   : > { %9830 = vst [vmem:[#allocation78_spill] sm:$0xff] %v7845_v12  ;;  %v6153_v12 = vld [vmem:[%s6285_s18 + $0x98] sm:$0xff] }
 0x691   : > { %2511 = vrot.lane.b32.xlu2 %v7835_v62, %s6211_s22 }
 0x699   : > { %2513 = vrot.lane.b32.xlu2 %v7841_v6, %s6211_s22 }
 0x6a0   : > { %2649 = vadd.xlane.f32.xlu1 %v2648_v39  ;;  %v2776_v39 = vpop.f32.mrf.mxu3 }
 0x6a5   : > { %v2494_v0 = vpop.permute.xlu1 %2493  ;;  %2661 = vadd.xlane.f32.xlu0 %v2660_v30  ;;  %v2985_v50 = vpop.f32.mrf.mxu2  ;;  %v2412_v30 = vmul.f32 %v6153_v12, %v5917_v45 }
 0x6a6   : > { %v7853_v41 = vadd.f32 %v2494_v0, %v2411_v11  ;;  %v2986_v49 = vadd.f32 %v2985_v50, %v2773_v46  ;;  %v2669_v11 = vsel %vm625_vm3, %v7841_v6, 0.0 }
 0x6a7   : > { %v7864_v50 = vadd.f32 %v2496_v16, %v2412_v30  ;;  %v2323_v30 = vpop.f32.mrf.mxu1 }
 0x6a8   : > { %9831 = vst [vmem:[#allocation79_spill] sm:$0xff] %v7853_v41  ;;  %v3062_v14 = vadd.f32 %v7589_v40, %v2986_v49  ;;  %2658 = vadd.xlane.f32.xlu1 %v2657_v17  ;;  %5620 = vmatmul.msk.f32.gmra.mxu2 %vm625_vm3, %v7853_v41  ;;  %v2779_v12 = vpop.f32.mrf.mxu3 }
 0x6a9   : > { %9832 = vst [vmem:[#allocation80_spill] sm:$0xff] %v7864_v50 }
 0x6aa   : > { %vm3094_vm15 = vcmp.gt.f32.partialorder %v3062_v14, 0.0  ;;  %v3126_v3 = vmul.f32 0.01, %v3062_v14 }
 0x6ac   : > { %v3158_v46 = vsel %vm3094_vm15, %v3062_v14, %v3126_v3 }
 0x6ad   : > { %2670 = vadd.xlane.f32.xlu0 %v2669_v11  ;;  %v2988_v0 = vpop.f32.mrf.mxu2  ;;  %5656 = vmatmul.msk.f32.gmra.mxu0 %vm983_vm5, %v3158_v46  ;;  %v7872_v11 = vadd.f32 %v7815_v54, %v2320_v61  ;;  %v7876_v46 = vadd.f32 %v7815_v54, %v2323_v30  ;;  %v3305_v61 = vpop.f32.mrf.mxu0 }
 0x6ae   : > { %v2989_v49 = vadd.f32 %v2988_v0, %v2776_v39 }
 0x6b0   : > { %v3063_v17 = vadd.f32 %v7589_v40, %v2989_v49  ;;  %5621 = vmatmul.msk.f32.gmra.mxu2 %vm625_vm3, %v7864_v50 }
 0x6b2   : > { %vm3095_vm4 = vcmp.gt.f32.partialorder %v3063_v17, 0.0  ;;  %v3127_v1 = vmul.f32 0.01, %v3063_v17 }
 0x6b4   : > { %v3159_v45 = vsel %vm3095_vm4, %v3063_v17, %v3127_v1  ;;  %v7881_v1 = vld [vmem:[%s9697_s6 + $0x2] ss:$0 sm:$0xff] }
 0x6b5   : > { %v2991_v58 = vpop.f32.mrf.mxu2  ;;  %5657 = vmatmul.msk.f32.gmra.mxu0 %vm983_vm5, %v3159_v45  ;;  %v7890_v0 = vadd.f32 %v7881_v1, %v3305_v61  ;;  %v3308_v17 = vpop.f32.mrf.mxu0 }
 0x6b6   : > { %v2992_v14 = vadd.f32 %v2991_v58, %v2779_v12  ;;  %v2672_v58 = vsel %vm625_vm3, %v7872_v11, 0.0  ;;  %v7895_v12 = vadd.f32 %v7881_v1, %v3308_v17 }
 0x6b7   : > { %v3657_v49 = vsel %vm625_vm3, %v7890_v0, 0.0 }
 0x6b8   : > { %v3064_v3 = vadd.f32 %v7589_v40, %v2992_v14  ;;  %v3403_v45 = vmul.f32 1.442695, %v7895_v12  ;;  %v2369_v14 = vmul.f32 1.442695, %v7740_v32  ;;  %v6154_v32 = vld [vmem:[%s6285_s18 + $0xa0] sm:$0xff] }
 0x6ba   : > { %vm3096_vm6 = vcmp.gt.f32.partialorder %v3064_v3, 0.0  ;;  %v3128_v16 = vmul.f32 0.01, %v3064_v3  ;;  %5918 = vpow2.f32 %v3403_v45 }
 0x6bb   : > { %5920 = vpow2.f32 %v2369_v14 }
 0x6bc   : > { %v3160_v39 = vsel %vm3096_vm6, %v3064_v3, %v3128_v16  ;;  %v7899_v3 = vpop.xlane.xlu0 %2643 }
 0x6bd   : > { %5658 = vmatmul.msk.f32.gmra.mxu0 %vm983_vm5, %v3160_v39  ;;  %9833 = vst [vmem:[#allocation81_spill] sm:$0xff] %v7899_v3  ;;  %v2326_v39 = vpop.f32.mrf.mxu1  ;;  %v3311_v20 = vpop.f32.mrf.mxu0 }
 0x6be   : > { %v7906_v59 = vadd.f32 %v7815_v54, %v2326_v39 }
 0x6c0   : > { %v5919_v30 = vpop.eup %5918 }
 0x6c1   : > { %2509 = vrot.lane.b32.xlu1 %v7818_v22, %s6211_s22  ;;  %2517 = vrot.lane.b32.xlu0 %v7876_v46, %s6211_s22  ;;  %v5921_v17 = vpop.eup %5920 }
 0x6c2   : > { %2673 = vadd.xlane.f32.xlu2 %v2672_v58  ;;  %v2371_v58 = vmul.f32 1.442695, %v7743_v26  ;;  %v2413_v45 = vmul.f32 %v6154_v32, %v5921_v17  ;;  %v2678_v26 = vsel %vm625_vm3, %v7906_v59, 0.0  ;;  %v6155_v32 = vld [vmem:[%s6285_s18 + $0xa8] sm:$0xff] }
 0x6c4   : > { %v2500_v61 = vpop.permute.xlu0 %2499  ;;  %5922 = vpow2.f32 %v2371_v58 }
 0x6c5   : > { %5924 = vpow2.f32 %v2373_v21 }
 0x6ca   : > { %3658 = vadd.xlane.f32.xlu2 %v3657_v49  ;;  %v2782_v49 = vpop.f32.mrf.mxu3 }
 0x6cc   : > { %v2502_v39 = vpop.permute.xlu0 %2501 }
 0x6d0   : > { %v7901_v16 = vpop.xlane.xlu1 %2640 }
 0x6d1   : > { %9834 = vst [vmem:[#allocation82_spill] sm:$0xff] %v7901_v16  ;;  %v6169_v16 = vld [vmem:[%s6279_s15 + $0x10] sm:$0xff] }
 0x6d2   : > { %v2785_v58 = vpop.f32.mrf.mxu3 }
 0x6e2   : > { %3499 = vrot.lane.b32.xlu2 %v5919_v30, %s6210_s21  ;;  %v2666_v30 = vsel %vm625_vm3, %v7835_v62, 0.0 }
 0x6e8   : > { %v2498_v48 = vpop.permute.xlu1 %2497  ;;  %v2994_v14 = vpop.f32.mrf.mxu2 }
 0x6e9   : > { %v7909_v3 = vadd.f32 %v2498_v48, %v2413_v45  ;;  %v2995_v27 = vadd.f32 %v2994_v14, %v2782_v49  ;;  %v5923_v48 = vpop.eup %5922  ;;  %v7920_v49 = vadd.f32 %v7881_v1, %v3311_v20  ;;  %v7923_v14 = vpop.xlane.xlu2 %2637  ;;  %v2375_v20 = vmul.f32 1.442695, %v7764_v2 }
 0x6ea   : > { %v2414_v45 = vmul.f32 %v6155_v32, %v5923_v48  ;;  %9836 = vst [vmem:[#allocation84_spill] sm:$0xff] %v7923_v14  ;;  %v7934_v48 = vpop.xlane.xlu0 %2652  ;;  %v6156_v32 = vld [vmem:[%s6285_s18 + $0xb0] sm:$0xff] }
 0x6eb   : > { %9835 = vst [vmem:[#allocation83_spill] sm:$0xff] %v7909_v3  ;;  %2667 = vadd.xlane.f32.xlu1 %v2666_v30  ;;  %2679 = vadd.xlane.f32.xlu0 %v2678_v26  ;;  %v3065_v54 = vadd.f32 %v7589_v40, %v2995_v27  ;;  %v3663_v52 = vsel %vm625_vm3, %v7920_v49, 0.0  ;;  %5926 = vpow2.f32 %v2375_v20 }
 0x6ec   : > { %5622 = vmatmul.msk.f32.gmra.mxu2 %vm625_vm3, %v7909_v3  ;;  %v7926_v27 = vadd.f32 %v2500_v61, %v2414_v45  ;;  %9838 = vst [vmem:[#allocation86_spill] sm:$0xff] %v7934_v48  ;;  %v2788_v61 = vpop.f32.mrf.mxu3  ;;  %v3405_v48 = vmul.f32 1.442695, %v7920_v49 }
 0x6ed   : > { %vm3097_vm7 = vcmp.gt.f32.partialorder %v3065_v54, 0.0  ;;  %v3129_v17 = vmul.f32 0.01, %v3065_v54 }
 0x6ee   : > { %9837 = vst [vmem:[#allocation85_spill] sm:$0xff] %v7926_v27 }
 0x6ef   : > { %v3161_v5 = vsel %vm3097_vm7, %v3065_v54, %v3129_v17  ;;  %v5925_v54 = vpop.eup %5924 }
 0x6f0   : > { %v2997_v30 = vpop.f32.mrf.mxu2  ;;  %5659 = vmatmul.msk.f32.gmra.mxu0 %vm983_vm5, %v3161_v5  ;;  %v3314_v5 = vpop.f32.mrf.mxu0 }
 0x6f1   : > { %v2998_v26 = vadd.f32 %v2997_v30, %v2785_v58  ;;  %v2415_v58 = vmul.f32 %v6156_v32, %v5925_v54  ;;  %v7941_v14 = vpop.xlane.xlu2 %2646 }
 0x6f2   : > { %9840 = vst [vmem:[#allocation88_spill] sm:$0xff] %v7941_v14  ;;  %v2504_v54 = vpop.permute.xlu0 %2503 }
 0x6f3   : > { %3664 = vadd.xlane.f32.xlu0 %v3663_v52  ;;  %v3066_v21 = vadd.f32 %v7589_v40, %v2998_v26  ;;  %v7938_v52 = vadd.f32 %v2502_v39, %v2415_v58  ;;  %v2377_v26 = vmul.f32 1.442695, %v7829_v31  ;;  %v6157_v39 = vld [vmem:[%s6285_s18 + $0xb8] sm:$0xff]  ;;  %v2379_v58 = vmul.f32 1.442695, %v7776_v37  ;;  %v6158_v37 = vld [vmem:[%s6285_s18 + $0xc0] sm:$0xff] }
 0x6f4   : > { %5623 = vmatmul.msk.f32.gmra.mxu2 %vm625_vm3, %v7926_v27 }
 0x6f5   : > { %vm3098_vm8 = vcmp.gt.f32.partialorder %v3066_v21, 0.0  ;;  %v3130_v17 = vmul.f32 0.01, %v3066_v21  ;;  %9839 = vst [vmem:[#allocation87_spill] sm:$0xff] %v7938_v52  ;;  %5928 = vpow2.f32 %v2377_v26  ;;  %v7959_v26 = vadd.f32 %v7881_v1, %v3314_v5  ;;  %v6159_v5 = vld [vmem:[%s6285_s18 + $0xc8] sm:$0xff] }
 0x6f6   : > { %5930 = vpow2.f32 %v3405_v48 }
 0x6f7   : > { %v3162_v45 = vsel %vm3098_vm8, %v3066_v21, %v3130_v17  ;;  %v5927_v21 = vpop.eup %5926  ;;  %5932 = vpow2.f32 %v2379_v58 }
 0x6f8   : > { %v3000_v30 = vpop.f32.mrf.mxu2  ;;  %5660 = vmatmul.msk.f32.gmra.mxu0 %vm983_vm5, %v3162_v45  ;;  %v3317_v45 = vpop.f32.mrf.mxu0 }
 0x6f9   : > { %v3001_v2 = vadd.f32 %v3000_v30, %v2788_v61  ;;  %v2416_v61 = vmul.f32 %v6157_v39, %v5927_v21  ;;  %v7956_v48 = vpop.xlane.xlu2 %2655 }
 0x6fa   : > { %9842 = vst [vmem:[#allocation90_spill] sm:$0xff] %v7956_v48 }
 0x6fb   : > { %v3067_v20 = vadd.f32 %v7589_v40, %v3001_v2  ;;  %v7949_v31 = vadd.f32 %v2504_v54, %v2416_v61  ;;  %v5929_v30 = vpop.eup %5928 }
 0x6fc   : > { %5624 = vmatmul.msk.f32.gmra.mxu2 %vm625_vm3, %v7938_v52  ;;  %v5931_v2 = vpop.eup %5930  ;;  %v2417_v21 = vmul.f32 %v6158_v37, %v5929_v30 }
 0x6fd   : > { %vm3099_vm9 = vcmp.gt.f32.partialorder %v3067_v20, 0.0  ;;  %v3131_v17 = vmul.f32 0.01, %v3067_v20  ;;  %9841 = vst [vmem:[#allocation89_spill] sm:$0xff] %v7949_v31  ;;  %v5933_v39 = vpop.eup %5932 }
 0x6fe   : > { %v2418_v48 = vmul.f32 %v6159_v5, %v5933_v39  ;;  %v2791_v39 = vpop.f32.mrf.mxu3 }
 0x6ff   : > { %v3163_v32 = vsel %vm3099_vm9, %v3067_v20, %v3131_v17  ;;  %v2506_v20 = vpop.permute.xlu0 %2505  ;;  %v3666_v17 = vsel %vm625_vm3, %v7959_v26, 0.0 }
 0x700   : > { %5661 = vmatmul.msk.f32.gmra.mxu0 %vm983_vm5, %v3163_v32  ;;  %v7963_v54 = vadd.f32 %v2506_v20, %v2417_v21  ;;  %v3320_v61 = vpop.f32.mrf.mxu0 }
 0x701   : > { %v2508_v32 = vpop.permute.xlu2 %2507  ;;  %v7989_v14 = vadd.f32 %v7881_v1, %v3320_v61 }
 0x702   : > { %9843 = vst [vmem:[#allocation91_spill] sm:$0xff] %v7963_v54  ;;  %v7970_v58 = vadd.f32 %v2508_v32, %v2418_v48  ;;  %v2381_v48 = vmul.f32 1.442695, %v7818_v22 }
 0x704   : > { %5625 = vmatmul.msk.f32.gmra.mxu2 %vm625_vm3, %v7949_v31  ;;  %2515 = vrot.lane.b32.xlu1 %v7872_v11, %s6211_s22  ;;  %9844 = vst [vmem:[#allocation92_spill] sm:$0xff] %v7970_v58 }
 0x707   : > { %3501 = vrot.lane.b32.xlu0 %v5931_v2, %s6210_s21  ;;  %v7973_v2 = vadd.f32 %v7881_v1, %v3317_v45 }
 0x708   : > { %v7977_v30 = vpop.f32.mrf.mxu0 }
 0x709   : > { %v3409_v20 = vmul.f32 1.442695, %v7973_v2 }
 0x70b   : > { %3667 = vadd.xlane.f32.xlu2 %v3666_v17  ;;  %5934 = vpow2.f32 %v3409_v20 }
 0x70c   : > { %5626 = vmatmul.msk.f32.gmra.mxu2 %vm625_vm3, %v7963_v54  ;;  %5936 = vpow2.f32 %v2381_v48  ;;  %v2383_v54 = vmul.f32 1.442695, %v7835_v62 }
 0x70e   : > { %5938 = vpow2.f32 %v2383_v54 }
 0x70f   : > { %5940 = vpow2.f32 %v2385_v53  ;;  %v6162_v53 = vld [vmem:[%s6285_s18 + $0xe0] sm:$0xff] }
 0x710   : > { %v7980_v37 = vpop.f32.mrf.mxu0 }
 0x711   : > { %v5935_v17 = vpop.eup %5934 }
 0x712   : > { %v5937_v48 = vpop.eup %5936 }
 0x713   : > { %v7982_v21 = vpop.xlane.xlu1 %2649 }
 0x714   : > { %5627 = vmatmul.msk.f32.gmra.mxu2 %vm625_vm3, %v7970_v58  ;;  %9845 = vst [vmem:[#allocation93_spill] sm:$0xff] %v7982_v21  ;;  %v7992_v58 = vpop.xlane.xlu2 %2664 }
 0x715   : > { %9847 = vst [vmem:[#allocation95_spill] sm:$0xff] %v7992_v58 }
 0x718   : > { %v3329_v45 = vpop.f32.mrf.mxu0 }
 0x71b   : > { %v7986_v32 = vpop.xlane.xlu1 %2658 }
 0x71c   : > { %9846 = vst [vmem:[#allocation94_spill] sm:$0xff] %v7986_v32  ;;  %v3672_v32 = vsel %vm625_vm3, %v7989_v14, 0.0 }
 0x720   : > { %v3332_v61 = vpop.f32.mrf.mxu0 }
 0x723   : > { %3505 = vrot.lane.b32.xlu2 %v5935_v17, %s6210_s21  ;;  %v2675_v17 = vsel %vm625_vm3, %v7876_v46, 0.0 }
 0x72b   : > { %v3003_v5 = vpop.f32.mrf.mxu2 }
 0x72c   : > { %v3004_v20 = vadd.f32 %v3003_v5, %v2791_v39  ;;  %v2794_v39 = vpop.f32.mrf.mxu3  ;;  %v6160_v5 = vld [vmem:[%s6285_s18 + $0xd0] sm:$0xff] }
 0x72d   : > { %v2419_v62 = vmul.f32 %v6160_v5, %v5937_v48  ;;  %v3335_v48 = vpop.f32.mrf.mxu0 }
 0x72e   : > { %v3068_v22 = vadd.f32 %v7589_v40, %v3004_v20  ;;  %2676 = vadd.xlane.f32.xlu1 %v2675_v17  ;;  %v8002_v20 = vadd.f32 %v7881_v1, %v3329_v45  ;;  %v8017_v6 = vadd.f32 %v7881_v1, %v3335_v48 }
 0x730   : > { %vm3100_vm10 = vcmp.gt.f32.partialorder %v3068_v22, 0.0  ;;  %v3132_v31 = vmul.f32 0.01, %v3068_v22  ;;  %v3421_v5 = vmul.f32 1.442695, %v8017_v6 }
 0x731   : > { %3673 = vadd.xlane.f32.xlu0 %v3672_v32  ;;  %v5939_v32 = vpop.eup %5938 }
 0x732   : > { %v3164_v52 = vsel %vm3100_vm10, %v3068_v22, %v3132_v31  ;;  %v2512_v31 = vpop.permute.xlu2 %2511  ;;  %v3681_v22 = vsel %vm625_vm3, %v8002_v20, 0.0  ;;  %5942 = vpow2.f32 %v3421_v5 }
 0x733   : > { %v2510_v58 = vpop.permute.xlu1 %2509  ;;  %v3006_v27 = vpop.f32.mrf.mxu2  ;;  %5662 = vmatmul.msk.f32.gmra.mxu0 %vm983_vm5, %v3164_v52 }
 0x734   : > { %v8004_v17 = vadd.f32 %v2510_v58, %v2419_v62  ;;  %v3007_v21 = vadd.f32 %v3006_v27, %v2794_v39  ;;  %v6161_v58 = vld [vmem:[%s6285_s18 + $0xd8] sm:$0xff] }
 0x735   : > { %v2420_v45 = vmul.f32 %v6161_v58, %v5939_v32  ;;  %v3401_v32 = vmul.f32 1.442695, %v7890_v0 }
 0x736   : > { %9848 = vst [vmem:[#allocation96_spill] sm:$0xff] %v8004_v17  ;;  %v3069_v54 = vadd.f32 %v7589_v40, %v3007_v21  ;;  %5628 = vmatmul.msk.f32.gmra.mxu2 %vm625_vm3, %v8004_v17  ;;  %v5941_v21 = vpop.eup %5940 }
 0x737   : > { %v8014_v40 = vadd.f32 %v2512_v31, %v2420_v45  ;;  %v2421_v62 = vmul.f32 %v6162_v53, %v5941_v21  ;;  %v8030_v31 = vadd.f32 %v7881_v1, %v7977_v30  ;;  %5944 = vpow2.f32 %v3401_v32  ;;  %v2797_v53 = vpop.f32.mrf.mxu3  ;;  %v8052_v32 = vpop.xlane.xlu0 %2661 }
 0x738   : > { %vm3101_vm11 = vcmp.gt.f32.partialorder %v3069_v54, 0.0  ;;  %v3133_v52 = vmul.f32 0.01, %v3069_v54  ;;  %v5943_v58 = vpop.eup %5942  ;;  %9851 = vst [vmem:[#allocation99_spill] sm:$0xff] %v8052_v32 }
 0x739   : > { %3682 = vadd.xlane.f32.xlu0 %v3681_v22  ;;  %9849 = vst [vmem:[#allocation97_spill] sm:$0xff] %v8014_v40  ;;  %v3338_v22 = vpop.f32.mrf.mxu0 }
 0x73a   : > { %v3165_v27 = vsel %vm3101_vm11, %v3069_v54, %v3133_v52  ;;  %v2514_v39 = vpop.permute.xlu2 %2513  ;;  %v3675_v52 = vsel %vm625_vm3, %v8030_v31, 0.0 }
 0x73b   : > { %5663 = vmatmul.msk.f32.gmra.mxu0 %vm983_vm5, %v3165_v27  ;;  %v8024_v54 = vadd.f32 %v2514_v39, %v2421_v62  ;;  %v8038_v27 = vadd.f32 %v7881_v1, %v3332_v61  ;;  %v8048_v39 = vadd.f32 %v7881_v1, %v3338_v22  ;;  %v2387_v61 = vmul.f32 1.442695, %v7872_v11  ;;  %v8063_v11 = vld [vmem:[%s9695_s4 + $0x2] ss:$0 sm:$0xff] }
 0x73d   : > { %9850 = vst [vmem:[#allocation98_spill] sm:$0xff] %v8024_v54  ;;  %v5945_v45 = vpop.eup %5944  ;;  %v3684_v48 = vsel %vm625_vm3, %v8038_v27, 0.0  ;;  %v3423_v5 = vmul.f32 1.442695, %v8048_v39 }
 0x73e   : > { %5629 = vmatmul.msk.f32.gmra.mxu2 %vm625_vm3, %v8014_v40  ;;  %v2389_v40 = vmul.f32 1.442695, %v7876_v46 }
 0x73f   : > { %5946 = vpow2.f32 %v3423_v5 }
 0x740   : > { %5948 = vpow2.f32 %v2387_v61  ;;  %v8066_v61 = vpop.xlane.xlu0 %2670 }
 0x741   : > { %v8041_v30 = vpop.f32.mrf.mxu0  ;;  %5950 = vpow2.f32 %v2389_v40  ;;  %9853 = vst [vmem:[#allocation101_spill] sm:$0xff] %v8066_v61  ;;  %v3660_v61 = vsel %vm625_vm3, %v7895_v12, 0.0 }
 0x746   : > { %5630 = vmatmul.msk.f32.gmra.mxu2 %vm625_vm3, %v8024_v54 }
 0x747   : > { %2519 = vrot.lane.b32.xlu1 %v7906_v59, %s6211_s22 }
 0x749   : > { %v8045_v21 = vpop.f32.mrf.mxu0 }
 0x74c   : > { %3676 = vadd.xlane.f32.xlu2 %v3675_v52  ;;  %v5947_v52 = vpop.eup %5946 }
 0x74d   : > { %3517 = vrot.lane.b32.xlu0 %v5943_v58, %s6210_s21  ;;  %v2800_v58 = vpop.f32.mrf.mxu3  ;;  %v5949_v5 = vpop.eup %5948 }
 0x74f   : > { %3497 = vrot.lane.b32.xlu1 %v5945_v45, %s6210_s21 }
 0x751   : > { %v3347_v62 = vpop.f32.mrf.mxu0 }
 0x754   : > { %3685 = vadd.xlane.f32.xlu2 %v3684_v48 }
 0x755   : > { %v2803_v40 = vpop.f32.mrf.mxu3 }
 0x75e   : > { %v8055_v45 = vpop.xlane.xlu1 %2667 }
 0x75f   : > { %9852 = vst [vmem:[#allocation100_spill] sm:$0xff] %v8055_v45  ;;  %v6164_v45 = vld [vmem:[%s6285_s18 + $0xe8] sm:$0xff] }
 0x760   : > { %v2422_v32 = vmul.f32 %v6164_v45, %v5949_v5  ;;  %v8081_v45 = vadd.f32 %v7881_v1, %v3347_v62 }
 0x76c   : > { %3519 = vrot.lane.b32.xlu2 %v5947_v52, %s6210_s21 }
 0x76d   : > { %v8057_v48 = vpop.f32.mrf.mxu0 }
 0x76f   : > { %v3009_v22 = vpop.f32.mrf.mxu2 }
 0x770   : > { %v3010_v54 = vadd.f32 %v3009_v22, %v2797_v53  ;;  %v3690_v53 = vsel %vm625_vm3, %v8048_v39, 0.0 }
 0x772   : > { %v3070_v17 = vadd.f32 %v8063_v11, %v3010_v54 }
 0x774   : > { %vm3102_vm12 = vcmp.gt.f32.partialorder %v3070_v17, 0.0  ;;  %v3134_v52 = vmul.f32 0.01, %v3070_v17 }
 0x775   : > { %v8069_v3 = vpop.f32.mrf.mxu0 }
 0x776   : > { %v2516_v50 = vpop.permute.xlu1 %2515  ;;  %v3166_v46 = vsel %vm3102_vm12, %v3070_v17, %v3134_v52  ;;  %v5951_v17 = vpop.eup %5950  ;;  %v6165_v52 = vld [vmem:[%s6285_s18 + $0xf0] sm:$0xff] }
 0x777   : > { %v8073_v22 = vadd.f32 %v2516_v50, %v2422_v32  ;;  %v3012_v33 = vpop.f32.mrf.mxu2  ;;  %5664 = vmatmul.msk.f32.gmra.mxu0 %vm983_vm5, %v3166_v46  ;;  %3691 = vadd.xlane.f32.xlu0 %v3690_v53  ;;  %v2518_v32 = vpop.permute.xlu0 %2517  ;;  %v2423_v46 = vmul.f32 %v6165_v52, %v5951_v17  ;;  %v3407_v52 = vmul.f32 1.442695, %v7959_v26 }
 0x778   : > { %v3013_v54 = vadd.f32 %v3012_v33, %v2800_v58  ;;  %v3699_v33 = vsel %vm625_vm3, %v8081_v45, 0.0 }
 0x779   : > { %9854 = vst [vmem:[#allocation102_spill] sm:$0xff] %v8073_v22  ;;  %3661 = vadd.xlane.f32.xlu1 %v3660_v61  ;;  %5631 = vmatmul.msk.f32.gmra.mxu2 %vm625_vm3, %v8073_v22  ;;  %v8087_v58 = vadd.f32 %v2518_v32, %v2423_v46  ;;  %5952 = vpow2.f32 %v3407_v52 }
 0x77a   : > { %v3071_v50 = vadd.f32 %v8063_v11, %v3013_v54  ;;  %v2806_v54 = vpop.f32.mrf.mxu3 }
 0x77b   : > { %9855 = vst [vmem:[#allocation103_spill] sm:$0xff] %v8087_v58 }
 0x77c   : > { %vm3103_vm13 = vcmp.gt.f32.partialorder %v3071_v50, 0.0  ;;  %v3135_v5 = vmul.f32 0.01, %v3071_v50 }
 0x77d   : > { %v3356_v61 = vpop.f32.mrf.mxu0 }
 0x77e   : > { %v3167_v53 = vsel %vm3103_vm13, %v3071_v50, %v3135_v5  ;;  %v8093_v22 = vadd.f32 %v7881_v1, %v3356_v61 }
 0x77f   : > { %v3015_v41 = vpop.f32.mrf.mxu2  ;;  %5665 = vmatmul.msk.f32.gmra.mxu0 %vm983_vm5, %v3167_v53  ;;  %3700 = vadd.xlane.f32.xlu0 %v3699_v33 }
 0x780   : > { %v3016_v62 = vadd.f32 %v3015_v41, %v2803_v40  ;;  %v3708_v32 = vsel %vm625_vm3, %v8093_v22, 0.0 }
 0x781   : > { %5632 = vmatmul.msk.f32.gmra.mxu2 %vm625_vm3, %v8087_v58  ;;  %v5953_v58 = vpop.eup %5952 }
 0x782   : > { %v3072_v17 = vadd.f32 %v8063_v11, %v3016_v62  ;;  %v2809_v53 = vpop.f32.mrf.mxu3 }
 0x784   : > { %vm3104_vm14 = vcmp.gt.f32.partialorder %v3072_v17, 0.0  ;;  %v3136_v50 = vmul.f32 0.01, %v3072_v17 }
 0x786   : > { %v3168_v5 = vsel %vm3104_vm14, %v3072_v17, %v3136_v50  ;;  %v8104_v17 = vadd.f32 %v7881_v1, %v8041_v30 }
 0x787   : > { %v3018_v46 = vpop.f32.mrf.mxu2  ;;  %5666 = vmatmul.msk.f32.gmra.mxu0 %vm983_vm5, %v3168_v5  ;;  %3709 = vadd.xlane.f32.xlu0 %v3708_v32 }
 0x788   : > { %v3019_v41 = vadd.f32 %v3018_v46, %v2806_v54  ;;  %v3693_v54 = vsel %vm625_vm3, %v8104_v17, 0.0 }
 0x78a   : > { %v3073_v40 = vadd.f32 %v8063_v11, %v3019_v41  ;;  %v2812_v52 = vpop.f32.mrf.mxu3 }
 0x78c   : > { %vm3105_vm15 = vcmp.gt.f32.partialorder %v3073_v40, 0.0  ;;  %v3137_v33 = vmul.f32 0.01, %v3073_v40 }
 0x78e   : > { %v3169_v61 = vsel %vm3105_vm15, %v3073_v40, %v3137_v33 }
 0x78f   : > { %v3021_v62 = vpop.f32.mrf.mxu2  ;;  %5667 = vmatmul.msk.f32.gmra.mxu0 %vm983_vm5, %v3169_v61  ;;  %v8116_v61 = vadd.f32 %v7881_v1, %v8045_v21  ;;  %v6166_v21 = vld [vmem:[%s6285_s18 + $0xf8] sm:$0xff] }
 0x790   : > { %v3022_v50 = vadd.f32 %v3021_v62, %v2809_v53 }
 0x791   : > { %v3427_v62 = vmul.f32 1.442695, %v8116_v61 }
 0x792   : > { %v3074_v5 = vadd.f32 %v8063_v11, %v3022_v50  ;;  %3503 = vrot.lane.b32.xlu1 %v5953_v58, %s6210_s21  ;;  %v3425_v58 = vmul.f32 1.442695, %v8104_v17  ;;  %v2391_v50 = vmul.f32 1.442695, %v7906_v59 }
 0x794   : > { %vm3106_vm4 = vcmp.gt.f32.partialorder %v3074_v5, 0.0  ;;  %v3138_v32 = vmul.f32 0.01, %v3074_v5  ;;  %5954 = vpow2.f32 %v3425_v58  ;;  %v3669_v58 = vsel %vm625_vm3, %v7973_v2, 0.0 }
 0x795   : > { %3694 = vadd.xlane.f32.xlu2 %v3693_v54  ;;  %5956 = vpow2.f32 %v3427_v62 }
 0x796   : > { %v3170_v46 = vsel %vm3106_vm4, %v3074_v5, %v3138_v32  ;;  %5958 = vpow2.f32 %v2391_v50  ;;  %v3429_v32 = vmul.f32 1.442695, %v8081_v45 }
 0x797   : > { %v3024_v41 = vpop.f32.mrf.mxu2  ;;  %5668 = vmatmul.msk.f32.gmra.mxu0 %vm983_vm5, %v3170_v46 }
 0x798   : > { %v3025_v40 = vadd.f32 %v3024_v41, %v2812_v52  ;;  %v2815_v52 = vpop.f32.mrf.mxu3  ;;  %5960 = vpow2.f32 %v3429_v32 }
 0x79a   : > { %v3075_v30 = vadd.f32 %v8063_v11, %v3025_v40  ;;  %v5955_v5 = vpop.eup %5954 }
 0x79b   : > { %v5957_v46 = vpop.eup %5956 }
 0x79c   : > { %vm3107_vm6 = vcmp.gt.f32.partialorder %v3075_v30, 0.0  ;;  %v3139_v53 = vmul.f32 0.01, %v3075_v30  ;;  %v5959_v41 = vpop.eup %5958 }
 0x79d   : > { %v2424_v40 = vmul.f32 %v6166_v21, %v5959_v41 }
 0x79e   : > { %v3171_v33 = vsel %vm3107_vm6, %v3075_v30, %v3139_v53  ;;  %v5961_v62 = vpop.eup %5960 }
 0x79f   : > { %5669 = vmatmul.msk.f32.gmra.mxu0 %vm983_vm5, %v3171_v33 }
 0x7a1   : > { %v8121_v54 = vpop.xlane.xlu1 %2676 }
 0x7a2   : > { %9856 = vst [vmem:[#allocation104_spill] sm:$0xff] %v8121_v54 }
 0x7ad   : > { %3521 = vrot.lane.b32.xlu2 %v5955_v5, %s6210_s21  ;;  %v2818_v5 = vpop.f32.mrf.mxu3 }
 0x7b5   : > { %3523 = vrot.lane.b32.xlu2 %v5957_v46, %s6210_s21 }
 0x7b9   : > { %v2520_v30 = vpop.permute.xlu1 %2519  ;;  %v3027_v53 = vpop.f32.mrf.mxu2 }
 0x7ba   : > { %v8126_v59 = vadd.f32 %v2520_v30, %v2424_v40  ;;  %v3028_v33 = vadd.f32 %v3027_v53, %v2815_v52  ;;  %v2821_v30 = vpop.f32.mrf.mxu3 }
 0x7bc   : > { %9857 = vst [vmem:[#allocation105_spill] sm:$0xff] %v8126_v59  ;;  %v3076_v50 = vadd.f32 %v8063_v11, %v3028_v33  ;;  %3670 = vadd.xlane.f32.xlu1 %v3669_v58  ;;  %5633 = vmatmul.msk.f32.gmra.mxu2 %vm625_vm3, %v8126_v59  ;;  %v3411_v58 = vmul.f32 1.442695, %v7989_v14 }
 0x7bd   : > { %3525 = vrot.lane.b32.xlu2 %v5961_v62, %s6210_s21 }
 0x7be   : > { %vm3108_vm7 = vcmp.gt.f32.partialorder %v3076_v50, 0.0  ;;  %v3140_v32 = vmul.f32 0.01, %v3076_v50  ;;  %5962 = vpow2.f32 %v3411_v58  ;;  %v6167_v58 = vld [vmem:[%s6279_s15] sm:$0xff] }
 0x7c0   : > { %v3172_v46 = vsel %vm3108_vm7, %v3076_v50, %v3140_v32 }
 0x7c1   : > { %v3030_v41 = vpop.f32.mrf.mxu2  ;;  %5670 = vmatmul.msk.f32.gmra.mxu0 %vm983_vm5, %v3172_v46 }
 0x7c2   : > { %v3031_v52 = vadd.f32 %v3030_v41, %v2818_v5  ;;  %v3413_v5 = vmul.f32 1.442695, %v8030_v31 }
 0x7c4   : > { %v3077_v21 = vadd.f32 %v8063_v11, %v3031_v52  ;;  %v5963_v46 = vpop.eup %5962  ;;  %5964 = vpow2.f32 %v3413_v5  ;;  %v8145_v52 = vadd.f32 %v7881_v1, %v8057_v48  ;;  %v5677_v48 = vld [vmem:[%s9694_s3 + $0x18] sm:$0x3f] }
 0x7c5   : > { %5678 = vmatpush.msk.msra.mxu1 %vm508_vm0, %v5677_v48 }
 0x7c6   : > { %vm3109_vm8 = vcmp.gt.f32.partialorder %v3077_v21, 0.0  ;;  %v3141_v40 = vmul.f32 0.01, %v3077_v21  ;;  %5679 = vmatmul.msk.f32.vlgmr.msra.gmra.mxu1 %vm411_vm2, %v6167_v58 }
 0x7c8   : > { %v3173_v53 = vsel %vm3109_vm8, %v3077_v21, %v3141_v40  ;;  %v8147_v21 = vpop.f32.mrf.mxu0  ;;  %v8151_v40 = vpop.xlane.xlu2 %2673 }
 0x7c9   : > { %v3033_v33 = vpop.f32.mrf.mxu2  ;;  %5671 = vmatmul.msk.f32.gmra.mxu0 %vm983_vm5, %v3173_v53  ;;  %9858 = vst [vmem:[#allocation106_spill] sm:$0xff] %v8151_v40 }
 0x7ca   : > { %v3034_v62 = vadd.f32 %v3033_v33, %v2821_v30  ;;  %v5965_v41 = vpop.eup %5964  ;;  %v5676_v30 = vld [vmem:[%s9693_s2 + $0x6] sm:$0x3] }
 0x7cb   : > { %5711 = vmatpush.msk.msra.mxu3 %vm722_vm1, %v5676_v30  ;;  %v6168_v30 = vld [vmem:[%s6279_s15 + $0x8] sm:$0xff] }
 0x7cc   : > { %v3078_v54 = vadd.f32 %v8063_v11, %v3034_v62 }
 0x7ce   : > { %vm3110_vm9 = vcmp.gt.f32.partialorder %v3078_v54, 0.0  ;;  %v3142_v50 = vmul.f32 0.01, %v3078_v54  ;;  %5680 = vmatmul.msk.f32.gmra.mxu1 %vm411_vm2, %v6168_v30  ;;  %v8188_v30 = vpop.xlane.xlu0 %2679 }
 0x7cf   : > { %9860 = vst [vmem:[#allocation108_spill] sm:$0xff] %v8188_v30 }
 0x7d0   : > { %v3174_v32 = vsel %vm3110_vm9, %v3078_v54, %v3142_v50  ;;  %v3702_v54 = vsel %vm625_vm3, %v8145_v52, 0.0  ;;  %v8157_v53 = vpop.f32.mrf.mxu0  ;;  %v8163_v33 = vpop.xlane.xlu2 %3658 }
 0x7d1   : > { %5672 = vmatmul.msk.f32.gmra.mxu0 %vm983_vm5, %v3174_v32  ;;  %9859 = vst [vmem:[#allocation107_spill] sm:$0xff] %v8163_v33  ;;  %v3498_v50 = vpop.permute.xlu1 %3497  ;;  %v6177_v33 = vld [vmem:[%s6279_s15 + $0x50] sm:$0xff] }
 0x7d5   : > { %3507 = vrot.lane.b32.xlu1 %v5963_v46, %s6210_s21  ;;  %v3593_v46 = vmul.f32 %v3498_v50, %v6846_v38 }
 0x7d6   : > { %5681 = vmatmul.msk.f32.gmra.mxu1 %vm411_vm2, %v6169_v16 }
 0x7d7   : > { %v8177_v48 = vadd.f32 %v3593_v46, %v7890_v0 }
 0x7d8   : > { %v3500_v40 = vpop.permute.xlu2 %3499 }
 0x7d9   : > { %v3594_v16 = vmul.f32 %v3500_v40, %v6682_v25 }
 0x7dd   : > { %3509 = vrot.lane.b32.xlu1 %v5965_v41, %s6210_s21  ;;  %v2824_v41 = vpop.f32.mrf.mxu3 }
 0x7e5   : > { %v2827_v0 = vpop.f32.mrf.mxu3 }
 0x7e6   : > { %3703 = vadd.xlane.f32.xlu2 %v3702_v54  ;;  %v3431_v54 = vmul.f32 1.442695, %v8145_v52 }
 0x7e8   : > { %5966 = vpow2.f32 %v3431_v54 }
 0x7ee   : > { %v5967_v54 = vpop.eup %5966 }
 0x7f4   : > { %v3365_v62 = vpop.f32.mrf.mxu0 }
 0x7f5   : > { %v8168_v32 = vadd.f32 %v7881_v1, %v3365_v62 }
 0x7f7   : > { %v3717_v5 = vsel %vm625_vm3, %v8168_v32, 0.0 }
 0x7f8   : > { %3718 = vadd.xlane.f32.xlu0 %v3717_v5  ;;  %v8186_v5 = vadd.f32 %v7881_v1, %v7980_v37 }
 0x7fa   : > { %v3678_v37 = vsel %vm625_vm3, %v8186_v5, 0.0 }
 0x7fc   : > { %v8179_v58 = vpop.f32.mrf.mxu0  ;;  %v3036_v62 = vpop.f32.mrf.mxu2 }
 0x7fd   : > { %v3037_v59 = vadd.f32 %v3036_v62, %v2824_v41 }
 0x7fe   : > { %3937 = vrot.lane.b32.xlu2 %v8177_v48, %s6211_s22 }
 0x7ff   : > { %v3079_v38 = vadd.f32 %v8063_v11, %v3037_v59  ;;  %v8195_v59 = vpop.xlane.xlu2 %3667 }
 0x800   : > { %9861 = vst [vmem:[#allocation109_spill] sm:$0xff] %v8195_v59 }
 0x801   : > { %vm3111_vm0 = vcmp.gt.f32.partialorder %v3079_v38, 0.0  ;;  %v3143_v50 = vmul.f32 0.01, %v3079_v38 }
 0x803   : > { %v3175_v46 = vsel %vm3111_vm0, %v3079_v38, %v3143_v50  ;;  %v8202_v38 = vadd.f32 %v7881_v1, %v8069_v3  ;;  %v8212_v3 = vpop.xlane.xlu0 %3664 }
 0x804   : > { %v8192_v41 = vpop.f32.mrf.mxu0  ;;  %5673 = vmatmul.msk.f32.gmra.mxu0 %vm983_vm5, %v3175_v46  ;;  %v3039_v62 = vpop.f32.mrf.mxu2  ;;  %9862 = vst [vmem:[#allocation110_spill] sm:$0xff] %v8212_v3 }
 0x805   : > { %v3040_v18 = vadd.f32 %v3039_v62, %v2827_v0  ;;  %v3433_v30 = vmul.f32 1.442695, %v8202_v38  ;;  %v6170_v0 = vld [vmem:[%s6279_s15 + $0x18] sm:$0xff] }
 0x806   : > { %3527 = vrot.lane.b32.xlu2 %v5967_v54, %s6210_s21  ;;  %5682 = vmatmul.msk.f32.gmra.mxu1 %vm411_vm2, %v6170_v0  ;;  %v8210_v54 = vadd.f32 %v3594_v16, %v7895_v12  ;;  %v6171_v12 = vld [vmem:[%s6279_s15 + $0x20] sm:$0xff]  ;;  %v3415_v16 = vmul.f32 1.442695, %v8186_v5  ;;  %v6172_v0 = vld [vmem:[%s6279_s15 + $0x28] sm:$0xff] }
 0x807   : > { %3679 = vadd.xlane.f32.xlu1 %v3678_v37  ;;  %v3080_v50 = vadd.f32 %v8063_v11, %v3040_v18  ;;  %5968 = vpow2.f32 %v3433_v30  ;;  %v8220_v25 = vpop.permute.xlu2 %3505 }
 0x808   : > { %5970 = vpow2.f32 %v3415_v16 }
 0x809   : > { %vm3112_vm1 = vcmp.gt.f32.partialorder %v3080_v50, 0.0  ;;  %v3144_v46 = vmul.f32 0.01, %v3080_v50 }
 0x80b   : > { %v3176_v59 = vsel %vm3112_vm1, %v3080_v50, %v3144_v46  ;;  %v3502_v50 = vpop.permute.xlu0 %3501  ;;  %v3435_v46 = vmul.f32 1.442695, %v8093_v22 }
 0x80c   : > { %v3374_v62 = vpop.f32.mrf.mxu0  ;;  %5674 = vmatmul.msk.f32.gmra.mxu0 %vm983_vm5, %v3176_v59  ;;  %v3595_v30 = vmul.f32 %v3502_v50, %v6709_v57 }
 0x80d   : > { %v8215_v37 = vadd.f32 %v7881_v1, %v3374_v62  ;;  %v5969_v40 = vpop.eup %5968  ;;  %5972 = vpow2.f32 %v3435_v46  ;;  %v6174_v46 = vld [vmem:[%s6279_s15 + $0x38] sm:$0xff] }
 0x80e   : > { %3939 = vrot.lane.b32.xlu2 %v8210_v54, %s6211_s22  ;;  %5683 = vmatmul.msk.f32.gmra.mxu1 %vm411_vm2, %v6171_v12  ;;  %v8235_v62 = vadd.f32 %v3595_v30, %v7920_v49  ;;  %v5971_v12 = vpop.eup %5970  ;;  %v3419_v49 = vmul.f32 1.442695, %v8038_v27 }
 0x80f   : > { %v3726_v18 = vsel %vm625_vm3, %v8215_v37, 0.0  ;;  %v8228_v59 = vpop.xlane.xlu2 %3676 }
 0x810   : > { %3727 = vadd.xlane.f32.xlu0 %v3726_v18  ;;  %9863 = vst [vmem:[#allocation111_spill] sm:$0xff] %v8228_v59  ;;  %v3417_v18 = vmul.f32 1.442695, %v8002_v20 }
 0x812   : > { %5974 = vpow2.f32 %v3417_v18 }
 0x813   : > { %v5973_v16 = vpop.eup %5972  ;;  %5976 = vpow2.f32 %v3419_v49 }
 0x816   : > { %3529 = vrot.lane.b32.xlu2 %v5969_v40, %s6210_s21  ;;  %5684 = vmatmul.msk.f32.gmra.mxu1 %vm411_vm2, %v6172_v0  ;;  %v6173_v40 = vld [vmem:[%s6279_s15 + $0x30] sm:$0xff]  ;;  %v8252_v0 = vpop.f32.mrf.mxu0 }
 0x817   : > { %v8241_v57 = vpop.xlane.xlu2 %3685 }
 0x818   : > { %9864 = vst [vmem:[#allocation112_spill] sm:$0xff] %v8241_v57  ;;  %v5975_v50 = vpop.eup %5974  ;;  %v2830_v57 = vpop.f32.mrf.mxu3 }
 0x819   : > { %v5977_v18 = vpop.eup %5976 }
 0x81e   : > { %3941 = vrot.lane.b32.xlu2 %v8235_v62, %s6211_s22  ;;  %5685 = vmatmul.msk.f32.gmra.mxu1 %vm411_vm2, %v6173_v40  ;;  %v6175_v40 = vld [vmem:[%s6279_s15 + $0x40] sm:$0xff] }
 0x81f   : > { %v8248_v30 = vpop.permute.xlu2 %3519 }
 0x820   : > { %3511 = vrot.lane.b32.xlu1 %v5971_v12, %s6210_s21 }
 0x826   : > { %3531 = vrot.lane.b32.xlu2 %v5973_v16, %s6210_s21  ;;  %5686 = vmatmul.msk.f32.gmra.mxu1 %vm411_vm2, %v6174_v46  ;;  %v8259_v16 = vpop.f32.mrf.mxu0 }
 0x827   : > { %v8255_v12 = vpop.xlane.xlu2 %3694 }
 0x828   : > { %3513 = vrot.lane.b32.xlu1 %v5975_v50, %s6210_s21  ;;  %9865 = vst [vmem:[#allocation113_spill] sm:$0xff] %v8255_v12  ;;  %v6176_v50 = vld [vmem:[%s6279_s15 + $0x48] sm:$0xff] }
 0x82e   : > { %5687 = vmatmul.msk.f32.gmra.mxu1 %vm411_vm2, %v6175_v40 }
 0x82f   : > { %v8263_v49 = vpop.permute.xlu2 %3521 }
 0x830   : > { %3515 = vrot.lane.b32.xlu1 %v5977_v18, %s6210_s21 }
 0x836   : > { %5688 = vmatmul.msk.f32.gmra.mxu1 %vm411_vm2, %v6176_v50 }
 0x837   : > { %v3524_v34 = vpop.permute.xlu2 %3523 }
 0x83e   : > { %v3383_v46 = vpop.f32.mrf.mxu0  ;;  %5689 = vmatmul.msk.f32.gmra.mxu1 %vm411_vm2, %v6177_v33 }
 0x83f   : > { %v8266_v59 = vadd.f32 %v7881_v1, %v3383_v46  ;;  %v3042_v18 = vpop.f32.mrf.mxu2  ;;  %v6178_v46 = vld [vmem:[%s6279_s15 + $0x58] sm:$0xff] }
 0x840   : > { %v3043_v3 = vadd.f32 %v3042_v18, %v2830_v57  ;;  %v8278_v57 = vadd.f32 %v7881_v1, %v8147_v21  ;;  %v8288_v18 = vpop.permute.xlu2 %3525  ;;  %v6179_v21 = vld [vmem:[%s6279_s15 + $0x60] sm:$0xff] }
 0x841   : > { %v3735_v12 = vsel %vm625_vm3, %v8266_v59, 0.0 }
 0x842   : > { %v3081_v40 = vadd.f32 %v8063_v11, %v3043_v3  ;;  %3736 = vadd.xlane.f32.xlu0 %v3735_v12  ;;  %v3711_v33 = vsel %vm625_vm3, %v8278_v57, 0.0  ;;  %v3606_v12 = vmul.f32 %v3524_v34, %v6918_v10  ;;  %v3687_v10 = vsel %vm625_vm3, %v8017_v6, 0.0  ;;  %v6180_v34 = vld [vmem:[%s6279_s15 + $0x68] sm:$0xff] }
 0x844   : > { %vm3113_vm10 = vcmp.gt.f32.partialorder %v3081_v40, 0.0  ;;  %v3145_v50 = vmul.f32 0.01, %v3081_v40 }
 0x846   : > { %v8273_v42 = vpop.f32.mrf.mxu0  ;;  %v3177_v9 = vsel %vm3113_vm10, %v3081_v40, %v3145_v50  ;;  %5690 = vmatmul.msk.f32.gmra.mxu1 %vm411_vm2, %v6178_v46  ;;  %v8294_v40 = vadd.f32 %v3606_v12, %v8116_v61  ;;  %v8296_v50 = vpop.xlane.xlu1 %3661 }
 0x847   : > { %5675 = vmatmul.msk.f32.gmra.mxu0 %vm983_vm5, %v3177_v9  ;;  %9867 = vst [vmem:[#allocation115_spill] sm:$0xff] %v8296_v50 }
 0x848   : > { %9866 = vst [vmem:[#allocation114_spill] sm:$0xff] %v8294_v40 }
 0x84e   : > { %v3389_v11 = vpop.f32.mrf.mxu0  ;;  %5691 = vmatmul.msk.f32.gmra.mxu1 %vm411_vm2, %v6179_v21 }
 0x84f   : > { %v8285_v3 = vadd.f32 %v7881_v1, %v3389_v11  ;;  %3712 = vadd.xlane.f32.xlu2 %v3711_v33  ;;  %v3504_v33 = vpop.permute.xlu1 %3503 }
 0x850   : > { %v3596_v12 = vmul.f32 %v3504_v33, %v6662_v15  ;;  %v5752_v33 = vld [vmem:[%s9696_s5 + $0xf8] sm:$0xff] }
 0x851   : > { %v3457_v9 = vmul.f32 1.442695, %v8285_v3  ;;  %4432 = vmatpush.msra.mxu2 %v5752_v33 }
 0x853   : > { %5978 = vpow2.f32 %v3457_v9  ;;  %v3696_v9 = vsel %vm625_vm3, %v8116_v61, 0.0  ;;  %v3705_v61 = vsel %vm625_vm3, %v8202_v38, 0.0 }
 0x856   : > { %3963 = vrot.lane.b32.xlu0 %v8294_v40, %s6211_s22  ;;  %5692 = vmatmul.msk.f32.gmra.mxu1 %vm411_vm2, %v6180_v34  ;;  %v8315_v34 = vadd.f32 %v3596_v12, %v7959_v26  ;;  %v3597_v12 = vmul.f32 %v8220_v25, %v6744_v24 }
 0x857   : > { %v8348_v33 = vpop.xlane.xlu1 %3670 }
 0x858   : > { %9869 = vst [vmem:[#allocation117_spill] sm:$0xff] %v8348_v33 }
 0x859   : > { %v8300_v46 = vpop.xlane.xlu2 %3703  ;;  %v5979_v11 = vpop.eup %5978 }
 0x85a   : > { %9868 = vst [vmem:[#allocation116_spill] sm:$0xff] %v8300_v46  ;;  %3688 = vadd.xlane.f32.xlu1 %v3687_v10  ;;  %v6181_v46 = vld [vmem:[%s6279_s15 + $0x70] sm:$0xff]  ;;  %v3437_v10 = vmul.f32 1.442695, %v8278_v57 }
 0x85c   : > { %5980 = vpow2.f32 %v3437_v10  ;;  %v8341_v10 = vadd.f32 %v3597_v12, %v7973_v2  ;;  %v6185_v2 = vld [vmem:[%s6279_s15 + $0x90] sm:$0xff] }
 0x85e   : > { %3553 = vrot.lane.b32.xlu0 %v5979_v11, %s6210_s21  ;;  %5693 = vmatmul.msk.f32.gmra.mxu1 %vm411_vm2, %v6181_v46  ;;  %v6182_v11 = vld [vmem:[%s6279_s15 + $0x78] sm:$0xff]  ;;  %v8327_v46 = vadd.f32 %v7881_v1, %v8157_v53  ;;  %v6183_v53 = vld [vmem:[%s6279_s15 + $0x80] sm:$0xff] }
 0x860   : > { %v3439_v24 = vmul.f32 1.442695, %v8327_v46 }
 0x861   : > { %v3938_v21 = vpop.permute.xlu2 %3937 }
 0x862   : > { %3697 = vadd.xlane.f32.xlu1 %v3696_v9  ;;  %5712 = vmatmul.msk.f32.vlgmr.msra.gmra.mxu3 %vm625_vm3, %v3938_v21  ;;  %v5981_v26 = vpop.eup %5980  ;;  %v3714_v9 = vsel %vm625_vm3, %v8327_v46, 0.0  ;;  %5982 = vpow2.f32 %v3439_v24  ;;  %v3441_v24 = vmul.f32 1.442695, %v8168_v32 }
 0x864   : > { %5984 = vpow2.f32 %v3441_v24  ;;  %v6189_v24 = vld [vmem:[%s6279_s15 + $0xa8] sm:$0xff] }
 0x866   : > { %5694 = vmatmul.msk.f32.gmra.mxu1 %vm411_vm2, %v6182_v11  ;;  %v6184_v11 = vld [vmem:[%s6279_s15 + $0x88] sm:$0xff] }
 0x867   : > { %3943 = vrot.lane.b32.xlu2 %v8315_v34, %s6211_s22 }
 0x869   : > { %v8319_v15 = vpop.permute.xlu2 %3527 }
 0x86a   : > { %3706 = vadd.xlane.f32.xlu1 %v3705_v61 }
 0x86e   : > { %5695 = vmatmul.msk.f32.gmra.mxu1 %vm411_vm2, %v6183_v53  ;;  %v3508_v53 = vpop.permute.xlu1 %3507 }
 0x86f   : > { %3533 = vrot.lane.b32.xlu2 %v5981_v26, %s6210_s21 }
 0x871   : > { %v3940_v21 = vpop.permute.xlu2 %3939 }
 0x872   : > { %5713 = vmatmul.msk.f32.gmra.mxu3 %vm625_vm3, %v3940_v21  ;;  %3715 = vadd.xlane.f32.xlu1 %v3714_v9  ;;  %v5983_v9 = vpop.eup %5982 }
 0x876   : > { %5696 = vmatmul.msk.f32.gmra.mxu1 %vm411_vm2, %v6184_v11  ;;  %v6186_v11 = vld [vmem:[%s6279_s15 + $0x98] sm:$0xff] }
 0x877   : > { %3945 = vrot.lane.b32.xlu2 %v8341_v10, %s6211_s22 }
 0x879   : > { %v3530_v61 = vpop.permute.xlu2 %3529 }
 0x87e   : > { %5697 = vmatmul.msk.f32.gmra.mxu1 %vm411_vm2, %v6185_v2 }
 0x881   : > { %v3392_v25 = vpop.f32.mrf.mxu0  ;;  %v3942_v26 = vpop.permute.xlu2 %3941 }
 0x882   : > { %5714 = vmatmul.msk.f32.gmra.mxu3 %vm625_vm3, %v3942_v26  ;;  %v8352_v21 = vadd.f32 %v7881_v1, %v3392_v25  ;;  %v5751_v1 = vld [vmem:[%s9696_s5 + $0xf0] sm:$0xff]  ;;  %v3598_v25 = vmul.f32 %v3508_v53, %v6723_v8  ;;  %v8377_v8 = vld [vmem:[%s9697_s6 + $0x2] ss:$0 sm:$0xff] }
 0x883   : > { %4433 = vmatpush.msra.mxu2 %v5751_v1  ;;  %v3510_v1 = vpop.permute.xlu1 %3509  ;;  %v8385_v33 = vadd.f32 %v8377_v8, %v8179_v58 }
 0x884   : > { %v3744_v12 = vsel %vm625_vm3, %v8352_v21, 0.0  ;;  %v8367_v26 = vadd.f32 %v3598_v25, %v7989_v14  ;;  %v3459_v2 = vmul.f32 1.442695, %v8352_v21 }
 0x886   : > { %5698 = vmatmul.msk.f32.gmra.mxu1 %vm411_vm2, %v6186_v11  ;;  %5986 = vpow2.f32 %v3459_v2  ;;  %v5985_v11 = vpop.eup %5984  ;;  %v3599_v2 = vmul.f32 %v3510_v1, %v6700_v51  ;;  %v6190_v51 = vld [vmem:[%s6279_s15 + $0xb0] sm:$0xff] }
 0x888   : > { %3745 = vadd.xlane.f32.xlu0 %v3744_v12  ;;  %v8396_v58 = vadd.f32 %v3599_v2, %v8030_v31  ;;  %v6191_v2 = vld [vmem:[%s6279_s15 + $0xb8] sm:$0xff] }
 0x889   : > { %v3395_v12 = vpop.f32.mrf.mxu0 }
 0x88a   : > { %v8380_v14 = vadd.f32 %v8377_v8, %v3395_v12  ;;  %v3720_v12 = vsel %vm625_vm3, %v8385_v33, 0.0 }
 0x88b   : > { %3535 = vrot.lane.b32.xlu1 %v5983_v9, %s6210_s21  ;;  %v6187_v9 = vld [vmem:[%s6279_s15 + $0xa0] sm:$0xff] }
 0x88c   : > { %v3461_v53 = vmul.f32 1.442695, %v8380_v14  ;;  %v5987_v25 = vpop.eup %5986 }
 0x88e   : > { %5699 = vmatmul.msk.f32.gmra.mxu1 %vm411_vm2, %v6187_v9  ;;  %5988 = vpow2.f32 %v3461_v53  ;;  %v3443_v9 = vmul.f32 1.442695, %v8385_v33  ;;  %v9870_v53 = vld [vmem:[#allocation39_spill] sm:$0xff] }
 0x88f   : > { %v3609_v1 = vmul.f32 %v3530_v61, %v9870_v53  ;;  %v3532_v61 = vpop.permute.xlu2 %3531  ;;  %v5749_v53 = vld [vmem:[%s9696_s5 + $0xe0] sm:$0xff] }
 0x890   : > { %5990 = vpow2.f32 %v3443_v9 }
 0x893   : > { %3947 = vrot.lane.b32.xlu1 %v8367_v26, %s6211_s22 }
 0x894   : > { %v5989_v50 = vpop.eup %5988 }
 0x896   : > { %5700 = vmatmul.msk.f32.gmra.mxu1 %vm411_vm2, %v6189_v24  ;;  %v8411_v24 = vadd.f32 %v3609_v1, %v8202_v38  ;;  %v3809_v1 = vpop.f32.mrf.mxu1 }
 0x898   : > { %9871 = vst [vmem:[#allocation39_spill] sm:$0xff] %v8411_v24 }
 0x89b   : > { %3537 = vrot.lane.b32.xlu1 %v5985_v11, %s6210_s21  ;;  %v8400_v11 = vadd.f32 %v8377_v8, %v8252_v0  ;;  %v8415_v0 = vadd.f32 %v8377_v8, %v8273_v42  ;;  %v8427_v42 = vpop.xlane.xlu1 %3679 }
 0x89c   : > { %3555 = vrot.lane.b32.xlu0 %v5987_v25, %s6210_s21  ;;  %v5991_v25 = vpop.eup %5990  ;;  %9872 = vst [vmem:[#allocation118_spill] sm:$0xff] %v8427_v42  ;;  %v5748_v42 = vld [vmem:[%s9696_s5 + $0xd8] sm:$0xff] }
 0x89d   : > { %v3729_v31 = vsel %vm625_vm3, %v8400_v11, 0.0  ;;  %v3738_v38 = vsel %vm625_vm3, %v8415_v0, 0.0  ;;  %v3455_v9 = vmul.f32 1.442695, %v8415_v0 }
 0x89e   : > { %5701 = vmatmul.msk.f32.gmra.mxu1 %vm411_vm2, %v6190_v51  ;;  %v8430_v51 = vpop.xlane.xlu0 %3673 }
 0x89f   : > { %9873 = vst [vmem:[#allocation119_spill] sm:$0xff] %v8430_v51  ;;  %5992 = vpow2.f32 %v3455_v9  ;;  %v5747_v9 = vld [vmem:[%s9696_s5 + $0xd0] sm:$0xff] }
 0x8a0   : > { %3721 = vadd.xlane.f32.xlu2 %v3720_v12 }
 0x8a3   : > { %3949 = vrot.lane.b32.xlu1 %v8396_v58, %s6211_s22  ;;  %v3512_v12 = vpop.permute.xlu1 %3511 }
 0x8a4   : > { %3557 = vrot.lane.b32.xlu0 %v5989_v50, %s6210_s21  ;;  %v5750_v50 = vld [vmem:[%s9696_s5 + $0xe8] sm:$0xff] }
 0x8a5   : > { %4434 = vmatpush.msra.mxu2 %v5750_v50  ;;  %v5993_v51 = vpop.eup %5992 }
 0x8a6   : > { %5702 = vmatmul.msk.f32.gmra.mxu1 %vm411_vm2, %v6191_v2 }
 0x8a7   : > { %4435 = vmatpush.msra.mxu2 %v5749_v53  ;;  %v9876_v53 = vld [vmem:[#allocation36_spill] sm:$0xff] }
 0x8a8   : > { %3730 = vadd.xlane.f32.xlu2 %v3729_v31  ;;  %v6192_v31 = vld [vmem:[%s6279_s15 + $0xc0] sm:$0xff] }
 0x8a9   : > { %4436 = vmatpush.msra.mxu2 %v5748_v42  ;;  %v5745_v42 = vld [vmem:[%s9696_s5 + $0xc0] sm:$0xff] }
 0x8ab   : > { %3539 = vrot.lane.b32.xlu1 %v5991_v25, %s6210_s21  ;;  %v8439_v50 = vpop.permute.xlu1 %3513  ;;  %4437 = vmatpush.msra.mxu2 %v5747_v9  ;;  %v6193_v9 = vld [vmem:[%s6279_s15 + $0xc8] sm:$0xff] }
 0x8ac   : > { %3969 = vrot.lane.b32.xlu0 %v8411_v24, %s6211_s22 }
 0x8ad   : > { %4438 = vmatpush.msra.mxu2 %v5746_v19  ;;  %v8474_v19 = vadd.f32 %v8377_v8, %v8192_v41 }
 0x8ae   : > { %5703 = vmatmul.msk.f32.gmra.mxu1 %vm411_vm2, %v6192_v31  ;;  %v8448_v31 = vpop.xlane.xlu0 %3682 }
 0x8af   : > { %9875 = vst [vmem:[#allocation121_spill] sm:$0xff] %v8448_v31  ;;  %4439 = vmatpush.msra.mxu2 %v5745_v42  ;;  %v3723_v42 = vsel %vm625_vm3, %v8474_v19, 0.0 }
 0x8b0   : > { %3739 = vadd.xlane.f32.xlu2 %v3738_v38 }
 0x8b6   : > { %v8470_v31 = vpop.permute.xlu0 %3517 }
 0x8be   : > { %v8487_v41 = vpop.xlane.xlu0 %3691 }
 0x8bf   : > { %9881 = vst [vmem:[#allocation123_spill] sm:$0xff] %v8487_v41 }
 0x8c2   : > { %v8437_v25 = vpop.xlane.xlu2 %3712 }
 0x8c3   : > { %9874 = vst [vmem:[#allocation120_spill] sm:$0xff] %v8437_v25 }
 0x8c4   : > { %v3398_v2 = vpop.f32.mrf.mxu0 }
 0x8c5   : > { %v8442_v38 = vadd.f32 %v8377_v8, %v3398_v2  ;;  %v3607_v2 = vmul.f32 %v8288_v18, %v9876_v53  ;;  %v8468_v53 = vpop.permute.xlu1 %3515 }
 0x8c7   : > { %v3463_v24 = vmul.f32 1.442695, %v8442_v38 }
 0x8c8   : > { %3551 = vrot.lane.b32.xlu2 %v5993_v51, %s6210_s21  ;;  %v8464_v51 = vadd.f32 %v3607_v2, %v8081_v45  ;;  %v9878_v45 = vld [vmem:[#allocation48_spill] sm:$0xff] }
 0x8c9   : > { %5994 = vpow2.f32 %v3463_v24  ;;  %v3812_v24 = vpop.f32.mrf.mxu1  ;;  %5704 = vmatmul.msk.f32.gmra.mxu1 %vm411_vm2, %v6193_v9 }
 0x8ca   : > { %v3944_v25 = vpop.permute.xlu2 %3943  ;;  %9877 = vst [vmem:[#allocation36_spill] sm:$0xff] %v8464_v51 }
 0x8cb   : > { %5715 = vmatmul.msk.f32.gmra.mxu3 %vm625_vm3, %v3944_v25  ;;  %v3610_v25 = vmul.f32 %v3532_v61, %v9878_v45  ;;  %v8500_v45 = vpop.xlane.xlu0 %3700 }
 0x8cc   : > { %9885 = vst [vmem:[#allocation125_spill] sm:$0xff] %v8500_v45 }
 0x8cd   : > { %v8483_v9 = vadd.f32 %v3610_v25, %v8093_v22  ;;  %v8485_v36 = vpop.xlane.xlu1 %3688 }
 0x8ce   : > { %9880 = vst [vmem:[#allocation122_spill] sm:$0xff] %v8485_v36 }
 0x8cf   : > { %v5995_v18 = vpop.eup %5994  ;;  %9879 = vst [vmem:[#allocation48_spill] sm:$0xff] %v8483_v9 }
 0x8d0   : > { %3559 = vrot.lane.b32.xlu0 %v5995_v18, %s6210_s21  ;;  %3965 = vrot.lane.b32.xlu2 %v8464_v51, %s6211_s22  ;;  %v9882_v18 = vld [vmem:[#allocation24_spill] sm:$0xff] }
 0x8d1   : > { %v3815_v25 = vpop.f32.mrf.mxu1 }
 0x8d2   : > { %v3534_v2 = vpop.permute.xlu2 %3533 }
 0x8d3   : > { %v3611_v51 = vmul.f32 %v3534_v2, %v9882_v18  ;;  %v8507_v2 = vld [vmem:[%s9695_s4 + $0x3] ss:$0 sm:$0xff] }
 0x8d5   : > { %3724 = vadd.xlane.f32.xlu1 %v3723_v42  ;;  %v8494_v61 = vadd.f32 %v3611_v51, %v8278_v57  ;;  %v8498_v22 = vpop.xlane.xlu1 %3697  ;;  %v6194_v42 = vld [vmem:[%s6279_s15 + $0xd0] sm:$0xff] }
 0x8d6   : > { %9884 = vst [vmem:[#allocation124_spill] sm:$0xff] %v8498_v22  ;;  %5705 = vmatmul.msk.f32.gmra.mxu1 %vm411_vm2, %v6194_v42  ;;  %v9886_v57 = vld [vmem:[#allocation12_spill] sm:$0xff]  ;;  %v3445_v22 = vmul.f32 1.442695, %v8474_v19 }
 0x8d7   : > { %9883 = vst [vmem:[#allocation24_spill] sm:$0xff] %v8494_v61  ;;  %v3600_v51 = vmul.f32 %v3512_v12, %v9886_v57 }
 0x8d8   : > { %3971 = vrot.lane.b32.xlu0 %v8483_v9, %s6211_s22  ;;  %5996 = vpow2.f32 %v3445_v22  ;;  %v3447_v22 = vmul.f32 1.442695, %v8215_v37 }
 0x8d9   : > { %v8517_v42 = vadd.f32 %v3600_v51, %v8186_v5 }
 0x8da   : > { %v3946_v40 = vpop.permute.xlu2 %3945  ;;  %5998 = vpow2.f32 %v3447_v22 }
 0x8db   : > { %5716 = vmatmul.msk.f32.gmra.mxu3 %vm625_vm3, %v3946_v40 }
 0x8dd   : > { %v8512_v45 = vpop.xlane.xlu1 %3706 }
 0x8de   : > { %9887 = vst [vmem:[#allocation12_spill] sm:$0xff] %v8512_v45  ;;  %v9891_v45 = vld [vmem:[#allocation9_spill] sm:$0xff] }
 0x8df   : > { %v3601_v5 = vmul.f32 %v8439_v50, %v9891_v45  ;;  %v9893_v50 = vld [vmem:[#allocation40_spill] sm:$0xff] }
 0x8e0   : > { %3973 = vrot.lane.b32.xlu0 %v8494_v61, %s6211_s22  ;;  %v8514_v61 = vpop.xlane.xlu0 %3709 }
 0x8e1   : > { %9888 = vst [vmem:[#allocation126_spill] sm:$0xff] %v8514_v61 }
 0x8e5   : > { %v4085_v40 = vpop.f32.mrf.mxu3 }
 0x8e6   : > { %v4086_v18 = vadd.f32 %v4085_v40, %v3809_v1  ;;  %v5997_v1 = vpop.eup %5996  ;;  %v8524_v40 = vpop.xlane.xlu1 %3715 }
 0x8e7   : > { %9890 = vst [vmem:[#allocation128_spill] sm:$0xff] %v8524_v40  ;;  %v8536_v40 = vadd.f32 %v3601_v5, %v8002_v20  ;;  %v5999_v20 = vpop.eup %5998 }
 0x8e8   : > { %v4186_v41 = vadd.f32 %v8507_v2, %v4086_v18  ;;  %v8522_v12 = vpop.xlane.xlu0 %3718 }
 0x8e9   : > { %9889 = vst [vmem:[#allocation127_spill] sm:$0xff] %v8522_v12 }
 0x8ea   : > { %vm4218_vm11 = vcmp.gt.f32.partialorder %v4186_v41, 0.0  ;;  %v4250_v36 = vmul.f32 0.01, %v4186_v41 }
 0x8ec   : > { %v4282_v9 = vsel %vm4218_vm11, %v4186_v41, %v4250_v36 }
 0x8ed   : > { %5754 = vmatmul.msk.f32.vlgmr.msra.gmra.mxu2 %vm983_vm5, %v4282_v9  ;;  %v3747_v9 = vsel %vm625_vm3, %v8380_v14, 0.0 }
 0x8ee   : > { %3951 = vrot.lane.b32.xlu1 %v8517_v42, %s6211_s22 }
 0x8f0   : > { %v8533_v51 = vpop.xlane.xlu0 %3727 }
 0x8f1   : > { %9892 = vst [vmem:[#allocation9_spill] sm:$0xff] %v8533_v51 }
 0x8f5   : > { %v4088_v18 = vpop.f32.mrf.mxu3 }
 0x8f6   : > { %v4089_v57 = vadd.f32 %v4088_v18, %v3812_v24  ;;  %3541 = vrot.lane.b32.xlu1 %v5997_v1, %s6210_s21 }
 0x8f8   : > { %v4187_v36 = vadd.f32 %v8507_v2, %v4089_v57  ;;  %v8547_v57 = vpop.xlane.xlu0 %3736 }
 0x8f9   : > { %3748 = vadd.xlane.f32.xlu2 %v3747_v9  ;;  %9894 = vst [vmem:[#allocation40_spill] sm:$0xff] %v8547_v57 }
 0x8fa   : > { %vm4219_vm12 = vcmp.gt.f32.partialorder %v4187_v36, 0.0  ;;  %v4251_v41 = vmul.f32 0.01, %v4187_v36 }
 0x8fc   : > { %v4283_v24 = vsel %vm4219_vm12, %v4187_v36, %v4251_v41  ;;  %v9895_v41 = vld [vmem:[#allocation13_spill] sm:$0xff] }
 0x8fd   : > { %v3536_v1 = vpop.permute.xlu1 %3535  ;;  %5755 = vmatmul.msk.f32.gmra.mxu2 %vm983_vm5, %v4283_v24  ;;  %v3602_v24 = vmul.f32 %v8468_v53, %v9895_v41 }
 0x8fe   : > { %v3612_v45 = vmul.f32 %v3536_v1, %v9893_v50  ;;  %3953 = vrot.lane.b32.xlu1 %v8536_v40, %s6211_s22  ;;  %v3449_v1 = vmul.f32 1.442695, %v8400_v11  ;;  %v9896_v50 = vld [vmem:[#allocation23_spill] sm:$0xff] }
 0x8ff   : > { %v8558_v57 = vadd.f32 %v3602_v24, %v8038_v27 }
 0x900   : > { %v8543_v18 = vadd.f32 %v3612_v45, %v8327_v46  ;;  %v3608_v45 = vmul.f32 %v8319_v15, %v9896_v50  ;;  %6000 = vpow2.f32 %v3449_v1  ;;  %v9900_v1 = vld [vmem:[#allocation26_spill] sm:$0xff] }
 0x902   : > { %3975 = vrot.lane.b32.xlu0 %v8543_v18, %s6211_s22 }
 0x905   : > { %v3948_v5 = vpop.permute.xlu1 %3947  ;;  %v4091_v36 = vpop.f32.mrf.mxu3 }
 0x906   : > { %v4092_v9 = vadd.f32 %v4091_v36, %v3815_v25  ;;  %3543 = vrot.lane.b32.xlu1 %v5999_v20, %s6210_s21  ;;  %5717 = vmatmul.msk.f32.gmra.mxu3 %vm625_vm3, %v3948_v5  ;;  %v8560_v25 = vpop.permute.xlu0 %3963  ;;  %v9897_v5 = vld [vmem:[#allocation49_spill] sm:$0xff]  ;;  %v6001_v41 = vpop.eup %6000 }
 0x908   : > { %v4188_v22 = vadd.f32 %v8507_v2, %v4092_v9  ;;  %v8567_v9 = vadd.f32 %v3608_v45, %v8145_v52 }
 0x90a   : > { %vm4220_vm13 = vcmp.gt.f32.partialorder %v4188_v22, 0.0  ;;  %v4252_v46 = vmul.f32 0.01, %v4188_v22 }
 0x90c   : > { %v4284_v20 = vsel %vm4220_vm13, %v4188_v22, %v4252_v46 }
 0x90d   : > { %v3538_v36 = vpop.permute.xlu1 %3537  ;;  %5756 = vmatmul.msk.f32.gmra.mxu2 %vm983_vm5, %v4284_v20 }
 0x90e   : > { %v3613_v53 = vmul.f32 %v3538_v36, %v9897_v5  ;;  %3955 = vrot.lane.b32.xlu1 %v8558_v57, %s6211_s22  ;;  %v8578_v22 = vpop.permute.xlu0 %3553  ;;  %v3818_v5 = vpop.f32.mrf.mxu1 }
 0x910   : > { %v8570_v15 = vadd.f32 %v3613_v53, %v8168_v32  ;;  %v6195_v53 = vld [vmem:[%s6279_s15 + $0xd8] sm:$0xff] }
 0x911   : > { %3967 = vrot.lane.b32.xlu2 %v8567_v9, %s6211_s22  ;;  %5706 = vmatmul.msk.f32.gmra.mxu1 %vm411_vm2, %v6195_v53  ;;  %v6196_v53 = vld [vmem:[%s6279_s15 + $0xe0] sm:$0xff] }
 0x912   : > { %3977 = vrot.lane.b32.xlu0 %v8570_v15, %s6211_s22 }
 0x913   : > { %v8576_v27 = vpop.xlane.xlu2 %3721 }
 0x915   : > { %v3950_v24 = vpop.permute.xlu1 %3949 }
 0x916   : > { %3545 = vrot.lane.b32.xlu1 %v6001_v41, %s6210_s21  ;;  %5718 = vmatmul.msk.f32.gmra.mxu3 %vm625_vm3, %v3950_v24  ;;  %v8584_v46 = vpop.xlane.xlu0 %3745  ;;  %v9902_v24 = vld [vmem:[#allocation46_spill] sm:$0xff]  ;;  %v3821_v12 = vpop.f32.mrf.mxu1 }
 0x917   : > { %9899 = vst [vmem:[#allocation23_spill] sm:$0xff] %v8584_v46 }
 0x919   : > { %5707 = vmatmul.msk.f32.gmra.mxu1 %vm411_vm2, %v6196_v53 }
 0x91b   : > { %v8582_v52 = vpop.xlane.xlu2 %3730 }
 0x91c   : > { %9898 = vst [vmem:[#allocation13_spill] sm:$0xff] %v8582_v52 }
 0x91d   : > { %v3540_v32 = vpop.permute.xlu1 %3539 }
 0x91e   : > { %v3614_v50 = vmul.f32 %v3540_v32, %v9900_v1  ;;  %v3556_v36 = vpop.permute.xlu0 %3555 }
 0x920   : > { %v8588_v45 = vadd.f32 %v3614_v50, %v8385_v33  ;;  %v9904_v33 = vld [vmem:[#allocation53_spill] sm:$0xff] }
 0x921   : > { %v3622_v1 = vmul.f32 %v3556_v36, %v9904_v33 }
 0x922   : > { %3979 = vrot.lane.b32.xlu0 %v8588_v45, %s6211_s22 }
 0x923   : > { %v8592_v20 = vpop.xlane.xlu2 %3739  ;;  %v8604_v50 = vadd.f32 %v3622_v1, %v8352_v21  ;;  %v9908_v1 = vld [vmem:[#allocation41_spill] sm:$0xff] }
 0x924   : > { %9901 = vst [vmem:[#allocation49_spill] sm:$0xff] %v8592_v20 }
 0x925   : > { %9905 = vst [vmem:[#allocation46_spill] sm:$0xff] %v8604_v50 }
 0x926   : > { %v3558_v32 = vpop.permute.xlu0 %3557 }
 0x92b   : > { %v3552_v41 = vpop.permute.xlu2 %3551 }
 0x92c   : > { %v3620_v51 = vmul.f32 %v3552_v41, %v9902_v24  ;;  %v9906_v41 = vld [vmem:[#allocation55_spill] sm:$0xff] }
 0x92d   : > { %v3623_v24 = vmul.f32 %v3558_v32, %v9906_v41  ;;  %v9910_v41 = vld [vmem:[#allocation27_spill] sm:$0xff] }
 0x92e   : > { %v8598_v46 = vadd.f32 %v3620_v51, %v8415_v0  ;;  %v8611_v0 = vpop.permute.xlu0 %3969  ;;  %v8615_v51 = vadd.f32 %v8377_v8, %v8259_v16 }
 0x92f   : > { %v8618_v36 = vadd.f32 %v3623_v24, %v8380_v14  ;;  %v3603_v24 = vmul.f32 %v8470_v31, %v9910_v41 }
 0x930   : > { %9903 = vst [vmem:[#allocation26_spill] sm:$0xff] %v8598_v46  ;;  %3991 = vrot.lane.b32.xlu0 %v8598_v46, %s6211_s22  ;;  %v3732_v21 = vsel %vm625_vm3, %v8615_v51, 0.0 }
 0x931   : > { %9907 = vst [vmem:[#allocation53_spill] sm:$0xff] %v8618_v36 }
 0x938   : > { %3995 = vrot.lane.b32.xlu0 %v8604_v50, %s6211_s22 }
 0x940   : > { %3733 = vadd.xlane.f32.xlu1 %v3732_v21  ;;  %3997 = vrot.lane.b32.xlu0 %v8618_v36, %s6211_s22  ;;  %v3451_v36 = vmul.f32 1.442695, %v8615_v51 }
 0x942   : > { %v3560_v33 = vpop.permute.xlu0 %3559  ;;  %6002 = vpow2.f32 %v3451_v36 }
 0x943   : > { %v3624_v53 = vmul.f32 %v3560_v33, %v9908_v1  ;;  %v8636_v33 = vadd.f32 %v3603_v24, %v8017_v6  ;;  %v3453_v24 = vmul.f32 1.442695, %v8266_v59 }
 0x945   : > { %v8626_v32 = vadd.f32 %v3624_v53, %v8442_v38  ;;  %6004 = vpow2.f32 %v3453_v24 }
 0x947   : > { %9909 = vst [vmem:[#allocation55_spill] sm:$0xff] %v8626_v32 }
 0x948   : > { %3999 = vrot.lane.b32.xlu0 %v8626_v32, %s6211_s22  ;;  %v8638_v1 = vpop.xlane.xlu1 %3724 }
 0x949   : > { %9911 = vst [vmem:[#allocation41_spill] sm:$0xff] %v8638_v1  ;;  %v9920_v1 = vld [vmem:[#allocation45_spill] sm:$0xff] }
 0x94e   : > { %v4094_v16 = vpop.f32.mrf.mxu3 }
 0x94f   : > { %v4095_v8 = vadd.f32 %v4094_v16, %v3818_v5  ;;  %v6003_v16 = vpop.eup %6002 }
 0x951   : > { %v4189_v14 = vadd.f32 %v8507_v2, %v4095_v8 }
 0x953   : > { %vm4221_vm14 = vcmp.gt.f32.partialorder %v4189_v14, 0.0  ;;  %v4253_v21 = vmul.f32 0.01, %v4189_v14 }
 0x955   : > { %v4285_v61 = vsel %vm4221_vm14, %v4189_v14, %v4253_v21  ;;  %v3824_v21 = vpop.f32.mrf.mxu1 }
 0x956   : > { %5757 = vmatmul.msk.f32.gmra.mxu2 %vm983_vm5, %v4285_v61  ;;  %v9912_v61 = vld [vmem:[#allocation16_spill] sm:$0xff] }
 0x957   : > { %v3604_v6 = vmul.f32 %v8248_v30, %v9912_v61  ;;  %v8659_v30 = vld [vmem:[%s9697_s6 + $0x3] ss:$0 sm:$0xff] }
 0x959   : > { %3957 = vrot.lane.b32.xlu1 %v8636_v33, %s6211_s22 }
 0x95e   : > { %v4097_v5 = vpop.f32.mrf.mxu3 }
 0x95f   : > { %v4098_v53 = vadd.f32 %v4097_v5, %v3821_v12  ;;  %v8650_v12 = vadd.f32 %v3604_v6, %v8048_v39  ;;  %v6197_v5 = vld [vmem:[%s6279_s15 + $0xe8] sm:$0xff]  ;;  %v3827_v6 = vpop.f32.mrf.mxu1 }
 0x960   : > { %v3952_v31 = vpop.permute.xlu1 %3951  ;;  %5708 = vmatmul.msk.f32.gmra.mxu1 %vm411_vm2, %v6197_v5 }
 0x961   : > { %v4190_v8 = vadd.f32 %v8507_v2, %v4098_v53  ;;  %5719 = vmatmul.msk.f32.gmra.mxu3 %vm625_vm3, %v3952_v31  ;;  %3547 = vrot.lane.b32.xlu1 %v6003_v16, %s6210_s21  ;;  %v6005_v53 = vpop.eup %6004 }
 0x963   : > { %vm4222_vm15 = vcmp.gt.f32.partialorder %v4190_v8, 0.0  ;;  %v4254_v14 = vmul.f32 0.01, %v4190_v8 }
 0x965   : > { %v4286_v41 = vsel %vm4222_vm15, %v4190_v8, %v4254_v14  ;;  %v9913_v8 = vld [vmem:[#allocation20_spill] sm:$0xff] }
 0x966   : > { %5758 = vmatmul.msk.f32.gmra.mxu2 %vm983_vm5, %v4286_v41  ;;  %v3605_v61 = vmul.f32 %v8263_v49, %v9913_v8  ;;  %v6198_v14 = vld [vmem:[%s6279_s15 + $0xf0] sm:$0xff] }
 0x968   : > { %v3542_v36 = vpop.permute.xlu1 %3541  ;;  %5709 = vmatmul.msk.f32.gmra.mxu1 %vm411_vm2, %v6198_v14  ;;  %v8670_v41 = vadd.f32 %v3605_v61, %v8104_v17  ;;  %v8677_v14 = vpop.permute.xlu0 %3971 }
 0x969   : > { %3959 = vrot.lane.b32.xlu1 %v8650_v12, %s6211_s22 }
 0x970   : > { %v3954_v16 = vpop.permute.xlu1 %3953  ;;  %v4441_v31 = vpop.f32.mrf.mxu2 }
 0x971   : > { %v4442_v39 = vadd.f32 %v8659_v30, %v4441_v31  ;;  %5720 = vmatmul.msk.f32.gmra.mxu3 %vm625_vm3, %v3954_v16  ;;  %3549 = vrot.lane.b32.xlu1 %v6005_v53, %s6210_s21  ;;  %v8681_v46 = vpop.permute.xlu0 %3973 }
 0x973   : > { %4665 = vrot.lane.b32.xlu0 %v4442_v39, %s6211_s22  ;;  %v4793_v50 = vsel %vm625_vm3, %v4442_v39, 0.0 }
 0x978   : > { %v3544_v24 = vpop.permute.xlu1 %3543 }
 0x979   : > { %3961 = vrot.lane.b32.xlu1 %v8670_v41, %s6211_s22 }
 0x980   : > { %v3956_v5 = vpop.permute.xlu1 %3955  ;;  %v4444_v20 = vpop.f32.mrf.mxu2 }
 0x981   : > { %5721 = vmatmul.msk.f32.gmra.mxu3 %vm625_vm3, %v3956_v5 }
 0x989   : > { %v4100_v53 = vpop.f32.mrf.mxu3 }
 0x98a   : > { %v4101_v16 = vadd.f32 %v4100_v53, %v3824_v21  ;;  %v3741_v53 = vsel %vm625_vm3, %v8285_v3, 0.0 }
 0x98c   : > { %v4191_v49 = vadd.f32 %v8507_v2, %v4101_v16  ;;  %v8686_v16 = vpop.permute.xlu0 %3975 }
 0x98e   : > { %vm4223_vm4 = vcmp.gt.f32.partialorder %v4191_v49, 0.0  ;;  %v4255_v31 = vmul.f32 0.01, %v4191_v49 }
 0x990   : > { %v4287_v8 = vsel %vm4223_vm4, %v4191_v49, %v4255_v31  ;;  %v3546_v31 = vpop.permute.xlu1 %3545 }
 0x991   : > { %5759 = vmatmul.msk.f32.gmra.mxu2 %vm983_vm5, %v4287_v8  ;;  %v9914_v8 = vld [vmem:[#allocation42_spill] sm:$0xff] }
 0x994   : > { %v8690_v49 = vpop.permute.xlu0 %3977 }
 0x999   : > { %v4103_v17 = vpop.f32.mrf.mxu3 }
 0x99a   : > { %v4104_v61 = vadd.f32 %v4103_v17, %v3827_v6  ;;  %v3750_v6 = vsel %vm625_vm3, %v8442_v38, 0.0  ;;  %v6199_v38 = vld [vmem:[%s6279_s15 + $0xf8] sm:$0xff] }
 0x99c   : > { %v4192_v32 = vadd.f32 %v8507_v2, %v4104_v61 }
 0x99d   : > { %4794 = vadd.xlane.f32.xlu0 %v4793_v50  ;;  %v8692_v50 = vpop.permute.xlu0 %3979 }
 0x99e   : > { %vm4224_vm6 = vcmp.gt.f32.partialorder %v4192_v32, 0.0  ;;  %v4256_v5 = vmul.f32 0.01, %v4192_v32 }
 0x9a0   : > { %v4288_v21 = vsel %vm4224_vm6, %v4192_v32, %v4256_v5  ;;  %v3615_v32 = vmul.f32 %v3542_v36, %v9914_v8 }
 0x9a1   : > { %5760 = vmatmul.msk.f32.gmra.mxu2 %vm983_vm5, %v4288_v21  ;;  %v3830_v21 = vpop.f32.mrf.mxu1  ;;  %5710 = vmatmul.msk.f32.gmra.mxu1 %vm411_vm2, %v6199_v38  ;;  %vm4953_vm2 = vcmask 31744  }
 0x9a2   : > { %v8698_v61 = vadd.f32 %v3615_v32, %v8474_v19  ;;  %v9918_v19 = vld [vmem:[#allocation33_spill] sm:$0xff] }
 0x9a3   : > { %3742 = vadd.xlane.f32.xlu1 %v3741_v53  ;;  %v9917_v53 = vld [vmem:[#allocation50_spill] sm:$0xff]  ;;  %v3617_v32 = vmul.f32 %v3546_v31, %v9918_v19 }
 0x9a4   : > { %9915 = vst [vmem:[#allocation27_spill] sm:$0xff] %v8698_v61 }
 0x9a5   : > { %v8695_v17 = vpop.permute.xlu0 %3991  ;;  %v8719_v38 = vadd.f32 %v3617_v32, %v8400_v11 }
 0x9a7   : > { %9919 = vst [vmem:[#allocation20_spill] sm:$0xff] %v8719_v38 }
 0x9ab   : > { %3751 = vadd.xlane.f32.xlu1 %v3750_v6  ;;  %v3616_v6 = vmul.f32 %v3544_v24, %v9917_v53 }
 0x9ad   : > { %v8707_v52 = vpop.permute.xlu0 %3995  ;;  %v8710_v36 = vadd.f32 %v3616_v6, %v8215_v37  ;;  %v4537_v6 = vmul.f32 1.442695, %v4442_v39  ;;  %v9922_v39 = vld [vmem:[#allocation52_spill] sm:$0xff] }
 0x9af   : > { %6006 = vpow2.f32 %v4537_v6 }
 0x9b3   : > { %v8700_v5 = vpop.xlane.xlu1 %3733 }
 0x9b4   : > { %9916 = vst [vmem:[#allocation16_spill] sm:$0xff] %v8700_v5  ;;  %v8716_v5 = vpop.f32.mrf.mxu2 }
 0x9b5   : > { %v8721_v24 = vpop.permute.xlu0 %3997 }
 0x9c4   : > { %3981 = vrot.lane.b32.xlu1 %v8698_v61, %s6211_s22 }
 0x9cb   : > { %v3958_v8 = vpop.permute.xlu1 %3957 }
 0x9cc   : > { %3983 = vrot.lane.b32.xlu1 %v8710_v36, %s6211_s22  ;;  %5722 = vmatmul.msk.f32.gmra.mxu3 %vm625_vm3, %v3958_v8 }
 0x9d3   : > { %v3548_v53 = vpop.permute.xlu1 %3547 }
 0x9d4   : > { %v3618_v61 = vmul.f32 %v3548_v53, %v9920_v1  ;;  %3985 = vrot.lane.b32.xlu1 %v8719_v38, %s6211_s22  ;;  %v8737_v1 = vpop.permute.xlu0 %3999 }
 0x9d6   : > { %v8727_v37 = vadd.f32 %v3618_v61, %v8615_v51  ;;  %v6007_v51 = vpop.eup %6006 }
 0x9d7   : > { %v4601_v53 = vmul.f32 %v6007_v51, %v7423_v44 }
 0x9d8   : > { %9921 = vst [vmem:[#allocation42_spill] sm:$0xff] %v8727_v37  ;;  %3987 = vrot.lane.b32.xlu2 %v8727_v37, %s6211_s22 }
 0x9d9   : > { %v4450_v31 = vpop.f32.mrf.mxu2 }
 0x9da   : > { %v8732_v11 = vadd.f32 %v8659_v30, %v4450_v31 }
 0x9db   : > { %v3960_v8 = vpop.permute.xlu1 %3959 }
 0x9dc   : > { %5723 = vmatmul.msk.f32.gmra.mxu3 %vm625_vm3, %v3960_v8  ;;  %4671 = vrot.lane.b32.xlu0 %v8732_v11, %s6211_s22 }
 0x9e3   : > { %v3550_v61 = vpop.permute.xlu1 %3549 }
 0x9e4   : > { %v3619_v19 = vmul.f32 %v3550_v61, %v9922_v39  ;;  %v4106_v32 = vpop.f32.mrf.mxu3  ;;  %v3833_v39 = vpop.f32.mrf.mxu1 }
 0x9e5   : > { %v4107_v37 = vadd.f32 %v4106_v32, %v3830_v21  ;;  %v4666_v38 = vpop.permute.xlu0 %4665  ;;  %v9923_v21 = vld [vmem:[#allocation38_spill] sm:$0xff] }
 0x9e6   : > { %v8742_v31 = vadd.f32 %v3619_v19, %v8266_v59  ;;  %v4761_v6 = vadd.f32 %v4666_v38, %v4601_v53  ;;  %v3621_v38 = vmul.f32 %v8578_v22, %v9923_v21  ;;  %v4445_v22 = vadd.f32 %v8659_v30, %v4444_v20 }
 0x9e7   : > { %v4193_v8 = vadd.f32 %v8507_v2, %v4107_v37 }
 0x9e8   : > { %3989 = vrot.lane.b32.xlu2 %v8742_v31, %s6211_s22  ;;  %v8755_v44 = vsel %vm625_vm3, %v4761_v6, %v8177_v48  ;;  %v8765_v37 = vadd.f32 %v3621_v38, %v8285_v3  ;;  %v3966_v48 = vpop.permute.xlu2 %3965 }
 0x9e9   : > { %vm4225_vm7 = vcmp.gt.f32.partialorder %v4193_v8, 0.0  ;;  %v4257_v59 = vmul.f32 0.01, %v4193_v8  ;;  %4954 = vst.msk [vmem:[%s8748_s19] sm:$0xff] %vm4953_vm2, %v8755_v44 }
 0x9eb   : > { %v3962_v51 = vpop.permute.xlu1 %3961  ;;  %v4289_v61 = vsel %vm4225_vm7, %v4193_v8, %v4257_v59  ;;  %v4796_v59 = vsel %vm625_vm3, %v4445_v22, 0.0 }
 0x9ec   : > { %5724 = vmatmul.msk.f32.gmra.mxu3 %vm625_vm3, %v3962_v51  ;;  %5761 = vmatmul.msk.f32.gmra.mxu2 %vm983_vm5, %v4289_v61  ;;  %v4802_v51 = vsel %vm625_vm3, %v8732_v11, 0.0  ;;  %v4453_v61 = vpop.f32.mrf.mxu2 }
 0x9f0   : > { %3993 = vrot.lane.b32.xlu2 %v8765_v37, %s6211_s22  ;;  %v8774_v6 = vpop.xlane.xlu2 %3748 }
 0x9f1   : > { %9924 = vst [vmem:[#allocation50_spill] sm:$0xff] %v8774_v6 }
 0x9f4   : > { %v4109_v19 = vpop.f32.mrf.mxu3  ;;  %5725 = vmatmul.msk.f32.gmra.mxu3 %vm625_vm3, %v8560_v25  ;;  %v3836_v25 = vpop.f32.mrf.mxu1 }
 0x9f5   : > { %v4110_v32 = vadd.f32 %v4109_v19, %v3833_v39 }
 0x9f7   : > { %v4194_v53 = vadd.f32 %v8507_v2, %v4110_v32 }
 0x9f8   : > { %4667 = vrot.lane.b32.xlu2 %v4445_v22, %s6211_s22  ;;  %v3968_v21 = vpop.permute.xlu2 %3967 }
 0x9f9   : > { %v4258_v3 = vmul.f32 0.01, %v4194_v53  ;;  %vm4226_vm8 = vcmp.gt.f32.partialorder %v4194_v53, 0.0 }
 0x9fb   : > { %v4290_v8 = vsel %vm4226_vm8, %v4194_v53, %v4258_v3  ;;  %v8795_v3 = vadd.f32 %v8659_v30, %v8716_v5 }
 0x9fc   : > { %5726 = vmatmul.msk.f32.gmra.mxu3 %vm625_vm3, %v3966_v48  ;;  %5762 = vmatmul.msk.f32.gmra.mxu2 %vm983_vm5, %v4290_v8  ;;  %v8784_v48 = vadd.f32 %v8659_v30, %v4453_v61 }
 0x9fe   : > { %4797 = vadd.xlane.f32.xlu1 %v4796_v59  ;;  %v4805_v53 = vsel %vm625_vm3, %v8784_v48, 0.0  ;;  %v4799_v59 = vsel %vm625_vm3, %v8795_v3, 0.0 }
 0xa04   : > { %v4112_v38 = vpop.f32.mrf.mxu3  ;;  %5727 = vmatmul.msk.f32.gmra.mxu3 %vm625_vm3, %v3968_v21  ;;  %v3839_v21 = vpop.f32.mrf.mxu1 }
 0xa05   : > { %v4113_v20 = vadd.f32 %v4112_v38, %v3836_v25 }
 0xa06   : > { %4803 = vadd.xlane.f32.xlu0 %v4802_v51  ;;  %v4539_v51 = vmul.f32 1.442695, %v4445_v22 }
 0xa07   : > { %v4195_v39 = vadd.f32 %v8507_v2, %v4113_v20 }
 0xa09   : > { %v4259_v19 = vmul.f32 0.01, %v4195_v39  ;;  %vm4227_vm9 = vcmp.gt.f32.partialorder %v4195_v39, 0.0 }
 0xa0b   : > { %v4291_v32 = vsel %vm4227_vm9, %v4195_v39, %v4259_v19 }
 0xa0c   : > { %5728 = vmatmul.msk.f32.gmra.mxu3 %vm625_vm3, %v8611_v0  ;;  %5763 = vmatmul.msk.f32.gmra.mxu2 %vm983_vm5, %v4291_v32 }
 0xa0e   : > { %4806 = vadd.xlane.f32.xlu0 %v4805_v53 }
 0xa10   : > { %v8825_v61 = vpop.xlane.xlu0 %4794 }
 0xa14   : > { %5729 = vmatmul.msk.f32.gmra.mxu3 %vm625_vm3, %v8677_v14  ;;  %v4456_v0 = vpop.f32.mrf.mxu2 }
 0xa15   : > { %v8802_v8 = vadd.f32 %v8659_v30, %v4456_v0 }
 0xa16   : > { %v8810_v14 = vpop.xlane.xlu1 %3742 }
 0xa17   : > { %4669 = vrot.lane.b32.xlu1 %v8795_v3, %s6211_s22  ;;  %v4808_v38 = vsel %vm625_vm3, %v8802_v8, 0.0 }
 0xa1c   : > { %5730 = vmatmul.msk.f32.gmra.mxu3 %vm625_vm3, %v8681_v46 }
 0xa1e   : > { %v8814_v46 = vpop.xlane.xlu1 %3751 }
 0xa21   : > { %4800 = vadd.xlane.f32.xlu2 %v4799_v59 }
 0xa22   : > { %4675 = vrot.lane.b32.xlu0 %v8802_v8, %s6211_s22 }
 0xa24   : > { %5731 = vmatmul.msk.f32.gmra.mxu3 %vm625_vm3, %v8686_v16  ;;  %v4543_v16 = vmul.f32 1.442695, %v8732_v11 }
 0xa26   : > { %6008 = vpow2.f32 %v4543_v16 }
 0xa27   : > { %6010 = vpow2.f32 %v4539_v51 }
 0xa2c   : > { %5732 = vmatmul.msk.f32.gmra.mxu3 %vm625_vm3, %v8690_v49  ;;  %v6009_v39 = vpop.eup %6008 }
 0xa2d   : > { %v4604_v53 = vmul.f32 %v6009_v39, %v7499_v4  ;;  %v6011_v0 = vpop.eup %6010 }
 0xa32   : > { %v3988_v25 = vpop.permute.xlu2 %3987 }
 0xa34   : > { %5733 = vmatmul.msk.f32.gmra.mxu3 %vm625_vm3, %v8692_v50  ;;  %v3842_v50 = vpop.f32.mrf.mxu1 }
 0xa36   : > { %v3982_v5 = vpop.permute.xlu1 %3981 }
 0xa39   : > { %4673 = vrot.lane.b32.xlu2 %v8784_v48, %s6211_s22 }
 0xa3c   : > { %5734 = vmatmul.msk.f32.gmra.mxu3 %vm625_vm3, %v3982_v5  ;;  %v3845_v11 = vpop.f32.mrf.mxu1 }
 0xa3e   : > { %v3984_v20 = vpop.permute.xlu1 %3983 }
 0xa41   : > { %4809 = vadd.xlane.f32.xlu1 %v4808_v38  ;;  %v4602_v38 = vmul.f32 %v6011_v0, %v7438_v23 }
 0xa42   : > { %v3990_v49 = vpop.permute.xlu2 %3989 }
 0xa44   : > { %5735 = vmatmul.msk.f32.gmra.mxu3 %vm625_vm3, %v3984_v20  ;;  %v3848_v39 = vpop.f32.mrf.mxu1 }
 0xa46   : > { %v3986_v32 = vpop.permute.xlu1 %3985 }
 0xa4a   : > { %v3994_v19 = vpop.permute.xlu2 %3993 }
 0xa4c   : > { %5736 = vmatmul.msk.f32.gmra.mxu3 %vm625_vm3, %v3986_v32 }
 0xa4e   : > { %v4672_v59 = vpop.permute.xlu0 %4671 }
 0xa4f   : > { %v4764_v5 = vadd.f32 %v4672_v59, %v4604_v53  ;;  %v4115_v22 = vpop.f32.mrf.mxu3  ;;  %v4459_v53 = vpop.f32.mrf.mxu2 }
 0xa50   : > { %v4116_v16 = vadd.f32 %v4115_v22, %v3839_v21 }
 0xa51   : > { %v8832_v20 = vsel %vm625_vm3, %v4764_v5, %v8315_v34  ;;  %v8848_v34 = vadd.f32 %v8659_v30, %v4459_v53 }
 0xa52   : > { %v4196_v51 = vadd.f32 %v8507_v2, %v4116_v16  ;;  %v4668_v6 = vpop.permute.xlu2 %4667  ;;  %4957 = vst.msk [vmem:[%s8748_s19 + $0x18] sm:$0xff] %vm4953_vm2, %v8832_v20 }
 0xa53   : > { %v4762_v32 = vadd.f32 %v4668_v6, %v4602_v38  ;;  %v3851_v6 = vpop.f32.mrf.mxu1 }
 0xa54   : > { %v4260_v4 = vmul.f32 0.01, %v4196_v51  ;;  %5737 = vmatmul.msk.f32.gmra.mxu3 %vm625_vm3, %v3988_v25  ;;  %vm4228_vm0 = vcmp.gt.f32.partialorder %v4196_v51, 0.0 }
 0xa55   : > { %v8841_v23 = vsel %vm625_vm3, %v4762_v32, %v8210_v54  ;;  %v4811_v54 = vsel %vm625_vm3, %v8848_v34, 0.0 }
 0xa56   : > { %v4292_v21 = vsel %vm4228_vm0, %v4196_v51, %v4260_v4  ;;  %4955 = vst.msk [vmem:[%s8748_s19 + $0x8] sm:$0xff] %vm4953_vm2, %v8841_v23 }
 0xa57   : > { %5764 = vmatmul.msk.f32.gmra.mxu2 %vm983_vm5, %v4292_v21 }
 0xa5a   : > { %4677 = vrot.lane.b32.xlu1 %v8848_v34, %s6211_s22 }
 0xa5b   : > { %v3854_v22 = vpop.f32.mrf.mxu1 }
 0xa5c   : > { %5738 = vmatmul.msk.f32.gmra.mxu3 %vm625_vm3, %v3990_v49 }
 0xa5f   : > { %v4118_v25 = vpop.f32.mrf.mxu3 }
 0xa60   : > { %v4119_v0 = vadd.f32 %v4118_v25, %v3842_v50 }
 0xa62   : > { %v4197_v59 = vadd.f32 %v8507_v2, %v4119_v0  ;;  %4812 = vadd.xlane.f32.xlu2 %v4811_v54  ;;  %v4541_v54 = vmul.f32 1.442695, %v8795_v3 }
 0xa63   : > { %v3857_v49 = vpop.f32.mrf.mxu1 }
 0xa64   : > { %v4261_v5 = vmul.f32 0.01, %v4197_v59  ;;  %5739 = vmatmul.msk.f32.gmra.mxu3 %vm625_vm3, %v8695_v17  ;;  %vm4229_vm1 = vcmp.gt.f32.partialorder %v4197_v59, 0.0  ;;  %6012 = vpow2.f32 %v4541_v54 }
 0xa66   : > { %v4293_v16 = vsel %vm4229_vm1, %v4197_v59, %v4261_v5 }
 0xa67   : > { %5765 = vmatmul.msk.f32.gmra.mxu2 %vm983_vm5, %v4293_v16 }
 0xa6c   : > { %5740 = vmatmul.msk.f32.gmra.mxu3 %vm625_vm3, %v3994_v19 }
 0xa6f   : > { %v4121_v38 = vpop.f32.mrf.mxu3  ;;  %v4462_v50 = vpop.f32.mrf.mxu2 }
 0xa70   : > { %v4122_v51 = vadd.f32 %v4121_v38, %v3845_v11  ;;  %v8861_v32 = vadd.f32 %v8659_v30, %v4462_v50  ;;  %v3860_v11 = vpop.f32.mrf.mxu1 }
 0xa71   : > { %v8879_v50 = vpop.xlane.xlu1 %4797 }
 0xa72   : > { %v4198_v4 = vadd.f32 %v8507_v2, %v4122_v51  ;;  %v4814_v53 = vsel %vm625_vm3, %v8861_v32, 0.0 }
 0xa73   : > { %4815 = vadd.xlane.f32.xlu0 %v4814_v53 }
 0xa74   : > { %v4262_v17 = vmul.f32 0.01, %v4198_v4  ;;  %5741 = vmatmul.msk.f32.gmra.mxu3 %vm625_vm3, %v8707_v52  ;;  %vm4230_vm10 = vcmp.gt.f32.partialorder %v4198_v4, 0.0 }
 0xa76   : > { %v4294_v21 = vsel %vm4230_vm10, %v4198_v4, %v4262_v17  ;;  %v4547_v17 = vmul.f32 1.442695, %v8802_v8 }
 0xa77   : > { %v4124_v19 = vpop.f32.mrf.mxu3  ;;  %5766 = vmatmul.msk.f32.gmra.mxu2 %vm983_vm5, %v4294_v21 }
 0xa78   : > { %v4125_v25 = vadd.f32 %v4124_v19, %v3848_v39  ;;  %v3863_v4 = vpop.f32.mrf.mxu1  ;;  %6014 = vpow2.f32 %v4547_v17 }
 0xa79   : > { %v8881_v51 = vpop.xlane.xlu0 %4803 }
 0xa7a   : > { %v4199_v0 = vadd.f32 %v8507_v2, %v4125_v25  ;;  %4679 = vrot.lane.b32.xlu2 %v8861_v32, %s6211_s22 }
 0xa7c   : > { %v4263_v59 = vmul.f32 0.01, %v4199_v0  ;;  %5742 = vmatmul.msk.f32.gmra.mxu3 %vm625_vm3, %v8721_v24  ;;  %vm4231_vm11 = vcmp.gt.f32.partialorder %v4199_v0, 0.0 }
 0xa7e   : > { %v4295_v52 = vsel %vm4231_vm11, %v4199_v0, %v4263_v59 }
 0xa7f   : > { %v4127_v5 = vpop.f32.mrf.mxu3  ;;  %v4465_v16 = vpop.f32.mrf.mxu2  ;;  %5767 = vmatmul.msk.f32.gmra.mxu2 %vm983_vm5, %v4295_v52 }
 0xa80   : > { %v4128_v39 = vadd.f32 %v4127_v5, %v3851_v6  ;;  %v8877_v38 = vadd.f32 %v8659_v30, %v4465_v16  ;;  %v6013_v6 = vpop.eup %6012  ;;  %v3866_v16 = vpop.f32.mrf.mxu1 }
 0xa81   : > { %v4603_v0 = vmul.f32 %v6013_v6, %v7453_v55  ;;  %v8894_v52 = vpop.xlane.xlu0 %4806 }
 0xa82   : > { %v4200_v3 = vadd.f32 %v8507_v2, %v4128_v39  ;;  %v4817_v24 = vsel %vm625_vm3, %v8877_v38, 0.0 }
 0xa84   : > { %v4264_v53 = vmul.f32 0.01, %v4200_v3  ;;  %4818 = vadd.xlane.f32.xlu1 %v4817_v24  ;;  %5743 = vmatmul.msk.f32.gmra.mxu3 %vm625_vm3, %v8737_v1  ;;  %vm4232_vm12 = vcmp.gt.f32.partialorder %v4200_v3, 0.0 }
 0xa86   : > { %v4296_v21 = vsel %vm4232_vm12, %v4200_v3, %v4264_v53  ;;  %v6015_v3 = vpop.eup %6014 }
 0xa87   : > { %v4130_v19 = vpop.f32.mrf.mxu3  ;;  %5768 = vmatmul.msk.f32.gmra.mxu2 %vm983_vm5, %v4296_v21  ;;  %4681 = vrot.lane.b32.xlu0 %v8877_v38, %s6211_s22  ;;  %v4606_v6 = vmul.f32 %v6015_v3, %v7518_v60 }
 0xa88   : > { %v4131_v25 = vadd.f32 %v4130_v19, %v3854_v22  ;;  %v4545_v22 = vmul.f32 1.442695, %v8784_v48 }
 0xa89   : > { %v4670_v54 = vpop.permute.xlu1 %4669 }
 0xa8a   : > { %v4201_v59 = vadd.f32 %v8507_v2, %v4131_v25  ;;  %v4763_v1 = vadd.f32 %v4670_v54, %v4603_v0  ;;  %6016 = vpow2.f32 %v4545_v22  ;;  %v3869_v0 = vpop.f32.mrf.mxu1 }
 0xa8c   : > { %v4265_v5 = vmul.f32 0.01, %v4201_v59  ;;  %vm4233_vm13 = vcmp.gt.f32.partialorder %v4201_v59, 0.0  ;;  %v8898_v8 = vsel %vm625_vm3, %v4763_v1, %v8235_v62 }
 0xa8d   : > { %4956 = vst.msk [vmem:[%s8748_s19 + $0x10] sm:$0xff] %vm4953_vm2, %v8898_v8 }
 0xa8e   : > { %v4297_v55 = vsel %vm4233_vm13, %v4201_v59, %v4265_v5 }
 0xa8f   : > { %v4133_v39 = vpop.f32.mrf.mxu3  ;;  %5769 = vmatmul.msk.f32.gmra.mxu2 %vm983_vm5, %v4297_v55  ;;  %v4468_v59 = vpop.f32.mrf.mxu2 }
 0xa90   : > { %v4134_v24 = vadd.f32 %v4133_v39, %v3857_v49  ;;  %v6017_v54 = vpop.eup %6016  ;;  %v8919_v5 = vadd.f32 %v8659_v30, %v4468_v59 }
 0xa91   : > { %v4605_v22 = vmul.f32 %v6017_v54, %v7509_v56 }
 0xa92   : > { %v4202_v53 = vadd.f32 %v8507_v2, %v4134_v24  ;;  %v3872_v56 = vpop.f32.mrf.mxu1 }
 0xa94   : > { %v4266_v62 = vmul.f32 0.01, %v4202_v53  ;;  %v8907_v17 = vpop.xlane.xlu2 %4800  ;;  %v4676_v21 = vpop.permute.xlu0 %4675  ;;  %vm4234_vm14 = vcmp.gt.f32.partialorder %v4202_v53, 0.0 }
 0xa95   : > { %v4766_v19 = vadd.f32 %v4676_v21, %v4606_v6 }
 0xa96   : > { %v4298_v25 = vsel %vm4234_vm14, %v4202_v53, %v4266_v62  ;;  %v4820_v62 = vsel %vm625_vm3, %v8919_v5, 0.0 }
 0xa97   : > { %v4136_v48 = vpop.f32.mrf.mxu3  ;;  %5770 = vmatmul.msk.f32.gmra.mxu2 %vm983_vm5, %v4298_v25  ;;  %v8912_v49 = vsel %vm625_vm3, %v4766_v19, %v8367_v26 }
 0xa98   : > { %v4137_v1 = vadd.f32 %v4136_v48, %v3860_v11  ;;  %4959 = vst.msk [vmem:[%s8748_s19 + $0x28] sm:$0xff] %vm4953_vm2, %v8912_v49 }
 0xa9a   : > { %v4203_v60 = vadd.f32 %v8507_v2, %v4137_v1 }
 0xa9c   : > { %v4267_v55 = vmul.f32 0.01, %v4203_v60  ;;  %v4674_v39 = vpop.permute.xlu2 %4673  ;;  %vm4235_vm15 = vcmp.gt.f32.partialorder %v4203_v60, 0.0 }
 0xa9d   : > { %v4765_v3 = vadd.f32 %v4674_v39, %v4605_v22  ;;  %4683 = vrot.lane.b32.xlu1 %v8919_v5, %s6211_s22 }
 0xa9e   : > { %v4299_v26 = vsel %vm4235_vm15, %v4203_v60, %v4267_v55 }
 0xa9f   : > { %v4139_v24 = vpop.f32.mrf.mxu3  ;;  %5771 = vmatmul.msk.f32.gmra.mxu2 %vm983_vm5, %v4299_v26  ;;  %v8927_v11 = vsel %vm625_vm3, %v4765_v3, %v8341_v10 }
 0xaa0   : > { %v4140_v53 = vadd.f32 %v4139_v24, %v3863_v4  ;;  %4958 = vst.msk [vmem:[%s8748_s19 + $0x20] sm:$0xff] %vm4953_vm2, %v8927_v11  ;;  %v3875_v4 = vpop.f32.mrf.mxu1 }
 0xaa2   : > { %v4204_v6 = vadd.f32 %v8507_v2, %v4140_v53 }
 0xaa3   : > { %4821 = vadd.xlane.f32.xlu2 %v4820_v62 }
 0xaa4   : > { %v4268_v21 = vmul.f32 0.01, %v4204_v6  ;;  %vm4236_vm4 = vcmp.gt.f32.partialorder %v4204_v6, 0.0 }
 0xaa6   : > { %v4300_v19 = vsel %vm4236_vm4, %v4204_v6, %v4268_v21  ;;  %v4549_v6 = vmul.f32 1.442695, %v8848_v34 }
 0xaa7   : > { %v4142_v25 = vpop.f32.mrf.mxu3  ;;  %5772 = vmatmul.msk.f32.gmra.mxu2 %vm983_vm5, %v4300_v19 }
 0xaa8   : > { %v4143_v48 = vadd.f32 %v4142_v25, %v3866_v16  ;;  %v3878_v39 = vpop.f32.mrf.mxu1  ;;  %6018 = vpow2.f32 %v4549_v6 }
 0xaaa   : > { %v4205_v10 = vadd.f32 %v8507_v2, %v4143_v48 }
 0xaac   : > { %v4269_v54 = vmul.f32 0.01, %v4205_v10  ;;  %vm4237_vm6 = vcmp.gt.f32.partialorder %v4205_v10, 0.0 }
 0xaae   : > { %v4301_v59 = vsel %vm4237_vm6, %v4205_v10, %v4269_v54 }
 0xaaf   : > { %v4145_v1 = vpop.f32.mrf.mxu3  ;;  %5773 = vmatmul.msk.f32.gmra.mxu2 %vm983_vm5, %v4301_v59  ;;  %v6019_v59 = vpop.eup %6018 }
 0xab0   : > { %v4146_v60 = vadd.f32 %v4145_v1, %v3869_v0  ;;  %v3881_v0 = vpop.f32.mrf.mxu1 }
 0xab2   : > { %v4206_v22 = vadd.f32 %v8507_v2, %v4146_v60 }
 0xab4   : > { %v4270_v55 = vmul.f32 0.01, %v4206_v22  ;;  %vm4238_vm7 = vcmp.gt.f32.partialorder %v4206_v22, 0.0  ;;  %v8944_v48 = vpop.xlane.xlu1 %4809 }
 0xab6   : > { %v4302_v3 = vsel %vm4238_vm7, %v4206_v22, %v4270_v55  ;;  %v4607_v22 = vmul.f32 %v6019_v59, %v7591_v47 }
 0xab7   : > { %v4148_v26 = vpop.f32.mrf.mxu3  ;;  %5774 = vmatmul.msk.f32.gmra.mxu2 %vm983_vm5, %v4302_v3 }
 0xab8   : > { %v4149_v16 = vadd.f32 %v4148_v26, %v3872_v56  ;;  %v3884_v1 = vpop.f32.mrf.mxu1 }
 0xaba   : > { %v4207_v24 = vadd.f32 %v8507_v2, %v4149_v16  ;;  %v4551_v16 = vmul.f32 1.442695, %v8861_v32 }
 0xabc   : > { %v4271_v53 = vmul.f32 0.01, %v4207_v24  ;;  %vm4239_vm8 = vcmp.gt.f32.partialorder %v4207_v24, 0.0  ;;  %6020 = vpow2.f32 %v4551_v16 }
 0xabe   : > { %v4303_v62 = vsel %vm4239_vm8, %v4207_v24, %v4271_v53 }
 0xabf   : > { %v4151_v21 = vpop.f32.mrf.mxu3  ;;  %5775 = vmatmul.msk.f32.gmra.mxu2 %vm983_vm5, %v4303_v62 }
 0xac0   : > { %v4152_v19 = vadd.f32 %v4151_v21, %v3875_v4  ;;  %v3887_v6 = vpop.f32.mrf.mxu1 }
 0xac2   : > { %v4208_v25 = vadd.f32 %v8507_v2, %v4152_v19 }
 0xac4   : > { %v4272_v10 = vmul.f32 0.01, %v4208_v25  ;;  %vm4240_vm9 = vcmp.gt.f32.partialorder %v4208_v25, 0.0 }
 0xac6   : > { %v4304_v56 = vsel %vm4240_vm9, %v4208_v25, %v4272_v10  ;;  %v6021_v10 = vpop.eup %6020 }
 0xac7   : > { %v4154_v54 = vpop.f32.mrf.mxu3  ;;  %5776 = vmatmul.msk.f32.gmra.mxu2 %vm983_vm5, %v4304_v56  ;;  %v4608_v59 = vmul.f32 %v6021_v10, %v7603_v43  ;;  %v6200_v43 = vld [vmem:[%s9695_s4 + $0x3] ss:$0 sm:$0xff] }
 0xac8   : > { %v4155_v34 = vadd.f32 %v4154_v54, %v3878_v39 }
 0xaca   : > { %v4209_v60 = vadd.f32 %v8507_v2, %v4155_v34 }
 0xacc   : > { %v4273_v4 = vmul.f32 0.01, %v4209_v60  ;;  %v4678_v55 = vpop.permute.xlu1 %4677  ;;  %vm4241_vm0 = vcmp.gt.f32.partialorder %v4209_v60, 0.0 }
 0xacd   : > { %v4767_v3 = vadd.f32 %v4678_v55, %v4607_v22 }
 0xace   : > { %v4305_v26 = vsel %vm4241_vm0, %v4209_v60, %v4273_v4 }
 0xacf   : > { %v4157_v24 = vpop.f32.mrf.mxu3  ;;  %5777 = vmatmul.msk.f32.gmra.mxu2 %vm983_vm5, %v4305_v26  ;;  %v8953_v53 = vsel %vm625_vm3, %v4767_v3, %v8396_v58 }
 0xad0   : > { %v4158_v39 = vadd.f32 %v4157_v24, %v3881_v0  ;;  %4960 = vst.msk [vmem:[%s8748_s19 + $0x30] sm:$0xff] %vm4953_vm2, %v8953_v53 }
 0xad2   : > { %v4210_v47 = vadd.f32 %v8507_v2, %v4158_v39 }
 0xad4   : > { %v4274_v62 = vmul.f32 0.01, %v4210_v47  ;;  %vm4242_vm1 = vcmp.gt.f32.partialorder %v4210_v47, 0.0 }
 0xad5   : > { %v8959_v21 = vpop.xlane.xlu2 %4812 }
 0xad6   : > { %v4306_v32 = vsel %vm4242_vm1, %v4210_v47, %v4274_v62 }
 0xad7   : > { %v4160_v19 = vpop.f32.mrf.mxu3  ;;  %5778 = vmatmul.msk.f32.gmra.mxu2 %vm983_vm5, %v4306_v32 }
 0xad8   : > { %v4161_v25 = vadd.f32 %v4160_v19, %v3884_v1  ;;  %v3890_v1 = vpop.f32.mrf.mxu1 }
 0xada   : > { %v4211_v58 = vadd.f32 %v8507_v2, %v4161_v25  ;;  %v4471_v0 = vpop.f32.mrf.mxu2 }
 0xadb   : > { %v8964_v56 = vadd.f32 %v8659_v30, %v4471_v0 }
 0xadc   : > { %v4275_v54 = vmul.f32 0.01, %v4211_v58  ;;  %vm4243_vm10 = vcmp.gt.f32.partialorder %v4211_v58, 0.0 }
 0xadd   : > { %4685 = vrot.lane.b32.xlu2 %v8964_v56, %s6211_s22  ;;  %v4680_v34 = vpop.permute.xlu2 %4679  ;;  %v4823_v60 = vsel %vm625_vm3, %v8964_v56, 0.0 }
 0xade   : > { %v4768_v22 = vadd.f32 %v4680_v34, %v4608_v59  ;;  %4824 = vadd.xlane.f32.xlu0 %v4823_v60  ;;  %v4307_v2 = vsel %vm4243_vm10, %v4211_v58, %v4275_v54 }
 0xadf   : > { %v4163_v4 = vpop.f32.mrf.mxu3  ;;  %5779 = vmatmul.msk.f32.gmra.mxu2 %vm983_vm5, %v4307_v2 }
 0xae0   : > { %v4164_v55 = vadd.f32 %v4163_v4, %v3887_v6  ;;  %v8974_v3 = vsel %vm625_vm3, %v4768_v22, %v8517_v42  ;;  %v3893_v47 = vpop.f32.mrf.mxu1  ;;  %v4553_v42 = vmul.f32 1.442695, %v8877_v38 }
 0xae1   : > { %4961 = vst.msk [vmem:[%s8748_s19 + $0x38] sm:$0xff] %vm4953_vm2, %v8974_v3 }
 0xae2   : > { %v4212_v26 = vadd.f32 %v6200_v43, %v4164_v55  ;;  %6022 = vpow2.f32 %v4553_v42 }
 0xae4   : > { %v4276_v16 = vmul.f32 0.01, %v4212_v26  ;;  %vm4244_vm11 = vcmp.gt.f32.partialorder %v4212_v26, 0.0 }
 0xae6   : > { %v4308_v24 = vsel %vm4244_vm11, %v4212_v26, %v4276_v16  ;;  %v8990_v59 = vpop.xlane.xlu0 %4815 }
 0xae7   : > { %v4166_v39 = vpop.f32.mrf.mxu3  ;;  %5780 = vmatmul.msk.f32.gmra.mxu2 %vm983_vm5, %v4308_v24 }
 0xae8   : > { %v4167_v6 = vadd.f32 %v4166_v39, %v3890_v1  ;;  %v3896_v34 = vpop.f32.mrf.mxu1  ;;  %v6023_v1 = vpop.eup %6022 }
 0xae9   : > { %v4609_v55 = vmul.f32 %v6023_v1, %v7618_v7  ;;  %v4555_v7 = vmul.f32 1.442695, %v8919_v5 }
 0xaea   : > { %v4213_v62 = vadd.f32 %v6200_v43, %v4167_v6  ;;  %v4474_v32 = vpop.f32.mrf.mxu2 }
 0xaeb   : > { %v8985_v19 = vadd.f32 %v8659_v30, %v4474_v32  ;;  %6024 = vpow2.f32 %v4555_v7 }
 0xaec   : > { %v4277_v25 = vmul.f32 0.01, %v4213_v62  ;;  %vm4245_vm12 = vcmp.gt.f32.partialorder %v4213_v62, 0.0 }
 0xaed   : > { %v4826_v10 = vsel %vm625_vm3, %v8985_v19, 0.0 }
 0xaee   : > { %4827 = vadd.xlane.f32.xlu1 %v4826_v10  ;;  %v4309_v58 = vsel %vm4245_vm12, %v4213_v62, %v4277_v25 }
 0xaef   : > { %v4169_v0 = vpop.f32.mrf.mxu3  ;;  %5781 = vmatmul.msk.f32.gmra.mxu2 %vm983_vm5, %v4309_v58 }
 0xaf0   : > { %v4170_v54 = vadd.f32 %v4169_v0, %v3893_v47  ;;  %v3899_v39 = vpop.f32.mrf.mxu1 }
 0xaf2   : > { %v4214_v60 = vadd.f32 %v6200_v43, %v4170_v54  ;;  %4687 = vrot.lane.b32.xlu0 %v8985_v19, %s6211_s22 }
 0xaf4   : > { %v4278_v38 = vmul.f32 0.01, %v4214_v60  ;;  %vm4246_vm13 = vcmp.gt.f32.partialorder %v4214_v60, 0.0 }
 0xaf6   : > { %v4310_v22 = vsel %vm4246_vm13, %v4214_v60, %v4278_v38 }
 0xaf7   : > { %v4172_v2 = vpop.f32.mrf.mxu3  ;;  %5782 = vmatmul.msk.f32.gmra.mxu2 %vm983_vm5, %v4310_v22  ;;  %v9010_v60 = vpop.xlane.xlu1 %4818 }
 0xaf8   : > { %v4173_v4 = vadd.f32 %v4172_v2, %v3896_v34  ;;  %v3902_v54 = vpop.f32.mrf.mxu1  ;;  %v6025_v22 = vpop.eup %6024 }
 0xaf9   : > { %v4682_v26 = vpop.permute.xlu0 %4681 }
 0xafa   : > { %v4215_v16 = vadd.f32 %v6200_v43, %v4173_v4  ;;  %v4769_v24 = vadd.f32 %v4682_v26, %v4609_v55  ;;  %v4477_v62 = vpop.f32.mrf.mxu2  ;;  %v4610_v4 = vmul.f32 %v6025_v22, %v7660_v35  ;;  %v4557_v35 = vmul.f32 1.442695, %v8964_v56 }
 0xafb   : > { %v9006_v10 = vadd.f32 %v8659_v30, %v4477_v62 }
 0xafc   : > { %v4279_v47 = vmul.f32 0.01, %v4215_v16  ;;  %vm4247_vm14 = vcmp.gt.f32.partialorder %v4215_v16, 0.0  ;;  %v8998_v6 = vsel %vm625_vm3, %v4769_v24, %v8536_v40  ;;  %6026 = vpow2.f32 %v4557_v35 }
 0xafd   : > { %4962 = vst.msk [vmem:[%s8748_s19 + $0x40] sm:$0xff] %vm4953_vm2, %v8998_v6  ;;  %v4829_v40 = vsel %vm625_vm3, %v9006_v10, 0.0 }
 0xafe   : > { %v4311_v32 = vsel %vm4247_vm14, %v4215_v16, %v4279_v47 }
 0xaff   : > { %v4175_v42 = vpop.f32.mrf.mxu3  ;;  %5783 = vmatmul.msk.f32.gmra.mxu2 %vm983_vm5, %v4311_v32 }
 0xb00   : > { %v4176_v25 = vadd.f32 %v4175_v42, %v3899_v39 }
 0xb02   : > { %v4216_v58 = vadd.f32 %v6200_v43, %v4176_v25  ;;  %v4480_v39 = vpop.f32.mrf.mxu2  ;;  %v6027_v25 = vpop.eup %6026 }
 0xb03   : > { %v4611_v7 = vmul.f32 %v6027_v25, %v7677_v29 }
 0xb04   : > { %v4280_v0 = vmul.f32 0.01, %v4216_v58  ;;  %vm4248_vm15 = vcmp.gt.f32.partialorder %v4216_v58, 0.0 }
 0xb06   : > { %4830 = vadd.xlane.f32.xlu2 %v4829_v40  ;;  %v4312_v34 = vsel %vm4248_vm15, %v4216_v58, %v4280_v0 }
 0xb07   : > { %4689 = vrot.lane.b32.xlu1 %v9006_v10, %s6211_s22  ;;  %v4178_v5 = vpop.f32.mrf.mxu3  ;;  %5784 = vmatmul.msk.f32.gmra.mxu2 %vm983_vm5, %v4312_v34 }
 0xb08   : > { %v4179_v38 = vadd.f32 %v4178_v5, %v3902_v54 }
 0xb0a   : > { %v4217_v1 = vadd.f32 %v6200_v43, %v4179_v38  ;;  %v4481_v43 = vadd.f32 %v8659_v30, %v4480_v39  ;;  %v4483_v62 = vpop.f32.mrf.mxu2 }
 0xb0b   : > { %v9029_v32 = vadd.f32 %v8659_v30, %v4483_v62 }
 0xb0c   : > { %v4281_v2 = vmul.f32 0.01, %v4217_v1  ;;  %vm4249_vm4 = vcmp.gt.f32.partialorder %v4217_v1, 0.0  ;;  %v4832_v47 = vsel %vm625_vm3, %v4481_v43, 0.0 }
 0xb0d   : > { %v4835_v42 = vsel %vm625_vm3, %v9029_v32, 0.0 }
 0xb0e   : > { %v4313_v55 = vsel %vm4249_vm4, %v4217_v1, %v4281_v2 }
 0xb0f   : > { %v4684_v26 = vpop.permute.xlu1 %4683  ;;  %5785 = vmatmul.msk.f32.gmra.mxu2 %vm983_vm5, %v4313_v55  ;;  %vm5178_vm5 = vcmask 7168  }
 0xb10   : > { %v4770_v16 = vadd.f32 %v4684_v26, %v4610_v4 }
 0xb12   : > { %v9019_v24 = vsel %vm625_vm3, %v4770_v16, %v8558_v57  ;;  %v4486_v40 = vpop.f32.mrf.mxu2  ;;  %v4561_v16 = vmul.f32 1.442695, %v9006_v10 }
 0xb13   : > { %4963 = vst.msk [vmem:[%s8748_s19 + $0x48] sm:$0xff] %vm4953_vm2, %v9019_v24  ;;  %v9046_v54 = vadd.f32 %v8659_v30, %v4486_v40  ;;  %v4987_v40 = vmul.f32 %v8841_v23, %v8841_v23 }
 0xb15   : > { %v4838_v34 = vsel %vm625_vm3, %v9046_v54, 0.0 }
 0xb16   : > { %v9031_v57 = vpop.xlane.xlu2 %4821 }
 0xb1a   : > { %v4489_v29 = vpop.f32.mrf.mxu2 }
 0xb1b   : > { %v9053_v5 = vadd.f32 %v8659_v30, %v4489_v29 }
 0xb1c   : > { %4833 = vadd.xlane.f32.xlu0 %v4832_v47 }
 0xb1d   : > { %v4841_v38 = vsel %vm625_vm3, %v9053_v5, 0.0 }
 0xb1e   : > { %4691 = vrot.lane.b32.xlu2 %v4481_v43, %s6211_s22 }
 0xb30   : > { %4693 = vrot.lane.b32.xlu0 %v9029_v32, %s6211_s22 }
 0xb31   : > { %4836 = vadd.xlane.f32.xlu1 %v4835_v42 }
 0xb37   : > { %v4686_v58 = vpop.permute.xlu2 %4685 }
 0xb38   : > { %v4771_v0 = vadd.f32 %v4686_v58, %v4611_v7 }
 0xb3a   : > { %v9040_v56 = vsel %vm625_vm3, %v4771_v0, %v8636_v33  ;;  %v4559_v33 = vmul.f32 1.442695, %v8985_v19  ;;  %v4492_v19 = vpop.f32.mrf.mxu2 }
 0xb3b   : > { %4964 = vst.msk [vmem:[%s8748_s19 + $0x50] sm:$0xff] %vm4953_vm2, %v9040_v56  ;;  %v9072_v39 = vadd.f32 %v8659_v30, %v4492_v19 }
 0xb3c   : > { %6028 = vpow2.f32 %v4559_v33 }
 0xb3d   : > { %6030 = vpow2.f32 %v4561_v16  ;;  %v4844_v7 = vsel %vm625_vm3, %v9072_v39, 0.0 }
 0xb42   : > { %v6029_v22 = vpop.eup %6028  ;;  %v4495_v33 = vpop.f32.mrf.mxu2 }
 0xb43   : > { %v4612_v2 = vmul.f32 %v6029_v22, %v7695_v13  ;;  %v4986_v13 = vmul.f32 %v8755_v44, %v8755_v44  ;;  %v6031_v62 = vpop.eup %6030  ;;  %v4988_v22 = vmul.f32 %v8898_v8, %v8898_v8 }
 0xb44   : > { %v4613_v30 = vmul.f32 %v6031_v62, %v7722_v28 }
 0xb45   : > { %v5018_v35 = vsel %vm4953_vm2, %v4986_v13, 0.0 }
 0xb47   : > { %4839 = vadd.xlane.f32.xlu2 %v4838_v34  ;;  %v9925_v34 = vld [vmem:[#allocation114_spill] sm:$0xff] }
 0xb4a   : > { %4695 = vrot.lane.b32.xlu1 %v9046_v54, %s6211_s22 }
 0xb51   : > { %v9058_v1 = vpop.xlane.xlu0 %4824 }
 0xb5a   : > { %4842 = vadd.xlane.f32.xlu0 %v4841_v38 }
 0xb5f   : > { %4697 = vrot.lane.b32.xlu2 %v9053_v5, %s6211_s22 }
 0xb61   : > { %v9078_v47 = vpop.xlane.xlu1 %4827 }
 0xb64   : > { %v4688_v4 = vpop.permute.xlu0 %4687 }
 0xb65   : > { %v4772_v55 = vadd.f32 %v4688_v4, %v4612_v2  ;;  %v4565_v2 = vmul.f32 1.442695, %v9029_v32  ;;  %v5024_v4 = vsel %vm4953_vm2, %v4988_v22, 0.0 }
 0xb67   : > { %v9065_v26 = vsel %vm625_vm3, %v4772_v55, %v8650_v12  ;;  %v4563_v12 = vmul.f32 1.442695, %v4481_v43  ;;  %v4498_v55 = vpop.f32.mrf.mxu2 }
 0xb68   : > { %4965 = vst.msk [vmem:[%s8748_s19 + $0x58] sm:$0xff] %vm4953_vm2, %v9065_v26 }
 0xb69   : > { %6032 = vpow2.f32 %v4563_v12  ;;  %v9926_v12 = vld [vmem:[#allocation71_spill] sm:$0xff] }
 0xb6a   : > { %6034 = vpow2.f32 %v4565_v2 }
 0xb6e   : > { %4699 = vrot.lane.b32.xlu0 %v9072_v39, %s6211_s22 }
 0xb6f   : > { %v6033_v43 = vpop.eup %6032 }
 0xb70   : > { %v4614_v58 = vmul.f32 %v6033_v43, %v7734_v63  ;;  %v9107_v63 = vld [vmem:[%s9697_s6 + $0x3] ss:$0 sm:$0xff]  ;;  %v6035_v13 = vpop.eup %6034 }
 0xb71   : > { %v9110_v38 = vadd.f32 %v9107_v63, %v4495_v33  ;;  %v9123_v16 = vadd.f32 %v9107_v63, %v4498_v55  ;;  %v4615_v32 = vmul.f32 %v6035_v13, %v9926_v12 }
 0xb73   : > { %v4847_v23 = vsel %vm625_vm3, %v9110_v38, 0.0  ;;  %v4850_v8 = vsel %vm625_vm3, %v9123_v16, 0.0 }
 0xb74   : > { %5019 = vadd.xlane.f32.xlu1 %v5018_v35 }
 0xb79   : > { %v4690_v10 = vpop.permute.xlu1 %4689  ;;  %v9082_v42 = vpop.xlane.xlu2 %4830 }
 0xb7a   : > { %v4773_v25 = vadd.f32 %v4690_v10, %v4613_v30  ;;  %v9927_v30 = vld [vmem:[#allocation36_spill] sm:$0xff] }
 0xb7c   : > { %4845 = vadd.xlane.f32.xlu1 %v4844_v7  ;;  %v9088_v44 = vsel %vm625_vm3, %v4773_v25, %v8670_v41  ;;  %v5021_v41 = vsel %vm4953_vm2, %v4987_v40, 0.0  ;;  %v4567_v25 = vmul.f32 1.442695, %v9046_v54  ;;  %v4501_v7 = vpop.f32.mrf.mxu2  ;;  %v4989_v54 = vmul.f32 %v8832_v20, %v8832_v20  ;;  %v9930_v20 = vld [vmem:[#allocation39_spill] sm:$0xff] }
 0xb7d   : > { %4966 = vst.msk [vmem:[%s8748_s19 + $0x60] sm:$0xff] %vm4953_vm2, %v9088_v44  ;;  %v9139_v43 = vadd.f32 %v9107_v63, %v4501_v7 }
 0xb7e   : > { %6036 = vpow2.f32 %v4567_v25 }
 0xb81   : > { %v4692_v0 = vpop.permute.xlu2 %4691 }
 0xb82   : > { %v4774_v28 = vadd.f32 %v4692_v0, %v4614_v58  ;;  %v4569_v58 = vmul.f32 1.442695, %v9053_v5  ;;  %v5027_v5 = vsel %vm4953_vm2, %v4989_v54, 0.0 }
 0xb84   : > { %v9098_v29 = vsel %vm625_vm3, %v4774_v28, %v9925_v34  ;;  %v6037_v28 = vpop.eup %6036  ;;  %6038 = vpow2.f32 %v4569_v58  ;;  %v9928_v34 = vld [vmem:[#allocation74_spill] sm:$0xff] }
 0xb85   : > { %4967 = vst.msk [vmem:[%s8748_s19 + $0x68] sm:$0xff] %vm4953_vm2, %v9098_v29 }
 0xb88   : > { %5022 = vadd.xlane.f32.xlu2 %v5021_v41  ;;  %v4616_v41 = vmul.f32 %v6037_v28, %v9928_v34 }
 0xb8a   : > { %v6039_v22 = vpop.eup %6038 }
 0xb8f   : > { %v9120_v19 = vpop.xlane.xlu0 %4833 }
 0xb90   : > { %4848 = vadd.xlane.f32.xlu2 %v4847_v23 }
 0xb95   : > { %4701 = vrot.lane.b32.xlu1 %v9110_v38, %s6211_s22 }
 0xb98   : > { %5025 = vadd.xlane.f32.xlu0 %v5024_v4  ;;  %v9929_v4 = vld [vmem:[#allocation76_spill] sm:$0xff] }
 0xb99   : > { %v4617_v55 = vmul.f32 %v6039_v22, %v9929_v4 }
 0xba0   : > { %4851 = vadd.xlane.f32.xlu0 %v4850_v8 }
 0xba2   : > { %v4694_v35 = vpop.permute.xlu0 %4693 }
 0xba3   : > { %v4775_v62 = vadd.f32 %v4694_v35, %v4615_v32  ;;  %v4853_v32 = vsel %vm625_vm3, %v9139_v43, 0.0 }
 0xba4   : > { %v9142_v0 = vpop.xlane.xlu1 %4836 }
 0xba5   : > { %v9130_v10 = vsel %vm625_vm3, %v4775_v62, %v9927_v30  ;;  %v4504_v62 = vpop.f32.mrf.mxu2  ;;  %v4571_v30 = vmul.f32 1.442695, %v9072_v39  ;;  %v9931_v39 = vld [vmem:[#allocation77_spill] sm:$0xff] }
 0xba6   : > { %4968 = vst.msk [vmem:[%s8748_s19 + $0x70] sm:$0xff] %vm4953_vm2, %v9130_v10  ;;  %v9174_v25 = vadd.f32 %v9107_v63, %v4504_v62 }
 0xba7   : > { %6040 = vpow2.f32 %v4571_v30 }
 0xba8   : > { %4703 = vrot.lane.b32.xlu2 %v9123_v16, %s6211_s22  ;;  %v4856_v58 = vsel %vm625_vm3, %v9174_v25, 0.0 }
 0xbad   : > { %v6041_v28 = vpop.eup %6040  ;;  %v4507_v34 = vpop.f32.mrf.mxu2 }
 0xbb4   : > { %4705 = vrot.lane.b32.xlu0 %v9139_v43, %s6211_s22 }
 0xbba   : > { %v9146_v40 = vpop.xlane.xlu2 %4839 }
 0xbbc   : > { %v4696_v33 = vpop.permute.xlu1 %4695 }
 0xbbd   : > { %v4776_v23 = vadd.f32 %v4696_v33, %v4616_v41  ;;  %v4618_v41 = vmul.f32 %v6041_v28, %v9931_v39 }
 0xbbf   : > { %5028 = vadd.xlane.f32.xlu1 %v5027_v5  ;;  %v9154_v2 = vsel %vm625_vm3, %v4776_v23, %v8567_v9  ;;  %v4990_v9 = vmul.f32 %v8927_v11, %v8927_v11  ;;  %v4991_v11 = vmul.f32 %v8912_v49, %v8912_v49  ;;  %v9187_v23 = vadd.f32 %v9107_v63, %v4507_v34  ;;  %v9932_v5 = vld [vmem:[#allocation48_spill] sm:$0xff]  ;;  %v9937_v34 = vld [vmem:[#allocation59_spill] sm:$0xff] }
 0xbc0   : > { %4969 = vst.msk [vmem:[%s8748_s19 + $0x78] sm:$0xff] %vm4953_vm2, %v9154_v2 }
 0xbc1   : > { %v5030_v35 = vsel %vm4953_vm2, %v4990_v9, 0.0  ;;  %v5033_v54 = vsel %vm4953_vm2, %v4991_v11, 0.0  ;;  %v4859_v49 = vsel %vm625_vm3, %v9187_v23, 0.0  ;;  %v4510_v11 = vpop.f32.mrf.mxu2 }
 0xbc2   : > { %v4698_v13 = vpop.permute.xlu2 %4697  ;;  %v9214_v28 = vadd.f32 %v9107_v63, %v4510_v11 }
 0xbc3   : > { %v4777_v8 = vadd.f32 %v4698_v13, %v4617_v55  ;;  %v9933_v55 = vld [vmem:[#allocation31_spill] sm:$0xff]  ;;  %v9934_v13 = vld [vmem:[#allocation58_spill] sm:$0xff] }
 0xbc5   : > { %v9162_v12 = vsel %vm625_vm3, %v4777_v8, %v9930_v20  ;;  %v2681_v8 = vadd.f32 %v9934_v13, %v9933_v55 }
 0xbc6   : > { %4970 = vst.msk [vmem:[%s8748_s19 + $0x80] sm:$0xff] %vm4953_vm2, %v9162_v12 }
 0xbc7   : > { %4854 = vadd.xlane.f32.xlu1 %v4853_v32  ;;  %v9935_v32 = vld [vmem:[#allocation107_spill] sm:$0xff] }
 0xbc8   : > { %v3753_v9 = vadd.f32 %v9935_v32, %v2681_v8 }
 0xbca   : > { %v4889_v62 = vadd.f32 %v8825_v61, %v3753_v9  ;;  %v4573_v61 = vmul.f32 1.442695, %v9110_v38  ;;  %v9940_v38 = vld [vmem:[#allocation82_spill] sm:$0xff] }
 0xbcc   : > { %6042 = vpow2.f32 %v4573_v61 }
 0xbcd   : > { %v9176_v7 = vpop.xlane.xlu0 %4842 }
 0xbd1   : > { %5031 = vadd.xlane.f32.xlu2 %v5030_v35 }
 0xbd9   : > { %4857 = vadd.xlane.f32.xlu2 %v4856_v58 }
 0xbde   : > { %5034 = vadd.xlane.f32.xlu0 %v5033_v54  ;;  %v9936_v54 = vld [vmem:[#allocation2_spill] sm:$0xff] }
 0xbdf   : > { %v2682_v39 = vadd.f32 %v9937_v34, %v9936_v54 }
 0xbe0   : > { %4707 = vrot.lane.b32.xlu1 %v9174_v25, %s6211_s22  ;;  %v4700_v33 = vpop.permute.xlu0 %4699 }
 0xbe1   : > { %v4778_v22 = vadd.f32 %v4700_v33, %v4618_v41  ;;  %v9938_v33 = vld [vmem:[#allocation115_spill] sm:$0xff] }
 0xbe3   : > { %v9191_v4 = vsel %vm625_vm3, %v4778_v22, %v9932_v5  ;;  %v3754_v22 = vadd.f32 %v9938_v33, %v2682_v39  ;;  %v9943_v33 = vld [vmem:[#allocation8_spill] sm:$0xff] }
 0xbe4   : > { %4971 = vst.msk [vmem:[%s8748_s19 + $0x88] sm:$0xff] %vm4953_vm2, %v9191_v4 }
 0xbe5   : > { %v4890_v55 = vadd.f32 %v8879_v50, %v3754_v22  ;;  %v4992_v50 = vmul.f32 %v8953_v53, %v8953_v53  ;;  %v9944_v22 = vld [vmem:[#allocation60_spill] sm:$0xff] }
 0xbe6   : > { %4860 = vadd.xlane.f32.xlu0 %v4859_v49  ;;  %v4575_v49 = vmul.f32 1.442695, %v9123_v16  ;;  %v9942_v16 = vld [vmem:[#allocation79_spill] sm:$0xff] }
 0xbe7   : > { %v5020_v20 = vpop.xlane.xlu1 %5019 }
 0xbe8   : > { %v5114_v35 = vmul.f32 0.5, %v5020_v20  ;;  %v9939_v20 = vld [vmem:[#allocation22_spill] sm:$0xff]  ;;  %6044 = vpow2.f32 %v4575_v49  ;;  %v9945_v49 = vld [vmem:[#allocation80_spill] sm:$0xff] }
 0xbe9   : > { %v2699_v32 = vadd.f32 %v9940_v38, %v9939_v20 }
 0xbea   : > { %v5146_v30 = vsub.f32 -3.675754, %v5114_v35  ;;  %v9941_v35 = vld [vmem:[#allocation120_spill] sm:$0xff] }
 0xbec   : > { %v5179_v58 = vsel %vm5178_vm5, %v5146_v30, %v4889_v62  ;;  %v3771_v62 = vadd.f32 %v9941_v35, %v2699_v32  ;;  %v6043_v30 = vpop.eup %6042  ;;  %v9947_v32 = vld [vmem:[#allocation110_spill] sm:$0xff] }
 0xbed   : > { %5211 = vst.msk [vmem:[%s9206_s29] sm:$0xff] %vm625_vm3, %v5179_v58  ;;  %v4619_v61 = vmul.f32 %v6043_v30, %v9942_v16 }
 0xbee   : > { %v6045_v54 = vpop.eup %6044 }
 0xbef   : > { %v9224_v8 = vpop.xlane.xlu1 %4845 }
 0xbf1   : > { %4709 = vrot.lane.b32.xlu2 %v9187_v23, %s6211_s22 }
 0xbfa   : > { %4711 = vrot.lane.b32.xlu0 %v9214_v28, %s6211_s22 }
 0xbfb   : > { %v5023_v41 = vpop.xlane.xlu2 %5022 }
 0xbfc   : > { %v5115_v5 = vmul.f32 0.5, %v5023_v41  ;;  %v5036_v41 = vsel %vm4953_vm2, %v4992_v50, 0.0 }
 0xbfe   : > { %v5147_v13 = vsub.f32 -3.675754, %v5115_v5  ;;  %v2683_v5 = vadd.f32 %v9944_v22, %v9943_v33  ;;  %v4994_v33 = vmul.f32 %v8998_v6, %v8998_v6 }
 0xc00   : > { %v5180_v9 = vsel %vm5178_vm5, %v5147_v13, %v4890_v55  ;;  %v4620_v55 = vmul.f32 %v6045_v54, %v9945_v49  ;;  %v9946_v13 = vld [vmem:[#allocation24_spill] sm:$0xff]  ;;  %v4993_v54 = vmul.f32 %v8974_v3, %v8974_v3  ;;  %v9948_v49 = vld [vmem:[#allocation83_spill] sm:$0xff] }
 0xc01   : > { %5212 = vst.msk [vmem:[%s9206_s29 + $0x8] sm:$0xff] %vm625_vm3, %v5180_v9  ;;  %v3755_v9 = vadd.f32 %v9947_v32, %v2683_v5 }
 0xc03   : > { %v4849_v58 = vpop.xlane.xlu2 %4848  ;;  %v4891_v30 = vadd.f32 %v8907_v17, %v3755_v9  ;;  %v4577_v17 = vmul.f32 1.442695, %v9139_v43  ;;  %v5042_v43 = vsel %vm4953_vm2, %v4994_v33, 0.0  ;;  %v9949_v9 = vld [vmem:[#allocation3_spill] sm:$0xff]  ;;  %v9952_v33 = vld [vmem:[#allocation4_spill] sm:$0xff] }
 0xc04   : > { %v9232_v11 = vadd.f32 %v4849_v58, %v3771_v62 }
 0xc05   : > { %6046 = vpow2.f32 %v4577_v17 }
 0xc07   : > { %v4702_v34 = vpop.permute.xlu1 %4701 }
 0xc08   : > { %v4779_v39 = vadd.f32 %v4702_v34, %v4619_v61  ;;  %v4862_v61 = vsel %vm625_vm3, %v9214_v28, 0.0  ;;  %v5039_v34 = vsel %vm4953_vm2, %v4993_v54, 0.0 }
 0xc0a   : > { %5037 = vadd.xlane.f32.xlu1 %v5036_v41  ;;  %v9243_v20 = vsel %vm625_vm3, %v4779_v39, %v9946_v13 }
 0xc0b   : > { %v4704_v53 = vpop.permute.xlu2 %4703  ;;  %v5026_v38 = vpop.xlane.xlu0 %5025  ;;  %4972 = vst.msk [vmem:[%s8748_s19 + $0x90] sm:$0xff] %vm4953_vm2, %v9243_v20 }
 0xc0c   : > { %v4780_v35 = vadd.f32 %v4704_v53, %v4620_v55  ;;  %v5116_v62 = vmul.f32 0.5, %v5026_v38  ;;  %v6047_v3 = vpop.eup %6046 }
 0xc0d   : > { %v4621_v55 = vmul.f32 %v6047_v3, %v9948_v49 }
 0xc0e   : > { %v5148_v58 = vsub.f32 -3.675754, %v5116_v62  ;;  %v9252_v50 = vsel %vm625_vm3, %v4780_v35, %v8543_v18  ;;  %v4513_v18 = vpop.f32.mrf.mxu2  ;;  %v9950_v35 = vld [vmem:[#allocation62_spill] sm:$0xff] }
 0xc0f   : > { %4973 = vst.msk [vmem:[%s8748_s19 + $0x98] sm:$0xff] %vm4953_vm2, %v9252_v50  ;;  %v9267_v39 = vadd.f32 %v9107_v63, %v4513_v18  ;;  %v2684_v62 = vadd.f32 %v9950_v35, %v9949_v9  ;;  %v9955_v9 = vld [vmem:[#allocation28_spill] sm:$0xff]  ;;  %v9956_v35 = vld [vmem:[#allocation93_spill] sm:$0xff] }
 0xc10   : > { %v5181_v16 = vsel %vm5178_vm5, %v5148_v58, %v4891_v30  ;;  %v9951_v58 = vld [vmem:[#allocation109_spill] sm:$0xff] }
 0xc11   : > { %5213 = vst.msk [vmem:[%s9206_s29 + $0x10] sm:$0xff] %vm625_vm3, %v5181_v16  ;;  %v4865_v22 = vsel %vm625_vm3, %v9267_v39, 0.0  ;;  %v3756_v16 = vadd.f32 %v9951_v58, %v2684_v62  ;;  %v2702_v62 = vadd.f32 %v9956_v35, %v9955_v9 }
 0xc12   : > { %4863 = vadd.xlane.f32.xlu1 %v4862_v61 }
 0xc13   : > { %v9269_v41 = vpop.xlane.xlu0 %4851 }
 0xc16   : > { %v4516_v5 = vpop.f32.mrf.mxu2 }
 0xc17   : > { %v9278_v53 = vadd.f32 %v9107_v63, %v4516_v5  ;;  %v9954_v5 = vld [vmem:[#allocation117_spill] sm:$0xff] }
 0xc19   : > { %v4868_v32 = vsel %vm625_vm3, %v9278_v53, 0.0 }
 0xc1a   : > { %5040 = vadd.xlane.f32.xlu2 %v5039_v34 }
 0xc1e   : > { %v4519_v34 = vpop.f32.mrf.mxu2 }
 0xc1f   : > { %v9301_v18 = vadd.f32 %v9107_v63, %v4519_v34  ;;  %v4995_v34 = vmul.f32 %v9019_v24, %v9019_v24 }
 0xc21   : > { %v5045_v35 = vsel %vm4953_vm2, %v4995_v34, 0.0  ;;  %v4871_v34 = vsel %vm625_vm3, %v9301_v18, 0.0 }
 0xc22   : > { %4866 = vadd.xlane.f32.xlu2 %v4865_v22  ;;  %v9953_v22 = vld [vmem:[#allocation61_spill] sm:$0xff] }
 0xc23   : > { %v2685_v3 = vadd.f32 %v9953_v22, %v9952_v33  ;;  %v9959_v22 = vld [vmem:[#allocation85_spill] sm:$0xff] }
 0xc24   : > { %5043 = vadd.xlane.f32.xlu0 %v5042_v43 }
 0xc25   : > { %v3757_v49 = vadd.f32 %v9954_v5, %v2685_v3 }
 0xc26   : > { %v4706_v13 = vpop.permute.xlu0 %4705 }
 0xc27   : > { %v4781_v38 = vadd.f32 %v4706_v13, %v4621_v55  ;;  %v4581_v13 = vmul.f32 1.442695, %v9187_v23 }
 0xc29   : > { %v9282_v6 = vsel %vm625_vm3, %v4781_v38, %v8570_v15  ;;  %v4892_v15 = vadd.f32 %v8881_v51, %v3756_v16  ;;  %v4579_v51 = vmul.f32 1.442695, %v9174_v25  ;;  %v4893_v38 = vadd.f32 %v8894_v52, %v3757_v49  ;;  %v9957_v52 = vld [vmem:[#allocation10_spill] sm:$0xff] }
 0xc2a   : > { %4974 = vst.msk [vmem:[%s8748_s19 + $0xa0] sm:$0xff] %vm4953_vm2, %v9282_v6  ;;  %v3774_v25 = vadd.f32 %v8576_v27, %v2702_v62 }
 0xc2b   : > { %4713 = vrot.lane.b32.xlu1 %v9267_v39, %s6211_s22  ;;  %6048 = vpow2.f32 %v4579_v51  ;;  %v9960_v51 = vld [vmem:[#allocation119_spill] sm:$0xff] }
 0xc2c   : > { %4869 = vadd.xlane.f32.xlu0 %v4868_v32  ;;  %6050 = vpow2.f32 %v4581_v13 }
 0xc31   : > { %v6049_v23 = vpop.eup %6048 }
 0xc32   : > { %v5029_v30 = vpop.xlane.xlu1 %5028  ;;  %v4622_v3 = vmul.f32 %v6049_v23, %v9959_v22  ;;  %v4996_v22 = vmul.f32 %v9040_v56, %v9040_v56 }
 0xc33   : > { %v5117_v61 = vmul.f32 0.5, %v5029_v30 }
 0xc35   : > { %v5149_v54 = vsub.f32 -3.675754, %v5117_v61 }
 0xc37   : > { %v5182_v17 = vsel %vm5178_vm5, %v5149_v54, %v4892_v15  ;;  %v6051_v15 = vpop.eup %6050  ;;  %v9958_v54 = vld [vmem:[#allocation63_spill] sm:$0xff] }
 0xc38   : > { %5214 = vst.msk [vmem:[%s9206_s29 + $0x18] sm:$0xff] %vm625_vm3, %v5182_v17  ;;  %v2686_v17 = vadd.f32 %v9958_v54, %v9957_v52  ;;  %v9965_v52 = vld [vmem:[#allocation41_spill] sm:$0xff] }
 0xc3a   : > { %4715 = vrot.lane.b32.xlu2 %v9278_v53, %s6211_s22  ;;  %v9314_v58 = vpop.xlane.xlu1 %4854 }
 0xc40   : > { %4717 = vrot.lane.b32.xlu0 %v9301_v18, %s6211_s22 }
 0xc44   : > { %v5032_v43 = vpop.xlane.xlu2 %5031 }
 0xc45   : > { %v5118_v55 = vmul.f32 0.5, %v5032_v43  ;;  %v3758_v43 = vadd.f32 %v9960_v51, %v2686_v17  ;;  %v5048_v51 = vsel %vm4953_vm2, %v4996_v22, 0.0  ;;  %v9970_v22 = vld [vmem:[#allocation6_spill] sm:$0xff] }
 0xc47   : > { %v5150_v32 = vsub.f32 -3.675754, %v5118_v55  ;;  %v9961_v55 = vld [vmem:[#allocation87_spill] sm:$0xff] }
 0xc48   : > { %v4623_v13 = vmul.f32 %v6051_v15, %v9961_v55 }
 0xc49   : > { %v5183_v30 = vsel %vm5178_vm5, %v5150_v32, %v4893_v38  ;;  %v4894_v38 = vadd.f32 %v8944_v48, %v3758_v43  ;;  %v9964_v48 = vld [vmem:[#allocation27_spill] sm:$0xff]  ;;  %v4997_v43 = vmul.f32 %v9065_v26, %v9065_v26 }
 0xc4a   : > { %5215 = vst.msk [vmem:[%s9206_s29 + $0x20] sm:$0xff] %vm625_vm3, %v5183_v30  ;;  %v9962_v30 = vld [vmem:[#allocation30_spill] sm:$0xff] }
 0xc4c   : > { %v4858_v16 = vpop.xlane.xlu2 %4857 }
 0xc4d   : > { %v9319_v61 = vadd.f32 %v4858_v16, %v3774_v25  ;;  %v9963_v25 = vld [vmem:[#allocation86_spill] sm:$0xff] }
 0xc4e   : > { %v2703_v16 = vadd.f32 %v9963_v25, %v9962_v30  ;;  %v9968_v30 = vld [vmem:[#allocation65_spill] sm:$0xff] }
 0xc50   : > { %v3775_v54 = vadd.f32 %v9965_v52, %v2703_v16 }
 0xc51   : > { %v5035_v33 = vpop.xlane.xlu0 %5034 }
 0xc52   : > { %v5119_v5 = vmul.f32 0.5, %v5035_v33  ;;  %v4708_v27 = vpop.permute.xlu1 %4707  ;;  %v4583_v33 = vmul.f32 1.442695, %v9214_v28  ;;  %v9966_v28 = vld [vmem:[#allocation89_spill] sm:$0xff] }
 0xc53   : > { %v4782_v49 = vadd.f32 %v4708_v27, %v4622_v3  ;;  %v4522_v3 = vpop.f32.mrf.mxu2 }
 0xc54   : > { %v5151_v32 = vsub.f32 -3.675754, %v5119_v5  ;;  %v4710_v9 = vpop.permute.xlu2 %4709  ;;  %6052 = vpow2.f32 %v4583_v33  ;;  %v9361_v5 = vadd.f32 %v9107_v63, %v4522_v3  ;;  %v9971_v3 = vld [vmem:[#allocation64_spill] sm:$0xff] }
 0xc55   : > { %v4783_v24 = vadd.f32 %v4710_v9, %v4623_v13  ;;  %5046 = vadd.xlane.f32.xlu1 %v5045_v35  ;;  %v9332_v62 = vsel %vm625_vm3, %v4782_v49, %v8588_v45  ;;  %v5051_v49 = vsel %vm4953_vm2, %v4997_v43, 0.0  ;;  %v9972_v43 = vld [vmem:[#allocation118_spill] sm:$0xff] }
 0xc56   : > { %v5184_v23 = vsel %vm5178_vm5, %v5151_v32, %v4894_v38  ;;  %4975 = vst.msk [vmem:[%s8748_s19 + $0xa8] sm:$0xff] %vm4953_vm2, %v9332_v62  ;;  %v4874_v56 = vsel %vm625_vm3, %v9361_v5, 0.0 }
 0xc57   : > { %5216 = vst.msk [vmem:[%s9206_s29 + $0x28] sm:$0xff] %vm625_vm3, %v5184_v23  ;;  %v9344_v15 = vsel %vm625_vm3, %v4783_v24, %v9964_v48  ;;  %v9967_v24 = vld [vmem:[#allocation5_spill] sm:$0xff]  ;;  %v9969_v23 = vld [vmem:[#allocation111_spill] sm:$0xff] }
 0xc58   : > { %4976 = vst.msk [vmem:[%s8748_s19 + $0xb0] sm:$0xff] %vm4953_vm2, %v9344_v15  ;;  %v2687_v25 = vadd.f32 %v9968_v30, %v9967_v24  ;;  %v9975_v30 = vld [vmem:[#allocation13_spill] sm:$0xff] }
 0xc59   : > { %v4861_v45 = vpop.xlane.xlu0 %4860 }
 0xc5a   : > { %v9350_v17 = vadd.f32 %v4861_v45, %v3775_v54  ;;  %v6053_v27 = vpop.eup %6052  ;;  %v3759_v48 = vadd.f32 %v9969_v23, %v2687_v25  ;;  %v9976_v23 = vld [vmem:[#allocation7_spill] sm:$0xff] }
 0xc5b   : > { %v4525_v55 = vpop.f32.mrf.mxu2  ;;  %v4624_v13 = vmul.f32 %v6053_v27, %v9966_v28 }
 0xc5c   : > { %v9368_v32 = vadd.f32 %v9107_v63, %v4525_v55 }
 0xc5d   : > { %4872 = vadd.xlane.f32.xlu1 %v4871_v34 }
 0xc5e   : > { %v4877_v35 = vsel %vm625_vm3, %v9368_v32, 0.0 }
 0xc63   : > { %5049 = vadd.xlane.f32.xlu2 %v5048_v51  ;;  %v4528_v45 = vpop.f32.mrf.mxu2  ;;  %v2688_v51 = vadd.f32 %v9971_v3, %v9970_v22 }
 0xc64   : > { %v9391_v33 = vadd.f32 %v9107_v63, %v4528_v45 }
 0xc65   : > { %v3760_v27 = vadd.f32 %v9972_v43, %v2688_v51  ;;  %v9979_v43 = vld [vmem:[#allocation47_spill] sm:$0xff] }
 0xc67   : > { %v4896_v28 = vadd.f32 %v8990_v59, %v3760_v27  ;;  %v9980_v27 = vld [vmem:[#allocation99_spill] sm:$0xff] }
 0xc6a   : > { %5052 = vadd.xlane.f32.xlu0 %v5051_v49  ;;  %v4585_v49 = vmul.f32 1.442695, %v9267_v39 }
 0xc6b   : > { %4875 = vadd.xlane.f32.xlu2 %v4874_v56  ;;  %v4587_v56 = vmul.f32 1.442695, %v9278_v53  ;;  %v9977_v53 = vld [vmem:[#allocation66_spill] sm:$0xff] }
 0xc6c   : > { %v4712_v38 = vpop.permute.xlu0 %4711  ;;  %6054 = vpow2.f32 %v4585_v49  ;;  %v2706_v49 = vadd.f32 %v9980_v27, %v9979_v43 }
 0xc6d   : > { %v4784_v26 = vadd.f32 %v4712_v38, %v4624_v13  ;;  %v9973_v38 = vld [vmem:[#allocation32_spill] sm:$0xff]  ;;  %6056 = vpow2.f32 %v4587_v56 }
 0xc6e   : > { %v9981_v56 = vld [vmem:[#allocation92_spill] sm:$0xff] }
 0xc6f   : > { %v9372_v9 = vsel %vm625_vm3, %v4784_v26, %v8710_v36  ;;  %v4895_v36 = vadd.f32 %v8959_v21, %v3759_v48  ;;  %v9974_v26 = vld [vmem:[#allocation94_spill] sm:$0xff]  ;;  %v2689_v48 = vadd.f32 %v9977_v53, %v9976_v23  ;;  %v9984_v53 = vld [vmem:[#allocation20_spill] sm:$0xff] }
 0xc70   : > { %4977 = vst.msk [vmem:[%s8748_s19 + $0xb8] sm:$0xff] %vm4953_vm2, %v9372_v9 }
 0xc72   : > { %4878 = vadd.xlane.f32.xlu0 %v4877_v35  ;;  %v2705_v35 = vadd.f32 %v9974_v26, %v9973_v38 }
 0xc74   : > { %v3777_v25 = vadd.f32 %v9975_v30, %v2705_v35 }
 0xc76   : > { %4719 = vrot.lane.b32.xlu1 %v9361_v5, %s6211_s22 }
 0xc7d   : > { %v5038_v16 = vpop.xlane.xlu1 %5037 }
 0xc7e   : > { %v5120_v52 = vmul.f32 0.5, %v5038_v16 }
 0xc80   : > { %v5152_v54 = vsub.f32 -3.675754, %v5120_v52 }
 0xc82   : > { %v5185_v34 = vsel %vm5178_vm5, %v5152_v54, %v4895_v36  ;;  %v6055_v36 = vpop.eup %6054  ;;  %v9978_v54 = vld [vmem:[#allocation121_spill] sm:$0xff] }
 0xc83   : > { %5217 = vst.msk [vmem:[%s9206_s29 + $0x30] sm:$0xff] %vm625_vm3, %v5185_v34  ;;  %4721 = vrot.lane.b32.xlu2 %v9368_v32, %s6211_s22  ;;  %v3761_v45 = vadd.f32 %v9978_v54, %v2689_v48  ;;  %v6057_v22 = vpop.eup %6056  ;;  %v4589_v54 = vmul.f32 1.442695, %v9301_v18  ;;  %v5003_v18 = vmul.f32 %v9191_v4, %v9191_v4 }
 0xc85   : > { %v9407_v16 = vpop.xlane.xlu1 %4863  ;;  %v4897_v3 = vadd.f32 %v9010_v60, %v3761_v45  ;;  %v9983_v60 = vld [vmem:[#allocation16_spill] sm:$0xff]  ;;  %v4999_v45 = vmul.f32 %v9098_v29, %v9098_v29  ;;  %6058 = vpow2.f32 %v4589_v54  ;;  %v9990_v54 = vld [vmem:[#allocation14_spill] sm:$0xff] }
 0xc86   : > { %4723 = vrot.lane.b32.xlu0 %v9391_v33, %s6211_s22 }
 0xc8d   : > { %v5041_v21 = vpop.xlane.xlu2 %5040 }
 0xc8e   : > { %v5121_v55 = vmul.f32 0.5, %v5041_v21  ;;  %v4998_v21 = vmul.f32 %v9088_v44, %v9088_v44 }
 0xc90   : > { %v5153_v13 = vsub.f32 -3.675754, %v5121_v55 }
 0xc92   : > { %v5186_v24 = vsel %vm5178_vm5, %v5153_v13, %v4896_v28  ;;  %v4626_v28 = vmul.f32 %v6057_v22, %v9981_v56  ;;  %v9982_v13 = vld [vmem:[#allocation91_spill] sm:$0xff]  ;;  %v5000_v22 = vmul.f32 %v9130_v10, %v9130_v10  ;;  %v5069_v56 = vsel %vm4953_vm2, %v5003_v18, 0.0 }
 0xc93   : > { %5218 = vst.msk [vmem:[%s9206_s29 + $0x38] sm:$0xff] %vm625_vm3, %v5186_v24  ;;  %v4625_v38 = vmul.f32 %v6055_v36, %v9982_v13  ;;  %v3778_v24 = vadd.f32 %v9983_v60, %v2706_v49  ;;  %v9993_v18 = vld [vmem:[#allocation43_spill] sm:$0xff] }
 0xc95   : > { %v4867_v39 = vpop.xlane.xlu2 %4866 }
 0xc96   : > { %v9411_v59 = vadd.f32 %v4867_v39, %v3777_v25  ;;  %v5054_v39 = vsel %vm4953_vm2, %v4998_v21, 0.0  ;;  %v9986_v21 = vld [vmem:[#allocation96_spill] sm:$0xff] }
 0xc97   : > { %v5044_v52 = vpop.xlane.xlu0 %5043 }
 0xc98   : > { %v5122_v34 = vmul.f32 0.5, %v5044_v52  ;;  %v9985_v52 = vld [vmem:[#allocation42_spill] sm:$0xff] }
 0xc9a   : > { %v5154_v51 = vsub.f32 -3.675754, %v5122_v34  ;;  %v5057_v34 = vsel %vm4953_vm2, %v4999_v45, 0.0  ;;  %v9991_v45 = vld [vmem:[#allocation67_spill] sm:$0xff] }
 0xc9c   : > { %v5187_v55 = vsel %vm5178_vm5, %v5154_v51, %v4897_v3  ;;  %v6059_v3 = vpop.eup %6058  ;;  %v5060_v51 = vsel %vm4953_vm2, %v5000_v22, 0.0 }
 0xc9d   : > { %5219 = vst.msk [vmem:[%s9206_s29 + $0x40] sm:$0xff] %vm625_vm3, %v5187_v55  ;;  %v4716_v26 = vpop.permute.xlu2 %4715  ;;  %v4714_v35 = vpop.permute.xlu1 %4713  ;;  %v4627_v43 = vmul.f32 %v6059_v3, %v9986_v21  ;;  %v9992_v3 = vld [vmem:[#allocation122_spill] sm:$0xff] }
 0xc9e   : > { %v4786_v30 = vadd.f32 %v4716_v26, %v4626_v28  ;;  %v4785_v25 = vadd.f32 %v4714_v35, %v4625_v38  ;;  %v4531_v55 = vpop.f32.mrf.mxu2  ;;  %v5006_v28 = vmul.f32 %v9282_v6, %v9282_v6  ;;  %v5009_v38 = vmul.f32 %v9372_v9, %v9372_v9  ;;  %v9987_v26 = vld [vmem:[#allocation11_spill] sm:$0xff]  ;;  %v9988_v35 = vld [vmem:[#allocation68_spill] sm:$0xff] }
 0xc9f   : > { %v4870_v44 = vpop.xlane.xlu0 %4869  ;;  %v9457_v10 = vadd.f32 %v9107_v63, %v4531_v55  ;;  %v2690_v60 = vadd.f32 %v9988_v35, %v9987_v26  ;;  %v9994_v55 = vld [vmem:[#allocation100_spill] sm:$0xff]  ;;  %v9998_v35 = vld [vmem:[#allocation123_spill] sm:$0xff] }
 0xca0   : > { %v9426_v23 = vadd.f32 %v4870_v44, %v3778_v24  ;;  %5055 = vadd.xlane.f32.xlu1 %v5054_v39  ;;  %v9430_v48 = vsel %vm625_vm3, %v4785_v25, %v9984_v53  ;;  %v9434_v36 = vsel %vm625_vm3, %v4786_v30, %v9985_v52  ;;  %v5078_v4 = vsel %vm4953_vm2, %v5006_v28, 0.0  ;;  %v9989_v30 = vld [vmem:[#allocation112_spill] sm:$0xff]  ;;  %v9995_v28 = vld [vmem:[#allocation15_spill] sm:$0xff] }
 0xca1   : > { %4978 = vst.msk [vmem:[%s8748_s19 + $0xc0] sm:$0xff] %vm4953_vm2, %v9430_v48  ;;  %v5087_v24 = vsel %vm4953_vm2, %v5009_v38, 0.0  ;;  %v3762_v25 = vadd.f32 %v9989_v30, %v2690_v60  ;;  %v9997_v38 = vld [vmem:[#allocation49_spill] sm:$0xff] }
 0xca2   : > { %4979 = vst.msk [vmem:[%s8748_s19 + $0xc8] sm:$0xff] %vm4953_vm2, %v9434_v36 }
 0xca3   : > { %v4898_v39 = vadd.f32 %v9031_v57, %v3762_v25 }
 0xca6   : > { %v4534_v13 = vpop.f32.mrf.mxu2 }
 0xcac   : > { %5058 = vadd.xlane.f32.xlu2 %v5057_v34  ;;  %v2691_v34 = vadd.f32 %v9991_v45, %v9990_v54 }
 0xcb0   : > { %5061 = vadd.xlane.f32.xlu0 %v5060_v51  ;;  %v3763_v51 = vadd.f32 %v9992_v3, %v2691_v34 }
 0xcb2   : > { %v4718_v27 = vpop.permute.xlu0 %4717  ;;  %v4899_v57 = vadd.f32 %v9058_v1, %v3763_v51 }
 0xcb3   : > { %v4787_v49 = vadd.f32 %v4718_v27, %v4627_v43  ;;  %v4593_v43 = vmul.f32 1.442695, %v9368_v32 }
 0xcb5   : > { %v4947_v29 = vsel %vm625_vm3, %v4787_v49, %v8742_v31  ;;  %v9466_v31 = vadd.f32 %v9107_v63, %v4534_v13  ;;  %v4591_v49 = vmul.f32 1.442695, %v9361_v5  ;;  %v9996_v13 = vld [vmem:[#allocation69_spill] sm:$0xff]  ;;  %6060 = vpow2.f32 %v4593_v43 }
 0xcb6   : > { %4980 = vst.msk [vmem:[%s8748_s19 + $0xd0] sm:$0xff] %vm4953_vm2, %v4947_v29  ;;  %v5012_v53 = vmul.f32 %v4947_v29, %v4947_v29  ;;  %v2708_v29 = vadd.f32 %v9994_v55, %v9993_v18  ;;  %v5002_v18 = vmul.f32 %v9162_v12, %v9162_v12  ;;  %v5007_v12 = vmul.f32 %v9332_v62, %v9332_v62 }
 0xcb7   : > { %6062 = vpow2.f32 %v4591_v49  ;;  %v5008_v62 = vmul.f32 %v9344_v15, %v9344_v15  ;;  %v5011_v15 = vmul.f32 %v9434_v36, %v9434_v36  ;;  %v10008_v36 = vld [vmem:[#allocation113_spill] sm:$0xff] }
 0xcb8   : > { %5070 = vadd.xlane.f32.xlu0 %v5069_v56  ;;  %v5096_v9 = vsel %vm4953_vm2, %v5012_v53, 0.0  ;;  %v3780_v26 = vadd.f32 %v9997_v38, %v2708_v29  ;;  %v10000_v53 = vld [vmem:[#allocation101_spill] sm:$0xff]  ;;  %v4595_v29 = vmul.f32 1.442695, %v9391_v33 }
 0xcb9   : > { %4725 = vrot.lane.b32.xlu1 %v9457_v10, %s6211_s22 }
 0xcba   : > { %6064 = vpow2.f32 %v4595_v29 }
 0xcc0   : > { %5079 = vadd.xlane.f32.xlu0 %v5078_v4  ;;  %v2692_v4 = vadd.f32 %v9996_v13, %v9995_v28  ;;  %v10003_v28 = vld [vmem:[#allocation26_spill] sm:$0xff]  ;;  %v5066_v13 = vsel %vm4953_vm2, %v5002_v18, 0.0  ;;  %v4597_v18 = vmul.f32 1.442695, %v9457_v10 }
 0xcc2   : > { %v3764_v1 = vadd.f32 %v9998_v35, %v2692_v4  ;;  %v5081_v4 = vsel %vm4953_vm2, %v5007_v12, 0.0  ;;  %v10004_v35 = vld [vmem:[#allocation102_spill] sm:$0xff]  ;;  %v10013_v12 = vld [vmem:[#allocation73_spill] sm:$0xff] }
 0xcc4   : > { %4727 = vrot.lane.b32.xlu2 %v9466_v31, %s6211_s22  ;;  %v4900_v30 = vadd.f32 %v9078_v47, %v3764_v1  ;;  %v10001_v47 = vld [vmem:[#allocation98_spill] sm:$0xff] }
 0xcc8   : > { %v5047_v6 = vpop.xlane.xlu1 %5046  ;;  %5088 = vadd.xlane.f32.xlu0 %v5087_v24  ;;  %v5001_v24 = vmul.f32 %v9154_v2, %v9154_v2 }
 0xcc9   : > { %v5123_v44 = vmul.f32 0.5, %v5047_v6 }
 0xcca   : > { %v5063_v54 = vsel %vm4953_vm2, %v5001_v24, 0.0  ;;  %v10005_v24 = vld [vmem:[#allocation46_spill] sm:$0xff] }
 0xccb   : > { %v5155_v63 = vsub.f32 -3.675754, %v5123_v44 }
 0xccd   : > { %v5188_v52 = vsel %vm5178_vm5, %v5155_v63, %v4898_v39  ;;  %v6061_v39 = vpop.eup %6060  ;;  %v9999_v63 = vld [vmem:[#allocation51_spill] sm:$0xff] }
 0xcce   : > { %5220 = vst.msk [vmem:[%s9206_s29 + $0x48] sm:$0xff] %vm625_vm3, %v5188_v52  ;;  %v2709_v52 = vadd.f32 %v10000_v53, %v9999_v63  ;;  %v6063_v2 = vpop.eup %6062 }
 0xccf   : > { %v6065_v38 = vpop.eup %6064 }
 0xcd0   : > { %5097 = vadd.xlane.f32.xlu0 %v5096_v9  ;;  %v9501_v25 = vpop.xlane.xlu1 %4872  ;;  %v3781_v45 = vadd.f32 %v8810_v14, %v2709_v52  ;;  %v4630_v1 = vmul.f32 %v6065_v38, %v10004_v35  ;;  %v5093_v52 = vsel %vm4953_vm2, %v5011_v15, 0.0 }
 0xcd6   : > { %v5050_v22 = vpop.xlane.xlu2 %5049 }
 0xcd7   : > { %v5124_v21 = vmul.f32 0.5, %v5050_v22  ;;  %v4629_v22 = vmul.f32 %v6061_v39, %v10001_v47 }
 0xcd9   : > { %v5156_v27 = vsub.f32 -3.675754, %v5124_v21  ;;  %v5004_v21 = vmul.f32 %v9243_v20, %v9243_v20 }
 0xcdb   : > { %v5189_v56 = vsel %vm5178_vm5, %v5156_v27, %v4899_v57  ;;  %v10002_v57 = vld [vmem:[#allocation97_spill] sm:$0xff] }
 0xcdc   : > { %5221 = vst.msk [vmem:[%s9206_s29 + $0x50] sm:$0xff] %vm625_vm3, %v5189_v56  ;;  %v4628_v27 = vmul.f32 %v6063_v2, %v10002_v57  ;;  %v5072_v56 = vsel %vm4953_vm2, %v5004_v21, 0.0 }
 0xcdd   : > { %v5053_v32 = vpop.xlane.xlu0 %5052 }
 0xcde   : > { %v5125_v60 = vmul.f32 0.5, %v5053_v32  ;;  %v4876_v5 = vpop.xlane.xlu2 %4875  ;;  %v5010_v32 = vmul.f32 %v9430_v48, %v9430_v48 }
 0xcdf   : > { %v9498_v6 = vadd.f32 %v4876_v5, %v3780_v26 }
 0xce0   : > { %v5157_v44 = vsub.f32 -3.675754, %v5125_v60 }
 0xce2   : > { %v5190_v9 = vsel %vm5178_vm5, %v5157_v44, %v4900_v30  ;;  %v5084_v44 = vsel %vm4953_vm2, %v5008_v62, 0.0 }
 0xce3   : > { %5222 = vst.msk [vmem:[%s9206_s29 + $0x58] sm:$0xff] %vm625_vm3, %v5190_v9  ;;  %5064 = vadd.xlane.f32.xlu1 %v5063_v54  ;;  %v4886_v9 = vsel %vm625_vm3, %v9466_v31, 0.0 }
 0xce5   : > { %v4879_v34 = vpop.xlane.xlu0 %4878 }
 0xce6   : > { %v9511_v3 = vadd.f32 %v4879_v34, %v3781_v45  ;;  %v4722_v51 = vpop.permute.xlu2 %4721  ;;  %v10006_v45 = vld [vmem:[#allocation17_spill] sm:$0xff]  ;;  %v10007_v34 = vld [vmem:[#allocation72_spill] sm:$0xff] }
 0xce7   : > { %v4789_v43 = vadd.f32 %v4722_v51, %v4629_v22  ;;  %v2693_v47 = vadd.f32 %v10007_v34, %v10006_v45  ;;  %v10020_v34 = vld [vmem:[#allocation126_spill] sm:$0xff] }
 0xce8   : > { %v4720_v49 = vpop.permute.xlu1 %4719 }
 0xce9   : > { %v4788_v55 = vadd.f32 %v4720_v49, %v4628_v27  ;;  %v4949_v14 = vsel %vm625_vm3, %v4789_v43, %v8765_v37  ;;  %v5005_v37 = vmul.f32 %v9252_v50, %v9252_v50  ;;  %v5090_v50 = vsel %vm4953_vm2, %v5010_v32, 0.0  ;;  %v10014_v32 = vld [vmem:[#allocation125_spill] sm:$0xff] }
 0xcea   : > { %4982 = vst.msk [vmem:[%s8748_s19 + $0xe0] sm:$0xff] %vm4953_vm2, %v4949_v14  ;;  %v5014_v54 = vmul.f32 %v4949_v14, %v4949_v14  ;;  %v3765_v51 = vadd.f32 %v10008_v36, %v2693_v47  ;;  %v4599_v49 = vmul.f32 1.442695, %v9466_v31  ;;  %v10010_v14 = vld [vmem:[#allocation70_spill] sm:$0xff] }
 0xceb   : > { %5073 = vadd.xlane.f32.xlu1 %v5072_v56  ;;  %v4948_v20 = vsel %vm625_vm3, %v4788_v55, %v10003_v28  ;;  %v5075_v26 = vsel %vm4953_vm2, %v5005_v37, 0.0  ;;  %v10009_v55 = vld [vmem:[#allocation29_spill] sm:$0xff]  ;;  %v10011_v28 = vld [vmem:[#allocation124_spill] sm:$0xff] }
 0xcec   : > { %4981 = vst.msk [vmem:[%s8748_s19 + $0xd8] sm:$0xff] %vm4953_vm2, %v4948_v20  ;;  %v5013_v63 = vmul.f32 %v4948_v20, %v4948_v20  ;;  %v5102_v2 = vsel %vm4953_vm2, %v5014_v54, 0.0  ;;  %v4901_v43 = vadd.f32 %v9082_v42, %v3765_v51  ;;  %6066 = vpow2.f32 %v4599_v49  ;;  %v10012_v42 = vld [vmem:[#allocation18_spill] sm:$0xff] }
 0xced   : > { %5067 = vadd.xlane.f32.xlu2 %v5066_v13  ;;  %v2694_v29 = vadd.f32 %v10010_v14, %v10009_v55  ;;  %6068 = vpow2.f32 %v4597_v18  ;;  %v2695_v37 = vadd.f32 %v10013_v12, %v10012_v42  ;;  %v10022_v14 = vld [vmem:[#allocation25_spill] sm:$0xff]  ;;  %v4883_v42 = vsel %vm625_vm3, %v9457_v10, 0.0 }
 0xcee   : > { %v5099_v53 = vsel %vm4953_vm2, %v5013_v63, 0.0  ;;  %v10017_v63 = vld [vmem:[#allocation84_spill] sm:$0xff] }
 0xcef   : > { %v3766_v20 = vadd.f32 %v10011_v28, %v2694_v29  ;;  %v3767_v35 = vadd.f32 %v10014_v32, %v2695_v37  ;;  %v10023_v29 = vld [vmem:[#allocation88_spill] sm:$0xff]  ;;  %v10024_v28 = vld [vmem:[#allocation127_spill] sm:$0xff] }
 0xcf1   : > { %v4902_v31 = vadd.f32 %v9120_v19, %v3766_v20  ;;  %v4903_v62 = vadd.f32 %v9142_v0, %v3767_v35 }
 0xcf2   : > { %v6067_v38 = vpop.eup %6066 }
 0xcf3   : > { %5082 = vadd.xlane.f32.xlu1 %v5081_v4 }
 0xcf5   : > { %5076 = vadd.xlane.f32.xlu2 %v5075_v26 }
 0xcf8   : > { %v4724_v60 = vpop.permute.xlu0 %4723 }
 0xcf9   : > { %v4790_v5 = vadd.f32 %v4724_v60, %v4630_v1 }
 0xcfb   : > { %5091 = vadd.xlane.f32.xlu1 %v5090_v50  ;;  %v4950_v30 = vsel %vm625_vm3, %v4790_v5, %v10005_v24  ;;  %v10015_v50 = vld [vmem:[#allocation105_spill] sm:$0xff] }
 0xcfc   : > { %v5015_v39 = vmul.f32 %v4950_v30, %v4950_v30  ;;  %4983 = vst.msk [vmem:[%s8748_s19 + $0xe8] sm:$0xff] %vm4953_vm2, %v4950_v30  ;;  %v4632_v24 = vmul.f32 %v6067_v38, %v10015_v50  ;;  %v6069_v30 = vpop.eup %6068  ;;  %v10025_v38 = vld [vmem:[#allocation44_spill] sm:$0xff]  ;;  %v10028_v50 = vld [vmem:[#allocation35_spill] sm:$0xff] }
 0xcfd   : > { %5085 = vadd.xlane.f32.xlu2 %v5084_v44 }
 0xcfe   : > { %v5105_v48 = vsel %vm4953_vm2, %v5015_v39, 0.0 }
 0xcff   : > { %5106 = vadd.xlane.f32.xlu0 %v5105_v48  ;;  %v10016_v48 = vld [vmem:[#allocation21_spill] sm:$0xff] }
 0xd00   : > { %v2698_v15 = vadd.f32 %v10017_v63, %v10016_v48 }
 0xd02   : > { %v3770_v47 = vadd.f32 %v10020_v34, %v2698_v15 }
 0xd03   : > { %5100 = vadd.xlane.f32.xlu1 %v5099_v53  ;;  %v10018_v53 = vld [vmem:[#allocation103_spill] sm:$0xff] }
 0xd05   : > { %5094 = vadd.xlane.f32.xlu2 %v5093_v52  ;;  %v4631_v52 = vmul.f32 %v6069_v30, %v10018_v53  ;;  %v10032_v53 = vld [vmem:[#allocation78_spill] sm:$0xff] }
 0xd07   : > { %4887 = vadd.xlane.f32.xlu0 %v4886_v9  ;;  %v10019_v9 = vld [vmem:[#allocation55_spill] sm:$0xff] }
 0xd0d   : > { %5103 = vadd.xlane.f32.xlu2 %v5102_v2 }
 0xd13   : > { %v5056_v22 = vpop.xlane.xlu1 %5055 }
 0xd14   : > { %v5126_v21 = vmul.f32 0.5, %v5056_v22 }
 0xd16   : > { %v5158_v57 = vsub.f32 -3.675754, %v5126_v21  ;;  %v4906_v21 = vadd.f32 %v9224_v8, %v3770_v47 }
 0xd18   : > { %v5191_v27 = vsel %vm5178_vm5, %v5158_v57, %v4901_v43  ;;  %v10021_v57 = vld [vmem:[#allocation53_spill] sm:$0xff] }
 0xd19   : > { %5223 = vst.msk [vmem:[%s9206_s29 + $0x60] sm:$0xff] %vm625_vm3, %v5191_v27 }
 0xd1f   : > { %v5059_v56 = vpop.xlane.xlu2 %5058 }
 0xd20   : > { %v5127_v13 = vmul.f32 0.5, %v5059_v56  ;;  %v2701_v56 = vadd.f32 %v10023_v29, %v10022_v14 }
 0xd22   : > { %v5159_v4 = vsub.f32 -3.675754, %v5127_v13  ;;  %v3773_v20 = vadd.f32 %v10024_v28, %v2701_v56  ;;  %v10038_v28 = vld [vmem:[#allocation81_spill] sm:$0xff] }
 0xd23   : > { %v5062_v26 = vpop.xlane.xlu0 %5061 }
 0xd24   : > { %v5192_v1 = vsel %vm5178_vm5, %v5159_v4, %v4902_v31  ;;  %v5128_v60 = vmul.f32 0.5, %v5062_v26  ;;  %v4909_v12 = vadd.f32 %v9314_v58, %v3773_v20  ;;  %v4880_v4 = vsel %vm625_vm3, %v9391_v33, 0.0  ;;  %v10026_v26 = vld [vmem:[#allocation90_spill] sm:$0xff] }
 0xd25   : > { %5224 = vst.msk [vmem:[%s9206_s29 + $0x68] sm:$0xff] %vm625_vm3, %v5192_v1  ;;  %v2704_v32 = vadd.f32 %v10026_v26, %v10025_v38  ;;  %v10027_v1 = vld [vmem:[#allocation9_spill] sm:$0xff] }
 0xd26   : > { %v5160_v5 = vsub.f32 -3.675754, %v5128_v60 }
 0xd27   : > { %v4728_v44 = vpop.permute.xlu2 %4727  ;;  %v3776_v60 = vadd.f32 %v10027_v1, %v2704_v32 }
 0xd28   : > { %v5193_v19 = vsel %vm5178_vm5, %v5160_v5, %v4903_v62  ;;  %v4792_v39 = vadd.f32 %v4728_v44, %v4632_v24  ;;  %v10029_v24 = vld [vmem:[#allocation95_spill] sm:$0xff]  ;;  %v10030_v44 = vld [vmem:[#allocation40_spill] sm:$0xff] }
 0xd29   : > { %5225 = vst.msk [vmem:[%s9206_s29 + $0x70] sm:$0xff] %vm625_vm3, %v5193_v19  ;;  %v4912_v58 = vadd.f32 %v9407_v16, %v3776_v60  ;;  %v2707_v33 = vadd.f32 %v10029_v24, %v10028_v50  ;;  %v10031_v16 = vld [vmem:[#allocation19_spill] sm:$0xff] }
 0xd2a   : > { %v4952_v54 = vsel %vm625_vm3, %v4792_v39, %v10019_v9 }
 0xd2b   : > { %v4726_v0 = vpop.permute.xlu1 %4725  ;;  %v5071_v2 = vpop.xlane.xlu0 %5070  ;;  %v5017_v45 = vmul.f32 %v4952_v54, %v4952_v54  ;;  %4985 = vst.msk [vmem:[%s8748_s19 + $0xf8] sm:$0xff] %vm4953_vm2, %v4952_v54  ;;  %v3779_v19 = vadd.f32 %v10030_v44, %v2707_v33  ;;  %v10033_v54 = vld [vmem:[#allocation116_spill] sm:$0xff] }
 0xd2c   : > { %v4791_v22 = vadd.f32 %v4726_v0, %v4631_v52  ;;  %v5131_v36 = vmul.f32 0.5, %v5071_v2  ;;  %v2696_v52 = vadd.f32 %v10032_v53, %v10031_v16 }
 0xd2d   : > { %v5111_v51 = vsel %vm4953_vm2, %v5017_v45, 0.0  ;;  %v4915_v48 = vadd.f32 %v9501_v25, %v3779_v19 }
 0xd2e   : > { %v5163_v43 = vsub.f32 -3.675754, %v5131_v36  ;;  %5112 = vadd.xlane.f32.xlu2 %v5111_v51  ;;  %v4951_v27 = vsel %vm625_vm3, %v4791_v22, %v10021_v57  ;;  %v3768_v0 = vadd.f32 %v10033_v54, %v2696_v52  ;;  %v10034_v22 = vld [vmem:[#allocation34_spill] sm:$0xff]  ;;  %v10035_v36 = vld [vmem:[#allocation75_spill] sm:$0xff]  ;;  %v10036_v57 = vld [vmem:[#allocation12_spill] sm:$0xff] }
 0xd2f   : > { %v5016_v49 = vmul.f32 %v4951_v27, %v4951_v27  ;;  %4984 = vst.msk [vmem:[%s8748_s19 + $0xf0] sm:$0xff] %vm4953_vm2, %v4951_v27  ;;  %v2697_v51 = vadd.f32 %v10035_v36, %v10034_v22  ;;  %v10044_v22 = vld [vmem:[#allocation50_spill] sm:$0xff] }
 0xd30   : > { %v5196_v18 = vsel %vm5178_vm5, %v5163_v43, %v4906_v21  ;;  %v4904_v45 = vadd.f32 %v9146_v40, %v3768_v0 }
 0xd31   : > { %5228 = vst.msk [vmem:[%s9206_s29 + $0x88] sm:$0xff] %vm625_vm3, %v5196_v18  ;;  %v5108_v55 = vsel %vm4953_vm2, %v5016_v49, 0.0  ;;  %v3769_v27 = vadd.f32 %v10036_v57, %v2697_v51 }
 0xd32   : > { %5109 = vadd.xlane.f32.xlu1 %v5108_v55 }
 0xd33   : > { %v5080_v8 = vpop.xlane.xlu0 %5079  ;;  %v4905_v55 = vadd.f32 %v9176_v7, %v3769_v27 }
 0xd34   : > { %v5134_v13 = vmul.f32 0.5, %v5080_v8  ;;  %v10037_v8 = vld [vmem:[#allocation37_spill] sm:$0xff] }
 0xd35   : > { %v2700_v20 = vadd.f32 %v10038_v28, %v10037_v8 }
 0xd36   : > { %v5166_v37 = vsub.f32 -3.675754, %v5134_v13  ;;  %4884 = vadd.xlane.f32.xlu2 %v4883_v42 }
 0xd38   : > { %v5199_v31 = vsel %vm5178_vm5, %v5166_v37, %v4909_v12  ;;  %v10039_v12 = vld [vmem:[#allocation128_spill] sm:$0xff] }
 0xd39   : > { %5231 = vst.msk [vmem:[%s9206_s29 + $0xa0] sm:$0xff] %vm625_vm3, %v5199_v31  ;;  %v3772_v7 = vadd.f32 %v10039_v12, %v2700_v20 }
 0xd3a   : > { %4881 = vadd.xlane.f32.xlu1 %v4880_v4 }
 0xd3b   : > { %v5089_v35 = vpop.xlane.xlu0 %5088 }
 0xd3c   : > { %v5137_v10 = vmul.f32 0.5, %v5089_v35 }
 0xd3e   : > { %v5169_v62 = vsub.f32 -3.675754, %v5137_v10 }
 0xd40   : > { %v5202_v5 = vsel %vm5178_vm5, %v5169_v62, %v4912_v58 }
 0xd41   : > { %5234 = vst.msk [vmem:[%s9206_s29 + $0xb8] sm:$0xff] %vm625_vm3, %v5202_v5 }
 0xd43   : > { %v5098_v30 = vpop.xlane.xlu0 %5097 }
 0xd44   : > { %v5140_v39 = vmul.f32 0.5, %v5098_v30 }
 0xd46   : > { %v5172_v63 = vsub.f32 -3.675754, %v5140_v39 }
 0xd48   : > { %v5205_v15 = vsel %vm5178_vm5, %v5172_v63, %v4915_v48 }
 0xd49   : > { %5237 = vst.msk [vmem:[%s9206_s29 + $0xd0] sm:$0xff] %vm625_vm3, %v5205_v15  ;;  %v10040_v15 = vld [vmem:[#allocation57_spill] sm:$0xff] }
 0xd56   : > { %v5065_v9 = vpop.xlane.xlu1 %5064 }
 0xd57   : > { %v5129_v2 = vmul.f32 0.5, %v5065_v9 }
 0xd59   : > { %v5161_v34 = vsub.f32 -3.675754, %v5129_v2 }
 0xd5b   : > { %v5194_v47 = vsel %vm5178_vm5, %v5161_v34, %v4904_v45  ;;  %v10042_v45 = vld [vmem:[#allocation56_spill] sm:$0xff] }
 0xd5c   : > { %5226 = vst.msk [vmem:[%s9206_s29 + $0x78] sm:$0xff] %vm625_vm3, %v5194_v47  ;;  %v10043_v34 = vld [vmem:[#allocation104_spill] sm:$0xff] }
 0xd5d   : > { %v2711_v47 = vadd.f32 %v10043_v34, %v10042_v45 }
 0xd5e   : > { %v5074_v25 = vpop.xlane.xlu1 %5073 }
 0xd5f   : > { %v5132_v21 = vmul.f32 0.5, %v5074_v25  ;;  %v3783_v36 = vadd.f32 %v10044_v22, %v2711_v47 }
 0xd60   : > { %v5068_v43 = vpop.xlane.xlu2 %5067 }
 0xd61   : > { %v5164_v49 = vsub.f32 -3.675754, %v5132_v21  ;;  %v5130_v18 = vmul.f32 0.5, %v5068_v43  ;;  %v10045_v21 = vld [vmem:[#allocation54_spill] sm:$0xff] }
 0xd62   : > { %v10046_v43 = vld [vmem:[#allocation106_spill] sm:$0xff] }
 0xd63   : > { %v5197_v40 = vsel %vm5178_vm5, %v5164_v49, %v9232_v11  ;;  %v5162_v14 = vsub.f32 -3.675754, %v5130_v18  ;;  %v4908_v11 = vadd.f32 %v9269_v41, %v3772_v7  ;;  %v10047_v18 = vld [vmem:[#allocation23_spill] sm:$0xff] }
 0xd64   : > { %5229 = vst.msk [vmem:[%s9206_s29 + $0x90] sm:$0xff] %vm625_vm3, %v5197_v40 }
 0xd65   : > { %v5195_v29 = vsel %vm5178_vm5, %v5162_v14, %v4905_v55 }
 0xd66   : > { %5227 = vst.msk [vmem:[%s9206_s29 + $0x80] sm:$0xff] %vm625_vm3, %v5195_v29  ;;  %v5083_v56 = vpop.xlane.xlu1 %5082 }
 0xd67   : > { %v5135_v13 = vmul.f32 0.5, %v5083_v56 }
 0xd68   : > { %v5077_v42 = vpop.xlane.xlu2 %5076 }
 0xd69   : > { %v5167_v37 = vsub.f32 -3.675754, %v5135_v13  ;;  %v5133_v31 = vmul.f32 0.5, %v5077_v42 }
 0xd6b   : > { %v5200_v4 = vsel %vm5178_vm5, %v5167_v37, %v9319_v61  ;;  %v5165_v38 = vsub.f32 -3.675754, %v5133_v31 }
 0xd6c   : > { %5232 = vst.msk [vmem:[%s9206_s29 + $0xa8] sm:$0xff] %vm625_vm3, %v5200_v4 }
 0xd6d   : > { %v5198_v26 = vsel %vm5178_vm5, %v5165_v38, %v4908_v11 }
 0xd6e   : > { %5230 = vst.msk [vmem:[%s9206_s29 + $0x98] sm:$0xff] %vm625_vm3, %v5198_v26  ;;  %v5092_v32 = vpop.xlane.xlu1 %5091 }
 0xd6f   : > { %v5138_v35 = vmul.f32 0.5, %v5092_v32 }
 0xd70   : > { %v5086_v1 = vpop.xlane.xlu2 %5085 }
 0xd71   : > { %v5170_v60 = vsub.f32 -3.675754, %v5138_v35  ;;  %v5136_v10 = vmul.f32 0.5, %v5086_v1 }
 0xd72   : > { %v5107_v63 = vpop.xlane.xlu0 %5106 }
 0xd73   : > { %v5203_v41 = vsel %vm5178_vm5, %v5170_v60, %v9411_v59  ;;  %v5168_v58 = vsub.f32 -3.675754, %v5136_v10  ;;  %v5143_v57 = vmul.f32 0.5, %v5107_v63 }
 0xd74   : > { %5235 = vst.msk [vmem:[%s9206_s29 + $0xc0] sm:$0xff] %vm625_vm3, %v5203_v41 }
 0xd75   : > { %v5201_v61 = vsel %vm5178_vm5, %v5168_v58, %v9350_v17  ;;  %v5175_v29 = vsub.f32 -3.675754, %v5143_v57 }
 0xd76   : > { %5233 = vst.msk [vmem:[%s9206_s29 + $0xb0] sm:$0xff] %vm625_vm3, %v5201_v61  ;;  %v5101_v62 = vpop.xlane.xlu1 %5100 }
 0xd77   : > { %v5141_v5 = vmul.f32 0.5, %v5101_v62 }
 0xd78   : > { %v5095_v50 = vpop.xlane.xlu2 %5094 }
 0xd79   : > { %v5173_v24 = vsub.f32 -3.675754, %v5141_v5  ;;  %v5139_v33 = vmul.f32 0.5, %v5095_v50 }
 0xd7a   : > { %v4888_v53 = vpop.xlane.xlu0 %4887 }
 0xd7b   : > { %v5206_v30 = vsel %vm5178_vm5, %v5173_v24, %v9498_v6  ;;  %v5171_v44 = vsub.f32 -3.675754, %v5139_v33  ;;  %v10041_v6 = vld [vmem:[#allocation108_spill] sm:$0xff] }
 0xd7c   : > { %5238 = vst.msk [vmem:[%s9206_s29 + $0xd8] sm:$0xff] %vm625_vm3, %v5206_v30  ;;  %v2712_v16 = vadd.f32 %v10041_v6, %v10040_v15 }
 0xd7d   : > { %v5204_v59 = vsel %vm5178_vm5, %v5171_v44, %v9426_v23 }
 0xd7e   : > { %5236 = vst.msk [vmem:[%s9206_s29 + $0xc8] sm:$0xff] %vm625_vm3, %v5204_v59  ;;  %v3784_v9 = vadd.f32 %v8814_v46, %v2712_v16  ;;  %v2710_v46 = vadd.f32 %v10046_v43, %v10045_v21 }
 0xd80   : > { %v5104_v17 = vpop.xlane.xlu2 %5103  ;;  %v4920_v54 = vadd.f32 %v4888_v53, %v3784_v9  ;;  %v3782_v55 = vadd.f32 %v10047_v18, %v2710_v46 }
 0xd81   : > { %v5142_v19 = vmul.f32 0.5, %v5104_v17 }
 0xd83   : > { %v5174_v39 = vsub.f32 -3.675754, %v5142_v19 }
 0xd85   : > { %v5207_v48 = vsel %vm5178_vm5, %v5174_v39, %v9511_v3 }
 0xd86   : > { %5239 = vst.msk [vmem:[%s9206_s29 + $0xe0] sm:$0xff] %vm625_vm3, %v5207_v48 }
 0xda1   : > { %v5113_v52 = vpop.xlane.xlu2 %5112 }
 0xda2   : > { %v5145_v23 = vmul.f32 0.5, %v5113_v52 }
 0xda4   : > { %v5177_v0 = vsub.f32 -3.675754, %v5145_v23 }
 0xda5   : > { %v5110_v2 = vpop.xlane.xlu1 %5109 }
 0xda6   : > { %v5210_v3 = vsel %vm5178_vm5, %v5177_v0, %v4920_v54  ;;  %v5144_v25 = vmul.f32 0.5, %v5110_v2 }
 0xda7   : > { %5242 = vst.msk [vmem:[%s9206_s29 + $0xf8] sm:$0xff] %vm625_vm3, %v5210_v3 }
 0xda8   : > { %v5176_v27 = vsub.f32 -3.675754, %v5144_v25 }
 0xda9   : > { %v4885_v51 = vpop.xlane.xlu2 %4884 }
 0xdaa   : > { %v4919_v49 = vadd.f32 %v4885_v51, %v3783_v36 }
 0xdac   : > { %v5209_v40 = vsel %vm5178_vm5, %v5176_v27, %v4919_v49 }
 0xdad   : > { %5241 = vst.msk [vmem:[%s9206_s29 + $0xf0] sm:$0xff] %vm625_vm3, %v5209_v40  ;;  %v4882_v14 = vpop.xlane.xlu1 %4881 }
 0xdae   : > { %v4918_v56 = vadd.f32 %v4882_v14, %v3782_v55 }
 0xdb0   : > { %v5208_v8 = vsel %vm5178_vm5, %v5175_v29, %v4918_v56 }
 0xdb1   : > { %5240 = vst.msk [vmem:[%s9206_s29 + $0xe8] sm:$0xff] %vm625_vm3, %v5208_v8 }
 0xdb2 PF: > { %s19_s27 = sadd.s32 1, %s6208_s27  }
 0xdb3   : > { %p16_p4 = scmp.ge.s32.totalorder %s19_s27, 4  }
 0xdb5   :  { %18 = sbr.rel (!%p16_p4) target bundleno = 1 (0x1), region = 108 }

</bundles_post_ra>
